<compile_context>
chip_gen: v5e
topology: v5e:2x2
jax: 0.10.0
libtpu: 0.0.40
codegen_flags: <defaults>
</compile_context>

<pallas_src>
import functools
import numpy as np
import jax
import jax.numpy as jnp
from jax.experimental import pallas as pl
from jax.experimental.pallas import tpu as pltpu

# 256 lanes/grid-step keeps the depth-3 accumulators (~21 (4,TILE) blocks plus
# temporaries) inside the 64-vreg budget while still amortizing per-step overhead.
_DEFAULT_LANE_TILE = 256

CHALEARN13_SPATIAL_PATH = np.array(
    [[1, 0, 1], [0, 1, 2], [1, 2, 1], [4, 3, 1], [5, 4, 3], [6, 5, 4],
     [5, 6, 5], [8, 7, 1], [9, 8, 7], [10, 9, 8], [9, 10, 9]],
    dtype=np.int32)


# ---------------------------------------------------------------------------
# In-kernel depth-3 signature (signatory.Signature(depth=3), basepoint=True)
# ---------------------------------------------------------------------------

def _sig3_from_ref(pts_ref, L, d):
    """pts_ref: (L*d, n) ref, row = step*d + dim (zero basepoint implied).

    Returns the depth-3 signature as a dense (d + d^2 + d^3, n) f32 value,
    levels 1/2/3 concatenated, word indices flattened in C order (matches
    signatory).  All accumulators are 2-D (d, n) blocks; d-loops Python-unrolled.
    """
    n = pts_ref.shape[-1]
    s1 = jnp.zeros((d, n), jnp.float32)
    s2 = [jnp.zeros((d, n), jnp.float32) for _ in range(d)]        # s2[i][j]
    s3 = [jnp.zeros((d, n), jnp.float32) for _ in range(d * d)]    # s3[i*d+j][k]
    prev = jnp.zeros((d, n), jnp.float32)
    for step in range(L):                      # static unroll over path length
        cur = pts_ref[step * d:(step + 1) * d, :].astype(jnp.float32)
        b1 = cur - prev                        # segment increment (d, n)
        prev = cur
        b1r = [b1[i:i + 1, :] for i in range(d)]
        s1r = [s1[i:i + 1, :] for i in range(d)]
        b2 = [0.5 * b1r[j] * b1 for j in range(d)]                 # b2[j][k]
        # Chen's identity: S <- S (x) exp(b1); level 3 uses OLD s1, s2
        for i in range(d):
            ci = s1r[i] + (1.0 / 3.0) * b1r[i]
            s2i = s2[i]
            for j in range(d):
                s3[i * d + j] = (s3[i * d + j]
                                 + s2i[j:j + 1, :] * b1
                                 + ci * b2[j])
        # level 2 uses OLD s1
        for i in range(d):
            s2[i] = s2[i] + s1r[i] * b1 + b2[i]
        s1 = s1 + b1
    # one dense contiguous (84, n) slab -> a single unmasked store by the caller
    return jnp.concatenate([s1] + s2 + s3, axis=0)


# ---------------------------------------------------------------------------
# Fully fused stem kernel
# ---------------------------------------------------------------------------

def _stem_fused_kernel(w_raw_ref, b_raw_ref, w_ps_ref, b_ps_ref,
                       w_fu_ref, b_fu_ref, sp_ref, tp_ref, raw_ref,
                       out_ref, sig_scr, *, d, L_sp, L_tp, sig_ch, cout):
    # ---- path signatures, kept in VMEM scratch (never touch HBM)
    sig_scr[0:sig_ch, :] = _sig3_from_ref(sp_ref, L_sp, d)
    sig_scr[sig_ch:2 * sig_ch, :] = _sig3_from_ref(tp_ref, L_tp, d)

    # ---- ps_fusion: relu(W_ps @ [spatial_sig ; temporal_sig] + b)
    ps = (jnp.dot(w_ps_ref[:, :sig_ch], sig_scr[0:sig_ch, :],
                  preferred_element_type=jnp.float32)
          + jnp.dot(w_ps_ref[:, sig_ch:], sig_scr[sig_ch:2 * sig_ch, :],
                    preferred_element_type=jnp.float32)
          + b_ps_ref[...])
    sig_fused = jnp.maximum(ps, 0.0)

    # ---- raw branch: relu(W_raw @ im2col + b)
    x_conv = jnp.maximum(
        jnp.dot(w_raw_ref[...], raw_ref[...].astype(jnp.float32),
                preferred_element_type=jnp.float32) + b_raw_ref[...], 0.0)

    # ---- final fusion on both halves (no (2*C_out, N) concat materialized)
    y = (jnp.dot(w_fu_ref[:, :cout], x_conv, preferred_element_type=jnp.float32)
         + jnp.dot(w_fu_ref[:, cout:], sig_fused, preferred_element_type=jnp.float32)
         + b_fu_ref[...])
    out_ref[...] = jnp.maximum(y, 0.0).astype(out_ref.dtype)


# ---------------------------------------------------------------------------
# Host-side glue (cheap prep only) + pallas_call wrapper
# ---------------------------------------------------------------------------

def _fold_bn(w, b, gamma, beta, eps=1e-5):
    # TODO(synk): BatchNorm is folded in inference mode with fresh-module running
    # stats (mean=0, var=1), not training-mode batch statistics.
    scale = gamma / jnp.sqrt(1.0 + eps)
    return w * scale[:, None], b * scale + beta


def _augment_with_time(p):
    """signatory.Augment(include_original=True, include_time=True, layer_sizes=()).
    p: (..., L, C) -> (..., L, C+1); time channel = linspace(0, 1, L), appended last.
    """
    L = p.shape[-2]
    t = jnp.linspace(0.0, 1.0, L, dtype=p.dtype)
    t = jnp.broadcast_to(t.reshape((1,) * (p.ndim - 2) + (L, 1)),
                         p.shape[:-1] + (1,))
    return jnp.concatenate([p, t], axis=-1)


def stem_v2_origin_ps_forward(x, params, temporal_length=7, spatial_length=3,
                              lane_tile=_DEFAULT_LANE_TILE):
    B, C, J, T = x.shape
    d = C + 1
    sig_ch = d + d * d + d ** 3          # 84 for C_in = 3
    cout = params['fu_w'].shape[0]
    N = B * J * T
    assert C == 3 and J == 11 and spatial_length == 3, \
        "reference module hard-codes 84 sig channels / an 11-joint, length-3 path"

    # ---- host-side data prep; positions ordered (B, J, T) on the lane axis ----
    # raw branch im2col for the (1,3) conv (zero pad along T)
    x_padT = jnp.pad(x, ((0, 0), (0, 0), (0, 0), (1, 1)))
    cols = jnp.stack([x_padT[..., k:k + T] for k in range(3)], axis=2)   # (B,C,3,J,T)
    raw_cols = jnp.transpose(cols, (1, 2, 0, 3, 4)).reshape(C * 3, N)

    # spatial paths from the hand-crafted joint path
    path = jnp.asarray(CHALEARN13_SPATIAL_PATH)                          # (11, 3)
    x_g = x[:, :, path, :]                                               # (B,C,J,Lsp,T)
    sp = jnp.transpose(x_g, (0, 2, 4, 3, 1))                             # (B,J,T,Lsp,C)
    sp = _augment_with_time(sp)                                          # (B,J,T,Lsp,d)
    sp_rows = sp.reshape(N, spatial_length * d).T                        # (Lsp*d, N)

    # temporal paths: replicate-pad + unfold, reproducing the reference
    # unfold+reshape EXACTLY (including its joint/tap interleaving).
    # TODO(synk): this unfold stays host-side; the reference's scrambled reshape
    # makes an in-kernel halo/tap read impractical.
    pad = (temporal_length - 1) // 2
    x_ps = jnp.pad(x, ((0, 0), (0, 0), (0, 0), (pad, pad)), mode='edge')
    u = jnp.stack([x_ps[..., k:k + T] for k in range(temporal_length)], axis=2)
    tp5 = u.reshape(B, C, J, temporal_length, T)   # == torch unfold+reshape scramble
    tp = jnp.transpose(tp5, (0, 2, 4, 3, 1))                             # (B,J,T,Ltp,C)
    tp = _augment_with_time(tp)
    tp_rows = tp.reshape(N, temporal_length * d).T                       # (Ltp*d, N)

    # ---- fold BN into the conv weights ----
    w_raw, b_raw = _fold_bn(params['raw_w'].reshape(cout, C * 3), params['raw_b'],
                            params['raw_gamma'], params['raw_beta'])
    w_ps, b_ps = _fold_bn(params['ps_w'].reshape(cout, 2 * sig_ch), params['ps_b'],
                          params['ps_gamma'], params['ps_beta'])
    w_fu, b_fu = _fold_bn(params['fu_w'].reshape(cout, 2 * cout), params['fu_b'],
                          params['fu_gamma'], params['fu_beta'])

    # ---- lane tiling: keep the grid >= 2 when possible (v7x megacore) ----
    tile = lane_tile
    while tile > 128 and (N + tile - 1) // tile < 2:
        tile //= 2
    n_pad = ((N + tile - 1) // tile) * tile
    grid = n_pad // tile

    def pad_cols(a):
        return a if a.shape[-1] == n_pad else jnp.pad(a, ((0, 0), (0, n_pad - N)))

    kernel = functools.partial(_stem_fused_kernel, d=d, L_sp=spatial_length,
                               L_tp=temporal_length, sig_ch=sig_ch, cout=cout)

    out = pl.pallas_call(
        kernel,
        out_shape=jax.ShapeDtypeStruct((cout, n_pad), jnp.float32),
        grid=(grid,),
        in_specs=[
            pl.BlockSpec((cout, C * 3), lambda i: (0, 0)),
            pl.BlockSpec((cout, 1), lambda i: (0, 0)),
            pl.BlockSpec((cout, 2 * sig_ch), lambda i: (0, 0)),
            pl.BlockSpec((cout, 1), lambda i: (0, 0)),
            pl.BlockSpec((cout, 2 * cout), lambda i: (0, 0)),
            pl.BlockSpec((cout, 1), lambda i: (0, 0)),
            pl.BlockSpec((spatial_length * d, tile), lambda i: (0, i)),
            pl.BlockSpec((temporal_length * d, tile), lambda i: (0, i)),
            pl.BlockSpec((C * 3, tile), lambda i: (0, i)),
        ],
        out_specs=pl.BlockSpec((cout, tile), lambda i: (0, i)),
        scratch_shapes=[pltpu.VMEM((2 * sig_ch, tile), jnp.float32)],
        compiler_params=pltpu.CompilerParams(
            dimension_semantics=("parallel",)),
    )(w_raw.astype(jnp.float32), b_raw.reshape(cout, 1).astype(jnp.float32),
      w_ps.astype(jnp.float32), b_ps.reshape(cout, 1).astype(jnp.float32),
      w_fu.astype(jnp.float32), b_fu.reshape(cout, 1).astype(jnp.float32),
      pad_cols(sp_rows.astype(jnp.float32)),
      pad_cols(tp_rows.astype(jnp.float32)),
      pad_cols(raw_cols.astype(jnp.float32)))

    out = out[:, :N]
    return out.reshape(cout, B, J, T).transpose(1, 0, 2, 3)


# ---------------------------------------------------------------------------
# Deterministic parameter init (synthetic, not a checkpoint load)
# ---------------------------------------------------------------------------

def init_params(key, c_in, c_out):
    d = c_in + 1
    sig_ch = d + d * d + d ** 3      # 84 for c_in = 3
    ks = jax.random.split(key, 12)
    f32 = jnp.float32
    return {
        'raw_w': 0.1 * jax.random.normal(ks[0], (c_out, c_in, 1, 3), f32),
        'raw_b': 0.01 * jax.random.normal(ks[1], (c_out,), f32),
        'raw_gamma': 1.0 + 0.1 * jax.random.normal(ks[2], (c_out,), f32),
        'raw_beta': 0.1 * jax.random.normal(ks[3], (c_out,), f32),
        'ps_w': 0.1 * jax.random.normal(ks[4], (c_out, 2 * sig_ch, 1, 1), f32),
        'ps_b': 0.01 * jax.random.normal(ks[5], (c_out,), f32),
        'ps_gamma': 1.0 + 0.1 * jax.random.normal(ks[6], (c_out,), f32),
        'ps_beta': 0.1 * jax.random.normal(ks[7], (c_out,), f32),
        'fu_w': 0.1 * jax.random.normal(ks[8], (c_out, 2 * c_out, 1, 1), f32),
        'fu_b': 0.01 * jax.random.normal(ks[9], (c_out,), f32),
        'fu_gamma': 1.0 + 0.1 * jax.random.normal(ks[10], (c_out,), f32),
        'fu_beta': 0.1 * jax.random.normal(ks[11], (c_out,), f32),
    }


if __name__ == "__main__":
    B, C_in, J, T = 2, 3, 11, 16     # J must be 11 (hand-crafted path), C_in must be 3
    C_out = 16

    key = jax.random.PRNGKey(0)
    kx, kp = jax.random.split(key)
    x = jax.random.normal(kx, (B, C_in, J, T), dtype=jnp.float32)
    params = init_params(kp, C_in, C_out)

    fwd = jax.jit(stem_v2_origin_ps_forward)
    y = jax.block_until_ready(fwd(x, params))

    assert y.shape == (B, C_out, J, T), y.shape
    assert bool(jnp.all(jnp.isfinite(y)))
    print("KERNEL_OK")
</pallas_src>

<mosaic_0001>
module attributes {stable_mosaic.version = 11 : i64} {
  func.func @_stem_fused_kernel(%arg0: i32, %arg1: memref<16x9xf32, #tpu.memory_space<vmem>>, %arg2: memref<16x1xf32, #tpu.memory_space<vmem>>, %arg3: memref<16x168xf32, #tpu.memory_space<vmem>>, %arg4: memref<16x1xf32, #tpu.memory_space<vmem>>, %arg5: memref<16x32xf32, #tpu.memory_space<vmem>>, %arg6: memref<16x1xf32, #tpu.memory_space<vmem>>, %arg7: memref<12x256xf32, #tpu.memory_space<vmem>>, %arg8: memref<28x256xf32, #tpu.memory_space<vmem>>, %arg9: memref<9x256xf32, #tpu.memory_space<vmem>>, %arg10: memref<16x256xf32, #tpu.memory_space<vmem>>, %arg11: memref<168x256xf32, #tpu.memory_space<vmem>>) attributes {dimension_semantics = [#tpu.dimension_semantics<parallel>], iteration_bounds = array<i64: 2>, scalar_prefetch = 0 : i64, scratch_operands = 1 : i64, tpu.core_type = #tpu.core_type<tc>, window_params = [{pipeline_mode = #tpu.pipeline_mode<synchronous>, transform_indices = @transform_0, window_bounds = array<i64: 16, 9>}, {pipeline_mode = #tpu.pipeline_mode<synchronous>, transform_indices = @transform_1, window_bounds = array<i64: 16, 1>}, {pipeline_mode = #tpu.pipeline_mode<synchronous>, transform_indices = @transform_2, window_bounds = array<i64: 16, 168>}, {pipeline_mode = #tpu.pipeline_mode<synchronous>, transform_indices = @transform_3, window_bounds = array<i64: 16, 1>}, {pipeline_mode = #tpu.pipeline_mode<synchronous>, transform_indices = @transform_4, window_bounds = array<i64: 16, 32>}, {pipeline_mode = #tpu.pipeline_mode<synchronous>, transform_indices = @transform_5, window_bounds = array<i64: 16, 1>}, {transform_indices = @transform_6, window_bounds = array<i64: 12, 256>}, {transform_indices = @transform_7, window_bounds = array<i64: 28, 256>}, {transform_indices = @transform_8, window_bounds = array<i64: 9, 256>}, {transform_indices = @transform_9, window_bounds = array<i64: 16, 256>}]} {
    %cst = arith.constant 0.000000e+00 : f32
    %0 = vector.broadcast %cst : f32 to vector<4x256xf32>
    %cst_0 = arith.constant 0.000000e+00 : f32
    %1 = vector.broadcast %cst_0 : f32 to vector<4x256xf32>
    %cst_1 = arith.constant 0.000000e+00 : f32
    %2 = vector.broadcast %cst_1 : f32 to vector<4x256xf32>
    %cst_2 = arith.constant 0.000000e+00 : f32
    %3 = vector.broadcast %cst_2 : f32 to vector<4x256xf32>
    %cst_3 = arith.constant 0.000000e+00 : f32
    %4 = vector.broadcast %cst_3 : f32 to vector<4x256xf32>
    %cst_4 = arith.constant 0.000000e+00 : f32
    %5 = vector.broadcast %cst_4 : f32 to vector<4x256xf32>
    %cst_5 = arith.constant 0.000000e+00 : f32
    %6 = vector.broadcast %cst_5 : f32 to vector<4x256xf32>
    %cst_6 = arith.constant 0.000000e+00 : f32
    %7 = vector.broadcast %cst_6 : f32 to vector<4x256xf32>
    %cst_7 = arith.constant 0.000000e+00 : f32
    %8 = vector.broadcast %cst_7 : f32 to vector<4x256xf32>
    %cst_8 = arith.constant 0.000000e+00 : f32
    %9 = vector.broadcast %cst_8 : f32 to vector<4x256xf32>
    %cst_9 = arith.constant 0.000000e+00 : f32
    %10 = vector.broadcast %cst_9 : f32 to vector<4x256xf32>
    %cst_10 = arith.constant 0.000000e+00 : f32
    %11 = vector.broadcast %cst_10 : f32 to vector<4x256xf32>
    %cst_11 = arith.constant 0.000000e+00 : f32
    %12 = vector.broadcast %cst_11 : f32 to vector<4x256xf32>
    %cst_12 = arith.constant 0.000000e+00 : f32
    %13 = vector.broadcast %cst_12 : f32 to vector<4x256xf32>
    %cst_13 = arith.constant 0.000000e+00 : f32
    %14 = vector.broadcast %cst_13 : f32 to vector<4x256xf32>
    %cst_14 = arith.constant 0.000000e+00 : f32
    %15 = vector.broadcast %cst_14 : f32 to vector<4x256xf32>
    %cst_15 = arith.constant 0.000000e+00 : f32
    %16 = vector.broadcast %cst_15 : f32 to vector<4x256xf32>
    %cst_16 = arith.constant 0.000000e+00 : f32
    %17 = vector.broadcast %cst_16 : f32 to vector<4x256xf32>
    %cst_17 = arith.constant 0.000000e+00 : f32
    %18 = vector.broadcast %cst_17 : f32 to vector<4x256xf32>
    %cst_18 = arith.constant 0.000000e+00 : f32
    %19 = vector.broadcast %cst_18 : f32 to vector<4x256xf32>
    %cst_19 = arith.constant 0.000000e+00 : f32
    %20 = vector.broadcast %cst_19 : f32 to vector<4x256xf32>
    %cst_20 = arith.constant 0.000000e+00 : f32
    %21 = vector.broadcast %cst_20 : f32 to vector<4x256xf32>
    %c0 = arith.constant 0 : index
    %c0_21 = arith.constant 0 : index
    %22 = vector.load %arg7[%c0, %c0_21] : memref<12x256xf32, #tpu.memory_space<vmem>>, vector<4x256xf32>
    %23 = arith.subf %22, %21 : vector<4x256xf32>
    %24 = vector.extract_strided_slice %23 {offsets = [0, 0], sizes = [1, 256], strides = [1, 1]} : vector<4x256xf32> to vector<1x256xf32>
    %25 = vector.extract_strided_slice %23 {offsets = [1, 0], sizes = [1, 256], strides = [1, 1]} : vector<4x256xf32> to vector<1x256xf32>
    %26 = vector.extract_strided_slice %23 {offsets = [2, 0], sizes = [1, 256], strides = [1, 1]} : vector<4x256xf32> to vector<1x256xf32>
    %27 = vector.extract_strided_slice %23 {offsets = [3, 0], sizes = [1, 256], strides = [1, 1]} : vector<4x256xf32> to vector<1x256xf32>
    %28 = vector.extract_strided_slice %0 {offsets = [0, 0], sizes = [1, 256], strides = [1, 1]} : vector<4x256xf32> to vector<1x256xf32>
    %29 = vector.extract_strided_slice %0 {offsets = [1, 0], sizes = [1, 256], strides = [1, 1]} : vector<4x256xf32> to vector<1x256xf32>
    %30 = vector.extract_strided_slice %0 {offsets = [2, 0], sizes = [1, 256], strides = [1, 1]} : vector<4x256xf32> to vector<1x256xf32>
    %31 = vector.extract_strided_slice %0 {offsets = [3, 0], sizes = [1, 256], strides = [1, 1]} : vector<4x256xf32> to vector<1x256xf32>
    %cst_22 = arith.constant 5.000000e-01 : f32
    %32 = vector.broadcast %cst_22 : f32 to vector<1x256xf32>
    %33 = arith.mulf %32, %24 : vector<1x256xf32>
    %34 = vector.broadcast %33 : vector<1x256xf32> to vector<4x256xf32>
    %35 = arith.mulf %34, %23 : vector<4x256xf32>
    %cst_23 = arith.constant 5.000000e-01 : f32
    %36 = vector.broadcast %cst_23 : f32 to vector<1x256xf32>
    %37 = arith.mulf %36, %25 : vector<1x256xf32>
    %38 = vector.broadcast %37 : vector<1x256xf32> to vector<4x256xf32>
    %39 = arith.mulf %38, %23 : vector<4x256xf32>
    %cst_24 = arith.constant 5.000000e-01 : f32
    %40 = vector.broadcast %cst_24 : f32 to vector<1x256xf32>
    %41 = arith.mulf %40, %26 : vector<1x256xf32>
    %42 = vector.broadcast %41 : vector<1x256xf32> to vector<4x256xf32>
    %43 = arith.mulf %42, %23 : vector<4x256xf32>
    %cst_25 = arith.constant 5.000000e-01 : f32
    %44 = vector.broadcast %cst_25 : f32 to vector<1x256xf32>
    %45 = arith.mulf %44, %27 : vector<1x256xf32>
    %46 = vector.broadcast %45 : vector<1x256xf32> to vector<4x256xf32>
    %47 = arith.mulf %46, %23 : vector<4x256xf32>
    %cst_26 = arith.constant 0.333333343 : f32
    %48 = vector.broadcast %cst_26 : f32 to vector<1x256xf32>
    %49 = arith.mulf %48, %24 : vector<1x256xf32>
    %50 = arith.addf %28, %49 : vector<1x256xf32>
    %51 = vector.extract_strided_slice %1 {offsets = [0, 0], sizes = [1, 256], strides = [1, 1]} : vector<4x256xf32> to vector<1x256xf32>
    %52 = vector.broadcast %51 : vector<1x256xf32> to vector<4x256xf32>
    %53 = arith.mulf %52, %23 : vector<4x256xf32>
    %54 = arith.addf %5, %53 : vector<4x256xf32>
    %55 = vector.broadcast %50 : vector<1x256xf32> to vector<4x256xf32>
    %56 = arith.mulf %55, %35 : vector<4x256xf32>
    %57 = arith.addf %54, %56 : vector<4x256xf32>
    %58 = vector.extract_strided_slice %1 {offsets = [1, 0], sizes = [1, 256], strides = [1, 1]} : vector<4x256xf32> to vector<1x256xf32>
    %59 = vector.broadcast %58 : vector<1x256xf32> to vector<4x256xf32>
    %60 = arith.mulf %59, %23 : vector<4x256xf32>
    %61 = arith.addf %6, %60 : vector<4x256xf32>
    %62 = vector.broadcast %50 : vector<1x256xf32> to vector<4x256xf32>
    %63 = arith.mulf %62, %39 : vector<4x256xf32>
    %64 = arith.addf %61, %63 : vector<4x256xf32>
    %65 = vector.extract_strided_slice %1 {offsets = [2, 0], sizes = [1, 256], strides = [1, 1]} : vector<4x256xf32> to vector<1x256xf32>
    %66 = vector.broadcast %65 : vector<1x256xf32> to vector<4x256xf32>
    %67 = arith.mulf %66, %23 : vector<4x256xf32>
    %68 = arith.addf %7, %67 : vector<4x256xf32>
    %69 = vector.broadcast %50 : vector<1x256xf32> to vector<4x256xf32>
    %70 = arith.mulf %69, %43 : vector<4x256xf32>
    %71 = arith.addf %68, %70 : vector<4x256xf32>
    %72 = vector.extract_strided_slice %1 {offsets = [3, 0], sizes = [1, 256], strides = [1, 1]} : vector<4x256xf32> to vector<1x256xf32>
    %73 = vector.broadcast %72 : vector<1x256xf32> to vector<4x256xf32>
    %74 = arith.mulf %73, %23 : vector<4x256xf32>
    %75 = arith.addf %8, %74 : vector<4x256xf32>
    %76 = vector.broadcast %50 : vector<1x256xf32> to vector<4x256xf32>
    %77 = arith.mulf %76, %47 : vector<4x256xf32>
    %78 = arith.addf %75, %77 : vector<4x256xf32>
    %cst_27 = arith.constant 0.333333343 : f32
    %79 = vector.broadcast %cst_27 : f32 to vector<1x256xf32>
    %80 = arith.mulf %79, %25 : vector<1x256xf32>
    %81 = arith.addf %29, %80 : vector<1x256xf32>
    %82 = vector.extract_strided_slice %2 {offsets = [0, 0], sizes = [1, 256], strides = [1, 1]} : vector<4x256xf32> to vector<1x256xf32>
    %83 = vector.broadcast %82 : vector<1x256xf32> to vector<4x256xf32>
    %84 = arith.mulf %83, %23 : vector<4x256xf32>
    %85 = arith.addf %9, %84 : vector<4x256xf32>
    %86 = vector.broadcast %81 : vector<1x256xf32> to vector<4x256xf32>
    %87 = arith.mulf %86, %35 : vector<4x256xf32>
    %88 = arith.addf %85, %87 : vector<4x256xf32>
    %89 = vector.extract_strided_slice %2 {offsets = [1, 0], sizes = [1, 256], strides = [1, 1]} : vector<4x256xf32> to vector<1x256xf32>
    %90 = vector.broadcast %89 : vector<1x256xf32> to vector<4x256xf32>
    %91 = arith.mulf %90, %23 : vector<4x256xf32>
    %92 = arith.addf %10, %91 : vector<4x256xf32>
    %93 = vector.broadcast %81 : vector<1x256xf32> to vector<4x256xf32>
    %94 = arith.mulf %93, %39 : vector<4x256xf32>
    %95 = arith.addf %92, %94 : vector<4x256xf32>
    %96 = vector.extract_strided_slice %2 {offsets = [2, 0], sizes = [1, 256], strides = [1, 1]} : vector<4x256xf32> to vector<1x256xf32>
    %97 = vector.broadcast %96 : vector<1x256xf32> to vector<4x256xf32>
    %98 = arith.mulf %97, %23 : vector<4x256xf32>
    %99 = arith.addf %11, %98 : vector<4x256xf32>
    %100 = vector.broadcast %81 : vector<1x256xf32> to vector<4x256xf32>
    %101 = arith.mulf %100, %43 : vector<4x256xf32>
    %102 = arith.addf %99, %101 : vector<4x256xf32>
    %103 = vector.extract_strided_slice %2 {offsets = [3, 0], sizes = [1, 256], strides = [1, 1]} : vector<4x256xf32> to vector<1x256xf32>
    %104 = vector.broadcast %103 : vector<1x256xf32> to vector<4x256xf32>
    %105 = arith.mulf %104, %23 : vector<4x256xf32>
    %106 = arith.addf %12, %105 : vector<4x256xf32>
    %107 = vector.broadcast %81 : vector<1x256xf32> to vector<4x256xf32>
    %108 = arith.mulf %107, %47 : vector<4x256xf32>
    %109 = arith.addf %106, %108 : vector<4x256xf32>
    %cst_28 = arith.constant 0.333333343 : f32
    %110 = vector.broadcast %cst_28 : f32 to vector<1x256xf32>
    %111 = arith.mulf %110, %26 : vector<1x256xf32>
    %112 = arith.addf %30, %111 : vector<1x256xf32>
    %113 = vector.extract_strided_slice %3 {offsets = [0, 0], sizes = [1, 256], strides = [1, 1]} : vector<4x256xf32> to vector<1x256xf32>
    %114 = vector.broadcast %113 : vector<1x256xf32> to vector<4x256xf32>
    %115 = arith.mulf %114, %23 : vector<4x256xf32>
    %116 = arith.addf %13, %115 : vector<4x256xf32>
    %117 = vector.broadcast %112 : vector<1x256xf32> to vector<4x256xf32>
    %118 = arith.mulf %117, %35 : vector<4x256xf32>
    %119 = arith.addf %116, %118 : vector<4x256xf32>
    %120 = vector.extract_strided_slice %3 {offsets = [1, 0], sizes = [1, 256], strides = [1, 1]} : vector<4x256xf32> to vector<1x256xf32>
    %121 = vector.broadcast %120 : vector<1x256xf32> to vector<4x256xf32>
    %122 = arith.mulf %121, %23 : vector<4x256xf32>
    %123 = arith.addf %14, %122 : vector<4x256xf32>
    %124 = vector.broadcast %112 : vector<1x256xf32> to vector<4x256xf32>
    %125 = arith.mulf %124, %39 : vector<4x256xf32>
    %126 = arith.addf %123, %125 : vector<4x256xf32>
    %127 = vector.extract_strided_slice %3 {offsets = [2, 0], sizes = [1, 256], strides = [1, 1]} : vector<4x256xf32> to vector<1x256xf32>
    %128 = vector.broadcast %127 : vector<1x256xf32> to vector<4x256xf32>
    %129 = arith.mulf %128, %23 : vector<4x256xf32>
    %130 = arith.addf %15, %129 : vector<4x256xf32>
    %131 = vector.broadcast %112 : vector<1x256xf32> to vector<4x256xf32>
    %132 = arith.mulf %131, %43 : vector<4x256xf32>
    %133 = arith.addf %130, %132 : vector<4x256xf32>
    %134 = vector.extract_strided_slice %3 {offsets = [3, 0], sizes = [1, 256], strides = [1, 1]} : vector<4x256xf32> to vector<1x256xf32>
    %135 = vector.broadcast %134 : vector<1x256xf32> to vector<4x256xf32>
    %136 = arith.mulf %135, %23 : vector<4x256xf32>
    %137 = arith.addf %16, %136 : vector<4x256xf32>
    %138 = vector.broadcast %112 : vector<1x256xf32> to vector<4x256xf32>
    %139 = arith.mulf %138, %47 : vector<4x256xf32>
    %140 = arith.addf %137, %139 : vector<4x256xf32>
    %cst_29 = arith.constant 0.333333343 : f32
    %141 = vector.broadcast %cst_29 : f32 to vector<1x256xf32>
    %142 = arith.mulf %141, %27 : vector<1x256xf32>
    %143 = arith.addf %31, %142 : vector<1x256xf32>
    %144 = vector.extract_strided_slice %4 {offsets = [0, 0], sizes = [1, 256], strides = [1, 1]} : vector<4x256xf32> to vector<1x256xf32>
    %145 = vector.broadcast %144 : vector<1x256xf32> to vector<4x256xf32>
    %146 = arith.mulf %145, %23 : vector<4x256xf32>
    %147 = arith.addf %17, %146 : vector<4x256xf32>
    %148 = vector.broadcast %143 : vector<1x256xf32> to vector<4x256xf32>
    %149 = arith.mulf %148, %35 : vector<4x256xf32>
    %150 = arith.addf %147, %149 : vector<4x256xf32>
    %151 = vector.extract_strided_slice %4 {offsets = [1, 0], sizes = [1, 256], strides = [1, 1]} : vector<4x256xf32> to vector<1x256xf32>
    %152 = vector.broadcast %151 : vector<1x256xf32> to vector<4x256xf32>
    %153 = arith.mulf %152, %23 : vector<4x256xf32>
    %154 = arith.addf %18, %153 : vector<4x256xf32>
    %155 = vector.broadcast %143 : vector<1x256xf32> to vector<4x256xf32>
    %156 = arith.mulf %155, %39 : vector<4x256xf32>
    %157 = arith.addf %154, %156 : vector<4x256xf32>
    %158 = vector.extract_strided_slice %4 {offsets = [2, 0], sizes = [1, 256], strides = [1, 1]} : vector<4x256xf32> to vector<1x256xf32>
    %159 = vector.broadcast %158 : vector<1x256xf32> to vector<4x256xf32>
    %160 = arith.mulf %159, %23 : vector<4x256xf32>
    %161 = arith.addf %19, %160 : vector<4x256xf32>
    %162 = vector.broadcast %143 : vector<1x256xf32> to vector<4x256xf32>
    %163 = arith.mulf %162, %43 : vector<4x256xf32>
    %164 = arith.addf %161, %163 : vector<4x256xf32>
    %165 = vector.extract_strided_slice %4 {offsets = [3, 0], sizes = [1, 256], strides = [1, 1]} : vector<4x256xf32> to vector<1x256xf32>
    %166 = vector.broadcast %165 : vector<1x256xf32> to vector<4x256xf32>
    %167 = arith.mulf %166, %23 : vector<4x256xf32>
    %168 = arith.addf %20, %167 : vector<4x256xf32>
    %169 = vector.broadcast %143 : vector<1x256xf32> to vector<4x256xf32>
    %170 = arith.mulf %169, %47 : vector<4x256xf32>
    %171 = arith.addf %168, %170 : vector<4x256xf32>
    %172 = vector.broadcast %28 : vector<1x256xf32> to vector<4x256xf32>
    %173 = arith.mulf %172, %23 : vector<4x256xf32>
    %174 = arith.addf %1, %173 : vector<4x256xf32>
    %175 = arith.addf %174, %35 : vector<4x256xf32>
    %176 = vector.broadcast %29 : vector<1x256xf32> to vector<4x256xf32>
    %177 = arith.mulf %176, %23 : vector<4x256xf32>
    %178 = arith.addf %2, %177 : vector<4x256xf32>
    %179 = arith.addf %178, %39 : vector<4x256xf32>
    %180 = vector.broadcast %30 : vector<1x256xf32> to vector<4x256xf32>
    %181 = arith.mulf %180, %23 : vector<4x256xf32>
    %182 = arith.addf %3, %181 : vector<4x256xf32>
    %183 = arith.addf %182, %43 : vector<4x256xf32>
    %184 = vector.broadcast %31 : vector<1x256xf32> to vector<4x256xf32>
    %185 = arith.mulf %184, %23 : vector<4x256xf32>
    %186 = arith.addf %4, %185 : vector<4x256xf32>
    %187 = arith.addf %186, %47 : vector<4x256xf32>
    %188 = arith.addf %0, %23 : vector<4x256xf32>
    %c4 = arith.constant 4 : index
    %c0_30 = arith.constant 0 : index
    %189 = vector.load %arg7[%c4, %c0_30] : memref<12x256xf32, #tpu.memory_space<vmem>>, vector<4x256xf32>
    %190 = arith.subf %189, %22 : vector<4x256xf32>
    %191 = vector.extract_strided_slice %190 {offsets = [0, 0], sizes = [1, 256], strides = [1, 1]} : vector<4x256xf32> to vector<1x256xf32>
    %192 = vector.extract_strided_slice %190 {offsets = [1, 0], sizes = [1, 256], strides = [1, 1]} : vector<4x256xf32> to vector<1x256xf32>
    %193 = vector.extract_strided_slice %190 {offsets = [2, 0], sizes = [1, 256], strides = [1, 1]} : vector<4x256xf32> to vector<1x256xf32>
    %194 = vector.extract_strided_slice %190 {offsets = [3, 0], sizes = [1, 256], strides = [1, 1]} : vector<4x256xf32> to vector<1x256xf32>
    %195 = vector.extract_strided_slice %188 {offsets = [0, 0], sizes = [1, 256], strides = [1, 1]} : vector<4x256xf32> to vector<1x256xf32>
    %196 = vector.extract_strided_slice %188 {offsets = [1, 0], sizes = [1, 256], strides = [1, 1]} : vector<4x256xf32> to vector<1x256xf32>
    %197 = vector.extract_strided_slice %188 {offsets = [2, 0], sizes = [1, 256], strides = [1, 1]} : vector<4x256xf32> to vector<1x256xf32>
    %198 = vector.extract_strided_slice %188 {offsets = [3, 0], sizes = [1, 256], strides = [1, 1]} : vector<4x256xf32> to vector<1x256xf32>
    %cst_31 = arith.constant 5.000000e-01 : f32
    %199 = vector.broadcast %cst_31 : f32 to vector<1x256xf32>
    %200 = arith.mulf %199, %191 : vector<1x256xf32>
    %201 = vector.broadcast %200 : vector<1x256xf32> to vector<4x256xf32>
    %202 = arith.mulf %201, %190 : vector<4x256xf32>
    %cst_32 = arith.constant 5.000000e-01 : f32
    %203 = vector.broadcast %cst_32 : f32 to vector<1x256xf32>
    %204 = arith.mulf %203, %192 : vector<1x256xf32>
    %205 = vector.broadcast %204 : vector<1x256xf32> to vector<4x256xf32>
    %206 = arith.mulf %205, %190 : vector<4x256xf32>
    %cst_33 = arith.constant 5.000000e-01 : f32
    %207 = vector.broadcast %cst_33 : f32 to vector<1x256xf32>
    %208 = arith.mulf %207, %193 : vector<1x256xf32>
    %209 = vector.broadcast %208 : vector<1x256xf32> to vector<4x256xf32>
    %210 = arith.mulf %209, %190 : vector<4x256xf32>
    %cst_34 = arith.constant 5.000000e-01 : f32
    %211 = vector.broadcast %cst_34 : f32 to vector<1x256xf32>
    %212 = arith.mulf %211, %194 : vector<1x256xf32>
    %213 = vector.broadcast %212 : vector<1x256xf32> to vector<4x256xf32>
    %214 = arith.mulf %213, %190 : vector<4x256xf32>
    %cst_35 = arith.constant 0.333333343 : f32
    %215 = vector.broadcast %cst_35 : f32 to vector<1x256xf32>
    %216 = arith.mulf %215, %191 : vector<1x256xf32>
    %217 = arith.addf %195, %216 : vector<1x256xf32>
    %218 = vector.extract_strided_slice %175 {offsets = [0, 0], sizes = [1, 256], strides = [1, 1]} : vector<4x256xf32> to vector<1x256xf32>
    %219 = vector.broadcast %218 : vector<1x256xf32> to vector<4x256xf32>
    %220 = arith.mulf %219, %190 : vector<4x256xf32>
    %221 = arith.addf %57, %220 : vector<4x256xf32>
    %222 = vector.broadcast %217 : vector<1x256xf32> to vector<4x256xf32>
    %223 = arith.mulf %222, %202 : vector<4x256xf32>
    %224 = arith.addf %221, %223 : vector<4x256xf32>
    %225 = vector.extract_strided_slice %175 {offsets = [1, 0], sizes = [1, 256], strides = [1, 1]} : vector<4x256xf32> to vector<1x256xf32>
    %226 = vector.broadcast %225 : vector<1x256xf32> to vector<4x256xf32>
    %227 = arith.mulf %226, %190 : vector<4x256xf32>
    %228 = arith.addf %64, %227 : vector<4x256xf32>
    %229 = vector.broadcast %217 : vector<1x256xf32> to vector<4x256xf32>
    %230 = arith.mulf %229, %206 : vector<4x256xf32>
    %231 = arith.addf %228, %230 : vector<4x256xf32>
    %232 = vector.extract_strided_slice %175 {offsets = [2, 0], sizes = [1, 256], strides = [1, 1]} : vector<4x256xf32> to vector<1x256xf32>
    %233 = vector.broadcast %232 : vector<1x256xf32> to vector<4x256xf32>
    %234 = arith.mulf %233, %190 : vector<4x256xf32>
    %235 = arith.addf %71, %234 : vector<4x256xf32>
    %236 = vector.broadcast %217 : vector<1x256xf32> to vector<4x256xf32>
    %237 = arith.mulf %236, %210 : vector<4x256xf32>
    %238 = arith.addf %235, %237 : vector<4x256xf32>
    %239 = vector.extract_strided_slice %175 {offsets = [3, 0], sizes = [1, 256], strides = [1, 1]} : vector<4x256xf32> to vector<1x256xf32>
    %240 = vector.broadcast %239 : vector<1x256xf32> to vector<4x256xf32>
    %241 = arith.mulf %240, %190 : vector<4x256xf32>
    %242 = arith.addf %78, %241 : vector<4x256xf32>
    %243 = vector.broadcast %217 : vector<1x256xf32> to vector<4x256xf32>
    %244 = arith.mulf %243, %214 : vector<4x256xf32>
    %245 = arith.addf %242, %244 : vector<4x256xf32>
    %cst_36 = arith.constant 0.333333343 : f32
    %246 = vector.broadcast %cst_36 : f32 to vector<1x256xf32>
    %247 = arith.mulf %246, %192 : vector<1x256xf32>
    %248 = arith.addf %196, %247 : vector<1x256xf32>
    %249 = vector.extract_strided_slice %179 {offsets = [0, 0], sizes = [1, 256], strides = [1, 1]} : vector<4x256xf32> to vector<1x256xf32>
    %250 = vector.broadcast %249 : vector<1x256xf32> to vector<4x256xf32>
    %251 = arith.mulf %250, %190 : vector<4x256xf32>
    %252 = arith.addf %88, %251 : vector<4x256xf32>
    %253 = vector.broadcast %248 : vector<1x256xf32> to vector<4x256xf32>
    %254 = arith.mulf %253, %202 : vector<4x256xf32>
    %255 = arith.addf %252, %254 : vector<4x256xf32>
    %256 = vector.extract_strided_slice %179 {offsets = [1, 0], sizes = [1, 256], strides = [1, 1]} : vector<4x256xf32> to vector<1x256xf32>
    %257 = vector.broadcast %256 : vector<1x256xf32> to vector<4x256xf32>
    %258 = arith.mulf %257, %190 : vector<4x256xf32>
    %259 = arith.addf %95, %258 : vector<4x256xf32>
    %260 = vector.broadcast %248 : vector<1x256xf32> to vector<4x256xf32>
    %261 = arith.mulf %260, %206 : vector<4x256xf32>
    %262 = arith.addf %259, %261 : vector<4x256xf32>
    %263 = vector.extract_strided_slice %179 {offsets = [2, 0], sizes = [1, 256], strides = [1, 1]} : vector<4x256xf32> to vector<1x256xf32>
    %264 = vector.broadcast %263 : vector<1x256xf32> to vector<4x256xf32>
    %265 = arith.mulf %264, %190 : vector<4x256xf32>
    %266 = arith.addf %102, %265 : vector<4x256xf32>
    %267 = vector.broadcast %248 : vector<1x256xf32> to vector<4x256xf32>
    %268 = arith.mulf %267, %210 : vector<4x256xf32>
    %269 = arith.addf %266, %268 : vector<4x256xf32>
    %270 = vector.extract_strided_slice %179 {offsets = [3, 0], sizes = [1, 256], strides = [1, 1]} : vector<4x256xf32> to vector<1x256xf32>
    %271 = vector.broadcast %270 : vector<1x256xf32> to vector<4x256xf32>
    %272 = arith.mulf %271, %190 : vector<4x256xf32>
    %273 = arith.addf %109, %272 : vector<4x256xf32>
    %274 = vector.broadcast %248 : vector<1x256xf32> to vector<4x256xf32>
    %275 = arith.mulf %274, %214 : vector<4x256xf32>
    %276 = arith.addf %273, %275 : vector<4x256xf32>
    %cst_37 = arith.constant 0.333333343 : f32
    %277 = vector.broadcast %cst_37 : f32 to vector<1x256xf32>
    %278 = arith.mulf %277, %193 : vector<1x256xf32>
    %279 = arith.addf %197, %278 : vector<1x256xf32>
    %280 = vector.extract_strided_slice %183 {offsets = [0, 0], sizes = [1, 256], strides = [1, 1]} : vector<4x256xf32> to vector<1x256xf32>
    %281 = vector.broadcast %280 : vector<1x256xf32> to vector<4x256xf32>
    %282 = arith.mulf %281, %190 : vector<4x256xf32>
    %283 = arith.addf %119, %282 : vector<4x256xf32>
    %284 = vector.broadcast %279 : vector<1x256xf32> to vector<4x256xf32>
    %285 = arith.mulf %284, %202 : vector<4x256xf32>
    %286 = arith.addf %283, %285 : vector<4x256xf32>
    %287 = vector.extract_strided_slice %183 {offsets = [1, 0], sizes = [1, 256], strides = [1, 1]} : vector<4x256xf32> to vector<1x256xf32>
    %288 = vector.broadcast %287 : vector<1x256xf32> to vector<4x256xf32>
    %289 = arith.mulf %288, %190 : vector<4x256xf32>
    %290 = arith.addf %126, %289 : vector<4x256xf32>
    %291 = vector.broadcast %279 : vector<1x256xf32> to vector<4x256xf32>
    %292 = arith.mulf %291, %206 : vector<4x256xf32>
    %293 = arith.addf %290, %292 : vector<4x256xf32>
    %294 = vector.extract_strided_slice %183 {offsets = [2, 0], sizes = [1, 256], strides = [1, 1]} : vector<4x256xf32> to vector<1x256xf32>
    %295 = vector.broadcast %294 : vector<1x256xf32> to vector<4x256xf32>
    %296 = arith.mulf %295, %190 : vector<4x256xf32>
    %297 = arith.addf %133, %296 : vector<4x256xf32>
    %298 = vector.broadcast %279 : vector<1x256xf32> to vector<4x256xf32>
    %299 = arith.mulf %298, %210 : vector<4x256xf32>
    %300 = arith.addf %297, %299 : vector<4x256xf32>
    %301 = vector.extract_strided_slice %183 {offsets = [3, 0], sizes = [1, 256], strides = [1, 1]} : vector<4x256xf32> to vector<1x256xf32>
    %302 = vector.broadcast %301 : vector<1x256xf32> to vector<4x256xf32>
    %303 = arith.mulf %302, %190 : vector<4x256xf32>
    %304 = arith.addf %140, %303 : vector<4x256xf32>
    %305 = vector.broadcast %279 : vector<1x256xf32> to vector<4x256xf32>
    %306 = arith.mulf %305, %214 : vector<4x256xf32>
    %307 = arith.addf %304, %306 : vector<4x256xf32>
    %cst_38 = arith.constant 0.333333343 : f32
    %308 = vector.broadcast %cst_38 : f32 to vector<1x256xf32>
    %309 = arith.mulf %308, %194 : vector<1x256xf32>
    %310 = arith.addf %198, %309 : vector<1x256xf32>
    %311 = vector.extract_strided_slice %187 {offsets = [0, 0], sizes = [1, 256], strides = [1, 1]} : vector<4x256xf32> to vector<1x256xf32>
    %312 = vector.broadcast %311 : vector<1x256xf32> to vector<4x256xf32>
    %313 = arith.mulf %312, %190 : vector<4x256xf32>
    %314 = arith.addf %150, %313 : vector<4x256xf32>
    %315 = vector.broadcast %310 : vector<1x256xf32> to vector<4x256xf32>
    %316 = arith.mulf %315, %202 : vector<4x256xf32>
    %317 = arith.addf %314, %316 : vector<4x256xf32>
    %318 = vector.extract_strided_slice %187 {offsets = [1, 0], sizes = [1, 256], strides = [1, 1]} : vector<4x256xf32> to vector<1x256xf32>
    %319 = vector.broadcast %318 : vector<1x256xf32> to vector<4x256xf32>
    %320 = arith.mulf %319, %190 : vector<4x256xf32>
    %321 = arith.addf %157, %320 : vector<4x256xf32>
    %322 = vector.broadcast %310 : vector<1x256xf32> to vector<4x256xf32>
    %323 = arith.mulf %322, %206 : vector<4x256xf32>
    %324 = arith.addf %321, %323 : vector<4x256xf32>
    %325 = vector.extract_strided_slice %187 {offsets = [2, 0], sizes = [1, 256], strides = [1, 1]} : vector<4x256xf32> to vector<1x256xf32>
    %326 = vector.broadcast %325 : vector<1x256xf32> to vector<4x256xf32>
    %327 = arith.mulf %326, %190 : vector<4x256xf32>
    %328 = arith.addf %164, %327 : vector<4x256xf32>
    %329 = vector.broadcast %310 : vector<1x256xf32> to vector<4x256xf32>
    %330 = arith.mulf %329, %210 : vector<4x256xf32>
    %331 = arith.addf %328, %330 : vector<4x256xf32>
    %332 = vector.extract_strided_slice %187 {offsets = [3, 0], sizes = [1, 256], strides = [1, 1]} : vector<4x256xf32> to vector<1x256xf32>
    %333 = vector.broadcast %332 : vector<1x256xf32> to vector<4x256xf32>
    %334 = arith.mulf %333, %190 : vector<4x256xf32>
    %335 = arith.addf %171, %334 : vector<4x256xf32>
    %336 = vector.broadcast %310 : vector<1x256xf32> to vector<4x256xf32>
    %337 = arith.mulf %336, %214 : vector<4x256xf32>
    %338 = arith.addf %335, %337 : vector<4x256xf32>
    %339 = vector.broadcast %195 : vector<1x256xf32> to vector<4x256xf32>
    %340 = arith.mulf %339, %190 : vector<4x256xf32>
    %341 = arith.addf %175, %340 : vector<4x256xf32>
    %342 = arith.addf %341, %202 : vector<4x256xf32>
    %343 = vector.broadcast %196 : vector<1x256xf32> to vector<4x256xf32>
    %344 = arith.mulf %343, %190 : vector<4x256xf32>
    %345 = arith.addf %179, %344 : vector<4x256xf32>
    %346 = arith.addf %345, %206 : vector<4x256xf32>
    %347 = vector.broadcast %197 : vector<1x256xf32> to vector<4x256xf32>
    %348 = arith.mulf %347, %190 : vector<4x256xf32>
    %349 = arith.addf %183, %348 : vector<4x256xf32>
    %350 = arith.addf %349, %210 : vector<4x256xf32>
    %351 = vector.broadcast %198 : vector<1x256xf32> to vector<4x256xf32>
    %352 = arith.mulf %351, %190 : vector<4x256xf32>
    %353 = arith.addf %187, %352 : vector<4x256xf32>
    %354 = arith.addf %353, %214 : vector<4x256xf32>
    %355 = arith.addf %188, %190 : vector<4x256xf32>
    %c8 = arith.constant 8 : index
    %c0_39 = arith.constant 0 : index
    %356 = vector.load %arg7[%c8, %c0_39] : memref<12x256xf32, #tpu.memory_space<vmem>>, vector<4x256xf32>
    %357 = arith.subf %356, %189 : vector<4x256xf32>
    %358 = vector.extract_strided_slice %357 {offsets = [0, 0], sizes = [1, 256], strides = [1, 1]} : vector<4x256xf32> to vector<1x256xf32>
    %359 = vector.extract_strided_slice %357 {offsets = [1, 0], sizes = [1, 256], strides = [1, 1]} : vector<4x256xf32> to vector<1x256xf32>
    %360 = vector.extract_strided_slice %357 {offsets = [2, 0], sizes = [1, 256], strides = [1, 1]} : vector<4x256xf32> to vector<1x256xf32>
    %361 = vector.extract_strided_slice %357 {offsets = [3, 0], sizes = [1, 256], strides = [1, 1]} : vector<4x256xf32> to vector<1x256xf32>
    %362 = vector.extract_strided_slice %355 {offsets = [0, 0], sizes = [1, 256], strides = [1, 1]} : vector<4x256xf32> to vector<1x256xf32>
    %363 = vector.extract_strided_slice %355 {offsets = [1, 0], sizes = [1, 256], strides = [1, 1]} : vector<4x256xf32> to vector<1x256xf32>
    %364 = vector.extract_strided_slice %355 {offsets = [2, 0], sizes = [1, 256], strides = [1, 1]} : vector<4x256xf32> to vector<1x256xf32>
    %365 = vector.extract_strided_slice %355 {offsets = [3, 0], sizes = [1, 256], strides = [1, 1]} : vector<4x256xf32> to vector<1x256xf32>
    %cst_40 = arith.constant 5.000000e-01 : f32
    %366 = vector.broadcast %cst_40 : f32 to vector<1x256xf32>
    %367 = arith.mulf %366, %358 : vector<1x256xf32>
    %368 = vector.broadcast %367 : vector<1x256xf32> to vector<4x256xf32>
    %369 = arith.mulf %368, %357 : vector<4x256xf32>
    %cst_41 = arith.constant 5.000000e-01 : f32
    %370 = vector.broadcast %cst_41 : f32 to vector<1x256xf32>
    %371 = arith.mulf %370, %359 : vector<1x256xf32>
    %372 = vector.broadcast %371 : vector<1x256xf32> to vector<4x256xf32>
    %373 = arith.mulf %372, %357 : vector<4x256xf32>
    %cst_42 = arith.constant 5.000000e-01 : f32
    %374 = vector.broadcast %cst_42 : f32 to vector<1x256xf32>
    %375 = arith.mulf %374, %360 : vector<1x256xf32>
    %376 = vector.broadcast %375 : vector<1x256xf32> to vector<4x256xf32>
    %377 = arith.mulf %376, %357 : vector<4x256xf32>
    %cst_43 = arith.constant 5.000000e-01 : f32
    %378 = vector.broadcast %cst_43 : f32 to vector<1x256xf32>
    %379 = arith.mulf %378, %361 : vector<1x256xf32>
    %380 = vector.broadcast %379 : vector<1x256xf32> to vector<4x256xf32>
    %381 = arith.mulf %380, %357 : vector<4x256xf32>
    %cst_44 = arith.constant 0.333333343 : f32
    %382 = vector.broadcast %cst_44 : f32 to vector<1x256xf32>
    %383 = arith.mulf %382, %358 : vector<1x256xf32>
    %384 = arith.addf %362, %383 : vector<1x256xf32>
    %385 = vector.extract_strided_slice %342 {offsets = [0, 0], sizes = [1, 256], strides = [1, 1]} : vector<4x256xf32> to vector<1x256xf32>
    %386 = vector.broadcast %385 : vector<1x256xf32> to vector<4x256xf32>
    %387 = arith.mulf %386, %357 : vector<4x256xf32>
    %388 = arith.addf %224, %387 : vector<4x256xf32>
    %389 = vector.broadcast %384 : vector<1x256xf32> to vector<4x256xf32>
    %390 = arith.mulf %389, %369 : vector<4x256xf32>
    %391 = arith.addf %388, %390 : vector<4x256xf32>
    %392 = vector.extract_strided_slice %342 {offsets = [1, 0], sizes = [1, 256], strides = [1, 1]} : vector<4x256xf32> to vector<1x256xf32>
    %393 = vector.broadcast %392 : vector<1x256xf32> to vector<4x256xf32>
    %394 = arith.mulf %393, %357 : vector<4x256xf32>
    %395 = arith.addf %231, %394 : vector<4x256xf32>
    %396 = vector.broadcast %384 : vector<1x256xf32> to vector<4x256xf32>
    %397 = arith.mulf %396, %373 : vector<4x256xf32>
    %398 = arith.addf %395, %397 : vector<4x256xf32>
    %399 = vector.extract_strided_slice %342 {offsets = [2, 0], sizes = [1, 256], strides = [1, 1]} : vector<4x256xf32> to vector<1x256xf32>
    %400 = vector.broadcast %399 : vector<1x256xf32> to vector<4x256xf32>
    %401 = arith.mulf %400, %357 : vector<4x256xf32>
    %402 = arith.addf %238, %401 : vector<4x256xf32>
    %403 = vector.broadcast %384 : vector<1x256xf32> to vector<4x256xf32>
    %404 = arith.mulf %403, %377 : vector<4x256xf32>
    %405 = arith.addf %402, %404 : vector<4x256xf32>
    %406 = vector.extract_strided_slice %342 {offsets = [3, 0], sizes = [1, 256], strides = [1, 1]} : vector<4x256xf32> to vector<1x256xf32>
    %407 = vector.broadcast %406 : vector<1x256xf32> to vector<4x256xf32>
    %408 = arith.mulf %407, %357 : vector<4x256xf32>
    %409 = arith.addf %245, %408 : vector<4x256xf32>
    %410 = vector.broadcast %384 : vector<1x256xf32> to vector<4x256xf32>
    %411 = arith.mulf %410, %381 : vector<4x256xf32>
    %412 = arith.addf %409, %411 : vector<4x256xf32>
    %cst_45 = arith.constant 0.333333343 : f32
    %413 = vector.broadcast %cst_45 : f32 to vector<1x256xf32>
    %414 = arith.mulf %413, %359 : vector<1x256xf32>
    %415 = arith.addf %363, %414 : vector<1x256xf32>
    %416 = vector.extract_strided_slice %346 {offsets = [0, 0], sizes = [1, 256], strides = [1, 1]} : vector<4x256xf32> to vector<1x256xf32>
    %417 = vector.broadcast %416 : vector<1x256xf32> to vector<4x256xf32>
    %418 = arith.mulf %417, %357 : vector<4x256xf32>
    %419 = arith.addf %255, %418 : vector<4x256xf32>
    %420 = vector.broadcast %415 : vector<1x256xf32> to vector<4x256xf32>
    %421 = arith.mulf %420, %369 : vector<4x256xf32>
    %422 = arith.addf %419, %421 : vector<4x256xf32>
    %423 = vector.extract_strided_slice %346 {offsets = [1, 0], sizes = [1, 256], strides = [1, 1]} : vector<4x256xf32> to vector<1x256xf32>
    %424 = vector.broadcast %423 : vector<1x256xf32> to vector<4x256xf32>
    %425 = arith.mulf %424, %357 : vector<4x256xf32>
    %426 = arith.addf %262, %425 : vector<4x256xf32>
    %427 = vector.broadcast %415 : vector<1x256xf32> to vector<4x256xf32>
    %428 = arith.mulf %427, %373 : vector<4x256xf32>
    %429 = arith.addf %426, %428 : vector<4x256xf32>
    %430 = vector.extract_strided_slice %346 {offsets = [2, 0], sizes = [1, 256], strides = [1, 1]} : vector<4x256xf32> to vector<1x256xf32>
    %431 = vector.broadcast %430 : vector<1x256xf32> to vector<4x256xf32>
    %432 = arith.mulf %431, %357 : vector<4x256xf32>
    %433 = arith.addf %269, %432 : vector<4x256xf32>
    %434 = vector.broadcast %415 : vector<1x256xf32> to vector<4x256xf32>
    %435 = arith.mulf %434, %377 : vector<4x256xf32>
    %436 = arith.addf %433, %435 : vector<4x256xf32>
    %437 = vector.extract_strided_slice %346 {offsets = [3, 0], sizes = [1, 256], strides = [1, 1]} : vector<4x256xf32> to vector<1x256xf32>
    %438 = vector.broadcast %437 : vector<1x256xf32> to vector<4x256xf32>
    %439 = arith.mulf %438, %357 : vector<4x256xf32>
    %440 = arith.addf %276, %439 : vector<4x256xf32>
    %441 = vector.broadcast %415 : vector<1x256xf32> to vector<4x256xf32>
    %442 = arith.mulf %441, %381 : vector<4x256xf32>
    %443 = arith.addf %440, %442 : vector<4x256xf32>
    %cst_46 = arith.constant 0.333333343 : f32
    %444 = vector.broadcast %cst_46 : f32 to vector<1x256xf32>
    %445 = arith.mulf %444, %360 : vector<1x256xf32>
    %446 = arith.addf %364, %445 : vector<1x256xf32>
    %447 = vector.extract_strided_slice %350 {offsets = [0, 0], sizes = [1, 256], strides = [1, 1]} : vector<4x256xf32> to vector<1x256xf32>
    %448 = vector.broadcast %447 : vector<1x256xf32> to vector<4x256xf32>
    %449 = arith.mulf %448, %357 : vector<4x256xf32>
    %450 = arith.addf %286, %449 : vector<4x256xf32>
    %451 = vector.broadcast %446 : vector<1x256xf32> to vector<4x256xf32>
    %452 = arith.mulf %451, %369 : vector<4x256xf32>
    %453 = arith.addf %450, %452 : vector<4x256xf32>
    %454 = vector.extract_strided_slice %350 {offsets = [1, 0], sizes = [1, 256], strides = [1, 1]} : vector<4x256xf32> to vector<1x256xf32>
    %455 = vector.broadcast %454 : vector<1x256xf32> to vector<4x256xf32>
    %456 = arith.mulf %455, %357 : vector<4x256xf32>
    %457 = arith.addf %293, %456 : vector<4x256xf32>
    %458 = vector.broadcast %446 : vector<1x256xf32> to vector<4x256xf32>
    %459 = arith.mulf %458, %373 : vector<4x256xf32>
    %460 = arith.addf %457, %459 : vector<4x256xf32>
    %461 = vector.extract_strided_slice %350 {offsets = [2, 0], sizes = [1, 256], strides = [1, 1]} : vector<4x256xf32> to vector<1x256xf32>
    %462 = vector.broadcast %461 : vector<1x256xf32> to vector<4x256xf32>
    %463 = arith.mulf %462, %357 : vector<4x256xf32>
    %464 = arith.addf %300, %463 : vector<4x256xf32>
    %465 = vector.broadcast %446 : vector<1x256xf32> to vector<4x256xf32>
    %466 = arith.mulf %465, %377 : vector<4x256xf32>
    %467 = arith.addf %464, %466 : vector<4x256xf32>
    %468 = vector.extract_strided_slice %350 {offsets = [3, 0], sizes = [1, 256], strides = [1, 1]} : vector<4x256xf32> to vector<1x256xf32>
    %469 = vector.broadcast %468 : vector<1x256xf32> to vector<4x256xf32>
    %470 = arith.mulf %469, %357 : vector<4x256xf32>
    %471 = arith.addf %307, %470 : vector<4x256xf32>
    %472 = vector.broadcast %446 : vector<1x256xf32> to vector<4x256xf32>
    %473 = arith.mulf %472, %381 : vector<4x256xf32>
    %474 = arith.addf %471, %473 : vector<4x256xf32>
    %cst_47 = arith.constant 0.333333343 : f32
    %475 = vector.broadcast %cst_47 : f32 to vector<1x256xf32>
    %476 = arith.mulf %475, %361 : vector<1x256xf32>
    %477 = arith.addf %365, %476 : vector<1x256xf32>
    %478 = vector.extract_strided_slice %354 {offsets = [0, 0], sizes = [1, 256], strides = [1, 1]} : vector<4x256xf32> to vector<1x256xf32>
    %479 = vector.broadcast %478 : vector<1x256xf32> to vector<4x256xf32>
    %480 = arith.mulf %479, %357 : vector<4x256xf32>
    %481 = arith.addf %317, %480 : vector<4x256xf32>
    %482 = vector.broadcast %477 : vector<1x256xf32> to vector<4x256xf32>
    %483 = arith.mulf %482, %369 : vector<4x256xf32>
    %484 = arith.addf %481, %483 : vector<4x256xf32>
    %485 = vector.extract_strided_slice %354 {offsets = [1, 0], sizes = [1, 256], strides = [1, 1]} : vector<4x256xf32> to vector<1x256xf32>
    %486 = vector.broadcast %485 : vector<1x256xf32> to vector<4x256xf32>
    %487 = arith.mulf %486, %357 : vector<4x256xf32>
    %488 = arith.addf %324, %487 : vector<4x256xf32>
    %489 = vector.broadcast %477 : vector<1x256xf32> to vector<4x256xf32>
    %490 = arith.mulf %489, %373 : vector<4x256xf32>
    %491 = arith.addf %488, %490 : vector<4x256xf32>
    %492 = vector.extract_strided_slice %354 {offsets = [2, 0], sizes = [1, 256], strides = [1, 1]} : vector<4x256xf32> to vector<1x256xf32>
    %493 = vector.broadcast %492 : vector<1x256xf32> to vector<4x256xf32>
    %494 = arith.mulf %493, %357 : vector<4x256xf32>
    %495 = arith.addf %331, %494 : vector<4x256xf32>
    %496 = vector.broadcast %477 : vector<1x256xf32> to vector<4x256xf32>
    %497 = arith.mulf %496, %377 : vector<4x256xf32>
    %498 = arith.addf %495, %497 : vector<4x256xf32>
    %499 = vector.extract_strided_slice %354 {offsets = [3, 0], sizes = [1, 256], strides = [1, 1]} : vector<4x256xf32> to vector<1x256xf32>
    %500 = vector.broadcast %499 : vector<1x256xf32> to vector<4x256xf32>
    %501 = arith.mulf %500, %357 : vector<4x256xf32>
    %502 = arith.addf %338, %501 : vector<4x256xf32>
    %503 = vector.broadcast %477 : vector<1x256xf32> to vector<4x256xf32>
    %504 = arith.mulf %503, %381 : vector<4x256xf32>
    %505 = arith.addf %502, %504 : vector<4x256xf32>
    %506 = vector.broadcast %362 : vector<1x256xf32> to vector<4x256xf32>
    %507 = arith.mulf %506, %357 : vector<4x256xf32>
    %508 = arith.addf %342, %507 : vector<4x256xf32>
    %509 = arith.addf %508, %369 : vector<4x256xf32>
    %510 = vector.broadcast %363 : vector<1x256xf32> to vector<4x256xf32>
    %511 = arith.mulf %510, %357 : vector<4x256xf32>
    %512 = arith.addf %346, %511 : vector<4x256xf32>
    %513 = arith.addf %512, %373 : vector<4x256xf32>
    %514 = vector.broadcast %364 : vector<1x256xf32> to vector<4x256xf32>
    %515 = arith.mulf %514, %357 : vector<4x256xf32>
    %516 = arith.addf %350, %515 : vector<4x256xf32>
    %517 = arith.addf %516, %377 : vector<4x256xf32>
    %518 = vector.broadcast %365 : vector<1x256xf32> to vector<4x256xf32>
    %519 = arith.mulf %518, %357 : vector<4x256xf32>
    %520 = arith.addf %354, %519 : vector<4x256xf32>
    %521 = arith.addf %520, %381 : vector<4x256xf32>
    %522 = arith.addf %355, %357 : vector<4x256xf32>
    %523 = tpu.concatenate %522, %509, %513, %517, %521, %391, %398, %405, %412, %422, %429, %436, %443, %453, %460, %467 in 0 : vector<4x256xf32>, vector<4x256xf32>, vector<4x256xf32>, vector<4x256xf32>, vector<4x256xf32>, vector<4x256xf32>, vector<4x256xf32>, vector<4x256xf32>, vector<4x256xf32>, vector<4x256xf32>, vector<4x256xf32>, vector<4x256xf32>, vector<4x256xf32>, vector<4x256xf32>, vector<4x256xf32>, vector<4x256xf32> -> vector<64x256xf32>
    %524 = tpu.concatenate %474, %484, %491, %498, %505 in 0 : vector<4x256xf32>, vector<4x256xf32>, vector<4x256xf32>, vector<4x256xf32>, vector<4x256xf32> -> vector<20x256xf32>
    %525 = tpu.concatenate %523, %524 in 0 : vector<64x256xf32>, vector<20x256xf32> -> vector<84x256xf32>
    %c0_48 = arith.constant 0 : index
    %c0_49 = arith.constant 0 : index
    %526 = vector.load %arg11[%c0_48, %c0_49] : memref<168x256xf32, #tpu.memory_space<vmem>>, vector<84x256xf32>
    tpu.vector_store %arg11[%c0_48, %c0_49], %525 {strides = array<i32>} : memref<168x256xf32, #tpu.memory_space<vmem>>, vector<84x256xf32>,
    %cst_50 = arith.constant 0.000000e+00 : f32
    %527 = vector.broadcast %cst_50 : f32 to vector<4x256xf32>
    %cst_51 = arith.constant 0.000000e+00 : f32
    %528 = vector.broadcast %cst_51 : f32 to vector<4x256xf32>
    %cst_52 = arith.constant 0.000000e+00 : f32
    %529 = vector.broadcast %cst_52 : f32 to vector<4x256xf32>
    %cst_53 = arith.constant 0.000000e+00 : f32
    %530 = vector.broadcast %cst_53 : f32 to vector<4x256xf32>
    %cst_54 = arith.constant 0.000000e+00 : f32
    %531 = vector.broadcast %cst_54 : f32 to vector<4x256xf32>
    %cst_55 = arith.constant 0.000000e+00 : f32
    %532 = vector.broadcast %cst_55 : f32 to vector<4x256xf32>
    %cst_56 = arith.constant 0.000000e+00 : f32
    %533 = vector.broadcast %cst_56 : f32 to vector<4x256xf32>
    %cst_57 = arith.constant 0.000000e+00 : f32
    %534 = vector.broadcast %cst_57 : f32 to vector<4x256xf32>
    %cst_58 = arith.constant 0.000000e+00 : f32
    %535 = vector.broadcast %cst_58 : f32 to vector<4x256xf32>
    %cst_59 = arith.constant 0.000000e+00 : f32
    %536 = vector.broadcast %cst_59 : f32 to vector<4x256xf32>
    %cst_60 = arith.constant 0.000000e+00 : f32
    %537 = vector.broadcast %cst_60 : f32 to vector<4x256xf32>
    %cst_61 = arith.constant 0.000000e+00 : f32
    %538 = vector.broadcast %cst_61 : f32 to vector<4x256xf32>
    %cst_62 = arith.constant 0.000000e+00 : f32
    %539 = vector.broadcast %cst_62 : f32 to vector<4x256xf32>
    %cst_63 = arith.constant 0.000000e+00 : f32
    %540 = vector.broadcast %cst_63 : f32 to vector<4x256xf32>
    %cst_64 = arith.constant 0.000000e+00 : f32
    %541 = vector.broadcast %cst_64 : f32 to vector<4x256xf32>
    %cst_65 = arith.constant 0.000000e+00 : f32
    %542 = vector.broadcast %cst_65 : f32 to vector<4x256xf32>
    %cst_66 = arith.constant 0.000000e+00 : f32
    %543 = vector.broadcast %cst_66 : f32 to vector<4x256xf32>
    %cst_67 = arith.constant 0.000000e+00 : f32
    %544 = vector.broadcast %cst_67 : f32 to vector<4x256xf32>
    %cst_68 = arith.constant 0.000000e+00 : f32
    %545 = vector.broadcast %cst_68 : f32 to vector<4x256xf32>
    %cst_69 = arith.constant 0.000000e+00 : f32
    %546 = vector.broadcast %cst_69 : f32 to vector<4x256xf32>
    %cst_70 = arith.constant 0.000000e+00 : f32
    %547 = vector.broadcast %cst_70 : f32 to vector<4x256xf32>
    %cst_71 = arith.constant 0.000000e+00 : f32
    %548 = vector.broadcast %cst_71 : f32 to vector<4x256xf32>
    %c0_72 = arith.constant 0 : index
    %c0_73 = arith.constant 0 : index
    %549 = vector.load %arg8[%c0_72, %c0_73] : memref<28x256xf32, #tpu.memory_space<vmem>>, vector<4x256xf32>
    %550 = arith.subf %549, %548 : vector<4x256xf32>
    %551 = vector.extract_strided_slice %550 {offsets = [0, 0], sizes = [1, 256], strides = [1, 1]} : vector<4x256xf32> to vector<1x256xf32>
    %552 = vector.extract_strided_slice %550 {offsets = [1, 0], sizes = [1, 256], strides = [1, 1]} : vector<4x256xf32> to vector<1x256xf32>
    %553 = vector.extract_strided_slice %550 {offsets = [2, 0], sizes = [1, 256], strides = [1, 1]} : vector<4x256xf32> to vector<1x256xf32>
    %554 = vector.extract_strided_slice %550 {offsets = [3, 0], sizes = [1, 256], strides = [1, 1]} : vector<4x256xf32> to vector<1x256xf32>
    %555 = vector.extract_strided_slice %527 {offsets = [0, 0], sizes = [1, 256], strides = [1, 1]} : vector<4x256xf32> to vector<1x256xf32>
    %556 = vector.extract_strided_slice %527 {offsets = [1, 0], sizes = [1, 256], strides = [1, 1]} : vector<4x256xf32> to vector<1x256xf32>
    %557 = vector.extract_strided_slice %527 {offsets = [2, 0], sizes = [1, 256], strides = [1, 1]} : vector<4x256xf32> to vector<1x256xf32>
    %558 = vector.extract_strided_slice %527 {offsets = [3, 0], sizes = [1, 256], strides = [1, 1]} : vector<4x256xf32> to vector<1x256xf32>
    %cst_74 = arith.constant 5.000000e-01 : f32
    %559 = vector.broadcast %cst_74 : f32 to vector<1x256xf32>
    %560 = arith.mulf %559, %551 : vector<1x256xf32>
    %561 = vector.broadcast %560 : vector<1x256xf32> to vector<4x256xf32>
    %562 = arith.mulf %561, %550 : vector<4x256xf32>
    %cst_75 = arith.constant 5.000000e-01 : f32
    %563 = vector.broadcast %cst_75 : f32 to vector<1x256xf32>
    %564 = arith.mulf %563, %552 : vector<1x256xf32>
    %565 = vector.broadcast %564 : vector<1x256xf32> to vector<4x256xf32>
    %566 = arith.mulf %565, %550 : vector<4x256xf32>
    %cst_76 = arith.constant 5.000000e-01 : f32
    %567 = vector.broadcast %cst_76 : f32 to vector<1x256xf32>
    %568 = arith.mulf %567, %553 : vector<1x256xf32>
    %569 = vector.broadcast %568 : vector<1x256xf32> to vector<4x256xf32>
    %570 = arith.mulf %569, %550 : vector<4x256xf32>
    %cst_77 = arith.constant 5.000000e-01 : f32
    %571 = vector.broadcast %cst_77 : f32 to vector<1x256xf32>
    %572 = arith.mulf %571, %554 : vector<1x256xf32>
    %573 = vector.broadcast %572 : vector<1x256xf32> to vector<4x256xf32>
    %574 = arith.mulf %573, %550 : vector<4x256xf32>
    %cst_78 = arith.constant 0.333333343 : f32
    %575 = vector.broadcast %cst_78 : f32 to vector<1x256xf32>
    %576 = arith.mulf %575, %551 : vector<1x256xf32>
    %577 = arith.addf %555, %576 : vector<1x256xf32>
    %578 = vector.extract_strided_slice %528 {offsets = [0, 0], sizes = [1, 256], strides = [1, 1]} : vector<4x256xf32> to vector<1x256xf32>
    %579 = vector.broadcast %578 : vector<1x256xf32> to vector<4x256xf32>
    %580 = arith.mulf %579, %550 : vector<4x256xf32>
    %581 = arith.addf %532, %580 : vector<4x256xf32>
    %582 = vector.broadcast %577 : vector<1x256xf32> to vector<4x256xf32>
    %583 = arith.mulf %582, %562 : vector<4x256xf32>
    %584 = arith.addf %581, %583 : vector<4x256xf32>
    %585 = vector.extract_strided_slice %528 {offsets = [1, 0], sizes = [1, 256], strides = [1, 1]} : vector<4x256xf32> to vector<1x256xf32>
    %586 = vector.broadcast %585 : vector<1x256xf32> to vector<4x256xf32>
    %587 = arith.mulf %586, %550 : vector<4x256xf32>
    %588 = arith.addf %533, %587 : vector<4x256xf32>
    %589 = vector.broadcast %577 : vector<1x256xf32> to vector<4x256xf32>
    %590 = arith.mulf %589, %566 : vector<4x256xf32>
    %591 = arith.addf %588, %590 : vector<4x256xf32>
    %592 = vector.extract_strided_slice %528 {offsets = [2, 0], sizes = [1, 256], strides = [1, 1]} : vector<4x256xf32> to vector<1x256xf32>
    %593 = vector.broadcast %592 : vector<1x256xf32> to vector<4x256xf32>
    %594 = arith.mulf %593, %550 : vector<4x256xf32>
    %595 = arith.addf %534, %594 : vector<4x256xf32>
    %596 = vector.broadcast %577 : vector<1x256xf32> to vector<4x256xf32>
    %597 = arith.mulf %596, %570 : vector<4x256xf32>
    %598 = arith.addf %595, %597 : vector<4x256xf32>
    %599 = vector.extract_strided_slice %528 {offsets = [3, 0], sizes = [1, 256], strides = [1, 1]} : vector<4x256xf32> to vector<1x256xf32>
    %600 = vector.broadcast %599 : vector<1x256xf32> to vector<4x256xf32>
    %601 = arith.mulf %600, %550 : vector<4x256xf32>
    %602 = arith.addf %535, %601 : vector<4x256xf32>
    %603 = vector.broadcast %577 : vector<1x256xf32> to vector<4x256xf32>
    %604 = arith.mulf %603, %574 : vector<4x256xf32>
    %605 = arith.addf %602, %604 : vector<4x256xf32>
    %cst_79 = arith.constant 0.333333343 : f32
    %606 = vector.broadcast %cst_79 : f32 to vector<1x256xf32>
    %607 = arith.mulf %606, %552 : vector<1x256xf32>
    %608 = arith.addf %556, %607 : vector<1x256xf32>
    %609 = vector.extract_strided_slice %529 {offsets = [0, 0], sizes = [1, 256], strides = [1, 1]} : vector<4x256xf32> to vector<1x256xf32>
    %610 = vector.broadcast %609 : vector<1x256xf32> to vector<4x256xf32>
    %611 = arith.mulf %610, %550 : vector<4x256xf32>
    %612 = arith.addf %536, %611 : vector<4x256xf32>
    %613 = vector.broadcast %608 : vector<1x256xf32> to vector<4x256xf32>
    %614 = arith.mulf %613, %562 : vector<4x256xf32>
    %615 = arith.addf %612, %614 : vector<4x256xf32>
    %616 = vector.extract_strided_slice %529 {offsets = [1, 0], sizes = [1, 256], strides = [1, 1]} : vector<4x256xf32> to vector<1x256xf32>
    %617 = vector.broadcast %616 : vector<1x256xf32> to vector<4x256xf32>
    %618 = arith.mulf %617, %550 : vector<4x256xf32>
    %619 = arith.addf %537, %618 : vector<4x256xf32>
    %620 = vector.broadcast %608 : vector<1x256xf32> to vector<4x256xf32>
    %621 = arith.mulf %620, %566 : vector<4x256xf32>
    %622 = arith.addf %619, %621 : vector<4x256xf32>
    %623 = vector.extract_strided_slice %529 {offsets = [2, 0], sizes = [1, 256], strides = [1, 1]} : vector<4x256xf32> to vector<1x256xf32>
    %624 = vector.broadcast %623 : vector<1x256xf32> to vector<4x256xf32>
    %625 = arith.mulf %624, %550 : vector<4x256xf32>
    %626 = arith.addf %538, %625 : vector<4x256xf32>
    %627 = vector.broadcast %608 : vector<1x256xf32> to vector<4x256xf32>
    %628 = arith.mulf %627, %570 : vector<4x256xf32>
    %629 = arith.addf %626, %628 : vector<4x256xf32>
    %630 = vector.extract_strided_slice %529 {offsets = [3, 0], sizes = [1, 256], strides = [1, 1]} : vector<4x256xf32> to vector<1x256xf32>
    %631 = vector.broadcast %630 : vector<1x256xf32> to vector<4x256xf32>
    %632 = arith.mulf %631, %550 : vector<4x256xf32>
    %633 = arith.addf %539, %632 : vector<4x256xf32>
    %634 = vector.broadcast %608 : vector<1x256xf32> to vector<4x256xf32>
    %635 = arith.mulf %634, %574 : vector<4x256xf32>
    %636 = arith.addf %633, %635 : vector<4x256xf32>
    %cst_80 = arith.constant 0.333333343 : f32
    %637 = vector.broadcast %cst_80 : f32 to vector<1x256xf32>
    %638 = arith.mulf %637, %553 : vector<1x256xf32>
    %639 = arith.addf %557, %638 : vector<1x256xf32>
    %640 = vector.extract_strided_slice %530 {offsets = [0, 0], sizes = [1, 256], strides = [1, 1]} : vector<4x256xf32> to vector<1x256xf32>
    %641 = vector.broadcast %640 : vector<1x256xf32> to vector<4x256xf32>
    %642 = arith.mulf %641, %550 : vector<4x256xf32>
    %643 = arith.addf %540, %642 : vector<4x256xf32>
    %644 = vector.broadcast %639 : vector<1x256xf32> to vector<4x256xf32>
    %645 = arith.mulf %644, %562 : vector<4x256xf32>
    %646 = arith.addf %643, %645 : vector<4x256xf32>
    %647 = vector.extract_strided_slice %530 {offsets = [1, 0], sizes = [1, 256], strides = [1, 1]} : vector<4x256xf32> to vector<1x256xf32>
    %648 = vector.broadcast %647 : vector<1x256xf32> to vector<4x256xf32>
    %649 = arith.mulf %648, %550 : vector<4x256xf32>
    %650 = arith.addf %541, %649 : vector<4x256xf32>
    %651 = vector.broadcast %639 : vector<1x256xf32> to vector<4x256xf32>
    %652 = arith.mulf %651, %566 : vector<4x256xf32>
    %653 = arith.addf %650, %652 : vector<4x256xf32>
    %654 = vector.extract_strided_slice %530 {offsets = [2, 0], sizes = [1, 256], strides = [1, 1]} : vector<4x256xf32> to vector<1x256xf32>
    %655 = vector.broadcast %654 : vector<1x256xf32> to vector<4x256xf32>
    %656 = arith.mulf %655, %550 : vector<4x256xf32>
    %657 = arith.addf %542, %656 : vector<4x256xf32>
    %658 = vector.broadcast %639 : vector<1x256xf32> to vector<4x256xf32>
    %659 = arith.mulf %658, %570 : vector<4x256xf32>
    %660 = arith.addf %657, %659 : vector<4x256xf32>
    %661 = vector.extract_strided_slice %530 {offsets = [3, 0], sizes = [1, 256], strides = [1, 1]} : vector<4x256xf32> to vector<1x256xf32>
    %662 = vector.broadcast %661 : vector<1x256xf32> to vector<4x256xf32>
    %663 = arith.mulf %662, %550 : vector<4x256xf32>
    %664 = arith.addf %543, %663 : vector<4x256xf32>
    %665 = vector.broadcast %639 : vector<1x256xf32> to vector<4x256xf32>
    %666 = arith.mulf %665, %574 : vector<4x256xf32>
    %667 = arith.addf %664, %666 : vector<4x256xf32>
    %cst_81 = arith.constant 0.333333343 : f32
    %668 = vector.broadcast %cst_81 : f32 to vector<1x256xf32>
    %669 = arith.mulf %668, %554 : vector<1x256xf32>
    %670 = arith.addf %558, %669 : vector<1x256xf32>
    %671 = vector.extract_strided_slice %531 {offsets = [0, 0], sizes = [1, 256], strides = [1, 1]} : vector<4x256xf32> to vector<1x256xf32>
    %672 = vector.broadcast %671 : vector<1x256xf32> to vector<4x256xf32>
    %673 = arith.mulf %672, %550 : vector<4x256xf32>
    %674 = arith.addf %544, %673 : vector<4x256xf32>
    %675 = vector.broadcast %670 : vector<1x256xf32> to vector<4x256xf32>
    %676 = arith.mulf %675, %562 : vector<4x256xf32>
    %677 = arith.addf %674, %676 : vector<4x256xf32>
    %678 = vector.extract_strided_slice %531 {offsets = [1, 0], sizes = [1, 256], strides = [1, 1]} : vector<4x256xf32> to vector<1x256xf32>
    %679 = vector.broadcast %678 : vector<1x256xf32> to vector<4x256xf32>
    %680 = arith.mulf %679, %550 : vector<4x256xf32>
    %681 = arith.addf %545, %680 : vector<4x256xf32>
    %682 = vector.broadcast %670 : vector<1x256xf32> to vector<4x256xf32>
    %683 = arith.mulf %682, %566 : vector<4x256xf32>
    %684 = arith.addf %681, %683 : vector<4x256xf32>
    %685 = vector.extract_strided_slice %531 {offsets = [2, 0], sizes = [1, 256], strides = [1, 1]} : vector<4x256xf32> to vector<1x256xf32>
    %686 = vector.broadcast %685 : vector<1x256xf32> to vector<4x256xf32>
    %687 = arith.mulf %686, %550 : vector<4x256xf32>
    %688 = arith.addf %546, %687 : vector<4x256xf32>
    %689 = vector.broadcast %670 : vector<1x256xf32> to vector<4x256xf32>
    %690 = arith.mulf %689, %570 : vector<4x256xf32>
    %691 = arith.addf %688, %690 : vector<4x256xf32>
    %692 = vector.extract_strided_slice %531 {offsets = [3, 0], sizes = [1, 256], strides = [1, 1]} : vector<4x256xf32> to vector<1x256xf32>
    %693 = vector.broadcast %692 : vector<1x256xf32> to vector<4x256xf32>
    %694 = arith.mulf %693, %550 : vector<4x256xf32>
    %695 = arith.addf %547, %694 : vector<4x256xf32>
    %696 = vector.broadcast %670 : vector<1x256xf32> to vector<4x256xf32>
    %697 = arith.mulf %696, %574 : vector<4x256xf32>
    %698 = arith.addf %695, %697 : vector<4x256xf32>
    %699 = vector.broadcast %555 : vector<1x256xf32> to vector<4x256xf32>
    %700 = arith.mulf %699, %550 : vector<4x256xf32>
    %701 = arith.addf %528, %700 : vector<4x256xf32>
    %702 = arith.addf %701, %562 : vector<4x256xf32>
    %703 = vector.broadcast %556 : vector<1x256xf32> to vector<4x256xf32>
    %704 = arith.mulf %703, %550 : vector<4x256xf32>
    %705 = arith.addf %529, %704 : vector<4x256xf32>
    %706 = arith.addf %705, %566 : vector<4x256xf32>
    %707 = vector.broadcast %557 : vector<1x256xf32> to vector<4x256xf32>
    %708 = arith.mulf %707, %550 : vector<4x256xf32>
    %709 = arith.addf %530, %708 : vector<4x256xf32>
    %710 = arith.addf %709, %570 : vector<4x256xf32>
    %711 = vector.broadcast %558 : vector<1x256xf32> to vector<4x256xf32>
    %712 = arith.mulf %711, %550 : vector<4x256xf32>
    %713 = arith.addf %531, %712 : vector<4x256xf32>
    %714 = arith.addf %713, %574 : vector<4x256xf32>
    %715 = arith.addf %527, %550 : vector<4x256xf32>
    %c4_82 = arith.constant 4 : index
    %c0_83 = arith.constant 0 : index
    %716 = vector.load %arg8[%c4_82, %c0_83] : memref<28x256xf32, #tpu.memory_space<vmem>>, vector<4x256xf32>
    %717 = arith.subf %716, %549 : vector<4x256xf32>
    %718 = vector.extract_strided_slice %717 {offsets = [0, 0], sizes = [1, 256], strides = [1, 1]} : vector<4x256xf32> to vector<1x256xf32>
    %719 = vector.extract_strided_slice %717 {offsets = [1, 0], sizes = [1, 256], strides = [1, 1]} : vector<4x256xf32> to vector<1x256xf32>
    %720 = vector.extract_strided_slice %717 {offsets = [2, 0], sizes = [1, 256], strides = [1, 1]} : vector<4x256xf32> to vector<1x256xf32>
    %721 = vector.extract_strided_slice %717 {offsets = [3, 0], sizes = [1, 256], strides = [1, 1]} : vector<4x256xf32> to vector<1x256xf32>
    %722 = vector.extract_strided_slice %715 {offsets = [0, 0], sizes = [1, 256], strides = [1, 1]} : vector<4x256xf32> to vector<1x256xf32>
    %723 = vector.extract_strided_slice %715 {offsets = [1, 0], sizes = [1, 256], strides = [1, 1]} : vector<4x256xf32> to vector<1x256xf32>
    %724 = vector.extract_strided_slice %715 {offsets = [2, 0], sizes = [1, 256], strides = [1, 1]} : vector<4x256xf32> to vector<1x256xf32>
    %725 = vector.extract_strided_slice %715 {offsets = [3, 0], sizes = [1, 256], strides = [1, 1]} : vector<4x256xf32> to vector<1x256xf32>
    %cst_84 = arith.constant 5.000000e-01 : f32
    %726 = vector.broadcast %cst_84 : f32 to vector<1x256xf32>
    %727 = arith.mulf %726, %718 : vector<1x256xf32>
    %728 = vector.broadcast %727 : vector<1x256xf32> to vector<4x256xf32>
    %729 = arith.mulf %728, %717 : vector<4x256xf32>
    %cst_85 = arith.constant 5.000000e-01 : f32
    %730 = vector.broadcast %cst_85 : f32 to vector<1x256xf32>
    %731 = arith.mulf %730, %719 : vector<1x256xf32>
    %732 = vector.broadcast %731 : vector<1x256xf32> to vector<4x256xf32>
    %733 = arith.mulf %732, %717 : vector<4x256xf32>
    %cst_86 = arith.constant 5.000000e-01 : f32
    %734 = vector.broadcast %cst_86 : f32 to vector<1x256xf32>
    %735 = arith.mulf %734, %720 : vector<1x256xf32>
    %736 = vector.broadcast %735 : vector<1x256xf32> to vector<4x256xf32>
    %737 = arith.mulf %736, %717 : vector<4x256xf32>
    %cst_87 = arith.constant 5.000000e-01 : f32
    %738 = vector.broadcast %cst_87 : f32 to vector<1x256xf32>
    %739 = arith.mulf %738, %721 : vector<1x256xf32>
    %740 = vector.broadcast %739 : vector<1x256xf32> to vector<4x256xf32>
    %741 = arith.mulf %740, %717 : vector<4x256xf32>
    %cst_88 = arith.constant 0.333333343 : f32
    %742 = vector.broadcast %cst_88 : f32 to vector<1x256xf32>
    %743 = arith.mulf %742, %718 : vector<1x256xf32>
    %744 = arith.addf %722, %743 : vector<1x256xf32>
    %745 = vector.extract_strided_slice %702 {offsets = [0, 0], sizes = [1, 256], strides = [1, 1]} : vector<4x256xf32> to vector<1x256xf32>
    %746 = vector.broadcast %745 : vector<1x256xf32> to vector<4x256xf32>
    %747 = arith.mulf %746, %717 : vector<4x256xf32>
    %748 = arith.addf %584, %747 : vector<4x256xf32>
    %749 = vector.broadcast %744 : vector<1x256xf32> to vector<4x256xf32>
    %750 = arith.mulf %749, %729 : vector<4x256xf32>
    %751 = arith.addf %748, %750 : vector<4x256xf32>
    %752 = vector.extract_strided_slice %702 {offsets = [1, 0], sizes = [1, 256], strides = [1, 1]} : vector<4x256xf32> to vector<1x256xf32>
    %753 = vector.broadcast %752 : vector<1x256xf32> to vector<4x256xf32>
    %754 = arith.mulf %753, %717 : vector<4x256xf32>
    %755 = arith.addf %591, %754 : vector<4x256xf32>
    %756 = vector.broadcast %744 : vector<1x256xf32> to vector<4x256xf32>
    %757 = arith.mulf %756, %733 : vector<4x256xf32>
    %758 = arith.addf %755, %757 : vector<4x256xf32>
    %759 = vector.extract_strided_slice %702 {offsets = [2, 0], sizes = [1, 256], strides = [1, 1]} : vector<4x256xf32> to vector<1x256xf32>
    %760 = vector.broadcast %759 : vector<1x256xf32> to vector<4x256xf32>
    %761 = arith.mulf %760, %717 : vector<4x256xf32>
    %762 = arith.addf %598, %761 : vector<4x256xf32>
    %763 = vector.broadcast %744 : vector<1x256xf32> to vector<4x256xf32>
    %764 = arith.mulf %763, %737 : vector<4x256xf32>
    %765 = arith.addf %762, %764 : vector<4x256xf32>
    %766 = vector.extract_strided_slice %702 {offsets = [3, 0], sizes = [1, 256], strides = [1, 1]} : vector<4x256xf32> to vector<1x256xf32>
    %767 = vector.broadcast %766 : vector<1x256xf32> to vector<4x256xf32>
    %768 = arith.mulf %767, %717 : vector<4x256xf32>
    %769 = arith.addf %605, %768 : vector<4x256xf32>
    %770 = vector.broadcast %744 : vector<1x256xf32> to vector<4x256xf32>
    %771 = arith.mulf %770, %741 : vector<4x256xf32>
    %772 = arith.addf %769, %771 : vector<4x256xf32>
    %cst_89 = arith.constant 0.333333343 : f32
    %773 = vector.broadcast %cst_89 : f32 to vector<1x256xf32>
    %774 = arith.mulf %773, %719 : vector<1x256xf32>
    %775 = arith.addf %723, %774 : vector<1x256xf32>
    %776 = vector.extract_strided_slice %706 {offsets = [0, 0], sizes = [1, 256], strides = [1, 1]} : vector<4x256xf32> to vector<1x256xf32>
    %777 = vector.broadcast %776 : vector<1x256xf32> to vector<4x256xf32>
    %778 = arith.mulf %777, %717 : vector<4x256xf32>
    %779 = arith.addf %615, %778 : vector<4x256xf32>
    %780 = vector.broadcast %775 : vector<1x256xf32> to vector<4x256xf32>
    %781 = arith.mulf %780, %729 : vector<4x256xf32>
    %782 = arith.addf %779, %781 : vector<4x256xf32>
    %783 = vector.extract_strided_slice %706 {offsets = [1, 0], sizes = [1, 256], strides = [1, 1]} : vector<4x256xf32> to vector<1x256xf32>
    %784 = vector.broadcast %783 : vector<1x256xf32> to vector<4x256xf32>
    %785 = arith.mulf %784, %717 : vector<4x256xf32>
    %786 = arith.addf %622, %785 : vector<4x256xf32>
    %787 = vector.broadcast %775 : vector<1x256xf32> to vector<4x256xf32>
    %788 = arith.mulf %787, %733 : vector<4x256xf32>
    %789 = arith.addf %786, %788 : vector<4x256xf32>
    %790 = vector.extract_strided_slice %706 {offsets = [2, 0], sizes = [1, 256], strides = [1, 1]} : vector<4x256xf32> to vector<1x256xf32>
    %791 = vector.broadcast %790 : vector<1x256xf32> to vector<4x256xf32>
    %792 = arith.mulf %791, %717 : vector<4x256xf32>
    %793 = arith.addf %629, %792 : vector<4x256xf32>
    %794 = vector.broadcast %775 : vector<1x256xf32> to vector<4x256xf32>
    %795 = arith.mulf %794, %737 : vector<4x256xf32>
    %796 = arith.addf %793, %795 : vector<4x256xf32>
    %797 = vector.extract_strided_slice %706 {offsets = [3, 0], sizes = [1, 256], strides = [1, 1]} : vector<4x256xf32> to vector<1x256xf32>
    %798 = vector.broadcast %797 : vector<1x256xf32> to vector<4x256xf32>
    %799 = arith.mulf %798, %717 : vector<4x256xf32>
    %800 = arith.addf %636, %799 : vector<4x256xf32>
    %801 = vector.broadcast %775 : vector<1x256xf32> to vector<4x256xf32>
    %802 = arith.mulf %801, %741 : vector<4x256xf32>
    %803 = arith.addf %800, %802 : vector<4x256xf32>
    %cst_90 = arith.constant 0.333333343 : f32
    %804 = vector.broadcast %cst_90 : f32 to vector<1x256xf32>
    %805 = arith.mulf %804, %720 : vector<1x256xf32>
    %806 = arith.addf %724, %805 : vector<1x256xf32>
    %807 = vector.extract_strided_slice %710 {offsets = [0, 0], sizes = [1, 256], strides = [1, 1]} : vector<4x256xf32> to vector<1x256xf32>
    %808 = vector.broadcast %807 : vector<1x256xf32> to vector<4x256xf32>
    %809 = arith.mulf %808, %717 : vector<4x256xf32>
    %810 = arith.addf %646, %809 : vector<4x256xf32>
    %811 = vector.broadcast %806 : vector<1x256xf32> to vector<4x256xf32>
    %812 = arith.mulf %811, %729 : vector<4x256xf32>
    %813 = arith.addf %810, %812 : vector<4x256xf32>
    %814 = vector.extract_strided_slice %710 {offsets = [1, 0], sizes = [1, 256], strides = [1, 1]} : vector<4x256xf32> to vector<1x256xf32>
    %815 = vector.broadcast %814 : vector<1x256xf32> to vector<4x256xf32>
    %816 = arith.mulf %815, %717 : vector<4x256xf32>
    %817 = arith.addf %653, %816 : vector<4x256xf32>
    %818 = vector.broadcast %806 : vector<1x256xf32> to vector<4x256xf32>
    %819 = arith.mulf %818, %733 : vector<4x256xf32>
    %820 = arith.addf %817, %819 : vector<4x256xf32>
    %821 = vector.extract_strided_slice %710 {offsets = [2, 0], sizes = [1, 256], strides = [1, 1]} : vector<4x256xf32> to vector<1x256xf32>
    %822 = vector.broadcast %821 : vector<1x256xf32> to vector<4x256xf32>
    %823 = arith.mulf %822, %717 : vector<4x256xf32>
    %824 = arith.addf %660, %823 : vector<4x256xf32>
    %825 = vector.broadcast %806 : vector<1x256xf32> to vector<4x256xf32>
    %826 = arith.mulf %825, %737 : vector<4x256xf32>
    %827 = arith.addf %824, %826 : vector<4x256xf32>
    %828 = vector.extract_strided_slice %710 {offsets = [3, 0], sizes = [1, 256], strides = [1, 1]} : vector<4x256xf32> to vector<1x256xf32>
    %829 = vector.broadcast %828 : vector<1x256xf32> to vector<4x256xf32>
    %830 = arith.mulf %829, %717 : vector<4x256xf32>
    %831 = arith.addf %667, %830 : vector<4x256xf32>
    %832 = vector.broadcast %806 : vector<1x256xf32> to vector<4x256xf32>
    %833 = arith.mulf %832, %741 : vector<4x256xf32>
    %834 = arith.addf %831, %833 : vector<4x256xf32>
    %cst_91 = arith.constant 0.333333343 : f32
    %835 = vector.broadcast %cst_91 : f32 to vector<1x256xf32>
    %836 = arith.mulf %835, %721 : vector<1x256xf32>
    %837 = arith.addf %725, %836 : vector<1x256xf32>
    %838 = vector.extract_strided_slice %714 {offsets = [0, 0], sizes = [1, 256], strides = [1, 1]} : vector<4x256xf32> to vector<1x256xf32>
    %839 = vector.broadcast %838 : vector<1x256xf32> to vector<4x256xf32>
    %840 = arith.mulf %839, %717 : vector<4x256xf32>
    %841 = arith.addf %677, %840 : vector<4x256xf32>
    %842 = vector.broadcast %837 : vector<1x256xf32> to vector<4x256xf32>
    %843 = arith.mulf %842, %729 : vector<4x256xf32>
    %844 = arith.addf %841, %843 : vector<4x256xf32>
    %845 = vector.extract_strided_slice %714 {offsets = [1, 0], sizes = [1, 256], strides = [1, 1]} : vector<4x256xf32> to vector<1x256xf32>
    %846 = vector.broadcast %845 : vector<1x256xf32> to vector<4x256xf32>
    %847 = arith.mulf %846, %717 : vector<4x256xf32>
    %848 = arith.addf %684, %847 : vector<4x256xf32>
    %849 = vector.broadcast %837 : vector<1x256xf32> to vector<4x256xf32>
    %850 = arith.mulf %849, %733 : vector<4x256xf32>
    %851 = arith.addf %848, %850 : vector<4x256xf32>
    %852 = vector.extract_strided_slice %714 {offsets = [2, 0], sizes = [1, 256], strides = [1, 1]} : vector<4x256xf32> to vector<1x256xf32>
    %853 = vector.broadcast %852 : vector<1x256xf32> to vector<4x256xf32>
    %854 = arith.mulf %853, %717 : vector<4x256xf32>
    %855 = arith.addf %691, %854 : vector<4x256xf32>
    %856 = vector.broadcast %837 : vector<1x256xf32> to vector<4x256xf32>
    %857 = arith.mulf %856, %737 : vector<4x256xf32>
    %858 = arith.addf %855, %857 : vector<4x256xf32>
    %859 = vector.extract_strided_slice %714 {offsets = [3, 0], sizes = [1, 256], strides = [1, 1]} : vector<4x256xf32> to vector<1x256xf32>
    %860 = vector.broadcast %859 : vector<1x256xf32> to vector<4x256xf32>
    %861 = arith.mulf %860, %717 : vector<4x256xf32>
    %862 = arith.addf %698, %861 : vector<4x256xf32>
    %863 = vector.broadcast %837 : vector<1x256xf32> to vector<4x256xf32>
    %864 = arith.mulf %863, %741 : vector<4x256xf32>
    %865 = arith.addf %862, %864 : vector<4x256xf32>
    %866 = vector.broadcast %722 : vector<1x256xf32> to vector<4x256xf32>
    %867 = arith.mulf %866, %717 : vector<4x256xf32>
    %868 = arith.addf %702, %867 : vector<4x256xf32>
    %869 = arith.addf %868, %729 : vector<4x256xf32>
    %870 = vector.broadcast %723 : vector<1x256xf32> to vector<4x256xf32>
    %871 = arith.mulf %870, %717 : vector<4x256xf32>
    %872 = arith.addf %706, %871 : vector<4x256xf32>
    %873 = arith.addf %872, %733 : vector<4x256xf32>
    %874 = vector.broadcast %724 : vector<1x256xf32> to vector<4x256xf32>
    %875 = arith.mulf %874, %717 : vector<4x256xf32>
    %876 = arith.addf %710, %875 : vector<4x256xf32>
    %877 = arith.addf %876, %737 : vector<4x256xf32>
    %878 = vector.broadcast %725 : vector<1x256xf32> to vector<4x256xf32>
    %879 = arith.mulf %878, %717 : vector<4x256xf32>
    %880 = arith.addf %714, %879 : vector<4x256xf32>
    %881 = arith.addf %880, %741 : vector<4x256xf32>
    %882 = arith.addf %715, %717 : vector<4x256xf32>
    %c8_92 = arith.constant 8 : index
    %c0_93 = arith.constant 0 : index
    %883 = vector.load %arg8[%c8_92, %c0_93] : memref<28x256xf32, #tpu.memory_space<vmem>>, vector<4x256xf32>
    %884 = arith.subf %883, %716 : vector<4x256xf32>
    %885 = vector.extract_strided_slice %884 {offsets = [0, 0], sizes = [1, 256], strides = [1, 1]} : vector<4x256xf32> to vector<1x256xf32>
    %886 = vector.extract_strided_slice %884 {offsets = [1, 0], sizes = [1, 256], strides = [1, 1]} : vector<4x256xf32> to vector<1x256xf32>
    %887 = vector.extract_strided_slice %884 {offsets = [2, 0], sizes = [1, 256], strides = [1, 1]} : vector<4x256xf32> to vector<1x256xf32>
    %888 = vector.extract_strided_slice %884 {offsets = [3, 0], sizes = [1, 256], strides = [1, 1]} : vector<4x256xf32> to vector<1x256xf32>
    %889 = vector.extract_strided_slice %882 {offsets = [0, 0], sizes = [1, 256], strides = [1, 1]} : vector<4x256xf32> to vector<1x256xf32>
    %890 = vector.extract_strided_slice %882 {offsets = [1, 0], sizes = [1, 256], strides = [1, 1]} : vector<4x256xf32> to vector<1x256xf32>
    %891 = vector.extract_strided_slice %882 {offsets = [2, 0], sizes = [1, 256], strides = [1, 1]} : vector<4x256xf32> to vector<1x256xf32>
    %892 = vector.extract_strided_slice %882 {offsets = [3, 0], sizes = [1, 256], strides = [1, 1]} : vector<4x256xf32> to vector<1x256xf32>
    %cst_94 = arith.constant 5.000000e-01 : f32
    %893 = vector.broadcast %cst_94 : f32 to vector<1x256xf32>
    %894 = arith.mulf %893, %885 : vector<1x256xf32>
    %895 = vector.broadcast %894 : vector<1x256xf32> to vector<4x256xf32>
    %896 = arith.mulf %895, %884 : vector<4x256xf32>
    %cst_95 = arith.constant 5.000000e-01 : f32
    %897 = vector.broadcast %cst_95 : f32 to vector<1x256xf32>
    %898 = arith.mulf %897, %886 : vector<1x256xf32>
    %899 = vector.broadcast %898 : vector<1x256xf32> to vector<4x256xf32>
    %900 = arith.mulf %899, %884 : vector<4x256xf32>
    %cst_96 = arith.constant 5.000000e-01 : f32
    %901 = vector.broadcast %cst_96 : f32 to vector<1x256xf32>
    %902 = arith.mulf %901, %887 : vector<1x256xf32>
    %903 = vector.broadcast %902 : vector<1x256xf32> to vector<4x256xf32>
    %904 = arith.mulf %903, %884 : vector<4x256xf32>
    %cst_97 = arith.constant 5.000000e-01 : f32
    %905 = vector.broadcast %cst_97 : f32 to vector<1x256xf32>
    %906 = arith.mulf %905, %888 : vector<1x256xf32>
    %907 = vector.broadcast %906 : vector<1x256xf32> to vector<4x256xf32>
    %908 = arith.mulf %907, %884 : vector<4x256xf32>
    %cst_98 = arith.constant 0.333333343 : f32
    %909 = vector.broadcast %cst_98 : f32 to vector<1x256xf32>
    %910 = arith.mulf %909, %885 : vector<1x256xf32>
    %911 = arith.addf %889, %910 : vector<1x256xf32>
    %912 = vector.extract_strided_slice %869 {offsets = [0, 0], sizes = [1, 256], strides = [1, 1]} : vector<4x256xf32> to vector<1x256xf32>
    %913 = vector.broadcast %912 : vector<1x256xf32> to vector<4x256xf32>
    %914 = arith.mulf %913, %884 : vector<4x256xf32>
    %915 = arith.addf %751, %914 : vector<4x256xf32>
    %916 = vector.broadcast %911 : vector<1x256xf32> to vector<4x256xf32>
    %917 = arith.mulf %916, %896 : vector<4x256xf32>
    %918 = arith.addf %915, %917 : vector<4x256xf32>
    %919 = vector.extract_strided_slice %869 {offsets = [1, 0], sizes = [1, 256], strides = [1, 1]} : vector<4x256xf32> to vector<1x256xf32>
    %920 = vector.broadcast %919 : vector<1x256xf32> to vector<4x256xf32>
    %921 = arith.mulf %920, %884 : vector<4x256xf32>
    %922 = arith.addf %758, %921 : vector<4x256xf32>
    %923 = vector.broadcast %911 : vector<1x256xf32> to vector<4x256xf32>
    %924 = arith.mulf %923, %900 : vector<4x256xf32>
    %925 = arith.addf %922, %924 : vector<4x256xf32>
    %926 = vector.extract_strided_slice %869 {offsets = [2, 0], sizes = [1, 256], strides = [1, 1]} : vector<4x256xf32> to vector<1x256xf32>
    %927 = vector.broadcast %926 : vector<1x256xf32> to vector<4x256xf32>
    %928 = arith.mulf %927, %884 : vector<4x256xf32>
    %929 = arith.addf %765, %928 : vector<4x256xf32>
    %930 = vector.broadcast %911 : vector<1x256xf32> to vector<4x256xf32>
    %931 = arith.mulf %930, %904 : vector<4x256xf32>
    %932 = arith.addf %929, %931 : vector<4x256xf32>
    %933 = vector.extract_strided_slice %869 {offsets = [3, 0], sizes = [1, 256], strides = [1, 1]} : vector<4x256xf32> to vector<1x256xf32>
    %934 = vector.broadcast %933 : vector<1x256xf32> to vector<4x256xf32>
    %935 = arith.mulf %934, %884 : vector<4x256xf32>
    %936 = arith.addf %772, %935 : vector<4x256xf32>
    %937 = vector.broadcast %911 : vector<1x256xf32> to vector<4x256xf32>
    %938 = arith.mulf %937, %908 : vector<4x256xf32>
    %939 = arith.addf %936, %938 : vector<4x256xf32>
    %cst_99 = arith.constant 0.333333343 : f32
    %940 = vector.broadcast %cst_99 : f32 to vector<1x256xf32>
    %941 = arith.mulf %940, %886 : vector<1x256xf32>
    %942 = arith.addf %890, %941 : vector<1x256xf32>
    %943 = vector.extract_strided_slice %873 {offsets = [0, 0], sizes = [1, 256], strides = [1, 1]} : vector<4x256xf32> to vector<1x256xf32>
    %944 = vector.broadcast %943 : vector<1x256xf32> to vector<4x256xf32>
    %945 = arith.mulf %944, %884 : vector<4x256xf32>
    %946 = arith.addf %782, %945 : vector<4x256xf32>
    %947 = vector.broadcast %942 : vector<1x256xf32> to vector<4x256xf32>
    %948 = arith.mulf %947, %896 : vector<4x256xf32>
    %949 = arith.addf %946, %948 : vector<4x256xf32>
    %950 = vector.extract_strided_slice %873 {offsets = [1, 0], sizes = [1, 256], strides = [1, 1]} : vector<4x256xf32> to vector<1x256xf32>
    %951 = vector.broadcast %950 : vector<1x256xf32> to vector<4x256xf32>
    %952 = arith.mulf %951, %884 : vector<4x256xf32>
    %953 = arith.addf %789, %952 : vector<4x256xf32>
    %954 = vector.broadcast %942 : vector<1x256xf32> to vector<4x256xf32>
    %955 = arith.mulf %954, %900 : vector<4x256xf32>
    %956 = arith.addf %953, %955 : vector<4x256xf32>
    %957 = vector.extract_strided_slice %873 {offsets = [2, 0], sizes = [1, 256], strides = [1, 1]} : vector<4x256xf32> to vector<1x256xf32>
    %958 = vector.broadcast %957 : vector<1x256xf32> to vector<4x256xf32>
    %959 = arith.mulf %958, %884 : vector<4x256xf32>
    %960 = arith.addf %796, %959 : vector<4x256xf32>
    %961 = vector.broadcast %942 : vector<1x256xf32> to vector<4x256xf32>
    %962 = arith.mulf %961, %904 : vector<4x256xf32>
    %963 = arith.addf %960, %962 : vector<4x256xf32>
    %964 = vector.extract_strided_slice %873 {offsets = [3, 0], sizes = [1, 256], strides = [1, 1]} : vector<4x256xf32> to vector<1x256xf32>
    %965 = vector.broadcast %964 : vector<1x256xf32> to vector<4x256xf32>
    %966 = arith.mulf %965, %884 : vector<4x256xf32>
    %967 = arith.addf %803, %966 : vector<4x256xf32>
    %968 = vector.broadcast %942 : vector<1x256xf32> to vector<4x256xf32>
    %969 = arith.mulf %968, %908 : vector<4x256xf32>
    %970 = arith.addf %967, %969 : vector<4x256xf32>
    %cst_100 = arith.constant 0.333333343 : f32
    %971 = vector.broadcast %cst_100 : f32 to vector<1x256xf32>
    %972 = arith.mulf %971, %887 : vector<1x256xf32>
    %973 = arith.addf %891, %972 : vector<1x256xf32>
    %974 = vector.extract_strided_slice %877 {offsets = [0, 0], sizes = [1, 256], strides = [1, 1]} : vector<4x256xf32> to vector<1x256xf32>
    %975 = vector.broadcast %974 : vector<1x256xf32> to vector<4x256xf32>
    %976 = arith.mulf %975, %884 : vector<4x256xf32>
    %977 = arith.addf %813, %976 : vector<4x256xf32>
    %978 = vector.broadcast %973 : vector<1x256xf32> to vector<4x256xf32>
    %979 = arith.mulf %978, %896 : vector<4x256xf32>
    %980 = arith.addf %977, %979 : vector<4x256xf32>
    %981 = vector.extract_strided_slice %877 {offsets = [1, 0], sizes = [1, 256], strides = [1, 1]} : vector<4x256xf32> to vector<1x256xf32>
    %982 = vector.broadcast %981 : vector<1x256xf32> to vector<4x256xf32>
    %983 = arith.mulf %982, %884 : vector<4x256xf32>
    %984 = arith.addf %820, %983 : vector<4x256xf32>
    %985 = vector.broadcast %973 : vector<1x256xf32> to vector<4x256xf32>
    %986 = arith.mulf %985, %900 : vector<4x256xf32>
    %987 = arith.addf %984, %986 : vector<4x256xf32>
    %988 = vector.extract_strided_slice %877 {offsets = [2, 0], sizes = [1, 256], strides = [1, 1]} : vector<4x256xf32> to vector<1x256xf32>
    %989 = vector.broadcast %988 : vector<1x256xf32> to vector<4x256xf32>
    %990 = arith.mulf %989, %884 : vector<4x256xf32>
    %991 = arith.addf %827, %990 : vector<4x256xf32>
    %992 = vector.broadcast %973 : vector<1x256xf32> to vector<4x256xf32>
    %993 = arith.mulf %992, %904 : vector<4x256xf32>
    %994 = arith.addf %991, %993 : vector<4x256xf32>
    %995 = vector.extract_strided_slice %877 {offsets = [3, 0], sizes = [1, 256], strides = [1, 1]} : vector<4x256xf32> to vector<1x256xf32>
    %996 = vector.broadcast %995 : vector<1x256xf32> to vector<4x256xf32>
    %997 = arith.mulf %996, %884 : vector<4x256xf32>
    %998 = arith.addf %834, %997 : vector<4x256xf32>
    %999 = vector.broadcast %973 : vector<1x256xf32> to vector<4x256xf32>
    %1000 = arith.mulf %999, %908 : vector<4x256xf32>
    %1001 = arith.addf %998, %1000 : vector<4x256xf32>
    %cst_101 = arith.constant 0.333333343 : f32
    %1002 = vector.broadcast %cst_101 : f32 to vector<1x256xf32>
    %1003 = arith.mulf %1002, %888 : vector<1x256xf32>
    %1004 = arith.addf %892, %1003 : vector<1x256xf32>
    %1005 = vector.extract_strided_slice %881 {offsets = [0, 0], sizes = [1, 256], strides = [1, 1]} : vector<4x256xf32> to vector<1x256xf32>
    %1006 = vector.broadcast %1005 : vector<1x256xf32> to vector<4x256xf32>
    %1007 = arith.mulf %1006, %884 : vector<4x256xf32>
    %1008 = arith.addf %844, %1007 : vector<4x256xf32>
    %1009 = vector.broadcast %1004 : vector<1x256xf32> to vector<4x256xf32>
    %1010 = arith.mulf %1009, %896 : vector<4x256xf32>
    %1011 = arith.addf %1008, %1010 : vector<4x256xf32>
    %1012 = vector.extract_strided_slice %881 {offsets = [1, 0], sizes = [1, 256], strides = [1, 1]} : vector<4x256xf32> to vector<1x256xf32>
    %1013 = vector.broadcast %1012 : vector<1x256xf32> to vector<4x256xf32>
    %1014 = arith.mulf %1013, %884 : vector<4x256xf32>
    %1015 = arith.addf %851, %1014 : vector<4x256xf32>
    %1016 = vector.broadcast %1004 : vector<1x256xf32> to vector<4x256xf32>
    %1017 = arith.mulf %1016, %900 : vector<4x256xf32>
    %1018 = arith.addf %1015, %1017 : vector<4x256xf32>
    %1019 = vector.extract_strided_slice %881 {offsets = [2, 0], sizes = [1, 256], strides = [1, 1]} : vector<4x256xf32> to vector<1x256xf32>
    %1020 = vector.broadcast %1019 : vector<1x256xf32> to vector<4x256xf32>
    %1021 = arith.mulf %1020, %884 : vector<4x256xf32>
    %1022 = arith.addf %858, %1021 : vector<4x256xf32>
    %1023 = vector.broadcast %1004 : vector<1x256xf32> to vector<4x256xf32>
    %1024 = arith.mulf %1023, %904 : vector<4x256xf32>
    %1025 = arith.addf %1022, %1024 : vector<4x256xf32>
    %1026 = vector.extract_strided_slice %881 {offsets = [3, 0], sizes = [1, 256], strides = [1, 1]} : vector<4x256xf32> to vector<1x256xf32>
    %1027 = vector.broadcast %1026 : vector<1x256xf32> to vector<4x256xf32>
    %1028 = arith.mulf %1027, %884 : vector<4x256xf32>
    %1029 = arith.addf %865, %1028 : vector<4x256xf32>
    %1030 = vector.broadcast %1004 : vector<1x256xf32> to vector<4x256xf32>
    %1031 = arith.mulf %1030, %908 : vector<4x256xf32>
    %1032 = arith.addf %1029, %1031 : vector<4x256xf32>
    %1033 = vector.broadcast %889 : vector<1x256xf32> to vector<4x256xf32>
    %1034 = arith.mulf %1033, %884 : vector<4x256xf32>
    %1035 = arith.addf %869, %1034 : vector<4x256xf32>
    %1036 = arith.addf %1035, %896 : vector<4x256xf32>
    %1037 = vector.broadcast %890 : vector<1x256xf32> to vector<4x256xf32>
    %1038 = arith.mulf %1037, %884 : vector<4x256xf32>
    %1039 = arith.addf %873, %1038 : vector<4x256xf32>
    %1040 = arith.addf %1039, %900 : vector<4x256xf32>
    %1041 = vector.broadcast %891 : vector<1x256xf32> to vector<4x256xf32>
    %1042 = arith.mulf %1041, %884 : vector<4x256xf32>
    %1043 = arith.addf %877, %1042 : vector<4x256xf32>
    %1044 = arith.addf %1043, %904 : vector<4x256xf32>
    %1045 = vector.broadcast %892 : vector<1x256xf32> to vector<4x256xf32>
    %1046 = arith.mulf %1045, %884 : vector<4x256xf32>
    %1047 = arith.addf %881, %1046 : vector<4x256xf32>
    %1048 = arith.addf %1047, %908 : vector<4x256xf32>
    %1049 = arith.addf %882, %884 : vector<4x256xf32>
    %c12 = arith.constant 12 : index
    %c0_102 = arith.constant 0 : index
    %1050 = vector.load %arg8[%c12, %c0_102] : memref<28x256xf32, #tpu.memory_space<vmem>>, vector<4x256xf32>
    %1051 = arith.subf %1050, %883 : vector<4x256xf32>
    %1052 = vector.extract_strided_slice %1051 {offsets = [0, 0], sizes = [1, 256], strides = [1, 1]} : vector<4x256xf32> to vector<1x256xf32>
    %1053 = vector.extract_strided_slice %1051 {offsets = [1, 0], sizes = [1, 256], strides = [1, 1]} : vector<4x256xf32> to vector<1x256xf32>
    %1054 = vector.extract_strided_slice %1051 {offsets = [2, 0], sizes = [1, 256], strides = [1, 1]} : vector<4x256xf32> to vector<1x256xf32>
    %1055 = vector.extract_strided_slice %1051 {offsets = [3, 0], sizes = [1, 256], strides = [1, 1]} : vector<4x256xf32> to vector<1x256xf32>
    %1056 = vector.extract_strided_slice %1049 {offsets = [0, 0], sizes = [1, 256], strides = [1, 1]} : vector<4x256xf32> to vector<1x256xf32>
    %1057 = vector.extract_strided_slice %1049 {offsets = [1, 0], sizes = [1, 256], strides = [1, 1]} : vector<4x256xf32> to vector<1x256xf32>
    %1058 = vector.extract_strided_slice %1049 {offsets = [2, 0], sizes = [1, 256], strides = [1, 1]} : vector<4x256xf32> to vector<1x256xf32>
    %1059 = vector.extract_strided_slice %1049 {offsets = [3, 0], sizes = [1, 256], strides = [1, 1]} : vector<4x256xf32> to vector<1x256xf32>
    %cst_103 = arith.constant 5.000000e-01 : f32
    %1060 = vector.broadcast %cst_103 : f32 to vector<1x256xf32>
    %1061 = arith.mulf %1060, %1052 : vector<1x256xf32>
    %1062 = vector.broadcast %1061 : vector<1x256xf32> to vector<4x256xf32>
    %1063 = arith.mulf %1062, %1051 : vector<4x256xf32>
    %cst_104 = arith.constant 5.000000e-01 : f32
    %1064 = vector.broadcast %cst_104 : f32 to vector<1x256xf32>
    %1065 = arith.mulf %1064, %1053 : vector<1x256xf32>
    %1066 = vector.broadcast %1065 : vector<1x256xf32> to vector<4x256xf32>
    %1067 = arith.mulf %1066, %1051 : vector<4x256xf32>
    %cst_105 = arith.constant 5.000000e-01 : f32
    %1068 = vector.broadcast %cst_105 : f32 to vector<1x256xf32>
    %1069 = arith.mulf %1068, %1054 : vector<1x256xf32>
    %1070 = vector.broadcast %1069 : vector<1x256xf32> to vector<4x256xf32>
    %1071 = arith.mulf %1070, %1051 : vector<4x256xf32>
    %cst_106 = arith.constant 5.000000e-01 : f32
    %1072 = vector.broadcast %cst_106 : f32 to vector<1x256xf32>
    %1073 = arith.mulf %1072, %1055 : vector<1x256xf32>
    %1074 = vector.broadcast %1073 : vector<1x256xf32> to vector<4x256xf32>
    %1075 = arith.mulf %1074, %1051 : vector<4x256xf32>
    %cst_107 = arith.constant 0.333333343 : f32
    %1076 = vector.broadcast %cst_107 : f32 to vector<1x256xf32>
    %1077 = arith.mulf %1076, %1052 : vector<1x256xf32>
    %1078 = arith.addf %1056, %1077 : vector<1x256xf32>
    %1079 = vector.extract_strided_slice %1036 {offsets = [0, 0], sizes = [1, 256], strides = [1, 1]} : vector<4x256xf32> to vector<1x256xf32>
    %1080 = vector.broadcast %1079 : vector<1x256xf32> to vector<4x256xf32>
    %1081 = arith.mulf %1080, %1051 : vector<4x256xf32>
    %1082 = arith.addf %918, %1081 : vector<4x256xf32>
    %1083 = vector.broadcast %1078 : vector<1x256xf32> to vector<4x256xf32>
    %1084 = arith.mulf %1083, %1063 : vector<4x256xf32>
    %1085 = arith.addf %1082, %1084 : vector<4x256xf32>
    %1086 = vector.extract_strided_slice %1036 {offsets = [1, 0], sizes = [1, 256], strides = [1, 1]} : vector<4x256xf32> to vector<1x256xf32>
    %1087 = vector.broadcast %1086 : vector<1x256xf32> to vector<4x256xf32>
    %1088 = arith.mulf %1087, %1051 : vector<4x256xf32>
    %1089 = arith.addf %925, %1088 : vector<4x256xf32>
    %1090 = vector.broadcast %1078 : vector<1x256xf32> to vector<4x256xf32>
    %1091 = arith.mulf %1090, %1067 : vector<4x256xf32>
    %1092 = arith.addf %1089, %1091 : vector<4x256xf32>
    %1093 = vector.extract_strided_slice %1036 {offsets = [2, 0], sizes = [1, 256], strides = [1, 1]} : vector<4x256xf32> to vector<1x256xf32>
    %1094 = vector.broadcast %1093 : vector<1x256xf32> to vector<4x256xf32>
    %1095 = arith.mulf %1094, %1051 : vector<4x256xf32>
    %1096 = arith.addf %932, %1095 : vector<4x256xf32>
    %1097 = vector.broadcast %1078 : vector<1x256xf32> to vector<4x256xf32>
    %1098 = arith.mulf %1097, %1071 : vector<4x256xf32>
    %1099 = arith.addf %1096, %1098 : vector<4x256xf32>
    %1100 = vector.extract_strided_slice %1036 {offsets = [3, 0], sizes = [1, 256], strides = [1, 1]} : vector<4x256xf32> to vector<1x256xf32>
    %1101 = vector.broadcast %1100 : vector<1x256xf32> to vector<4x256xf32>
    %1102 = arith.mulf %1101, %1051 : vector<4x256xf32>
    %1103 = arith.addf %939, %1102 : vector<4x256xf32>
    %1104 = vector.broadcast %1078 : vector<1x256xf32> to vector<4x256xf32>
    %1105 = arith.mulf %1104, %1075 : vector<4x256xf32>
    %1106 = arith.addf %1103, %1105 : vector<4x256xf32>
    %cst_108 = arith.constant 0.333333343 : f32
    %1107 = vector.broadcast %cst_108 : f32 to vector<1x256xf32>
    %1108 = arith.mulf %1107, %1053 : vector<1x256xf32>
    %1109 = arith.addf %1057, %1108 : vector<1x256xf32>
    %1110 = vector.extract_strided_slice %1040 {offsets = [0, 0], sizes = [1, 256], strides = [1, 1]} : vector<4x256xf32> to vector<1x256xf32>
    %1111 = vector.broadcast %1110 : vector<1x256xf32> to vector<4x256xf32>
    %1112 = arith.mulf %1111, %1051 : vector<4x256xf32>
    %1113 = arith.addf %949, %1112 : vector<4x256xf32>
    %1114 = vector.broadcast %1109 : vector<1x256xf32> to vector<4x256xf32>
    %1115 = arith.mulf %1114, %1063 : vector<4x256xf32>
    %1116 = arith.addf %1113, %1115 : vector<4x256xf32>
    %1117 = vector.extract_strided_slice %1040 {offsets = [1, 0], sizes = [1, 256], strides = [1, 1]} : vector<4x256xf32> to vector<1x256xf32>
    %1118 = vector.broadcast %1117 : vector<1x256xf32> to vector<4x256xf32>
    %1119 = arith.mulf %1118, %1051 : vector<4x256xf32>
    %1120 = arith.addf %956, %1119 : vector<4x256xf32>
    %1121 = vector.broadcast %1109 : vector<1x256xf32> to vector<4x256xf32>
    %1122 = arith.mulf %1121, %1067 : vector<4x256xf32>
    %1123 = arith.addf %1120, %1122 : vector<4x256xf32>
    %1124 = vector.extract_strided_slice %1040 {offsets = [2, 0], sizes = [1, 256], strides = [1, 1]} : vector<4x256xf32> to vector<1x256xf32>
    %1125 = vector.broadcast %1124 : vector<1x256xf32> to vector<4x256xf32>
    %1126 = arith.mulf %1125, %1051 : vector<4x256xf32>
    %1127 = arith.addf %963, %1126 : vector<4x256xf32>
    %1128 = vector.broadcast %1109 : vector<1x256xf32> to vector<4x256xf32>
    %1129 = arith.mulf %1128, %1071 : vector<4x256xf32>
    %1130 = arith.addf %1127, %1129 : vector<4x256xf32>
    %1131 = vector.extract_strided_slice %1040 {offsets = [3, 0], sizes = [1, 256], strides = [1, 1]} : vector<4x256xf32> to vector<1x256xf32>
    %1132 = vector.broadcast %1131 : vector<1x256xf32> to vector<4x256xf32>
    %1133 = arith.mulf %1132, %1051 : vector<4x256xf32>
    %1134 = arith.addf %970, %1133 : vector<4x256xf32>
    %1135 = vector.broadcast %1109 : vector<1x256xf32> to vector<4x256xf32>
    %1136 = arith.mulf %1135, %1075 : vector<4x256xf32>
    %1137 = arith.addf %1134, %1136 : vector<4x256xf32>
    %cst_109 = arith.constant 0.333333343 : f32
    %1138 = vector.broadcast %cst_109 : f32 to vector<1x256xf32>
    %1139 = arith.mulf %1138, %1054 : vector<1x256xf32>
    %1140 = arith.addf %1058, %1139 : vector<1x256xf32>
    %1141 = vector.extract_strided_slice %1044 {offsets = [0, 0], sizes = [1, 256], strides = [1, 1]} : vector<4x256xf32> to vector<1x256xf32>
    %1142 = vector.broadcast %1141 : vector<1x256xf32> to vector<4x256xf32>
    %1143 = arith.mulf %1142, %1051 : vector<4x256xf32>
    %1144 = arith.addf %980, %1143 : vector<4x256xf32>
    %1145 = vector.broadcast %1140 : vector<1x256xf32> to vector<4x256xf32>
    %1146 = arith.mulf %1145, %1063 : vector<4x256xf32>
    %1147 = arith.addf %1144, %1146 : vector<4x256xf32>
    %1148 = vector.extract_strided_slice %1044 {offsets = [1, 0], sizes = [1, 256], strides = [1, 1]} : vector<4x256xf32> to vector<1x256xf32>
    %1149 = vector.broadcast %1148 : vector<1x256xf32> to vector<4x256xf32>
    %1150 = arith.mulf %1149, %1051 : vector<4x256xf32>
    %1151 = arith.addf %987, %1150 : vector<4x256xf32>
    %1152 = vector.broadcast %1140 : vector<1x256xf32> to vector<4x256xf32>
    %1153 = arith.mulf %1152, %1067 : vector<4x256xf32>
    %1154 = arith.addf %1151, %1153 : vector<4x256xf32>
    %1155 = vector.extract_strided_slice %1044 {offsets = [2, 0], sizes = [1, 256], strides = [1, 1]} : vector<4x256xf32> to vector<1x256xf32>
    %1156 = vector.broadcast %1155 : vector<1x256xf32> to vector<4x256xf32>
    %1157 = arith.mulf %1156, %1051 : vector<4x256xf32>
    %1158 = arith.addf %994, %1157 : vector<4x256xf32>
    %1159 = vector.broadcast %1140 : vector<1x256xf32> to vector<4x256xf32>
    %1160 = arith.mulf %1159, %1071 : vector<4x256xf32>
    %1161 = arith.addf %1158, %1160 : vector<4x256xf32>
    %1162 = vector.extract_strided_slice %1044 {offsets = [3, 0], sizes = [1, 256], strides = [1, 1]} : vector<4x256xf32> to vector<1x256xf32>
    %1163 = vector.broadcast %1162 : vector<1x256xf32> to vector<4x256xf32>
    %1164 = arith.mulf %1163, %1051 : vector<4x256xf32>
    %1165 = arith.addf %1001, %1164 : vector<4x256xf32>
    %1166 = vector.broadcast %1140 : vector<1x256xf32> to vector<4x256xf32>
    %1167 = arith.mulf %1166, %1075 : vector<4x256xf32>
    %1168 = arith.addf %1165, %1167 : vector<4x256xf32>
    %cst_110 = arith.constant 0.333333343 : f32
    %1169 = vector.broadcast %cst_110 : f32 to vector<1x256xf32>
    %1170 = arith.mulf %1169, %1055 : vector<1x256xf32>
    %1171 = arith.addf %1059, %1170 : vector<1x256xf32>
    %1172 = vector.extract_strided_slice %1048 {offsets = [0, 0], sizes = [1, 256], strides = [1, 1]} : vector<4x256xf32> to vector<1x256xf32>
    %1173 = vector.broadcast %1172 : vector<1x256xf32> to vector<4x256xf32>
    %1174 = arith.mulf %1173, %1051 : vector<4x256xf32>
    %1175 = arith.addf %1011, %1174 : vector<4x256xf32>
    %1176 = vector.broadcast %1171 : vector<1x256xf32> to vector<4x256xf32>
    %1177 = arith.mulf %1176, %1063 : vector<4x256xf32>
    %1178 = arith.addf %1175, %1177 : vector<4x256xf32>
    %1179 = vector.extract_strided_slice %1048 {offsets = [1, 0], sizes = [1, 256], strides = [1, 1]} : vector<4x256xf32> to vector<1x256xf32>
    %1180 = vector.broadcast %1179 : vector<1x256xf32> to vector<4x256xf32>
    %1181 = arith.mulf %1180, %1051 : vector<4x256xf32>
    %1182 = arith.addf %1018, %1181 : vector<4x256xf32>
    %1183 = vector.broadcast %1171 : vector<1x256xf32> to vector<4x256xf32>
    %1184 = arith.mulf %1183, %1067 : vector<4x256xf32>
    %1185 = arith.addf %1182, %1184 : vector<4x256xf32>
    %1186 = vector.extract_strided_slice %1048 {offsets = [2, 0], sizes = [1, 256], strides = [1, 1]} : vector<4x256xf32> to vector<1x256xf32>
    %1187 = vector.broadcast %1186 : vector<1x256xf32> to vector<4x256xf32>
    %1188 = arith.mulf %1187, %1051 : vector<4x256xf32>
    %1189 = arith.addf %1025, %1188 : vector<4x256xf32>
    %1190 = vector.broadcast %1171 : vector<1x256xf32> to vector<4x256xf32>
    %1191 = arith.mulf %1190, %1071 : vector<4x256xf32>
    %1192 = arith.addf %1189, %1191 : vector<4x256xf32>
    %1193 = vector.extract_strided_slice %1048 {offsets = [3, 0], sizes = [1, 256], strides = [1, 1]} : vector<4x256xf32> to vector<1x256xf32>
    %1194 = vector.broadcast %1193 : vector<1x256xf32> to vector<4x256xf32>
    %1195 = arith.mulf %1194, %1051 : vector<4x256xf32>
    %1196 = arith.addf %1032, %1195 : vector<4x256xf32>
    %1197 = vector.broadcast %1171 : vector<1x256xf32> to vector<4x256xf32>
    %1198 = arith.mulf %1197, %1075 : vector<4x256xf32>
    %1199 = arith.addf %1196, %1198 : vector<4x256xf32>
    %1200 = vector.broadcast %1056 : vector<1x256xf32> to vector<4x256xf32>
    %1201 = arith.mulf %1200, %1051 : vector<4x256xf32>
    %1202 = arith.addf %1036, %1201 : vector<4x256xf32>
    %1203 = arith.addf %1202, %1063 : vector<4x256xf32>
    %1204 = vector.broadcast %1057 : vector<1x256xf32> to vector<4x256xf32>
    %1205 = arith.mulf %1204, %1051 : vector<4x256xf32>
    %1206 = arith.addf %1040, %1205 : vector<4x256xf32>
    %1207 = arith.addf %1206, %1067 : vector<4x256xf32>
    %1208 = vector.broadcast %1058 : vector<1x256xf32> to vector<4x256xf32>
    %1209 = arith.mulf %1208, %1051 : vector<4x256xf32>
    %1210 = arith.addf %1044, %1209 : vector<4x256xf32>
    %1211 = arith.addf %1210, %1071 : vector<4x256xf32>
    %1212 = vector.broadcast %1059 : vector<1x256xf32> to vector<4x256xf32>
    %1213 = arith.mulf %1212, %1051 : vector<4x256xf32>
    %1214 = arith.addf %1048, %1213 : vector<4x256xf32>
    %1215 = arith.addf %1214, %1075 : vector<4x256xf32>
    %1216 = arith.addf %1049, %1051 : vector<4x256xf32>
    %c16 = arith.constant 16 : index
    %c0_111 = arith.constant 0 : index
    %1217 = vector.load %arg8[%c16, %c0_111] : memref<28x256xf32, #tpu.memory_space<vmem>>, vector<4x256xf32>
    %1218 = arith.subf %1217, %1050 : vector<4x256xf32>
    %1219 = vector.extract_strided_slice %1218 {offsets = [0, 0], sizes = [1, 256], strides = [1, 1]} : vector<4x256xf32> to vector<1x256xf32>
    %1220 = vector.extract_strided_slice %1218 {offsets = [1, 0], sizes = [1, 256], strides = [1, 1]} : vector<4x256xf32> to vector<1x256xf32>
    %1221 = vector.extract_strided_slice %1218 {offsets = [2, 0], sizes = [1, 256], strides = [1, 1]} : vector<4x256xf32> to vector<1x256xf32>
    %1222 = vector.extract_strided_slice %1218 {offsets = [3, 0], sizes = [1, 256], strides = [1, 1]} : vector<4x256xf32> to vector<1x256xf32>
    %1223 = vector.extract_strided_slice %1216 {offsets = [0, 0], sizes = [1, 256], strides = [1, 1]} : vector<4x256xf32> to vector<1x256xf32>
    %1224 = vector.extract_strided_slice %1216 {offsets = [1, 0], sizes = [1, 256], strides = [1, 1]} : vector<4x256xf32> to vector<1x256xf32>
    %1225 = vector.extract_strided_slice %1216 {offsets = [2, 0], sizes = [1, 256], strides = [1, 1]} : vector<4x256xf32> to vector<1x256xf32>
    %1226 = vector.extract_strided_slice %1216 {offsets = [3, 0], sizes = [1, 256], strides = [1, 1]} : vector<4x256xf32> to vector<1x256xf32>
    %cst_112 = arith.constant 5.000000e-01 : f32
    %1227 = vector.broadcast %cst_112 : f32 to vector<1x256xf32>
    %1228 = arith.mulf %1227, %1219 : vector<1x256xf32>
    %1229 = vector.broadcast %1228 : vector<1x256xf32> to vector<4x256xf32>
    %1230 = arith.mulf %1229, %1218 : vector<4x256xf32>
    %cst_113 = arith.constant 5.000000e-01 : f32
    %1231 = vector.broadcast %cst_113 : f32 to vector<1x256xf32>
    %1232 = arith.mulf %1231, %1220 : vector<1x256xf32>
    %1233 = vector.broadcast %1232 : vector<1x256xf32> to vector<4x256xf32>
    %1234 = arith.mulf %1233, %1218 : vector<4x256xf32>
    %cst_114 = arith.constant 5.000000e-01 : f32
    %1235 = vector.broadcast %cst_114 : f32 to vector<1x256xf32>
    %1236 = arith.mulf %1235, %1221 : vector<1x256xf32>
    %1237 = vector.broadcast %1236 : vector<1x256xf32> to vector<4x256xf32>
    %1238 = arith.mulf %1237, %1218 : vector<4x256xf32>
    %cst_115 = arith.constant 5.000000e-01 : f32
    %1239 = vector.broadcast %cst_115 : f32 to vector<1x256xf32>
    %1240 = arith.mulf %1239, %1222 : vector<1x256xf32>
    %1241 = vector.broadcast %1240 : vector<1x256xf32> to vector<4x256xf32>
    %1242 = arith.mulf %1241, %1218 : vector<4x256xf32>
    %cst_116 = arith.constant 0.333333343 : f32
    %1243 = vector.broadcast %cst_116 : f32 to vector<1x256xf32>
    %1244 = arith.mulf %1243, %1219 : vector<1x256xf32>
    %1245 = arith.addf %1223, %1244 : vector<1x256xf32>
    %1246 = vector.extract_strided_slice %1203 {offsets = [0, 0], sizes = [1, 256], strides = [1, 1]} : vector<4x256xf32> to vector<1x256xf32>
    %1247 = vector.broadcast %1246 : vector<1x256xf32> to vector<4x256xf32>
    %1248 = arith.mulf %1247, %1218 : vector<4x256xf32>
    %1249 = arith.addf %1085, %1248 : vector<4x256xf32>
    %1250 = vector.broadcast %1245 : vector<1x256xf32> to vector<4x256xf32>
    %1251 = arith.mulf %1250, %1230 : vector<4x256xf32>
    %1252 = arith.addf %1249, %1251 : vector<4x256xf32>
    %1253 = vector.extract_strided_slice %1203 {offsets = [1, 0], sizes = [1, 256], strides = [1, 1]} : vector<4x256xf32> to vector<1x256xf32>
    %1254 = vector.broadcast %1253 : vector<1x256xf32> to vector<4x256xf32>
    %1255 = arith.mulf %1254, %1218 : vector<4x256xf32>
    %1256 = arith.addf %1092, %1255 : vector<4x256xf32>
    %1257 = vector.broadcast %1245 : vector<1x256xf32> to vector<4x256xf32>
    %1258 = arith.mulf %1257, %1234 : vector<4x256xf32>
    %1259 = arith.addf %1256, %1258 : vector<4x256xf32>
    %1260 = vector.extract_strided_slice %1203 {offsets = [2, 0], sizes = [1, 256], strides = [1, 1]} : vector<4x256xf32> to vector<1x256xf32>
    %1261 = vector.broadcast %1260 : vector<1x256xf32> to vector<4x256xf32>
    %1262 = arith.mulf %1261, %1218 : vector<4x256xf32>
    %1263 = arith.addf %1099, %1262 : vector<4x256xf32>
    %1264 = vector.broadcast %1245 : vector<1x256xf32> to vector<4x256xf32>
    %1265 = arith.mulf %1264, %1238 : vector<4x256xf32>
    %1266 = arith.addf %1263, %1265 : vector<4x256xf32>
    %1267 = vector.extract_strided_slice %1203 {offsets = [3, 0], sizes = [1, 256], strides = [1, 1]} : vector<4x256xf32> to vector<1x256xf32>
    %1268 = vector.broadcast %1267 : vector<1x256xf32> to vector<4x256xf32>
    %1269 = arith.mulf %1268, %1218 : vector<4x256xf32>
    %1270 = arith.addf %1106, %1269 : vector<4x256xf32>
    %1271 = vector.broadcast %1245 : vector<1x256xf32> to vector<4x256xf32>
    %1272 = arith.mulf %1271, %1242 : vector<4x256xf32>
    %1273 = arith.addf %1270, %1272 : vector<4x256xf32>
    %cst_117 = arith.constant 0.333333343 : f32
    %1274 = vector.broadcast %cst_117 : f32 to vector<1x256xf32>
    %1275 = arith.mulf %1274, %1220 : vector<1x256xf32>
    %1276 = arith.addf %1224, %1275 : vector<1x256xf32>
    %1277 = vector.extract_strided_slice %1207 {offsets = [0, 0], sizes = [1, 256], strides = [1, 1]} : vector<4x256xf32> to vector<1x256xf32>
    %1278 = vector.broadcast %1277 : vector<1x256xf32> to vector<4x256xf32>
    %1279 = arith.mulf %1278, %1218 : vector<4x256xf32>
    %1280 = arith.addf %1116, %1279 : vector<4x256xf32>
    %1281 = vector.broadcast %1276 : vector<1x256xf32> to vector<4x256xf32>
    %1282 = arith.mulf %1281, %1230 : vector<4x256xf32>
    %1283 = arith.addf %1280, %1282 : vector<4x256xf32>
    %1284 = vector.extract_strided_slice %1207 {offsets = [1, 0], sizes = [1, 256], strides = [1, 1]} : vector<4x256xf32> to vector<1x256xf32>
    %1285 = vector.broadcast %1284 : vector<1x256xf32> to vector<4x256xf32>
    %1286 = arith.mulf %1285, %1218 : vector<4x256xf32>
    %1287 = arith.addf %1123, %1286 : vector<4x256xf32>
    %1288 = vector.broadcast %1276 : vector<1x256xf32> to vector<4x256xf32>
    %1289 = arith.mulf %1288, %1234 : vector<4x256xf32>
    %1290 = arith.addf %1287, %1289 : vector<4x256xf32>
    %1291 = vector.extract_strided_slice %1207 {offsets = [2, 0], sizes = [1, 256], strides = [1, 1]} : vector<4x256xf32> to vector<1x256xf32>
    %1292 = vector.broadcast %1291 : vector<1x256xf32> to vector<4x256xf32>
    %1293 = arith.mulf %1292, %1218 : vector<4x256xf32>
    %1294 = arith.addf %1130, %1293 : vector<4x256xf32>
    %1295 = vector.broadcast %1276 : vector<1x256xf32> to vector<4x256xf32>
    %1296 = arith.mulf %1295, %1238 : vector<4x256xf32>
    %1297 = arith.addf %1294, %1296 : vector<4x256xf32>
    %1298 = vector.extract_strided_slice %1207 {offsets = [3, 0], sizes = [1, 256], strides = [1, 1]} : vector<4x256xf32> to vector<1x256xf32>
    %1299 = vector.broadcast %1298 : vector<1x256xf32> to vector<4x256xf32>
    %1300 = arith.mulf %1299, %1218 : vector<4x256xf32>
    %1301 = arith.addf %1137, %1300 : vector<4x256xf32>
    %1302 = vector.broadcast %1276 : vector<1x256xf32> to vector<4x256xf32>
    %1303 = arith.mulf %1302, %1242 : vector<4x256xf32>
    %1304 = arith.addf %1301, %1303 : vector<4x256xf32>
    %cst_118 = arith.constant 0.333333343 : f32
    %1305 = vector.broadcast %cst_118 : f32 to vector<1x256xf32>
    %1306 = arith.mulf %1305, %1221 : vector<1x256xf32>
    %1307 = arith.addf %1225, %1306 : vector<1x256xf32>
    %1308 = vector.extract_strided_slice %1211 {offsets = [0, 0], sizes = [1, 256], strides = [1, 1]} : vector<4x256xf32> to vector<1x256xf32>
    %1309 = vector.broadcast %1308 : vector<1x256xf32> to vector<4x256xf32>
    %1310 = arith.mulf %1309, %1218 : vector<4x256xf32>
    %1311 = arith.addf %1147, %1310 : vector<4x256xf32>
    %1312 = vector.broadcast %1307 : vector<1x256xf32> to vector<4x256xf32>
    %1313 = arith.mulf %1312, %1230 : vector<4x256xf32>
    %1314 = arith.addf %1311, %1313 : vector<4x256xf32>
    %1315 = vector.extract_strided_slice %1211 {offsets = [1, 0], sizes = [1, 256], strides = [1, 1]} : vector<4x256xf32> to vector<1x256xf32>
    %1316 = vector.broadcast %1315 : vector<1x256xf32> to vector<4x256xf32>
    %1317 = arith.mulf %1316, %1218 : vector<4x256xf32>
    %1318 = arith.addf %1154, %1317 : vector<4x256xf32>
    %1319 = vector.broadcast %1307 : vector<1x256xf32> to vector<4x256xf32>
    %1320 = arith.mulf %1319, %1234 : vector<4x256xf32>
    %1321 = arith.addf %1318, %1320 : vector<4x256xf32>
    %1322 = vector.extract_strided_slice %1211 {offsets = [2, 0], sizes = [1, 256], strides = [1, 1]} : vector<4x256xf32> to vector<1x256xf32>
    %1323 = vector.broadcast %1322 : vector<1x256xf32> to vector<4x256xf32>
    %1324 = arith.mulf %1323, %1218 : vector<4x256xf32>
    %1325 = arith.addf %1161, %1324 : vector<4x256xf32>
    %1326 = vector.broadcast %1307 : vector<1x256xf32> to vector<4x256xf32>
    %1327 = arith.mulf %1326, %1238 : vector<4x256xf32>
    %1328 = arith.addf %1325, %1327 : vector<4x256xf32>
    %1329 = vector.extract_strided_slice %1211 {offsets = [3, 0], sizes = [1, 256], strides = [1, 1]} : vector<4x256xf32> to vector<1x256xf32>
    %1330 = vector.broadcast %1329 : vector<1x256xf32> to vector<4x256xf32>
    %1331 = arith.mulf %1330, %1218 : vector<4x256xf32>
    %1332 = arith.addf %1168, %1331 : vector<4x256xf32>
    %1333 = vector.broadcast %1307 : vector<1x256xf32> to vector<4x256xf32>
    %1334 = arith.mulf %1333, %1242 : vector<4x256xf32>
    %1335 = arith.addf %1332, %1334 : vector<4x256xf32>
    %cst_119 = arith.constant 0.333333343 : f32
    %1336 = vector.broadcast %cst_119 : f32 to vector<1x256xf32>
    %1337 = arith.mulf %1336, %1222 : vector<1x256xf32>
    %1338 = arith.addf %1226, %1337 : vector<1x256xf32>
    %1339 = vector.extract_strided_slice %1215 {offsets = [0, 0], sizes = [1, 256], strides = [1, 1]} : vector<4x256xf32> to vector<1x256xf32>
    %1340 = vector.broadcast %1339 : vector<1x256xf32> to vector<4x256xf32>
    %1341 = arith.mulf %1340, %1218 : vector<4x256xf32>
    %1342 = arith.addf %1178, %1341 : vector<4x256xf32>
    %1343 = vector.broadcast %1338 : vector<1x256xf32> to vector<4x256xf32>
    %1344 = arith.mulf %1343, %1230 : vector<4x256xf32>
    %1345 = arith.addf %1342, %1344 : vector<4x256xf32>
    %1346 = vector.extract_strided_slice %1215 {offsets = [1, 0], sizes = [1, 256], strides = [1, 1]} : vector<4x256xf32> to vector<1x256xf32>
    %1347 = vector.broadcast %1346 : vector<1x256xf32> to vector<4x256xf32>
    %1348 = arith.mulf %1347, %1218 : vector<4x256xf32>
    %1349 = arith.addf %1185, %1348 : vector<4x256xf32>
    %1350 = vector.broadcast %1338 : vector<1x256xf32> to vector<4x256xf32>
    %1351 = arith.mulf %1350, %1234 : vector<4x256xf32>
    %1352 = arith.addf %1349, %1351 : vector<4x256xf32>
    %1353 = vector.extract_strided_slice %1215 {offsets = [2, 0], sizes = [1, 256], strides = [1, 1]} : vector<4x256xf32> to vector<1x256xf32>
    %1354 = vector.broadcast %1353 : vector<1x256xf32> to vector<4x256xf32>
    %1355 = arith.mulf %1354, %1218 : vector<4x256xf32>
    %1356 = arith.addf %1192, %1355 : vector<4x256xf32>
    %1357 = vector.broadcast %1338 : vector<1x256xf32> to vector<4x256xf32>
    %1358 = arith.mulf %1357, %1238 : vector<4x256xf32>
    %1359 = arith.addf %1356, %1358 : vector<4x256xf32>
    %1360 = vector.extract_strided_slice %1215 {offsets = [3, 0], sizes = [1, 256], strides = [1, 1]} : vector<4x256xf32> to vector<1x256xf32>
    %1361 = vector.broadcast %1360 : vector<1x256xf32> to vector<4x256xf32>
    %1362 = arith.mulf %1361, %1218 : vector<4x256xf32>
    %1363 = arith.addf %1199, %1362 : vector<4x256xf32>
    %1364 = vector.broadcast %1338 : vector<1x256xf32> to vector<4x256xf32>
    %1365 = arith.mulf %1364, %1242 : vector<4x256xf32>
    %1366 = arith.addf %1363, %1365 : vector<4x256xf32>
    %1367 = vector.broadcast %1223 : vector<1x256xf32> to vector<4x256xf32>
    %1368 = arith.mulf %1367, %1218 : vector<4x256xf32>
    %1369 = arith.addf %1203, %1368 : vector<4x256xf32>
    %1370 = arith.addf %1369, %1230 : vector<4x256xf32>
    %1371 = vector.broadcast %1224 : vector<1x256xf32> to vector<4x256xf32>
    %1372 = arith.mulf %1371, %1218 : vector<4x256xf32>
    %1373 = arith.addf %1207, %1372 : vector<4x256xf32>
    %1374 = arith.addf %1373, %1234 : vector<4x256xf32>
    %1375 = vector.broadcast %1225 : vector<1x256xf32> to vector<4x256xf32>
    %1376 = arith.mulf %1375, %1218 : vector<4x256xf32>
    %1377 = arith.addf %1211, %1376 : vector<4x256xf32>
    %1378 = arith.addf %1377, %1238 : vector<4x256xf32>
    %1379 = vector.broadcast %1226 : vector<1x256xf32> to vector<4x256xf32>
    %1380 = arith.mulf %1379, %1218 : vector<4x256xf32>
    %1381 = arith.addf %1215, %1380 : vector<4x256xf32>
    %1382 = arith.addf %1381, %1242 : vector<4x256xf32>
    %1383 = arith.addf %1216, %1218 : vector<4x256xf32>
    %c20 = arith.constant 20 : index
    %c0_120 = arith.constant 0 : index
    %1384 = vector.load %arg8[%c20, %c0_120] : memref<28x256xf32, #tpu.memory_space<vmem>>, vector<4x256xf32>
    %1385 = arith.subf %1384, %1217 : vector<4x256xf32>
    %1386 = vector.extract_strided_slice %1385 {offsets = [0, 0], sizes = [1, 256], strides = [1, 1]} : vector<4x256xf32> to vector<1x256xf32>
    %1387 = vector.extract_strided_slice %1385 {offsets = [1, 0], sizes = [1, 256], strides = [1, 1]} : vector<4x256xf32> to vector<1x256xf32>
    %1388 = vector.extract_strided_slice %1385 {offsets = [2, 0], sizes = [1, 256], strides = [1, 1]} : vector<4x256xf32> to vector<1x256xf32>
    %1389 = vector.extract_strided_slice %1385 {offsets = [3, 0], sizes = [1, 256], strides = [1, 1]} : vector<4x256xf32> to vector<1x256xf32>
    %1390 = vector.extract_strided_slice %1383 {offsets = [0, 0], sizes = [1, 256], strides = [1, 1]} : vector<4x256xf32> to vector<1x256xf32>
    %1391 = vector.extract_strided_slice %1383 {offsets = [1, 0], sizes = [1, 256], strides = [1, 1]} : vector<4x256xf32> to vector<1x256xf32>
    %1392 = vector.extract_strided_slice %1383 {offsets = [2, 0], sizes = [1, 256], strides = [1, 1]} : vector<4x256xf32> to vector<1x256xf32>
    %1393 = vector.extract_strided_slice %1383 {offsets = [3, 0], sizes = [1, 256], strides = [1, 1]} : vector<4x256xf32> to vector<1x256xf32>
    %cst_121 = arith.constant 5.000000e-01 : f32
    %1394 = vector.broadcast %cst_121 : f32 to vector<1x256xf32>
    %1395 = arith.mulf %1394, %1386 : vector<1x256xf32>
    %1396 = vector.broadcast %1395 : vector<1x256xf32> to vector<4x256xf32>
    %1397 = arith.mulf %1396, %1385 : vector<4x256xf32>
    %cst_122 = arith.constant 5.000000e-01 : f32
    %1398 = vector.broadcast %cst_122 : f32 to vector<1x256xf32>
    %1399 = arith.mulf %1398, %1387 : vector<1x256xf32>
    %1400 = vector.broadcast %1399 : vector<1x256xf32> to vector<4x256xf32>
    %1401 = arith.mulf %1400, %1385 : vector<4x256xf32>
    %cst_123 = arith.constant 5.000000e-01 : f32
    %1402 = vector.broadcast %cst_123 : f32 to vector<1x256xf32>
    %1403 = arith.mulf %1402, %1388 : vector<1x256xf32>
    %1404 = vector.broadcast %1403 : vector<1x256xf32> to vector<4x256xf32>
    %1405 = arith.mulf %1404, %1385 : vector<4x256xf32>
    %cst_124 = arith.constant 5.000000e-01 : f32
    %1406 = vector.broadcast %cst_124 : f32 to vector<1x256xf32>
    %1407 = arith.mulf %1406, %1389 : vector<1x256xf32>
    %1408 = vector.broadcast %1407 : vector<1x256xf32> to vector<4x256xf32>
    %1409 = arith.mulf %1408, %1385 : vector<4x256xf32>
    %cst_125 = arith.constant 0.333333343 : f32
    %1410 = vector.broadcast %cst_125 : f32 to vector<1x256xf32>
    %1411 = arith.mulf %1410, %1386 : vector<1x256xf32>
    %1412 = arith.addf %1390, %1411 : vector<1x256xf32>
    %1413 = vector.extract_strided_slice %1370 {offsets = [0, 0], sizes = [1, 256], strides = [1, 1]} : vector<4x256xf32> to vector<1x256xf32>
    %1414 = vector.broadcast %1413 : vector<1x256xf32> to vector<4x256xf32>
    %1415 = arith.mulf %1414, %1385 : vector<4x256xf32>
    %1416 = arith.addf %1252, %1415 : vector<4x256xf32>
    %1417 = vector.broadcast %1412 : vector<1x256xf32> to vector<4x256xf32>
    %1418 = arith.mulf %1417, %1397 : vector<4x256xf32>
    %1419 = arith.addf %1416, %1418 : vector<4x256xf32>
    %1420 = vector.extract_strided_slice %1370 {offsets = [1, 0], sizes = [1, 256], strides = [1, 1]} : vector<4x256xf32> to vector<1x256xf32>
    %1421 = vector.broadcast %1420 : vector<1x256xf32> to vector<4x256xf32>
    %1422 = arith.mulf %1421, %1385 : vector<4x256xf32>
    %1423 = arith.addf %1259, %1422 : vector<4x256xf32>
    %1424 = vector.broadcast %1412 : vector<1x256xf32> to vector<4x256xf32>
    %1425 = arith.mulf %1424, %1401 : vector<4x256xf32>
    %1426 = arith.addf %1423, %1425 : vector<4x256xf32>
    %1427 = vector.extract_strided_slice %1370 {offsets = [2, 0], sizes = [1, 256], strides = [1, 1]} : vector<4x256xf32> to vector<1x256xf32>
    %1428 = vector.broadcast %1427 : vector<1x256xf32> to vector<4x256xf32>
    %1429 = arith.mulf %1428, %1385 : vector<4x256xf32>
    %1430 = arith.addf %1266, %1429 : vector<4x256xf32>
    %1431 = vector.broadcast %1412 : vector<1x256xf32> to vector<4x256xf32>
    %1432 = arith.mulf %1431, %1405 : vector<4x256xf32>
    %1433 = arith.addf %1430, %1432 : vector<4x256xf32>
    %1434 = vector.extract_strided_slice %1370 {offsets = [3, 0], sizes = [1, 256], strides = [1, 1]} : vector<4x256xf32> to vector<1x256xf32>
    %1435 = vector.broadcast %1434 : vector<1x256xf32> to vector<4x256xf32>
    %1436 = arith.mulf %1435, %1385 : vector<4x256xf32>
    %1437 = arith.addf %1273, %1436 : vector<4x256xf32>
    %1438 = vector.broadcast %1412 : vector<1x256xf32> to vector<4x256xf32>
    %1439 = arith.mulf %1438, %1409 : vector<4x256xf32>
    %1440 = arith.addf %1437, %1439 : vector<4x256xf32>
    %cst_126 = arith.constant 0.333333343 : f32
    %1441 = vector.broadcast %cst_126 : f32 to vector<1x256xf32>
    %1442 = arith.mulf %1441, %1387 : vector<1x256xf32>
    %1443 = arith.addf %1391, %1442 : vector<1x256xf32>
    %1444 = vector.extract_strided_slice %1374 {offsets = [0, 0], sizes = [1, 256], strides = [1, 1]} : vector<4x256xf32> to vector<1x256xf32>
    %1445 = vector.broadcast %1444 : vector<1x256xf32> to vector<4x256xf32>
    %1446 = arith.mulf %1445, %1385 : vector<4x256xf32>
    %1447 = arith.addf %1283, %1446 : vector<4x256xf32>
    %1448 = vector.broadcast %1443 : vector<1x256xf32> to vector<4x256xf32>
    %1449 = arith.mulf %1448, %1397 : vector<4x256xf32>
    %1450 = arith.addf %1447, %1449 : vector<4x256xf32>
    %1451 = vector.extract_strided_slice %1374 {offsets = [1, 0], sizes = [1, 256], strides = [1, 1]} : vector<4x256xf32> to vector<1x256xf32>
    %1452 = vector.broadcast %1451 : vector<1x256xf32> to vector<4x256xf32>
    %1453 = arith.mulf %1452, %1385 : vector<4x256xf32>
    %1454 = arith.addf %1290, %1453 : vector<4x256xf32>
    %1455 = vector.broadcast %1443 : vector<1x256xf32> to vector<4x256xf32>
    %1456 = arith.mulf %1455, %1401 : vector<4x256xf32>
    %1457 = arith.addf %1454, %1456 : vector<4x256xf32>
    %1458 = vector.extract_strided_slice %1374 {offsets = [2, 0], sizes = [1, 256], strides = [1, 1]} : vector<4x256xf32> to vector<1x256xf32>
    %1459 = vector.broadcast %1458 : vector<1x256xf32> to vector<4x256xf32>
    %1460 = arith.mulf %1459, %1385 : vector<4x256xf32>
    %1461 = arith.addf %1297, %1460 : vector<4x256xf32>
    %1462 = vector.broadcast %1443 : vector<1x256xf32> to vector<4x256xf32>
    %1463 = arith.mulf %1462, %1405 : vector<4x256xf32>
    %1464 = arith.addf %1461, %1463 : vector<4x256xf32>
    %1465 = vector.extract_strided_slice %1374 {offsets = [3, 0], sizes = [1, 256], strides = [1, 1]} : vector<4x256xf32> to vector<1x256xf32>
    %1466 = vector.broadcast %1465 : vector<1x256xf32> to vector<4x256xf32>
    %1467 = arith.mulf %1466, %1385 : vector<4x256xf32>
    %1468 = arith.addf %1304, %1467 : vector<4x256xf32>
    %1469 = vector.broadcast %1443 : vector<1x256xf32> to vector<4x256xf32>
    %1470 = arith.mulf %1469, %1409 : vector<4x256xf32>
    %1471 = arith.addf %1468, %1470 : vector<4x256xf32>
    %cst_127 = arith.constant 0.333333343 : f32
    %1472 = vector.broadcast %cst_127 : f32 to vector<1x256xf32>
    %1473 = arith.mulf %1472, %1388 : vector<1x256xf32>
    %1474 = arith.addf %1392, %1473 : vector<1x256xf32>
    %1475 = vector.extract_strided_slice %1378 {offsets = [0, 0], sizes = [1, 256], strides = [1, 1]} : vector<4x256xf32> to vector<1x256xf32>
    %1476 = vector.broadcast %1475 : vector<1x256xf32> to vector<4x256xf32>
    %1477 = arith.mulf %1476, %1385 : vector<4x256xf32>
    %1478 = arith.addf %1314, %1477 : vector<4x256xf32>
    %1479 = vector.broadcast %1474 : vector<1x256xf32> to vector<4x256xf32>
    %1480 = arith.mulf %1479, %1397 : vector<4x256xf32>
    %1481 = arith.addf %1478, %1480 : vector<4x256xf32>
    %1482 = vector.extract_strided_slice %1378 {offsets = [1, 0], sizes = [1, 256], strides = [1, 1]} : vector<4x256xf32> to vector<1x256xf32>
    %1483 = vector.broadcast %1482 : vector<1x256xf32> to vector<4x256xf32>
    %1484 = arith.mulf %1483, %1385 : vector<4x256xf32>
    %1485 = arith.addf %1321, %1484 : vector<4x256xf32>
    %1486 = vector.broadcast %1474 : vector<1x256xf32> to vector<4x256xf32>
    %1487 = arith.mulf %1486, %1401 : vector<4x256xf32>
    %1488 = arith.addf %1485, %1487 : vector<4x256xf32>
    %1489 = vector.extract_strided_slice %1378 {offsets = [2, 0], sizes = [1, 256], strides = [1, 1]} : vector<4x256xf32> to vector<1x256xf32>
    %1490 = vector.broadcast %1489 : vector<1x256xf32> to vector<4x256xf32>
    %1491 = arith.mulf %1490, %1385 : vector<4x256xf32>
    %1492 = arith.addf %1328, %1491 : vector<4x256xf32>
    %1493 = vector.broadcast %1474 : vector<1x256xf32> to vector<4x256xf32>
    %1494 = arith.mulf %1493, %1405 : vector<4x256xf32>
    %1495 = arith.addf %1492, %1494 : vector<4x256xf32>
    %1496 = vector.extract_strided_slice %1378 {offsets = [3, 0], sizes = [1, 256], strides = [1, 1]} : vector<4x256xf32> to vector<1x256xf32>
    %1497 = vector.broadcast %1496 : vector<1x256xf32> to vector<4x256xf32>
    %1498 = arith.mulf %1497, %1385 : vector<4x256xf32>
    %1499 = arith.addf %1335, %1498 : vector<4x256xf32>
    %1500 = vector.broadcast %1474 : vector<1x256xf32> to vector<4x256xf32>
    %1501 = arith.mulf %1500, %1409 : vector<4x256xf32>
    %1502 = arith.addf %1499, %1501 : vector<4x256xf32>
    %cst_128 = arith.constant 0.333333343 : f32
    %1503 = vector.broadcast %cst_128 : f32 to vector<1x256xf32>
    %1504 = arith.mulf %1503, %1389 : vector<1x256xf32>
    %1505 = arith.addf %1393, %1504 : vector<1x256xf32>
    %1506 = vector.extract_strided_slice %1382 {offsets = [0, 0], sizes = [1, 256], strides = [1, 1]} : vector<4x256xf32> to vector<1x256xf32>
    %1507 = vector.broadcast %1506 : vector<1x256xf32> to vector<4x256xf32>
    %1508 = arith.mulf %1507, %1385 : vector<4x256xf32>
    %1509 = arith.addf %1345, %1508 : vector<4x256xf32>
    %1510 = vector.broadcast %1505 : vector<1x256xf32> to vector<4x256xf32>
    %1511 = arith.mulf %1510, %1397 : vector<4x256xf32>
    %1512 = arith.addf %1509, %1511 : vector<4x256xf32>
    %1513 = vector.extract_strided_slice %1382 {offsets = [1, 0], sizes = [1, 256], strides = [1, 1]} : vector<4x256xf32> to vector<1x256xf32>
    %1514 = vector.broadcast %1513 : vector<1x256xf32> to vector<4x256xf32>
    %1515 = arith.mulf %1514, %1385 : vector<4x256xf32>
    %1516 = arith.addf %1352, %1515 : vector<4x256xf32>
    %1517 = vector.broadcast %1505 : vector<1x256xf32> to vector<4x256xf32>
    %1518 = arith.mulf %1517, %1401 : vector<4x256xf32>
    %1519 = arith.addf %1516, %1518 : vector<4x256xf32>
    %1520 = vector.extract_strided_slice %1382 {offsets = [2, 0], sizes = [1, 256], strides = [1, 1]} : vector<4x256xf32> to vector<1x256xf32>
    %1521 = vector.broadcast %1520 : vector<1x256xf32> to vector<4x256xf32>
    %1522 = arith.mulf %1521, %1385 : vector<4x256xf32>
    %1523 = arith.addf %1359, %1522 : vector<4x256xf32>
    %1524 = vector.broadcast %1505 : vector<1x256xf32> to vector<4x256xf32>
    %1525 = arith.mulf %1524, %1405 : vector<4x256xf32>
    %1526 = arith.addf %1523, %1525 : vector<4x256xf32>
    %1527 = vector.extract_strided_slice %1382 {offsets = [3, 0], sizes = [1, 256], strides = [1, 1]} : vector<4x256xf32> to vector<1x256xf32>
    %1528 = vector.broadcast %1527 : vector<1x256xf32> to vector<4x256xf32>
    %1529 = arith.mulf %1528, %1385 : vector<4x256xf32>
    %1530 = arith.addf %1366, %1529 : vector<4x256xf32>
    %1531 = vector.broadcast %1505 : vector<1x256xf32> to vector<4x256xf32>
    %1532 = arith.mulf %1531, %1409 : vector<4x256xf32>
    %1533 = arith.addf %1530, %1532 : vector<4x256xf32>
    %1534 = vector.broadcast %1390 : vector<1x256xf32> to vector<4x256xf32>
    %1535 = arith.mulf %1534, %1385 : vector<4x256xf32>
    %1536 = arith.addf %1370, %1535 : vector<4x256xf32>
    %1537 = arith.addf %1536, %1397 : vector<4x256xf32>
    %1538 = vector.broadcast %1391 : vector<1x256xf32> to vector<4x256xf32>
    %1539 = arith.mulf %1538, %1385 : vector<4x256xf32>
    %1540 = arith.addf %1374, %1539 : vector<4x256xf32>
    %1541 = arith.addf %1540, %1401 : vector<4x256xf32>
    %1542 = vector.broadcast %1392 : vector<1x256xf32> to vector<4x256xf32>
    %1543 = arith.mulf %1542, %1385 : vector<4x256xf32>
    %1544 = arith.addf %1378, %1543 : vector<4x256xf32>
    %1545 = arith.addf %1544, %1405 : vector<4x256xf32>
    %1546 = vector.broadcast %1393 : vector<1x256xf32> to vector<4x256xf32>
    %1547 = arith.mulf %1546, %1385 : vector<4x256xf32>
    %1548 = arith.addf %1382, %1547 : vector<4x256xf32>
    %1549 = arith.addf %1548, %1409 : vector<4x256xf32>
    %1550 = arith.addf %1383, %1385 : vector<4x256xf32>
    %c24 = arith.constant 24 : index
    %c0_129 = arith.constant 0 : index
    %1551 = vector.load %arg8[%c24, %c0_129] : memref<28x256xf32, #tpu.memory_space<vmem>>, vector<4x256xf32>
    %1552 = arith.subf %1551, %1384 : vector<4x256xf32>
    %1553 = vector.extract_strided_slice %1552 {offsets = [0, 0], sizes = [1, 256], strides = [1, 1]} : vector<4x256xf32> to vector<1x256xf32>
    %1554 = vector.extract_strided_slice %1552 {offsets = [1, 0], sizes = [1, 256], strides = [1, 1]} : vector<4x256xf32> to vector<1x256xf32>
    %1555 = vector.extract_strided_slice %1552 {offsets = [2, 0], sizes = [1, 256], strides = [1, 1]} : vector<4x256xf32> to vector<1x256xf32>
    %1556 = vector.extract_strided_slice %1552 {offsets = [3, 0], sizes = [1, 256], strides = [1, 1]} : vector<4x256xf32> to vector<1x256xf32>
    %1557 = vector.extract_strided_slice %1550 {offsets = [0, 0], sizes = [1, 256], strides = [1, 1]} : vector<4x256xf32> to vector<1x256xf32>
    %1558 = vector.extract_strided_slice %1550 {offsets = [1, 0], sizes = [1, 256], strides = [1, 1]} : vector<4x256xf32> to vector<1x256xf32>
    %1559 = vector.extract_strided_slice %1550 {offsets = [2, 0], sizes = [1, 256], strides = [1, 1]} : vector<4x256xf32> to vector<1x256xf32>
    %1560 = vector.extract_strided_slice %1550 {offsets = [3, 0], sizes = [1, 256], strides = [1, 1]} : vector<4x256xf32> to vector<1x256xf32>
    %cst_130 = arith.constant 5.000000e-01 : f32
    %1561 = vector.broadcast %cst_130 : f32 to vector<1x256xf32>
    %1562 = arith.mulf %1561, %1553 : vector<1x256xf32>
    %1563 = vector.broadcast %1562 : vector<1x256xf32> to vector<4x256xf32>
    %1564 = arith.mulf %1563, %1552 : vector<4x256xf32>
    %cst_131 = arith.constant 5.000000e-01 : f32
    %1565 = vector.broadcast %cst_131 : f32 to vector<1x256xf32>
    %1566 = arith.mulf %1565, %1554 : vector<1x256xf32>
    %1567 = vector.broadcast %1566 : vector<1x256xf32> to vector<4x256xf32>
    %1568 = arith.mulf %1567, %1552 : vector<4x256xf32>
    %cst_132 = arith.constant 5.000000e-01 : f32
    %1569 = vector.broadcast %cst_132 : f32 to vector<1x256xf32>
    %1570 = arith.mulf %1569, %1555 : vector<1x256xf32>
    %1571 = vector.broadcast %1570 : vector<1x256xf32> to vector<4x256xf32>
    %1572 = arith.mulf %1571, %1552 : vector<4x256xf32>
    %cst_133 = arith.constant 5.000000e-01 : f32
    %1573 = vector.broadcast %cst_133 : f32 to vector<1x256xf32>
    %1574 = arith.mulf %1573, %1556 : vector<1x256xf32>
    %1575 = vector.broadcast %1574 : vector<1x256xf32> to vector<4x256xf32>
    %1576 = arith.mulf %1575, %1552 : vector<4x256xf32>
    %cst_134 = arith.constant 0.333333343 : f32
    %1577 = vector.broadcast %cst_134 : f32 to vector<1x256xf32>
    %1578 = arith.mulf %1577, %1553 : vector<1x256xf32>
    %1579 = arith.addf %1557, %1578 : vector<1x256xf32>
    %1580 = vector.extract_strided_slice %1537 {offsets = [0, 0], sizes = [1, 256], strides = [1, 1]} : vector<4x256xf32> to vector<1x256xf32>
    %1581 = vector.broadcast %1580 : vector<1x256xf32> to vector<4x256xf32>
    %1582 = arith.mulf %1581, %1552 : vector<4x256xf32>
    %1583 = arith.addf %1419, %1582 : vector<4x256xf32>
    %1584 = vector.broadcast %1579 : vector<1x256xf32> to vector<4x256xf32>
    %1585 = arith.mulf %1584, %1564 : vector<4x256xf32>
    %1586 = arith.addf %1583, %1585 : vector<4x256xf32>
    %1587 = vector.extract_strided_slice %1537 {offsets = [1, 0], sizes = [1, 256], strides = [1, 1]} : vector<4x256xf32> to vector<1x256xf32>
    %1588 = vector.broadcast %1587 : vector<1x256xf32> to vector<4x256xf32>
    %1589 = arith.mulf %1588, %1552 : vector<4x256xf32>
    %1590 = arith.addf %1426, %1589 : vector<4x256xf32>
    %1591 = vector.broadcast %1579 : vector<1x256xf32> to vector<4x256xf32>
    %1592 = arith.mulf %1591, %1568 : vector<4x256xf32>
    %1593 = arith.addf %1590, %1592 : vector<4x256xf32>
    %1594 = vector.extract_strided_slice %1537 {offsets = [2, 0], sizes = [1, 256], strides = [1, 1]} : vector<4x256xf32> to vector<1x256xf32>
    %1595 = vector.broadcast %1594 : vector<1x256xf32> to vector<4x256xf32>
    %1596 = arith.mulf %1595, %1552 : vector<4x256xf32>
    %1597 = arith.addf %1433, %1596 : vector<4x256xf32>
    %1598 = vector.broadcast %1579 : vector<1x256xf32> to vector<4x256xf32>
    %1599 = arith.mulf %1598, %1572 : vector<4x256xf32>
    %1600 = arith.addf %1597, %1599 : vector<4x256xf32>
    %1601 = vector.extract_strided_slice %1537 {offsets = [3, 0], sizes = [1, 256], strides = [1, 1]} : vector<4x256xf32> to vector<1x256xf32>
    %1602 = vector.broadcast %1601 : vector<1x256xf32> to vector<4x256xf32>
    %1603 = arith.mulf %1602, %1552 : vector<4x256xf32>
    %1604 = arith.addf %1440, %1603 : vector<4x256xf32>
    %1605 = vector.broadcast %1579 : vector<1x256xf32> to vector<4x256xf32>
    %1606 = arith.mulf %1605, %1576 : vector<4x256xf32>
    %1607 = arith.addf %1604, %1606 : vector<4x256xf32>
    %cst_135 = arith.constant 0.333333343 : f32
    %1608 = vector.broadcast %cst_135 : f32 to vector<1x256xf32>
    %1609 = arith.mulf %1608, %1554 : vector<1x256xf32>
    %1610 = arith.addf %1558, %1609 : vector<1x256xf32>
    %1611 = vector.extract_strided_slice %1541 {offsets = [0, 0], sizes = [1, 256], strides = [1, 1]} : vector<4x256xf32> to vector<1x256xf32>
    %1612 = vector.broadcast %1611 : vector<1x256xf32> to vector<4x256xf32>
    %1613 = arith.mulf %1612, %1552 : vector<4x256xf32>
    %1614 = arith.addf %1450, %1613 : vector<4x256xf32>
    %1615 = vector.broadcast %1610 : vector<1x256xf32> to vector<4x256xf32>
    %1616 = arith.mulf %1615, %1564 : vector<4x256xf32>
    %1617 = arith.addf %1614, %1616 : vector<4x256xf32>
    %1618 = vector.extract_strided_slice %1541 {offsets = [1, 0], sizes = [1, 256], strides = [1, 1]} : vector<4x256xf32> to vector<1x256xf32>
    %1619 = vector.broadcast %1618 : vector<1x256xf32> to vector<4x256xf32>
    %1620 = arith.mulf %1619, %1552 : vector<4x256xf32>
    %1621 = arith.addf %1457, %1620 : vector<4x256xf32>
    %1622 = vector.broadcast %1610 : vector<1x256xf32> to vector<4x256xf32>
    %1623 = arith.mulf %1622, %1568 : vector<4x256xf32>
    %1624 = arith.addf %1621, %1623 : vector<4x256xf32>
    %1625 = vector.extract_strided_slice %1541 {offsets = [2, 0], sizes = [1, 256], strides = [1, 1]} : vector<4x256xf32> to vector<1x256xf32>
    %1626 = vector.broadcast %1625 : vector<1x256xf32> to vector<4x256xf32>
    %1627 = arith.mulf %1626, %1552 : vector<4x256xf32>
    %1628 = arith.addf %1464, %1627 : vector<4x256xf32>
    %1629 = vector.broadcast %1610 : vector<1x256xf32> to vector<4x256xf32>
    %1630 = arith.mulf %1629, %1572 : vector<4x256xf32>
    %1631 = arith.addf %1628, %1630 : vector<4x256xf32>
    %1632 = vector.extract_strided_slice %1541 {offsets = [3, 0], sizes = [1, 256], strides = [1, 1]} : vector<4x256xf32> to vector<1x256xf32>
    %1633 = vector.broadcast %1632 : vector<1x256xf32> to vector<4x256xf32>
    %1634 = arith.mulf %1633, %1552 : vector<4x256xf32>
    %1635 = arith.addf %1471, %1634 : vector<4x256xf32>
    %1636 = vector.broadcast %1610 : vector<1x256xf32> to vector<4x256xf32>
    %1637 = arith.mulf %1636, %1576 : vector<4x256xf32>
    %1638 = arith.addf %1635, %1637 : vector<4x256xf32>
    %cst_136 = arith.constant 0.333333343 : f32
    %1639 = vector.broadcast %cst_136 : f32 to vector<1x256xf32>
    %1640 = arith.mulf %1639, %1555 : vector<1x256xf32>
    %1641 = arith.addf %1559, %1640 : vector<1x256xf32>
    %1642 = vector.extract_strided_slice %1545 {offsets = [0, 0], sizes = [1, 256], strides = [1, 1]} : vector<4x256xf32> to vector<1x256xf32>
    %1643 = vector.broadcast %1642 : vector<1x256xf32> to vector<4x256xf32>
    %1644 = arith.mulf %1643, %1552 : vector<4x256xf32>
    %1645 = arith.addf %1481, %1644 : vector<4x256xf32>
    %1646 = vector.broadcast %1641 : vector<1x256xf32> to vector<4x256xf32>
    %1647 = arith.mulf %1646, %1564 : vector<4x256xf32>
    %1648 = arith.addf %1645, %1647 : vector<4x256xf32>
    %1649 = vector.extract_strided_slice %1545 {offsets = [1, 0], sizes = [1, 256], strides = [1, 1]} : vector<4x256xf32> to vector<1x256xf32>
    %1650 = vector.broadcast %1649 : vector<1x256xf32> to vector<4x256xf32>
    %1651 = arith.mulf %1650, %1552 : vector<4x256xf32>
    %1652 = arith.addf %1488, %1651 : vector<4x256xf32>
    %1653 = vector.broadcast %1641 : vector<1x256xf32> to vector<4x256xf32>
    %1654 = arith.mulf %1653, %1568 : vector<4x256xf32>
    %1655 = arith.addf %1652, %1654 : vector<4x256xf32>
    %1656 = vector.extract_strided_slice %1545 {offsets = [2, 0], sizes = [1, 256], strides = [1, 1]} : vector<4x256xf32> to vector<1x256xf32>
    %1657 = vector.broadcast %1656 : vector<1x256xf32> to vector<4x256xf32>
    %1658 = arith.mulf %1657, %1552 : vector<4x256xf32>
    %1659 = arith.addf %1495, %1658 : vector<4x256xf32>
    %1660 = vector.broadcast %1641 : vector<1x256xf32> to vector<4x256xf32>
    %1661 = arith.mulf %1660, %1572 : vector<4x256xf32>
    %1662 = arith.addf %1659, %1661 : vector<4x256xf32>
    %1663 = vector.extract_strided_slice %1545 {offsets = [3, 0], sizes = [1, 256], strides = [1, 1]} : vector<4x256xf32> to vector<1x256xf32>
    %1664 = vector.broadcast %1663 : vector<1x256xf32> to vector<4x256xf32>
    %1665 = arith.mulf %1664, %1552 : vector<4x256xf32>
    %1666 = arith.addf %1502, %1665 : vector<4x256xf32>
    %1667 = vector.broadcast %1641 : vector<1x256xf32> to vector<4x256xf32>
    %1668 = arith.mulf %1667, %1576 : vector<4x256xf32>
    %1669 = arith.addf %1666, %1668 : vector<4x256xf32>
    %cst_137 = arith.constant 0.333333343 : f32
    %1670 = vector.broadcast %cst_137 : f32 to vector<1x256xf32>
    %1671 = arith.mulf %1670, %1556 : vector<1x256xf32>
    %1672 = arith.addf %1560, %1671 : vector<1x256xf32>
    %1673 = vector.extract_strided_slice %1549 {offsets = [0, 0], sizes = [1, 256], strides = [1, 1]} : vector<4x256xf32> to vector<1x256xf32>
    %1674 = vector.broadcast %1673 : vector<1x256xf32> to vector<4x256xf32>
    %1675 = arith.mulf %1674, %1552 : vector<4x256xf32>
    %1676 = arith.addf %1512, %1675 : vector<4x256xf32>
    %1677 = vector.broadcast %1672 : vector<1x256xf32> to vector<4x256xf32>
    %1678 = arith.mulf %1677, %1564 : vector<4x256xf32>
    %1679 = arith.addf %1676, %1678 : vector<4x256xf32>
    %1680 = vector.extract_strided_slice %1549 {offsets = [1, 0], sizes = [1, 256], strides = [1, 1]} : vector<4x256xf32> to vector<1x256xf32>
    %1681 = vector.broadcast %1680 : vector<1x256xf32> to vector<4x256xf32>
    %1682 = arith.mulf %1681, %1552 : vector<4x256xf32>
    %1683 = arith.addf %1519, %1682 : vector<4x256xf32>
    %1684 = vector.broadcast %1672 : vector<1x256xf32> to vector<4x256xf32>
    %1685 = arith.mulf %1684, %1568 : vector<4x256xf32>
    %1686 = arith.addf %1683, %1685 : vector<4x256xf32>
    %1687 = vector.extract_strided_slice %1549 {offsets = [2, 0], sizes = [1, 256], strides = [1, 1]} : vector<4x256xf32> to vector<1x256xf32>
    %1688 = vector.broadcast %1687 : vector<1x256xf32> to vector<4x256xf32>
    %1689 = arith.mulf %1688, %1552 : vector<4x256xf32>
    %1690 = arith.addf %1526, %1689 : vector<4x256xf32>
    %1691 = vector.broadcast %1672 : vector<1x256xf32> to vector<4x256xf32>
    %1692 = arith.mulf %1691, %1572 : vector<4x256xf32>
    %1693 = arith.addf %1690, %1692 : vector<4x256xf32>
    %1694 = vector.extract_strided_slice %1549 {offsets = [3, 0], sizes = [1, 256], strides = [1, 1]} : vector<4x256xf32> to vector<1x256xf32>
    %1695 = vector.broadcast %1694 : vector<1x256xf32> to vector<4x256xf32>
    %1696 = arith.mulf %1695, %1552 : vector<4x256xf32>
    %1697 = arith.addf %1533, %1696 : vector<4x256xf32>
    %1698 = vector.broadcast %1672 : vector<1x256xf32> to vector<4x256xf32>
    %1699 = arith.mulf %1698, %1576 : vector<4x256xf32>
    %1700 = arith.addf %1697, %1699 : vector<4x256xf32>
    %1701 = vector.broadcast %1557 : vector<1x256xf32> to vector<4x256xf32>
    %1702 = arith.mulf %1701, %1552 : vector<4x256xf32>
    %1703 = arith.addf %1537, %1702 : vector<4x256xf32>
    %1704 = arith.addf %1703, %1564 : vector<4x256xf32>
    %1705 = vector.broadcast %1558 : vector<1x256xf32> to vector<4x256xf32>
    %1706 = arith.mulf %1705, %1552 : vector<4x256xf32>
    %1707 = arith.addf %1541, %1706 : vector<4x256xf32>
    %1708 = arith.addf %1707, %1568 : vector<4x256xf32>
    %1709 = vector.broadcast %1559 : vector<1x256xf32> to vector<4x256xf32>
    %1710 = arith.mulf %1709, %1552 : vector<4x256xf32>
    %1711 = arith.addf %1545, %1710 : vector<4x256xf32>
    %1712 = arith.addf %1711, %1572 : vector<4x256xf32>
    %1713 = vector.broadcast %1560 : vector<1x256xf32> to vector<4x256xf32>
    %1714 = arith.mulf %1713, %1552 : vector<4x256xf32>
    %1715 = arith.addf %1549, %1714 : vector<4x256xf32>
    %1716 = arith.addf %1715, %1576 : vector<4x256xf32>
    %1717 = arith.addf %1550, %1552 : vector<4x256xf32>
    %1718 = tpu.concatenate %1717, %1704, %1708, %1712, %1716, %1586, %1593, %1600, %1607, %1617, %1624, %1631, %1638, %1648, %1655, %1662 in 0 : vector<4x256xf32>, vector<4x256xf32>, vector<4x256xf32>, vector<4x256xf32>, vector<4x256xf32>, vector<4x256xf32>, vector<4x256xf32>, vector<4x256xf32>, vector<4x256xf32>, vector<4x256xf32>, vector<4x256xf32>, vector<4x256xf32>, vector<4x256xf32>, vector<4x256xf32>, vector<4x256xf32>, vector<4x256xf32> -> vector<64x256xf32>
    %1719 = tpu.concatenate %1669, %1679, %1686, %1693, %1700 in 0 : vector<4x256xf32>, vector<4x256xf32>, vector<4x256xf32>, vector<4x256xf32>, vector<4x256xf32> -> vector<20x256xf32>
    %1720 = tpu.concatenate %1718, %1719 in 0 : vector<64x256xf32>, vector<20x256xf32> -> vector<84x256xf32>
    %c84 = arith.constant 84 : index
    %c0_138 = arith.constant 0 : index
    %1721 = vector.load %arg11[%c84, %c0_138] : memref<168x256xf32, #tpu.memory_space<vmem>>, vector<84x256xf32>
    tpu.vector_store %arg11[%c84, %c0_138], %1720 {strides = array<i32>} : memref<168x256xf32, #tpu.memory_space<vmem>>, vector<84x256xf32>,
    %c0_139 = arith.constant 0 : index
    %c0_140 = arith.constant 0 : index
    %1722 = vector.load %arg3[%c0_139, %c0_140] : memref<16x168xf32, #tpu.memory_space<vmem>>, vector<16x84xf32>
    %c0_141 = arith.constant 0 : index
    %c0_142 = arith.constant 0 : index
    %1723 = vector.load %arg11[%c0_141, %c0_142] : memref<168x256xf32, #tpu.memory_space<vmem>>, vector<84x256xf32>
    %cst_143 = arith.constant dense<0.000000e+00> : vector<16x256xf32>
    %1724 = tpu.matmul %1722, %1723, %cst_143 {dimension_numbers = #tpu.dot_dimension_numbers<[1], [0], [0], [1], [0, 0, 1, 1], [], []>} : vector<16x84xf32>, vector<84x256xf32>, vector<16x256xf32> -> vector<16x256xf32>
    %c0_144 = arith.constant 0 : index
    %c84_145 = arith.constant 84 : index
    %1725 = vector.load %arg3[%c0_144, %c84_145] : memref<16x168xf32, #tpu.memory_space<vmem>>, vector<16x84xf32>
    %c84_146 = arith.constant 84 : index
    %c0_147 = arith.constant 0 : index
    %1726 = vector.load %arg11[%c84_146, %c0_147] : memref<168x256xf32, #tpu.memory_space<vmem>>, vector<84x256xf32>
    %cst_148 = arith.constant dense<0.000000e+00> : vector<16x256xf32>
    %1727 = tpu.matmul %1725, %1726, %cst_148 {dimension_numbers = #tpu.dot_dimension_numbers<[1], [0], [0], [1], [0, 0, 1, 1], [], []>} : vector<16x84xf32>, vector<84x256xf32>, vector<16x256xf32> -> vector<16x256xf32>
    %1728 = arith.addf %1724, %1727 : vector<16x256xf32>
    %c0_149 = arith.constant 0 : index
    %c0_150 = arith.constant 0 : index
    %1729 = vector.load %arg4[%c0_149, %c0_150] : memref<16x1xf32, #tpu.memory_space<vmem>>, vector<16x1xf32>
    %1730 = vector.broadcast %1729 : vector<16x1xf32> to vector<16x256xf32>
    %1731 = arith.addf %1728, %1730 : vector<16x256xf32>
    %cst_151 = arith.constant 0.000000e+00 : f32
    %1732 = vector.broadcast %cst_151 : f32 to vector<16x256xf32>
    %1733 = arith.maximumf %1731, %1732 : vector<16x256xf32>
    %c0_152 = arith.constant 0 : index
    %c0_153 = arith.constant 0 : index
    %1734 = vector.load %arg1[%c0_152, %c0_153] : memref<16x9xf32, #tpu.memory_space<vmem>>, vector<16x9xf32>
    %c0_154 = arith.constant 0 : index
    %c0_155 = arith.constant 0 : index
    %1735 = vector.load %arg9[%c0_154, %c0_155] : memref<9x256xf32, #tpu.memory_space<vmem>>, vector<9x256xf32>
    %cst_156 = arith.constant dense<0.000000e+00> : vector<16x256xf32>
    %1736 = tpu.matmul %1734, %1735, %cst_156 {dimension_numbers = #tpu.dot_dimension_numbers<[1], [0], [0], [1], [0, 0, 1, 1], [], []>} : vector<16x9xf32>, vector<9x256xf32>, vector<16x256xf32> -> vector<16x256xf32>
    %c0_157 = arith.constant 0 : index
    %c0_158 = arith.constant 0 : index
    %1737 = vector.load %arg2[%c0_157, %c0_158] : memref<16x1xf32, #tpu.memory_space<vmem>>, vector<16x1xf32>
    %1738 = vector.broadcast %1737 : vector<16x1xf32> to vector<16x256xf32>
    %1739 = arith.addf %1736, %1738 : vector<16x256xf32>
    %cst_159 = arith.constant 0.000000e+00 : f32
    %1740 = vector.broadcast %cst_159 : f32 to vector<16x256xf32>
    %1741 = arith.maximumf %1739, %1740 : vector<16x256xf32>
    %c0_160 = arith.constant 0 : index
    %c0_161 = arith.constant 0 : index
    %1742 = vector.load %arg5[%c0_160, %c0_161] : memref<16x32xf32, #tpu.memory_space<vmem>>, vector<16x16xf32>
    %cst_162 = arith.constant dense<0.000000e+00> : vector<16x256xf32>
    %1743 = tpu.matmul %1742, %1741, %cst_162 {dimension_numbers = #tpu.dot_dimension_numbers<[1], [0], [0], [1], [0, 0, 1, 1], [], []>} : vector<16x16xf32>, vector<16x256xf32>, vector<16x256xf32> -> vector<16x256xf32>
    %c0_163 = arith.constant 0 : index
    %c16_164 = arith.constant 16 : index
    %1744 = vector.load %arg5[%c0_163, %c16_164] : memref<16x32xf32, #tpu.memory_space<vmem>>, vector<16x16xf32>
    %cst_165 = arith.constant dense<0.000000e+00> : vector<16x256xf32>
    %1745 = tpu.matmul %1744, %1733, %cst_165 {dimension_numbers = #tpu.dot_dimension_numbers<[1], [0], [0], [1], [0, 0, 1, 1], [], []>} : vector<16x16xf32>, vector<16x256xf32>, vector<16x256xf32> -> vector<16x256xf32>
    %1746 = arith.addf %1743, %1745 : vector<16x256xf32>
    %c0_166 = arith.constant 0 : index
    %c0_167 = arith.constant 0 : index
    %1747 = vector.load %arg6[%c0_166, %c0_167] : memref<16x1xf32, #tpu.memory_space<vmem>>, vector<16x1xf32>
    %1748 = vector.broadcast %1747 : vector<16x1xf32> to vector<16x256xf32>
    %1749 = arith.addf %1746, %1748 : vector<16x256xf32>
    %cst_168 = arith.constant 0.000000e+00 : f32
    %1750 = vector.broadcast %cst_168 : f32 to vector<16x256xf32>
    %1751 = arith.maximumf %1749, %1750 : vector<16x256xf32>
    %c0_169 = arith.constant 0 : index
    %c0_170 = arith.constant 0 : index
    %1752 = vector.load %arg10[%c0_169, %c0_170] : memref<16x256xf32, #tpu.memory_space<vmem>>, vector<16x256xf32>
    tpu.vector_store %arg10[%c0_169, %c0_170], %1751 {strides = array<i32>} : memref<16x256xf32, #tpu.memory_space<vmem>>, vector<16x256xf32>,
    return
  }
  func.func @transform_0(%arg0: i32) -> (i32, i32) {
    %c0_i32 = arith.constant 0 : i32
    %c0_i32_0 = arith.constant 0 : i32
    %c0_i32_1 = arith.constant 0 : i32
    return %c0_i32, %c0_i32_0 : i32, i32
  }
  func.func @transform_1(%arg0: i32) -> (i32, i32) {
    %c0_i32 = arith.constant 0 : i32
    %c0_i32_0 = arith.constant 0 : i32
    %c0_i32_1 = arith.constant 0 : i32
    return %c0_i32, %c0_i32_0 : i32, i32
  }
  func.func @transform_2(%arg0: i32) -> (i32, i32) {
    %c0_i32 = arith.constant 0 : i32
    %c0_i32_0 = arith.constant 0 : i32
    %c0_i32_1 = arith.constant 0 : i32
    return %c0_i32, %c0_i32_0 : i32, i32
  }
  func.func @transform_3(%arg0: i32) -> (i32, i32) {
    %c0_i32 = arith.constant 0 : i32
    %c0_i32_0 = arith.constant 0 : i32
    %c0_i32_1 = arith.constant 0 : i32
    return %c0_i32, %c0_i32_0 : i32, i32
  }
  func.func @transform_4(%arg0: i32) -> (i32, i32) {
    %c0_i32 = arith.constant 0 : i32
    %c0_i32_0 = arith.constant 0 : i32
    %c0_i32_1 = arith.constant 0 : i32
    return %c0_i32, %c0_i32_0 : i32, i32
  }
  func.func @transform_5(%arg0: i32) -> (i32, i32) {
    %c0_i32 = arith.constant 0 : i32
    %c0_i32_0 = arith.constant 0 : i32
    %c0_i32_1 = arith.constant 0 : i32
    return %c0_i32, %c0_i32_0 : i32, i32
  }
  func.func @transform_6(%arg0: i32) -> (i32, i32) {
    %c0_i32 = arith.constant 0 : i32
    %c0_i32_0 = arith.constant 0 : i32
    return %c0_i32, %arg0 : i32, i32
  }
  func.func @transform_7(%arg0: i32) -> (i32, i32) {
    %c0_i32 = arith.constant 0 : i32
    %c0_i32_0 = arith.constant 0 : i32
    return %c0_i32, %arg0 : i32, i32
  }
  func.func @transform_8(%arg0: i32) -> (i32, i32) {
    %c0_i32 = arith.constant 0 : i32
    %c0_i32_0 = arith.constant 0 : i32
    return %c0_i32, %arg0 : i32, i32
  }
  func.func @transform_9(%arg0: i32) -> (i32, i32) {
    %c0_i32 = arith.constant 0 : i32
    %c0_i32_0 = arith.constant 0 : i32
    return %c0_i32, %arg0 : i32, i32
  }
}

</mosaic_0001>

<bundles_post_ra>
// kernel: stem_v2_origin_ps_forward.1
= control target key start
LH: loop header
LB: loop body
LE: loop exit
PB: predicated region body
PF: predicated region fallthrough
CT: control target
= control target key end

     0   :  { %s4641_s30 = smov 0   ;;  %s4643_s10 = smov 0   ;;  %s7592_s0 = inlined_call_operand.vmem [shape: f32[16,9], index: 0, kind: input, shape index: {}]   ;;  %s7593_s1 = inlined_call_operand.vmem [shape: f32[16,1], index: 1, kind: input, shape index: {}]   ;;  %s7594_s2 = inlined_call_operand.vmem [shape: f32[16,168], index: 2, kind: input, shape index: {}]   ;;  %s7595_s3 = inlined_call_operand.vmem [shape: f32[16,1], index: 3, kind: input, shape index: {}]   ;;  %s7596_s4 = inlined_call_operand.vmem [shape: f32[16,32], index: 4, kind: input, shape index: {}]   ;;  %s7597_s5 = inlined_call_operand.vmem [shape: f32[16,1], index: 5, kind: input, shape index: {}]   ;;  %s7598_s6 = inlined_call_operand.vmem [shape: f32[12,512], index: 6, kind: input, shape index: {}]   ;;  %s7599_s7 = inlined_call_operand.vmem [shape: f32[28,512], index: 7, kind: input, shape index: {}]   ;;  %s7600_s8 = inlined_call_operand.vmem [shape: f32[9,512], index: 8, kind: input, shape index: {}]   ;;  %s7601_s9 = inlined_call_operand.vmem [shape: f32[16,512], index: 9, kind: output, shape index: {}]  }
   0x1   :  { %s4645_s11 = smov 0  }
   0x2 LB: > { %s4466_s12 = sadd.s32 4294967295, %s4586_s11   ;;  %s4658_s13 = sadd.s32 1, %s4586_s11   ;;  %s4586_s11 = sphi %s4645_s11, %s8951_s11   ;;  %s4582_s10 = sphi %s4643_s10, %s8950_s10   ;;  %s4578_s30 = sphi %s4641_s30, %s8949_s30  }
   0x3   : > { %s149_s14 = ssub.s32 %s4586_s11, %s4658_s13  ;;  %s152_s15 = sadd.s32 1, %s4582_s10 }
   0x4   : > { %p150_p0 = scmp.eq.s32.totalorder %s149_s14, 0  ;;  %p159_p1 = scmp.ne.s32.totalorder %s4582_s10, %s4578_s30 }
   0x5   : > { %p160_p2 = scmp.eq.s32.totalorder %s4586_s11, 0  ;;  %p241_p3 = scmp.eq.s32.totalorder %s4466_s12, 1 }
   0x6   : > { %s4669_s16 = scalar_select %p150_p0, %s4582_s10, %s152_s15  }
   0x7   : > { %p4671_p4 = por %p160_p2, %p159_p1  ;;  %p4675_p5 = por %p241_p3, %p159_p1 }
   0x8   : > { %p4469_p6 = scmp.ge.s32.totalorder %s4586_s11, 2 }
   0xa   : > { %281 = sbr.rel (%p4469_p6) target bundleno = 43 (0x2b), region = 40 }
   0xf   : > { %284 = sbr.rel (!%p4671_p4) target bundleno = 23 (0x17), region = 44  ;;  %s286_s19 = sand.u32 (%p4671_p4), 1, %s4582_s10  }
  0x10   : > { %s4515_s20 = sshll.u32 (%p4671_p4), %s4586_s11, 4  ;;  %s4470_s21 = sshll.u32 (%p4671_p4), %s286_s19, 5 }
  0x11   : > { %s291_s24 = scalar_lea.vmem (%p4671_p4), %s7598_s6, %s4515_s20  ;;  %s288_s25 = scalar_lea.vmem (%p4671_p4), [#allocation3], %s4470_s21 }
  0x12   : > { %v304_v0 = vld [vmem:[%s291_s24] sm:$0xff] (%p4671_p4)  ;;  %v306_v1 = vld [vmem:[%s291_s24 + $0x8] sm:$0xff] (%p4671_p4) }
  0x13   : > { %v308_v2 = vld [vmem:[%s291_s24 + $0x20] sm:$0xff] (%p4671_p4)  ;;  %305 = vst [vmem:[%s288_s25] sm:$0xff] (%p4671_p4), %v304_v0  ;;  %v310_v3 = vld [vmem:[%s291_s24 + $0x28] sm:$0xff] (%p4671_p4) }
  0x14   : > { %307 = vst [vmem:[%s288_s25 + $0x8] sm:$0xff] %v306_v1 }
  0x15   : > { %309 = vst [vmem:[%s288_s25 + $0x10] sm:$0xff] %v308_v2 }
  0x16   : > { %311 = vst [vmem:[%s288_s25 + $0x18] sm:$0xff] %v310_v3 }
  0x17 PF: > { %317 = sbr.rel (!%p4671_p4) target bundleno = 35 (0x23), region = 67  ;;  %s319_s26 = sand.u32 (%p4671_p4), 1, %s4582_s10  }
  0x18   : > { %s4516_s27 = sshll.u32 (%p4671_p4), %s4586_s11, 4  ;;  %s4473_s28 = sshll.u32 (%p4671_p4), %s319_s26, 6 }
  0x19   : > { %s324_s15 = scalar_lea.vmem (%p4671_p4), %s7599_s7, %s4516_s27  ;;  %s321_s19 = scalar_lea.vmem (%p4671_p4), [#allocation4], %s4473_s28 }
  0x1a   : > { %v337_v4 = vld [vmem:[%s324_s15] sm:$0xff] (%p4671_p4)  ;;  %v339_v5 = vld [vmem:[%s324_s15 + $0x8] sm:$0xff] (%p4671_p4) }
  0x1b   : > { %v341_v6 = vld [vmem:[%s324_s15 + $0x20] sm:$0xff] (%p4671_p4)  ;;  %338 = vst [vmem:[%s321_s19] sm:$0xff] (%p4671_p4), %v337_v4  ;;  %v343_v7 = vld [vmem:[%s324_s15 + $0x28] sm:$0xff] (%p4671_p4) }
  0x1c   : > { %340 = vst [vmem:[%s321_s19 + $0x8] sm:$0xff] %v339_v5  ;;  %v345_v8 = vld [vmem:[%s324_s15 + $0x40] sm:$0xff]  ;;  %v347_v9 = vld [vmem:[%s324_s15 + $0x48] sm:$0xff] }
  0x1d   : > { %342 = vst [vmem:[%s321_s19 + $0x10] sm:$0xff] %v341_v6  ;;  %v349_v10 = vld [vmem:[%s324_s15 + $0x60] sm:$0xff]  ;;  %v351_v11 = vld [vmem:[%s324_s15 + $0x68] sm:$0xff] }
  0x1e   : > { %344 = vst [vmem:[%s321_s19 + $0x18] sm:$0xff] %v343_v7 }
  0x1f   : > { %346 = vst [vmem:[%s321_s19 + $0x20] sm:$0xff] %v345_v8 }
  0x20   : > { %348 = vst [vmem:[%s321_s19 + $0x28] sm:$0xff] %v347_v9 }
  0x21   : > { %350 = vst [vmem:[%s321_s19 + $0x30] sm:$0xff] %v349_v10 }
  0x22   : > { %352 = vst [vmem:[%s321_s19 + $0x38] sm:$0xff] %v351_v11 }
  0x23 PF: > { %358 = sbr.rel (!%p4671_p4) target bundleno = 43 (0x2b), region = 90  ;;  %s360_s20 = sand.u32 (%p4671_p4), 1, %s4582_s10  }
  0x24   : > { %s4517_s21 = sshll.u32 (%p4671_p4), %s4586_s11, 4  ;;  %s4476_s22 = sshll.u32 (%p4671_p4), %s360_s20, 5 }
  0x25   : > { %s365_s25 = scalar_lea.vmem (%p4671_p4), %s7600_s8, %s4517_s21  ;;  %s362_s26 = scalar_lea.vmem (%p4671_p4), [#allocation5], %s4476_s22 }
  0x26   : > { %v378_v12 = vld [vmem:[%s365_s25] sm:$0xff] (%p4671_p4)  ;;  %v380_v13 = vld [vmem:[%s365_s25 + $0x8] sm:$0xff] (%p4671_p4) }
  0x27   : > { %v382_v14 = vld [vmem:[%s365_s25 + $0x20] sm:$0xff] (%p4671_p4)  ;;  %379 = vst [vmem:[%s362_s26] sm:$0xff] (%p4671_p4), %v378_v12  ;;  %v384_v15 = vld [vmem:[%s365_s25 + $0x28] sm:$0xff] (%p4671_p4) }
  0x28   : > { %381 = vst [vmem:[%s362_s26 + $0x8] sm:$0xff] %v380_v13 }
  0x29   : > { %383 = vst [vmem:[%s362_s26 + $0x10] sm:$0xff] %v382_v14 }
  0x2a   : > { %385 = vst [vmem:[%s362_s26 + $0x18] sm:$0xff] %v384_v15 }
  0x2b PF: > { %p4479_p7 = scmp.ge.s32.totalorder %s4586_s11, 1  ;;  %p390_p8 = scmp.lt.s32.totalorder %s4586_s11, 3 }
  0x2d   : > { %p391_p9 = pnand %p4479_p7, %p390_p8 }
  0x2f   : > { %394 = sbr.rel (%p391_p9) target bundleno = 1008 (0x3f0), region = 113 }
  0x34   : > { %v3849_v16 = vld [vmem:[%s7594_s2 + $0x10] sm:$0xff]  ;;  %v3848_v17 = vld [vmem:[%s7594_s2] sm:$0xff]  ;;  %s397_s14 = sand.u32 1, %s4578_s30   ;;  %s4588_s15 = smov 44   ;;  %v3873_v20 = vld [vmem:[%s7594_s2 + $0x18] sm:$0xff]  ;;  %vm1335_vm0 = vcmask 1043456  }
  0x35   : > { %3904 = vrot.lane.b32.xlu1 %v3849_v16, %s4588_s15  ;;  %3900 = vrot.lane.b32.xlu0 %v3848_v17, %s4588_s15  ;;  %s4710_s19 = sshll.u32 %s397_s14, 5  ;;  %v3872_v25 = vld [vmem:[%s7594_s2 + $0x8] sm:$0xff]  ;;  %s4481_s24 = sshll.u32 %s397_s14, 6  ;;  %vm3995_vm1 = vcmask 687104   ;;  %vm4151_vm2 = vcmask 1040384   ;;  %vm4144_vm3 = vcmask 72704  }
  0x36   : > { %s4713_s20 = scalar_lea.vmem [#allocation3], %s4710_s19  ;;  %s4772_s25 = scalar_lea.vmem [#allocation4], %s4481_s24  ;;  %vm3908_vm4 = vcmask 359424   ;;  %vm4216_vm5 = vcmask 130048  }
  0x37   : > { %v4716_v18 = vld [vmem:[%s4713_s20] sm:$0xf]  ;;  %v567_v19 = vld [vmem:[%s4713_s20] sm:$0xf0]  ;;  %v4729_v23 = vld [vmem:[%s4713_s20 + $0x8] sm:$0xf0] }
  0x38   : > { %v4723_v21 = vmul.f32 0.5, %v4716_v18  ;;  %v4726_v22 = vmul.f32 0.33333334, %v4716_v18  ;;  %v571_v24 = vrot.slane %v4716_v18, 4  ;;  %v4736_v26 = vmul.f32 0.0, %v4716_v18  ;;  %s413_s29 = scalar_lea.vmem [#allocation5], %s4710_s19 }
  0x39   : > { %v1025_v27 = vperm.slane %v4716_v18, 3  ;;  %v1053_v28 = vld [vmem:[%s4713_s20 + $0x10] sm:$0xf]  ;;  %v1057_v29 = vrot.slane %v567_v19, 4  ;;  %v1054_v33 = vld [vmem:[%s4713_s20 + $0x18] sm:$0xf] }
  0x3a   : > { %8145 = vst [vmem:[#allocation7_spill] sm:$0xff] %v4726_v22  ;;  %v473_v30 = vperm.slane %v4723_v21, 3  ;;  %v4742_v31 = vperm.slane %v4726_v22, 3  ;;  %v4744_v32 = vsub.f32 %v567_v19, %v571_v24  ;;  %v1058_v34 = vrot.slane %v4729_v23, 4  ;;  %v4775_v48 = vld [vmem:[%s4772_s25] sm:$0xf0] }
  0x3b   : > { %8146 = vst [vmem:[#allocation8_spill] sm:$0xff] %v4736_v26  ;;  %v4748_v35 = vsub.f32 %v1053_v28, %v1057_v29  ;;  %v1986_v52 = vld [vmem:[%s4772_s25 + $0x10] sm:$0xf]  ;;  %v1990_v53 = vrot.slane %v4775_v48, 4  ;;  %v1501_v58 = vld [vmem:[%s4772_s25 + $0x8] sm:$0xf0] }
  0x3c   : > { %8147 = vst [vmem:[#allocation9_spill] sm:$0xff] %v4744_v32  ;;  %v4751_v36 = vmul.f32 %v473_v30, %v4716_v18  ;;  %v4754_v37 = vmul.f32 0.5, %v4744_v32  ;;  %v595_v38 = vmul.f32 0.33333334, %v4744_v32  ;;  %v1027_v39 = vmul.f32 %v1025_v27, %v4744_v32  ;;  %v1987_v59 = vld [vmem:[%s4772_s25 + $0x18] sm:$0xf] }
  0x3d   : > { %3906 = vrot.lane.b32.xlu1 %v3873_v20, %s4588_s15  ;;  %3902 = vrot.lane.b32.xlu0 %v3872_v25, %s4588_s15  ;;  %v1047_v40 = vrot.slane %v4744_v32, 4  ;;  %v4759_v41 = vsub.f32 %v1054_v33, %v1058_v34  ;;  %v4762_v42 = vmul.f32 0.5, %v4748_v35  ;;  %v1081_v43 = vmul.f32 0.33333334, %v4748_v35  ;;  %8150 = vst [vmem:[#allocation12_spill] sm:$0xff] %v4775_v48  ;;  %s452_s24 = scalar_lea.vmem [#allocation6], %s4710_s19 }
  0x3e   : > { %8148 = vst [vmem:[#allocation10_spill] sm:$0xff] %v4751_v36  ;;  %v553_v44 = vmul.f32 %v4742_v31, %v4751_v36  ;;  %v4769_v45 = vadd.f32 %v4736_v26, %v4751_v36  ;;  %v591_v46 = vperm.slane %v4754_v37, 7  ;;  %v599_v47 = vrot.slane %v595_v38, 4  ;;  %v2220_v4 = vld [vmem:[%s4772_s25 + $0x10] sm:$0xf0]  ;;  %s4518_s19 = sshll.u32 (%p4675_p5), %s4466_s12, 4 }
  0x3f   : > { %8149 = vst [vmem:[#allocation11_spill] sm:$0xff] %v4759_v41  ;;  %v1031_v49 = vrot.slane %v1027_v39, 4  ;;  %v4778_v50 = vadd.f32 %v1047_v40, %v4716_v18  ;;  %v1077_v51 = vperm.slane %v4762_v42, 3  ;;  %v1991_v63 = vrot.slane %v1501_v58, 4  ;;  %v2221_v5 = vld [vmem:[%s4772_s25 + $0x18] sm:$0xf0]  ;;  %s4350_s17 = scalar_lea.vmem (%p4675_p5), %s7601_s9, %s4518_s19 }
  0x40   : > { %v555_v54 = vadd.f32 %v553_v44, %v4736_v26  ;;  %v4785_v55 = vmul.f32 %v591_v46, %v4744_v32  ;;  %v4788_v56 = vadd.f32 %v599_v47, %v4716_v18  ;;  %v943_v57 = vperm.slane %v4769_v45, 3  ;;  %v2706_v10 = vld [vmem:[%s4772_s25 + $0x20] sm:$0xf]  ;;  %v2707_v14 = vld [vmem:[%s4772_s25 + $0x28] sm:$0xf] }
  0x41   : > { %8151 = vst [vmem:[#allocation13_spill] sm:$0xff] %v4778_v50  ;;  %v1035_v60 = vadd.f32 %v1031_v49, %v4769_v45  ;;  %v4795_v61 = vmul.f32 %v1077_v51, %v4748_v35  ;;  %v4798_v62 = vadd.f32 %v1081_v43, %v4778_v50  ;;  %v4805_v3 = vsub.f32 %v1986_v52, %v1990_v53  ;;  %v2940_v24 = vld [vmem:[%s4772_s25 + $0x20] sm:$0xf0]  ;;  %v4828_v25 = vld [vmem:[%s4713_s20 + $0x8] sm:$0xf] }
  0x42   : > { %8152 = vst [vmem:[#allocation14_spill] sm:$0xff] %v4785_v55  ;;  %v4801_v0 = vperm.slane %v4788_v56, 3  ;;  %v945_v1 = vmul.f32 %v943_v57, %v4744_v32  ;;  %v1039_v2 = vrot.slane %v4785_v55, 4  ;;  %v4812_v7 = vsub.f32 %v1987_v59, %v1991_v63  ;;  %v2941_v33 = vld [vmem:[%s4772_s25 + $0x28] sm:$0xf0] }
  0x43   : > { %8153 = vst [vmem:[#allocation15_spill] sm:$0xff] %v4788_v56  ;;  %v4810_v6 = vperm.slane %v4798_v62, 3  ;;  %v2224_v8 = vrot.slane %v1986_v52, 4  ;;  %v2225_v9 = vrot.slane %v1987_v59, 4  ;;  %v2710_v15 = vrot.slane %v2220_v4, 4 }
  0x44   : > { %8154 = vst [vmem:[#allocation16_spill] sm:$0xff] %v4795_v61  ;;  %v949_v11 = vrot.slane %v945_v1, 4  ;;  %v955_v12 = vmul.f32 %v4801_v0, %v4785_v55  ;;  %v4817_v13 = vadd.f32 %v1039_v2, %v1035_v60  ;;  %v2711_v20 = vrot.slane %v2221_v5, 4  ;;  %v3426_v34 = vld [vmem:[%s4772_s25 + $0x30] sm:$0xf] }
  0x45   : > { %8155 = vst [vmem:[#allocation17_spill] sm:$0xff] %v4798_v62  ;;  %v1249_v16 = vmul.f32 %v4810_v6, %v4795_v61  ;;  %v4822_v17 = vsub.f32 %v2220_v4, %v2224_v8  ;;  %v4824_v19 = vsub.f32 %v2221_v5, %v2225_v9  ;;  %v4831_v30 = vsub.f32 %v2706_v10, %v2710_v15  ;;  %v3427_v43 = vld [vmem:[%s4772_s25 + $0x38] sm:$0xf] }
  0x46   : > { %8156 = vst [vmem:[#allocation18_spill] sm:$0xff] %v4805_v3  ;;  %v953_v27 = vadd.f32 %v949_v11, %v555_v54  ;;  %v959_v28 = vrot.slane %v955_v12, 4  ;;  %v1243_v29 = vperm.slane %v4817_v13, 3  ;;  %v4835_v38 = vsub.f32 %v2707_v14, %v2711_v20 }
  0x47   : > { %8157 = vst [vmem:[#allocation19_spill] sm:$0xff] %v4812_v7  ;;  %v2944_v39 = vrot.slane %v2706_v10, 4  ;;  %v2945_v40 = vrot.slane %v2707_v14, 4  ;;  %v3430_v44 = vrot.slane %v2940_v24, 4  ;;  %v3431_v49 = vrot.slane %v2941_v33, 4 }
  0x48   : > { %8158 = vst [vmem:[#allocation20_spill] sm:$0xff] %v4817_v13  ;;  %v963_v46 = vadd.f32 %v959_v28, %v953_v27  ;;  %v1245_v47 = vmul.f32 %v1243_v29, %v4748_v35  ;;  %v4840_v51 = vmul.f32 0.5, %v4828_v25  ;;  %v4849_v57 = vmul.f32 0.33333334, %v4828_v25 }
  0x49   : > { %8159 = vst [vmem:[#allocation21_spill] sm:$0xff] %v4822_v17  ;;  %v4842_v52 = vsub.f32 %v2940_v24, %v2944_v39  ;;  %v4844_v53 = vsub.f32 %v2941_v33, %v2945_v40  ;;  %v4846_v54 = vsub.f32 %v3426_v34, %v3430_v44  ;;  %v4851_v59 = vsub.f32 %v3427_v43, %v3431_v49 }
  0x4a   : > { %8160 = vst [vmem:[#allocation22_spill] sm:$0xff] %v4824_v19  ;;  %v1247_v58 = vadd.f32 %v1245_v47, %v963_v46  ;;  %v474_v60 = vperm.slane %v4840_v51, 3  ;;  %v4855_v63 = vmul.f32 0.0, %v4828_v25  ;;  %v4858_v1 = vperm.slane %v4849_v57, 3 }
  0x4b   : > { %8161 = vst [vmem:[#allocation23_spill] sm:$0xff] %v4831_v30  ;;  %v572_v2 = vrot.slane %v4828_v25, 4  ;;  %v1026_v4 = vperm.slane %v4828_v25, 3  ;;  %v4863_v5 = vmul.f32 0.5, %v4759_v41  ;;  %v1082_v10 = vmul.f32 0.33333334, %v4759_v41 }
  0x4c   : > { %8162 = vst [vmem:[#allocation24_spill] sm:$0xff] %v4835_v38  ;;  %v1251_v8 = vadd.f32 %v1249_v16, %v1247_v58  ;;  %v4866_v9 = vmul.f32 %v474_v60, %v4828_v25  ;;  %v465_v11 = vperm.slane %v4723_v21, 1  ;;  %v469_v15 = vperm.slane %v4723_v21, 2 }
  0x4d   : > { %8163 = vst [vmem:[#allocation25_spill] sm:$0xff] %v4842_v52  ;;  %v4871_v12 = vsub.f32 %v4729_v23, %v572_v2  ;;  %v1078_v14 = vperm.slane %v4863_v5, 3  ;;  %v583_v20 = vperm.slane %v4754_v37, 5  ;;  %v587_v23 = vperm.slane %v4754_v37, 6 }
  0x4e   : > { %8164 = vst [vmem:[#allocation26_spill] sm:$0xff] %v4844_v53  ;;  %v554_v16 = vmul.f32 %v4858_v1, %v4866_v9  ;;  %v4880_v24 = vadd.f32 %v4855_v63, %v4866_v9  ;;  %v4883_v27 = vmul.f32 %v465_v11, %v4716_v18  ;;  %v4898_v44 = vmul.f32 %v469_v15, %v4716_v18 }
  0x4f   : > { %8165 = vst [vmem:[#allocation27_spill] sm:$0xff] %v4846_v54  ;;  %v4887_v28 = vmul.f32 0.5, %v4871_v12  ;;  %v596_v29 = vmul.f32 0.33333334, %v4871_v12  ;;  %v1028_v33 = vmul.f32 %v1026_v4, %v4871_v12  ;;  %v1048_v34 = vrot.slane %v4871_v12, 4 }
  0x50   : > { %8166 = vst [vmem:[#allocation28_spill] sm:$0xff] %v4849_v57  ;;  %v556_v39 = vadd.f32 %v554_v16, %v4855_v63  ;;  %v944_v40 = vperm.slane %v4880_v24, 3  ;;  %v4895_v43 = vmul.f32 %v1078_v14, %v4759_v41  ;;  %v545_v2 = vmul.f32 %v4742_v31, %v4883_v27 }
  0x51   : > { %8167 = vst [vmem:[#allocation29_spill] sm:$0xff] %v4851_v59  ;;  %v592_v46 = vperm.slane %v4887_v28, 7  ;;  %v600_v47 = vrot.slane %v596_v29, 4  ;;  %v1032_v49 = vrot.slane %v1028_v33, 4  ;;  %v4902_v58 = vadd.f32 %v1048_v34, %v4828_v25 }
  0x52   : > { %8168 = vst [vmem:[#allocation30_spill] sm:$0xff] %v4855_v63  ;;  %v946_v60 = vmul.f32 %v944_v40, %v4871_v12  ;;  %v549_v4 = vmul.f32 %v4742_v31, %v4898_v44  ;;  %v547_v33 = vadd.f32 %v545_v2, %v4736_v26  ;;  %v4925_v40 = vmul.f32 %v587_v23, %v4744_v32 }
  0x53   : > { %8169 = vst [vmem:[#allocation31_spill] sm:$0xff] %v4866_v9  ;;  %v4913_v11 = vmul.f32 %v592_v46, %v4871_v12  ;;  %v4916_v14 = vadd.f32 %v600_v47, %v4828_v25  ;;  %v1036_v15 = vadd.f32 %v1032_v49, %v4880_v24  ;;  %v4920_v16 = vadd.f32 %v1082_v10, %v4902_v58 }
  0x54   : > { %8170 = vst [vmem:[#allocation32_spill] sm:$0xff] %v4871_v12  ;;  %v950_v29 = vrot.slane %v946_v60, 4  ;;  %v551_v34 = vadd.f32 %v549_v4, %v4736_v26  ;;  %v899_v10 = vperm.slane %v4769_v45, 1  ;;  %v921_v23 = vperm.slane %v4769_v45, 2 }
  0x55   : > { %1388 = vst [vmem:[#allocation2 + $0xa8] sm:$0xf] %v1251_v8  ;;  %v4910_v8 = vmul.f32 %v583_v20, %v4744_v32  ;;  %v4928_v46 = vperm.slane %v4916_v14, 3  ;;  %v1040_v47 = vrot.slane %v4913_v11, 4  ;;  %v4932_v50 = vperm.slane %v4920_v16, 3 }
  0x56   : > { %8171 = vst [vmem:[#allocation33_spill] sm:$0xff] %v4883_v27  ;;  %v954_v49 = vadd.f32 %v950_v29, %v556_v39  ;;  %v933_v2 = vmul.f32 %v4801_v0, %v4925_v40  ;;  %v901_v53 = vmul.f32 %v899_v10, %v4744_v32  ;;  %v923_v39 = vmul.f32 %v921_v23, %v4744_v32 }
  0x57   : > { %8172 = vst [vmem:[#allocation34_spill] sm:$0xff] %v4895_v43  ;;  %v911_v60 = vmul.f32 %v4801_v0, %v4910_v8  ;;  %v956_v4 = vmul.f32 %v4928_v46, %v4913_v11  ;;  %v1250_v59 = vmul.f32 %v4932_v50, %v4895_v43  ;;  %v1069_v38 = vperm.slane %v4762_v42, 1 }
  0x58   : > { %8173 = vst [vmem:[#allocation35_spill] sm:$0xff] %v4898_v44  ;;  %v937_v29 = vrot.slane %v933_v2, 4  ;;  %v905_v54 = vrot.slane %v901_v53, 4  ;;  %v1073_v52 = vperm.slane %v4762_v42, 2  ;;  %v927_v30 = vrot.slane %v923_v39, 4 }
  0x59   : > { %8174 = vst [vmem:[#allocation36_spill] sm:$0xff] %v4902_v58  ;;  %v4943_v58 = vadd.f32 %v1040_v47, %v1036_v15  ;;  %v960_v19 = vrot.slane %v956_v4, 4  ;;  %v4953_v15 = vmul.f32 %v1069_v38, %v4748_v35  ;;  %v1223_v47 = vperm.slane %v4817_v13, 1 }
  0x5a   : > { %8175 = vst [vmem:[#allocation37_spill] sm:$0xff] %v4910_v8  ;;  %v1233_v10 = vperm.slane %v4817_v13, 2  ;;  %v909_v2 = vadd.f32 %v905_v54, %v547_v33  ;;  %v4959_v17 = vmul.f32 %v1073_v52, %v4748_v35  ;;  %v931_v4 = vadd.f32 %v927_v30, %v551_v34 }
  0x5b   : > { %8176 = vst [vmem:[#allocation38_spill] sm:$0xff] %v4913_v11  ;;  %v1244_v7 = vperm.slane %v4943_v58, 3  ;;  %v1225_v53 = vmul.f32 %v1223_v47, %v4748_v35  ;;  %v1229_v39 = vmul.f32 %v4810_v6, %v4953_v15  ;;  %v470_v54 = vperm.slane %v4840_v51, 2 }
  0x5c   : > { %8177 = vst [vmem:[#allocation39_spill] sm:$0xff] %v4916_v14  ;;  %v3870_v20 = vld [vmem:[#allocation2 + $0xa8] sm:$0xf]  ;;  %v1235_v38 = vmul.f32 %v1233_v10, %v4748_v35  ;;  %v1239_v8 = vmul.f32 %v4810_v6, %v4959_v17  ;;  %v584_v52 = vperm.slane %v4887_v28, 5  ;;  %v588_v30 = vperm.slane %v4887_v28, 6 }
  0x5d   : > { %8178 = vst [vmem:[#allocation40_spill] sm:$0xff] %v4920_v16  ;;  %4490 = vmatpush.msk.msra.mxu2 %vm1335_vm0, %v3870_v20  ;;  %v915_v20 = vrot.slane %v911_v60, 4  ;;  %v964_v60 = vadd.f32 %v960_v19, %v954_v49  ;;  %v1246_v23 = vmul.f32 %v1244_v7, %v4759_v41  ;;  %v466_v19 = vperm.slane %v4840_v51, 1 }
  0x5e   : > { %8179 = vst [vmem:[#allocation41_spill] sm:$0xff] %v4925_v40  ;;  %v941_v7 = vadd.f32 %v937_v29, %v931_v4  ;;  %v900_v47 = vperm.slane %v4880_v24, 1  ;;  %v4976_v10 = vmul.f32 %v470_v54, %v4828_v25  ;;  %v4982_v29 = vmul.f32 %v588_v30, %v4871_v12 }
  0x5f   : > { %8180 = vst [vmem:[#allocation42_spill] sm:$0xff] %v4943_v58  ;;  %v1248_v3 = vadd.f32 %v1246_v23, %v964_v60  ;;  %v919_v48 = vadd.f32 %v915_v20, %v909_v2  ;;  %v4972_v49 = vmul.f32 %v466_v19, %v4828_v25  ;;  %v4979_v60 = vmul.f32 %v584_v52, %v4871_v12 }
  0x60   : > { %8181 = vst [vmem:[#allocation43_spill] sm:$0xff] %v4953_v15  ;;  %v1237_v20 = vadd.f32 %v1235_v38, %v941_v7  ;;  %v550_v4 = vmul.f32 %v4858_v1, %v4976_v10  ;;  %v934_v38 = vmul.f32 %v4928_v46, %v4982_v29  ;;  %v1070_v54 = vperm.slane %v4863_v5, 1 }
  0x61   : > { %8182 = vst [vmem:[#allocation44_spill] sm:$0xff] %v4959_v17  ;;  %v1252_v33 = vadd.f32 %v1250_v59, %v1248_v3  ;;  %v1227_v34 = vadd.f32 %v1225_v53, %v919_v48  ;;  %v546_v48 = vmul.f32 %v4858_v1, %v4972_v49  ;;  %v902_v3 = vmul.f32 %v900_v47, %v4871_v12 }
  0x62   : > { %8183 = vst [vmem:[#allocation45_spill] sm:$0xff] %v4972_v49  ;;  %v922_v59 = vperm.slane %v4880_v24, 2  ;;  %v1241_v2 = vadd.f32 %v1239_v8, %v1237_v20  ;;  %v912_v53 = vmul.f32 %v4928_v46, %v4979_v60  ;;  %v552_v30 = vadd.f32 %v550_v4, %v4855_v63 }
  0x63   : > { %8184 = vst [vmem:[#allocation46_spill] sm:$0xff] %v4976_v10  ;;  %v1231_v23 = vadd.f32 %v1229_v39, %v1227_v34  ;;  %v548_v19 = vadd.f32 %v546_v48, %v4855_v63  ;;  %v906_v39 = vrot.slane %v902_v3, 4  ;;  %v4999_v20 = vmul.f32 %v1070_v54, %v4759_v41 }
  0x64   : > { %8185 = vst [vmem:[#allocation47_spill] sm:$0xff] %v4979_v60  ;;  %v924_v7 = vmul.f32 %v922_v59, %v4871_v12  ;;  %v1360_v52 = vrot.slane %v1241_v2, 4  ;;  %v916_v8 = vrot.slane %v912_v53, 4  ;;  %v1074_v60 = vperm.slane %v4863_v5, 2 }
  0x65   : > { %8186 = vst [vmem:[#allocation48_spill] sm:$0xff] %v4982_v29  ;;  %v910_v34 = vadd.f32 %v906_v39, %v548_v19  ;;  %v1224_v48 = vperm.slane %v4943_v58, 1  ;;  %v1234_v3 = vperm.slane %v4943_v58, 2  ;;  %v461_v59 = vperm.slane %v4723_v21, 0 }
  0x66   : > { %1389 = vst [vmem:[#allocation2 + $0x90] sm:$0xf] %v1252_v33  ;;  %v938_v33 = vrot.slane %v934_v38, 4  ;;  %v928_v47 = vrot.slane %v924_v7, 4  ;;  %v1366_v49 = vsel %vm1335_vm0, %v1231_v23, %v1360_v52  ;;  %v5007_v53 = vmul.f32 %v1074_v60, %v4759_v41 }
  0x67   : > { %8187 = vst [vmem:[#allocation49_spill] sm:$0xff] %v4999_v20  ;;  %4066 = vmatpush.msra.mxu2 %v1366_v49  ;;  %v920_v2 = vadd.f32 %v916_v8, %v910_v34  ;;  %v5010_v38 = vperm.slane %v4726_v22, 2  ;;  %v1226_v39 = vmul.f32 %v1224_v48, %v4759_v41  ;;  %v1230_v23 = vmul.f32 %v4932_v50, %v4999_v20 }
  0x68   : > { %v932_v4 = vadd.f32 %v928_v47, %v552_v30  ;;  %8188 = vst [vmem:[#allocation50_spill] sm:$0xff] %v5007_v53  ;;  %v1236_v7 = vmul.f32 %v1234_v3, %v4759_v41  ;;  %v5017_v54 = vmul.f32 %v461_v59, %v4716_v18  ;;  %v1240_v49 = vmul.f32 %v4932_v50, %v5007_v53 }
  0x69   : > { %v535_v60 = vmul.f32 %v5010_v38, %v4751_v36  ;;  %v5026_v52 = vadd.f32 %v4736_v26, %v4898_v44  ;;  %v1228_v30 = vadd.f32 %v1226_v39, %v920_v2  ;;  %v579_v34 = vperm.slane %v4754_v37, 4 }
  0x6a   : > { %8189 = vst [vmem:[#allocation51_spill] sm:$0xff] %v5017_v54  ;;  %v942_v21 = vadd.f32 %v938_v33, %v932_v4  ;;  %v541_v8 = vmul.f32 %v4742_v31, %v5017_v54  ;;  %v5032_v47 = vperm.slane %v4788_v56, 2  ;;  %v875_v59 = vperm.slane %v4769_v45, 0 }
  0x6b   : > { %v537_v48 = vadd.f32 %v535_v60, %v4736_v26  ;;  %v853_v3 = vperm.slane %v5026_v52, 3  ;;  %v1232_v4 = vadd.f32 %v1230_v23, %v1228_v30  ;;  %v5039_v2 = vmul.f32 %v579_v34, %v4744_v32 }
  0x6c   : > { %v1238_v33 = vadd.f32 %v1236_v7, %v942_v21  ;;  %v865_v31 = vmul.f32 %v5032_v47, %v4785_v55  ;;  %v877_v7 = vmul.f32 %v875_v59, %v4744_v32  ;;  %v1005_v21 = vperm.slane %v4716_v18, 2 }
  0x6d   : > { %v3871_v19 = vld [vmem:[#allocation2 + $0x90] sm:$0xf]  ;;  %8190 = vst [vmem:[#allocation52_spill] sm:$0xff] %v5039_v2  ;;  %v855_v39 = vmul.f32 %v853_v3, %v4744_v32  ;;  %v889_v45 = vmul.f32 %v4801_v0, %v5039_v2  ;;  %v1019_v23 = vrot.slane %v4925_v40, 4  ;;  %v1065_v30 = vperm.slane %v4762_v42, 0 }
  0x6e   : > { %4493 = vmatpush.msk.msra.mxu3 %vm1335_vm0, %v3871_v19  ;;  %v543_v19 = vadd.f32 %v541_v8, %v4736_v26  ;;  %v1242_v37 = vadd.f32 %v1240_v49, %v1238_v33  ;;  %v869_v60 = vrot.slane %v865_v31, 4  ;;  %v881_v56 = vrot.slane %v877_v7, 4 }
  0x6f   : > { %v859_v34 = vrot.slane %v855_v39, 4  ;;  %v1007_v55 = vmul.f32 %v1005_v21, %v4744_v32  ;;  %v893_v49 = vrot.slane %v889_v45, 4  ;;  %v5052_v33 = vmul.f32 %v1065_v30, %v4748_v35 }
  0x70   : > { %v1361_v8 = vrot.slane %v1242_v37, 4  ;;  %v5055_v3 = vperm.slane %v4798_v62, 2  ;;  %v1211_v18 = vperm.slane %v4817_v13, 0  ;;  %v885_v31 = vadd.f32 %v881_v56, %v543_v19 }
  0x71   : > { %8191 = vst [vmem:[#allocation53_spill] sm:$0xff] %v5052_v33  ;;  %v863_v59 = vadd.f32 %v859_v34, %v537_v48  ;;  %v1011_v2 = vrot.slane %v1007_v55, 4  ;;  %v1219_v39 = vmul.f32 %v4810_v6, %v5052_v33  ;;  %v462_v7 = vperm.slane %v4840_v51, 0 }
  0x72   : > { %v1367_v0 = vsel %vm1335_vm0, %v1232_v4, %v1361_v8  ;;  %v1207_v42 = vmul.f32 %v5055_v3, %v4795_v61  ;;  %v1213_v37 = vmul.f32 %v1211_v18, %v4748_v35  ;;  %v897_v45 = vadd.f32 %v893_v49, %v885_v31 }
  0x73   : > { %4089 = vmatpush.msra.mxu3 %v1367_v0  ;;  %v873_v21 = vadd.f32 %v869_v60, %v863_v59  ;;  %v1015_v30 = vadd.f32 %v1011_v2, %v5026_v52  ;;  %v5067_v4 = vperm.slane %v4849_v57, 2  ;;  %v5070_v55 = vmul.f32 %v462_v7, %v4828_v25 }
  0x74   : > { %v5074_v56 = vadd.f32 %v4855_v63, %v4976_v10  ;;  %v580_v48 = vperm.slane %v4887_v28, 4  ;;  %v5078_v6 = vperm.slane %v4916_v14, 2  ;;  %v1215_v19 = vadd.f32 %v1213_v37, %v897_v45 }
  0x75   : > { %8192 = vst [vmem:[#allocation54_spill] sm:$0xff] %v5070_v55  ;;  %v5080_v51 = vadd.f32 %v1019_v23, %v1015_v30  ;;  %v536_v2 = vmul.f32 %v5067_v4, %v4866_v9  ;;  %v876_v60 = vperm.slane %v4880_v24, 0  ;;  %v542_v8 = vmul.f32 %v4858_v1, %v5070_v55 }
  0x76   : > { %v5088_v34 = vmul.f32 %v580_v48, %v4871_v12  ;;  %v854_v49 = vperm.slane %v5074_v56, 3  ;;  %v866_v28 = vmul.f32 %v5078_v6, %v4913_v11  ;;  %v1221_v18 = vadd.f32 %v1219_v39, %v1215_v19 }
  0x77   : > { %8193 = vst [vmem:[#allocation55_spill] sm:$0xff] %v5080_v51  ;;  %v1201_v23 = vperm.slane %v5080_v51, 3  ;;  %v538_v0 = vadd.f32 %v536_v2, %v4855_v63  ;;  %v878_v59 = vmul.f32 %v876_v60, %v4871_v12  ;;  %v544_v24 = vadd.f32 %v542_v8, %v4855_v63 }
  0x78   : > { %8194 = vst [vmem:[#allocation56_spill] sm:$0xff] %v5088_v34  ;;  %v856_v31 = vmul.f32 %v854_v49, %v4871_v12  ;;  %v870_v1 = vrot.slane %v866_v28, 4  ;;  %v890_v37 = vmul.f32 %v4928_v46, %v5088_v34  ;;  %v1354_v45 = vrot.slane %v1221_v18, 4 }
  0x79   : > { %v1203_v7 = vmul.f32 %v1201_v23, %v4748_v35  ;;  %v882_v30 = vrot.slane %v878_v59, 4  ;;  %v1006_v48 = vperm.slane %v4828_v25, 2  ;;  %v1020_v19 = vrot.slane %v4982_v29, 4 }
  0x7a   : > { %v860_v13 = vrot.slane %v856_v31, 4  ;;  %v894_v39 = vrot.slane %v890_v37, 4  ;;  %v1066_v2 = vperm.slane %v4863_v5, 0  ;;  %v5106_v28 = vperm.slane %v4920_v16, 2 }
  0x7b   : > { %v1205_v60 = vadd.f32 %v1203_v7, %v873_v21  ;;  %v886_v8 = vadd.f32 %v882_v30, %v544_v24  ;;  %v1008_v49 = vmul.f32 %v1006_v48, %v4871_v12  ;;  %v1212_v18 = vperm.slane %v4943_v58, 0 }
  0x7c   : > { %v864_v46 = vadd.f32 %v860_v13, %v538_v0  ;;  %v5109_v23 = vmul.f32 %v1066_v2, %v4759_v41  ;;  %v527_v25 = vmul.f32 %v5010_v38, %v4883_v27  ;;  %v1208_v5 = vmul.f32 %v5106_v28, %v4895_v43  ;;  %v8196_v2 = vld [vmem:[#allocation37_spill] sm:$0xff] }
  0x7d   : > { %v1209_v59 = vadd.f32 %v1207_v42, %v1205_v60  ;;  %v898_v31 = vadd.f32 %v894_v39, %v886_v8  ;;  %v1012_v37 = vrot.slane %v1008_v49, 4  ;;  %v1214_v24 = vmul.f32 %v1212_v18, %v4759_v41 }
  0x7e   : > { %8195 = vst [vmem:[#allocation57_spill] sm:$0xff] %v5109_v23  ;;  %v874_v21 = vadd.f32 %v870_v1, %v864_v46  ;;  %v1220_v13 = vmul.f32 %v4932_v50, %v5109_v23  ;;  %v529_v0 = vadd.f32 %v527_v25, %v4736_v26  ;;  %v531_v42 = vmul.f32 %v5010_v38, %v4898_v44 }
  0x7f   : > { %v1364_v7 = vsel %vm1335_vm0, %v1209_v59, %v1354_v45  ;;  %v1016_v30 = vadd.f32 %v1012_v37, %v5074_v56  ;;  %v809_v48 = vperm.slane %v5026_v52, 1  ;;  %v1216_v39 = vadd.f32 %v1214_v24, %v898_v31 }
  0x80   : > { %4067 = vmatpush.msra.mxu2 %v1364_v7  ;;  %v821_v1 = vmul.f32 %v5032_v47, %v8196_v2  ;;  %v831_v60 = vperm.slane %v5026_v52, 2  ;;  %v843_v50 = vmul.f32 %v5032_v47, %v4925_v40  ;;  %v533_v45 = vadd.f32 %v531_v42, %v4736_v26 }
  0x81   : > { %v5130_v8 = vadd.f32 %v1020_v19, %v1016_v30  ;;  %v811_v49 = vmul.f32 %v809_v48, %v4744_v32  ;;  %v1181_v46 = vperm.slane %v5080_v51, 1  ;;  %v1222_v18 = vadd.f32 %v1220_v13, %v1216_v39 }
  0x82   : > { %v825_v25 = vrot.slane %v821_v1, 4  ;;  %v833_v59 = vmul.f32 %v831_v60, %v4744_v32  ;;  %v847_v31 = vrot.slane %v843_v50, 4  ;;  %v1187_v19 = vmul.f32 %v5055_v3, %v4953_v15  ;;  %v8198_v1 = vld [vmem:[#allocation45_spill] sm:$0xff] }
  0x83   : > { %8197 = vst [vmem:[#allocation58_spill] sm:$0xff] %v5130_v8  ;;  %v1202_v37 = vperm.slane %v5130_v8, 3  ;;  %v815_v24 = vrot.slane %v811_v49, 4  ;;  %v1183_v7 = vmul.f32 %v1181_v46, %v4748_v35  ;;  %v1355_v30 = vrot.slane %v1222_v18, 4 }
  0x84   : > { %v837_v58 = vrot.slane %v833_v59, 4  ;;  %v1191_v42 = vperm.slane %v5080_v51, 2  ;;  %v1197_v48 = vmul.f32 %v5055_v3, %v4959_v17  ;;  %v528_v60 = vmul.f32 %v5067_v4, %v8198_v1  ;;  %v8199_v59 = vld [vmem:[#allocation47_spill] sm:$0xff] }
  0x85   : > { %v1204_v13 = vmul.f32 %v1202_v37, %v4759_v41  ;;  %v819_v39 = vadd.f32 %v815_v24, %v529_v0  ;;  %v532_v50 = vmul.f32 %v5067_v4, %v4976_v10  ;;  %v810_v18 = vperm.slane %v5074_v56, 1 }
  0x86   : > { %v841_v49 = vadd.f32 %v837_v58, %v533_v45  ;;  %v1193_v46 = vmul.f32 %v1191_v42, %v4748_v35  ;;  %v822_v15 = vmul.f32 %v5078_v6, %v8199_v59  ;;  %v530_v17 = vadd.f32 %v528_v60, %v4855_v63 }
  0x87   : > { %v1206_v40 = vadd.f32 %v1204_v13, %v874_v21  ;;  %v829_v44 = vadd.f32 %v825_v25, %v819_v39  ;;  %v534_v0 = vadd.f32 %v532_v50, %v4855_v63  ;;  %v812_v24 = vmul.f32 %v810_v18, %v4871_v12 }
  0x88   : > { %v851_v37 = vadd.f32 %v847_v31, %v841_v49  ;;  %v826_v43 = vrot.slane %v822_v15, 4  ;;  %v832_v10 = vperm.slane %v5074_v56, 2  ;;  %v844_v42 = vmul.f32 %v5078_v6, %v4982_v29  ;;  %v5166_v49 = vld [vmem:[%s4772_s25] sm:$0xf] }
  0x89   : > { %v1210_v58 = vadd.f32 %v1208_v5, %v1206_v40  ;;  %v1185_v45 = vadd.f32 %v1183_v7, %v829_v44  ;;  %v1182_v23 = vperm.slane %v5130_v8, 1  ;;  %v816_v25 = vrot.slane %v812_v24, 4 }
  0x8a   : > { %v1195_v21 = vadd.f32 %v1193_v46, %v851_v37  ;;  %v834_v13 = vmul.f32 %v832_v10, %v4871_v12  ;;  %v1188_v31 = vmul.f32 %v5106_v28, %v4999_v20  ;;  %v848_v60 = vrot.slane %v844_v42, 4 }
  0x8b   : > { %v1365_v39 = vsel %vm1335_vm0, %v1210_v58, %v1355_v30  ;;  %v1189_v15 = vadd.f32 %v1187_v19, %v1185_v45  ;;  %v1184_v40 = vmul.f32 %v1182_v23, %v4759_v41  ;;  %v820_v5 = vadd.f32 %v816_v25, %v530_v17 }
  0x8c   : > { %4090 = vmatpush.msra.mxu3 %v1365_v39  ;;  %v1199_v44 = vadd.f32 %v1197_v48, %v1195_v21  ;;  %v838_v7 = vrot.slane %v834_v13, 4  ;;  %v1192_v50 = vperm.slane %v5130_v8, 2  ;;  %v1198_v10 = vmul.f32 %v5106_v28, %v5007_v53 }
  0x8d   : > { %v5171_v46 = vmul.f32 0.5, %v5166_v49  ;;  %v5174_v30 = vmul.f32 0.33333334, %v5166_v49  ;;  %v5177_v19 = vmul.f32 0.0, %v5166_v49  ;;  %v830_v48 = vadd.f32 %v826_v43, %v820_v5 }
  0x8e   : > { %v1331_v23 = vrot.slane %v1199_v44, 4  ;;  %v842_v17 = vadd.f32 %v838_v7, %v534_v0  ;;  %v1194_v18 = vmul.f32 %v1192_v50, %v4759_v41  ;;  %v1504_v13 = vrot.slane %v5166_v49, 4  ;;  %v8206_v50 = vld [vmem:[#allocation12_spill] sm:$0xff] }
  0x8f   : > { %8200 = vst [vmem:[#allocation59_spill] sm:$0xff] %v5174_v30  ;;  %v1398_v37 = vperm.slane %v5171_v46, 1  ;;  %v1402_v24 = vperm.slane %v5171_v46, 2  ;;  %v1406_v58 = vperm.slane %v5171_v46, 3  ;;  %v5184_v45 = vperm.slane %v5174_v30, 3 }
  0x90   : > { %8201 = vst [vmem:[#allocation60_spill] sm:$0xff] %v5177_v19  ;;  %v1350_v42 = vsel %vm1335_vm0, %v1189_v15, %v1331_v23  ;;  %v852_v21 = vadd.f32 %v848_v60, %v842_v17  ;;  %v1186_v25 = vadd.f32 %v1184_v40, %v830_v48  ;;  %v1958_v44 = vperm.slane %v5166_v49, 3  ;;  %v8208_v60 = vld [vmem:[#allocation18_spill] sm:$0xff] }
  0x91   : > { %8202 = vst [vmem:[#allocation61_spill] sm:$0xff] %v5184_v45  ;;  %4068 = vmatpush.msra.mxu2 %v1350_v42  ;;  %v5189_v43 = vmul.f32 %v1398_v37, %v5166_v49  ;;  %v5192_v0 = vmul.f32 %v1402_v24, %v5166_v49  ;;  %v5195_v39 = vmul.f32 %v1406_v58, %v5166_v49  ;;  %v5202_v40 = vmul.f32 0.5, %v8208_v60 }
  0x92   : > { %v1190_v5 = vadd.f32 %v1188_v31, %v1186_v25  ;;  %v1196_v7 = vadd.f32 %v1194_v18, %v852_v21  ;;  %v5199_v15 = vsub.f32 %v8206_v50, %v1504_v13 }
  0x93   : > { %8203 = vst [vmem:[#allocation62_spill] sm:$0xff] %v5189_v43  ;;  %v1478_v23 = vmul.f32 %v5184_v45, %v5189_v43  ;;  %v1482_v48 = vmul.f32 %v5184_v45, %v5192_v0  ;;  %v1486_v17 = vmul.f32 %v5184_v45, %v5195_v39  ;;  %v5212_v37 = vadd.f32 %v5177_v19, %v5195_v39 }
  0x94   : > { %8204 = vst [vmem:[#allocation63_spill] sm:$0xff] %v5192_v0  ;;  %v1200_v31 = vadd.f32 %v1198_v10, %v1196_v7  ;;  %v5215_v18 = vmul.f32 0.5, %v5199_v15  ;;  %v1528_v24 = vmul.f32 0.33333334, %v5199_v15  ;;  %v1960_v58 = vmul.f32 %v1958_v44, %v5199_v15 }
  0x95   : > { %8205 = vst [vmem:[#allocation64_spill] sm:$0xff] %v5195_v39  ;;  %v1480_v42 = vadd.f32 %v1478_v23, %v5177_v19  ;;  %v1484_v21 = vadd.f32 %v1482_v48, %v5177_v19  ;;  %v1488_v25 = vadd.f32 %v1486_v17, %v5177_v19  ;;  %v1832_v13 = vperm.slane %v5212_v37, 1 }
  0x96   : > { %8207 = vst [vmem:[#allocation12_spill] sm:$0xff] %v5199_v15  ;;  %v1332_v50 = vrot.slane %v1200_v31, 4  ;;  %v1516_v43 = vperm.slane %v5215_v18, 5  ;;  %v1520_v10 = vperm.slane %v5215_v18, 6  ;;  %v1524_v7 = vperm.slane %v5215_v18, 7 }
  0x97   : > { %8209 = vst [vmem:[#allocation65_spill] sm:$0xff] %v5202_v40  ;;  %v1532_v53 = vrot.slane %v1528_v24, 4  ;;  %v1834_v20 = vmul.f32 %v1832_v13, %v5199_v15  ;;  %v1854_v44 = vperm.slane %v5212_v37, 2  ;;  %v1876_v23 = vperm.slane %v5212_v37, 3 }
  0x98   : > { %8210 = vst [vmem:[#allocation66_spill] sm:$0xff] %v5212_v37  ;;  %v1351_v48 = vsel %vm1335_vm0, %v1190_v5, %v1332_v50  ;;  %v5231_v17 = vmul.f32 %v1516_v43, %v5199_v15  ;;  %v5234_v31 = vmul.f32 %v1520_v10, %v5199_v15  ;;  %v5237_v29 = vmul.f32 %v1524_v7, %v5199_v15 }
  0x99   : > { %8211 = vst [vmem:[#allocation67_spill] sm:$0xff] %v5215_v18  ;;  %4091 = vmatpush.msra.mxu3 %v1351_v48  ;;  %v5240_v24 = vadd.f32 %v1532_v53, %v5166_v49  ;;  %v1838_v13 = vrot.slane %v1834_v20, 4  ;;  %v1856_v45 = vmul.f32 %v1854_v44, %v5199_v15  ;;  %v1878_v18 = vmul.f32 %v1876_v23, %v5199_v15 }
  0x9a   : > { %8212 = vst [vmem:[#allocation68_spill] sm:$0xff] %v5231_v17  ;;  %v1964_v39 = vrot.slane %v1960_v58, 4  ;;  %v1972_v5 = vrot.slane %v5237_v29, 4  ;;  %v1980_v43 = vrot.slane %v5199_v15, 4  ;;  %v2002_v50 = vperm.slane %v5202_v40, 1 }
  0x9b   : > { %8213 = vst [vmem:[#allocation69_spill] sm:$0xff] %v5234_v31  ;;  %v5248_v10 = vperm.slane %v5240_v24, 3  ;;  %v1842_v7 = vadd.f32 %v1838_v13, %v1480_v42  ;;  %v1860_v48 = vrot.slane %v1856_v45, 4  ;;  %v1882_v19 = vrot.slane %v1878_v18, 4 }
  0x9c   : > { %8214 = vst [vmem:[#allocation70_spill] sm:$0xff] %v5237_v29  ;;  %v1968_v53 = vadd.f32 %v1964_v39, %v5212_v37  ;;  %v5252_v20 = vadd.f32 %v1980_v43, %v5166_v49  ;;  %v5255_v44 = vmul.f32 %v2002_v50, %v8208_v60  ;;  %v2006_v58 = vperm.slane %v5202_v40, 2 }
  0x9d   : > { %8215 = vst [vmem:[#allocation71_spill] sm:$0xff] %v5240_v24  ;;  %v1844_v23 = vmul.f32 %v5248_v10, %v5231_v17  ;;  %v1864_v15 = vadd.f32 %v1860_v48, %v1484_v21  ;;  %v1866_v24 = vmul.f32 %v5248_v10, %v5234_v31  ;;  %v1886_v42 = vadd.f32 %v1882_v19, %v1488_v25 }
  0x9e   : > { %8216 = vst [vmem:[#allocation72_spill] sm:$0xff] %v5248_v10  ;;  %v1888_v45 = vmul.f32 %v5248_v10, %v5237_v29  ;;  %v5264_v39 = vadd.f32 %v1972_v5, %v1968_v53  ;;  %v5267_v49 = vmul.f32 %v2006_v58, %v8208_v60  ;;  %v2010_v18 = vperm.slane %v5202_v40, 3 }
  0x9f   : > { %8217 = vst [vmem:[#allocation73_spill] sm:$0xff] %v5252_v20  ;;  %v1848_v13 = vrot.slane %v1844_v23, 4  ;;  %v1870_v43 = vrot.slane %v1866_v24, 4  ;;  %v2014_v50 = vmul.f32 0.33333334, %v8208_v60  ;;  %v2210_v21 = vperm.slane %v5252_v20, 3 }
  0xa0   : > { %8218 = vst [vmem:[#allocation74_spill] sm:$0xff] %v5255_v44  ;;  %v1892_v48 = vrot.slane %v1888_v45, 4  ;;  %v5273_v17 = vmul.f32 %v2010_v18, %v8208_v60  ;;  %v2156_v19 = vperm.slane %v5264_v39, 1  ;;  %v2166_v25 = vperm.slane %v5264_v39, 2 }
  0xa1   : > { %8219 = vst [vmem:[#allocation75_spill] sm:$0xff] %v5264_v39  ;;  %v1852_v5 = vadd.f32 %v1848_v13, %v1842_v7  ;;  %v1874_v53 = vadd.f32 %v1870_v43, %v1864_v15  ;;  %v5278_v58 = vadd.f32 %v2014_v50, %v5252_v20  ;;  %v2176_v23 = vperm.slane %v5264_v39, 3  ;;  %v8225_v7 = vld [vmem:[#allocation21_spill] sm:$0xff] }
  0xa2   : > { %8220 = vst [vmem:[#allocation76_spill] sm:$0xff] %v5267_v49  ;;  %v1896_v24 = vadd.f32 %v1892_v48, %v1886_v42  ;;  %v2158_v40 = vmul.f32 %v2156_v19, %v8208_v60  ;;  %v2168_v31 = vmul.f32 %v2166_v25, %v8208_v60  ;;  %v2212_v45 = vmul.f32 %v2210_v21, %v8208_v60 }
  0xa3   : > { %8221 = vst [vmem:[#allocation77_spill] sm:$0xff] %v5273_v17  ;;  %v5285_v18 = vperm.slane %v5278_v58, 3  ;;  %v2178_v10 = vmul.f32 %v2176_v23, %v8208_v60  ;;  %v5290_v15 = vadd.f32 %v8208_v60, %v5252_v20  ;;  %v5293_v13 = vmul.f32 0.5, %v8225_v7 }
  0xa4   : > { %8222 = vst [vmem:[#allocation78_spill] sm:$0xff] %v5278_v58  ;;  %v2160_v43 = vadd.f32 %v2158_v40, %v1852_v5  ;;  %v2170_v42 = vadd.f32 %v2168_v31, %v1874_v53  ;;  %v2214_v50 = vadd.f32 %v2212_v45, %v5264_v39  ;;  %v2248_v48 = vmul.f32 0.33333334, %v8225_v7 }
  0xa5   : > { %8223 = vst [vmem:[#allocation79_spill] sm:$0xff] %v5285_v18  ;;  %v2162_v21 = vmul.f32 %v5285_v18, %v5255_v44  ;;  %v2172_v19 = vmul.f32 %v5285_v18, %v5267_v49  ;;  %v2180_v25 = vadd.f32 %v2178_v10, %v1896_v24  ;;  %v2182_v23 = vmul.f32 %v5285_v18, %v5273_v17 }
  0xa6   : > { %8224 = vst [vmem:[#allocation80_spill] sm:$0xff] %v5290_v15  ;;  %v5304_v20 = vadd.f32 %v2214_v50, %v5273_v17  ;;  %v2236_v40 = vperm.slane %v5293_v13, 5  ;;  %v2240_v31 = vperm.slane %v5293_v13, 6  ;;  %v2244_v5 = vperm.slane %v5293_v13, 7 }
  0xa7   : > { %8226 = vst [vmem:[#allocation81_spill] sm:$0xff] %v5293_v13  ;;  %v2164_v53 = vadd.f32 %v2162_v21, %v2160_v43  ;;  %v2174_v45 = vadd.f32 %v2172_v19, %v2170_v42  ;;  %v2184_v60 = vadd.f32 %v2182_v23, %v2180_v25  ;;  %v2252_v44 = vrot.slane %v2248_v48, 4  ;;  %v8231_v25 = vld [vmem:[#allocation23_spill] sm:$0xff] }
  0xa8   : > { %v5310_v39 = vmul.f32 %v2236_v40, %v8225_v7  ;;  %v5313_v10 = vmul.f32 %v2240_v31, %v8225_v7  ;;  %v5316_v24 = vmul.f32 %v2244_v5, %v8225_v7  ;;  %v2552_v50 = vperm.slane %v5304_v20, 1 }
  0xa9   : > { %v5320_v49 = vadd.f32 %v2252_v44, %v5290_v15  ;;  %v2574_v13 = vperm.slane %v5304_v20, 2  ;;  %v2596_v43 = vperm.slane %v5304_v20, 3  ;;  %v2678_v42 = vperm.slane %v5290_v15, 3 }
  0xaa   : > { %8227 = vst [vmem:[#allocation82_spill] sm:$0xff] %v5310_v39  ;;  %v2554_v48 = vmul.f32 %v2552_v50, %v8225_v7  ;;  %v2692_v21 = vrot.slane %v5316_v24, 4  ;;  %v2700_v19 = vrot.slane %v8225_v7, 4  ;;  %v5329_v23 = vmul.f32 0.5, %v8231_v25 }
  0xab   : > { %8228 = vst [vmem:[#allocation83_spill] sm:$0xff] %v5313_v10  ;;  %v5332_v40 = vperm.slane %v5320_v49, 3  ;;  %v2576_v44 = vmul.f32 %v2574_v13, %v8225_v7  ;;  %v2598_v31 = vmul.f32 %v2596_v43, %v8225_v7  ;;  %v2680_v5 = vmul.f32 %v2678_v42, %v8225_v7 }
  0xac   : > { %8229 = vst [vmem:[#allocation84_spill] sm:$0xff] %v5316_v24  ;;  %v2558_v18 = vrot.slane %v2554_v48, 4  ;;  %v5338_v17 = vadd.f32 %v2700_v19, %v5290_v15  ;;  %v2722_v50 = vperm.slane %v5329_v23, 1  ;;  %v2726_v58 = vperm.slane %v5329_v23, 2 }
  0xad   : > { %8230 = vst [vmem:[#allocation85_spill] sm:$0xff] %v5320_v49  ;;  %v2564_v29 = vmul.f32 %v5332_v40, %v5310_v39  ;;  %v2580_v37 = vrot.slane %v2576_v44, 4  ;;  %v2586_v49 = vmul.f32 %v5332_v40, %v5313_v10  ;;  %v2602_v13 = vrot.slane %v2598_v31, 4 }
  0xae   : > { %8232 = vst [vmem:[#allocation86_spill] sm:$0xff] %v5329_v23  ;;  %v2562_v0 = vadd.f32 %v2558_v18, %v2164_v53  ;;  %v2608_v43 = vmul.f32 %v5332_v40, %v5316_v24  ;;  %v2684_v42 = vrot.slane %v2680_v5, 4  ;;  %v5349_v48 = vmul.f32 %v2722_v50, %v8231_v25 }
  0xaf   : > { %8233 = vst [vmem:[#allocation87_spill] sm:$0xff] %v5332_v40  ;;  %v2568_v19 = vrot.slane %v2564_v29, 4  ;;  %v2584_v7 = vadd.f32 %v2580_v37, %v2174_v45  ;;  %v2590_v15 = vrot.slane %v2586_v49, 4  ;;  %v2606_v30 = vadd.f32 %v2602_v13, %v2184_v60  ;;  %v8241_v49 = vld [vmem:[#allocation25_spill] sm:$0xff] }
  0xb0   : > { %8234 = vst [vmem:[#allocation88_spill] sm:$0xff] %v5338_v17  ;;  %v2612_v41 = vrot.slane %v2608_v43, 4  ;;  %v2688_v39 = vadd.f32 %v2684_v42, %v5304_v20  ;;  %v5353_v44 = vmul.f32 %v2726_v58, %v8231_v25  ;;  %v2730_v31 = vperm.slane %v5329_v23, 3 }
  0xb1   : > { %8235 = vst [vmem:[#allocation89_spill] sm:$0xff] %v5349_v48  ;;  %v2572_v18 = vadd.f32 %v2568_v19, %v2562_v0  ;;  %v2594_v53 = vadd.f32 %v2590_v15, %v2584_v7  ;;  %v2734_v40 = vmul.f32 0.33333334, %v8231_v25  ;;  %v2930_v5 = vperm.slane %v5338_v17, 3 }
  0xb2   : > { %8236 = vst [vmem:[#allocation90_spill] sm:$0xff] %v5353_v44  ;;  %v2616_v50 = vadd.f32 %v2612_v41, %v2606_v30  ;;  %v5358_v24 = vadd.f32 %v2692_v21, %v2688_v39  ;;  %v5361_v29 = vmul.f32 %v2730_v31, %v8231_v25  ;;  %v5365_v60 = vadd.f32 %v8231_v25, %v5338_v17 }
  0xb3   : > { %v5368_v37 = vadd.f32 %v2734_v40, %v5338_v17  ;;  %v2932_v0 = vmul.f32 %v2930_v5, %v8231_v25  ;;  %v5372_v58 = vmul.f32 0.5, %v8241_v49  ;;  %v2968_v15 = vmul.f32 0.33333334, %v8241_v49 }
  0xb4   : > { %8237 = vst [vmem:[#allocation91_spill] sm:$0xff] %v5358_v24  ;;  %v2876_v41 = vperm.slane %v5358_v24, 1  ;;  %v2886_v30 = vperm.slane %v5358_v24, 2  ;;  %v2896_v39 = vperm.slane %v5358_v24, 3  ;;  %v3398_v7 = vperm.slane %v5365_v60, 3 }
  0xb5   : > { %8238 = vst [vmem:[#allocation92_spill] sm:$0xff] %v5361_v29  ;;  %v5380_v45 = vperm.slane %v5368_v37, 3  ;;  %v2934_v21 = vadd.f32 %v2932_v0, %v5358_v24  ;;  %v2956_v40 = vperm.slane %v5372_v58, 5  ;;  %v2960_v13 = vperm.slane %v5372_v58, 6 }
  0xb6   : > { %8239 = vst [vmem:[#allocation93_spill] sm:$0xff] %v5365_v60  ;;  %v2878_v43 = vmul.f32 %v2876_v41, %v8231_v25  ;;  %v2888_v42 = vmul.f32 %v2886_v30, %v8231_v25  ;;  %v2898_v19 = vmul.f32 %v2896_v39, %v8231_v25  ;;  %v2964_v31 = vperm.slane %v5372_v58, 7 }
  0xb7   : > { %8240 = vst [vmem:[#allocation94_spill] sm:$0xff] %v5368_v37  ;;  %v2882_v5 = vmul.f32 %v5380_v45, %v5349_v48  ;;  %v2892_v17 = vmul.f32 %v5380_v45, %v5353_v44  ;;  %v2902_v0 = vmul.f32 %v5380_v45, %v5361_v29  ;;  %v5396_v24 = vadd.f32 %v2934_v21, %v5361_v29 }
  0xb8   : > { %8242 = vst [vmem:[#allocation95_spill] sm:$0xff] %v5372_v58  ;;  %v2880_v37 = vadd.f32 %v2878_v43, %v2572_v18  ;;  %v2890_v41 = vadd.f32 %v2888_v42, %v2594_v53  ;;  %v2900_v23 = vadd.f32 %v2898_v19, %v2616_v50  ;;  %v5399_v30 = vmul.f32 %v2956_v40, %v8241_v49 }
  0xb9   : > { %8243 = vst [vmem:[#allocation96_spill] sm:$0xff] %v5380_v45  ;;  %v5402_v39 = vmul.f32 %v2960_v13, %v8241_v49  ;;  %v5405_v48 = vmul.f32 %v2964_v31, %v8241_v49  ;;  %v2972_v58 = vrot.slane %v2968_v15, 4  ;;  %v3272_v44 = vperm.slane %v5396_v24, 1 }
  0xba   : > { %8244 = vst [vmem:[#allocation97_spill] sm:$0xff] %v5396_v24  ;;  %v2884_v25 = vadd.f32 %v2882_v5, %v2880_v37  ;;  %v2894_v45 = vadd.f32 %v2892_v17, %v2890_v41  ;;  %v2904_v10 = vadd.f32 %v2902_v0, %v2900_v23  ;;  %v3294_v21 = vperm.slane %v5396_v24, 2  ;;  %v8249_v37 = vld [vmem:[#allocation27_spill] sm:$0xff] }
  0xbb   : > { %8245 = vst [vmem:[#allocation98_spill] sm:$0xff] %v5399_v30  ;;  %v5410_v18 = vadd.f32 %v2972_v58, %v5365_v60  ;;  %v3274_v53 = vmul.f32 %v3272_v44, %v8241_v49  ;;  %v3316_v50 = vperm.slane %v5396_v24, 3  ;;  %v3400_v40 = vmul.f32 %v3398_v7, %v8241_v49 }
  0xbc   : > { %8246 = vst [vmem:[#allocation99_spill] sm:$0xff] %v5402_v39  ;;  %v3296_v13 = vmul.f32 %v3294_v21, %v8241_v49  ;;  %v3412_v15 = vrot.slane %v5405_v48, 4  ;;  %v3420_v43 = vrot.slane %v8241_v49, 4  ;;  %v5419_v17 = vmul.f32 0.5, %v8249_v37 }
  0xbd   : > { %8247 = vst [vmem:[#allocation100_spill] sm:$0xff] %v5405_v48  ;;  %v5422_v23 = vperm.slane %v5410_v18, 3  ;;  %v3278_v58 = vrot.slane %v3274_v53, 4  ;;  %v3318_v42 = vmul.f32 %v3316_v50, %v8241_v49  ;;  %v3404_v44 = vrot.slane %v3400_v40, 4 }
  0xbe   : > { %8248 = vst [vmem:[#allocation101_spill] sm:$0xff] %v5410_v18  ;;  %v3300_v19 = vrot.slane %v3296_v13, 4  ;;  %v5426_v31 = vadd.f32 %v3420_v43, %v5365_v60  ;;  %v3442_v7 = vperm.slane %v5419_v17, 1  ;;  %v3446_v5 = vperm.slane %v5419_v17, 2 }
  0xbf   : > { %8250 = vst [vmem:[#allocation102_spill] sm:$0xff] %v5419_v17  ;;  %v3282_v0 = vadd.f32 %v3278_v58, %v2884_v25  ;;  %v3284_v41 = vmul.f32 %v5422_v23, %v5399_v30  ;;  %v3306_v21 = vmul.f32 %v5422_v23, %v5402_v39  ;;  %v3322_v53 = vrot.slane %v3318_v42, 4 }
  0xc0   : > { %8251 = vst [vmem:[#allocation103_spill] sm:$0xff] %v5422_v23  ;;  %v3304_v18 = vadd.f32 %v3300_v19, %v2894_v45  ;;  %v3328_v50 = vmul.f32 %v5422_v23, %v5405_v48  ;;  %v3408_v40 = vadd.f32 %v3404_v44, %v5396_v24  ;;  %v5438_v13 = vmul.f32 %v3442_v7, %v8249_v37  ;;  %v5448_v19 = vld [vmem:[%s4772_s25 + $0x8] sm:$0xf] }
  0xc1   : > { %8252 = vst [vmem:[#allocation104_spill] sm:$0xff] %v5426_v31  ;;  %v3288_v43 = vrot.slane %v3284_v41, 4  ;;  %v3310_v60 = vrot.slane %v3306_v21, 4  ;;  %v3326_v25 = vadd.f32 %v3322_v53, %v2904_v10  ;;  %v5441_v58 = vmul.f32 %v3446_v5, %v8249_v37 }
  0xc2   : > { %8253 = vst [vmem:[#allocation105_spill] sm:$0xff] %v5438_v13  ;;  %v3332_v30 = vrot.slane %v3328_v50, 4  ;;  %v5443_v49 = vadd.f32 %v3412_v15, %v3408_v40  ;;  %v3450_v42 = vperm.slane %v5419_v17, 3  ;;  %v3454_v45 = vmul.f32 0.33333334, %v8249_v37 }
  0xc3   : > { %8254 = vst [vmem:[#allocation106_spill] sm:$0xff] %v5441_v58  ;;  %v3292_v39 = vadd.f32 %v3288_v43, %v3282_v0  ;;  %v3314_v44 = vadd.f32 %v3310_v60, %v3304_v18  ;;  %v5451_v7 = vmul.f32 0.5, %v5448_v19  ;;  %v5454_v41 = vmul.f32 0.33333334, %v5448_v19 }
  0xc4   : > { %8255 = vst [vmem:[#allocation107_spill] sm:$0xff] %v5443_v49  ;;  %v3336_v10 = vadd.f32 %v3332_v30, %v3326_v25  ;;  %v5457_v5 = vmul.f32 %v3450_v42, %v8249_v37  ;;  %v5460_v15 = vadd.f32 %v3454_v45, %v5426_v31  ;;  %v3596_v21 = vperm.slane %v5443_v49, 1 }
  0xc5   : > { %8256 = vst [vmem:[#allocation108_spill] sm:$0xff] %v5448_v19  ;;  %v3606_v53 = vperm.slane %v5443_v49, 2  ;;  %v3616_v0 = vperm.slane %v5443_v49, 3  ;;  %v1399_v60 = vperm.slane %v5451_v7, 1  ;;  %v1403_v18 = vperm.slane %v5451_v7, 2 }
  0xc6   : > { %8257 = vst [vmem:[#allocation109_spill] sm:$0xff] %v5451_v7  ;;  %v5468_v50 = vperm.slane %v5460_v15, 3  ;;  %v3598_v30 = vmul.f32 %v3596_v21, %v8249_v37  ;;  %v1407_v40 = vperm.slane %v5451_v7, 3  ;;  %v5473_v43 = vmul.f32 0.0, %v5448_v19 }
  0xc7   : > { %8258 = vst [vmem:[#allocation110_spill] sm:$0xff] %v5454_v41  ;;  %v3608_v25 = vmul.f32 %v3606_v53, %v8249_v37  ;;  %v3618_v42 = vmul.f32 %v3616_v0, %v8249_v37  ;;  %v5478_v45 = vmul.f32 %v1399_v60, %v5448_v19  ;;  %v5481_v31 = vmul.f32 %v1403_v18, %v5448_v19 }
  0xc8   : > { %8259 = vst [vmem:[#allocation111_spill] sm:$0xff] %v5457_v5  ;;  %v3600_v49 = vadd.f32 %v3598_v30, %v3292_v39  ;;  %v3612_v21 = vmul.f32 %v5468_v50, %v5441_v58  ;;  %v3622_v7 = vmul.f32 %v5468_v50, %v5457_v5  ;;  %v5490_v0 = vmul.f32 %v1407_v40, %v5448_v19 }
  0xc9   : > { %8260 = vst [vmem:[#allocation112_spill] sm:$0xff] %v5460_v15  ;;  %v3602_v15 = vmul.f32 %v5468_v50, %v5438_v13  ;;  %v3610_v53 = vadd.f32 %v3608_v25, %v3314_v44  ;;  %v3620_v17 = vadd.f32 %v3618_v42, %v3336_v10  ;;  %v5493_v60 = vperm.slane %v5454_v41, 3  ;;  %v8267_v13 = vld [vmem:[#allocation19_spill] sm:$0xff] }
  0xca   : > { %8261 = vst [vmem:[#allocation113_spill] sm:$0xff] %v5468_v50  ;;  %v1505_v39 = vrot.slane %v5448_v19, 4  ;;  %v1959_v30 = vperm.slane %v5448_v19, 3  ;;  %v5498_v37 = vmul.f32 0.5, %v8267_v13 }
  0xcb   : > { %8262 = vst [vmem:[#allocation114_spill] sm:$0xff] %v5473_v43  ;;  %v3604_v18 = vadd.f32 %v3602_v15, %v3600_v49  ;;  %v3614_v58 = vadd.f32 %v3612_v21, %v3610_v53  ;;  %v3624_v23 = vadd.f32 %v3622_v7, %v3620_v17  ;;  %v1479_v44 = vmul.f32 %v5493_v60, %v5478_v45  ;;  %v4552_v15 = vld [vmem:[%s4772_s25 + $0x8] sm:$0xf0] }
  0xcc   : > { %8263 = vst [vmem:[#allocation115_spill] sm:$0xff] %v5478_v45  ;;  %v1483_v10 = vmul.f32 %v5493_v60, %v5481_v31  ;;  %v1487_v40 = vmul.f32 %v5493_v60, %v5490_v0  ;;  %v5508_v49 = vadd.f32 %v5473_v43, %v5490_v0  ;;  %v5511_v25 = vsub.f32 %v4552_v15, %v1505_v39 }
  0xcd   : > { %8264 = vst [vmem:[#allocation116_spill] sm:$0xff] %v5481_v31  ;;  %v2003_v42 = vperm.slane %v5498_v37, 1  ;;  %v3732_v21 = vrot.slane %v3614_v58, 4  ;;  %v3800_v17 = vrot.slane %v3624_v23, 4  ;;  %v1481_v7 = vadd.f32 %v1479_v44, %v5473_v43 }
  0xce   : > { %8265 = vst [vmem:[#allocation117_spill] sm:$0xff] %v5490_v0  ;;  %v1485_v53 = vadd.f32 %v1483_v10, %v5473_v43  ;;  %v1489_v45 = vadd.f32 %v1487_v40, %v5473_v43  ;;  %v5518_v31 = vmul.f32 0.5, %v5511_v25  ;;  %v1833_v0 = vperm.slane %v5508_v49, 1 }
  0xcf   : > { %8266 = vst [vmem:[#allocation118_spill] sm:$0xff] %v5493_v60  ;;  %v1529_v60 = vmul.f32 0.33333334, %v5511_v25  ;;  %v5523_v39 = vsel %vm1335_vm0, %v3604_v18, %v3732_v21  ;;  %v1855_v15 = vperm.slane %v5508_v49, 2  ;;  %v1877_v23 = vperm.slane %v5508_v49, 3 }
  0xd0   : > { %8268 = vst [vmem:[#allocation119_spill] sm:$0xff] %v5498_v37  ;;  %v1961_v58 = vmul.f32 %v1959_v30, %v5511_v25  ;;  %v7759_v44 = vrot.slane %v5523_v39, 4  ;;  %v1517_v10 = vperm.slane %v5518_v31, 5  ;;  %v1521_v40 = vperm.slane %v5518_v31, 6 }
  0xd1   : > { %8269 = vst [vmem:[#allocation120_spill] sm:$0xff] %v5508_v49  ;;  %v1525_v43 = vperm.slane %v5518_v31, 7  ;;  %v1533_v41 = vrot.slane %v1529_v60, 4  ;;  %v1835_v50 = vmul.f32 %v1833_v0, %v5511_v25  ;;  %v1857_v18 = vmul.f32 %v1855_v15, %v5511_v25 }
  0xd2   : > { %8270 = vst [vmem:[#allocation121_spill] sm:$0xff] %v5511_v25  ;;  %v1879_v21 = vmul.f32 %v1877_v23, %v5511_v25  ;;  %v5538_v5 = vsel %vm1335_vm0, %v7759_v44, %v3800_v17  ;;  %v5541_v30 = vmul.f32 %v1517_v10, %v5511_v25  ;;  %v5544_v48 = vmul.f32 %v1521_v40, %v5511_v25 }
  0xd3   : > { %8271 = vst [vmem:[#allocation122_spill] sm:$0xff] %v5518_v31  ;;  %v5547_v31 = vmul.f32 %v1525_v43, %v5511_v25  ;;  %v7761_v0 = vrot.slane %v5538_v5, 4  ;;  %v5551_v60 = vadd.f32 %v1533_v41, %v5448_v19  ;;  %v1839_v15 = vrot.slane %v1835_v50, 4 }
  0xd4   : > { %8272 = vst [vmem:[#allocation123_spill] sm:$0xff] %v5523_v39  ;;  %v1861_v23 = vrot.slane %v1857_v18, 4  ;;  %v1883_v39 = vrot.slane %v1879_v21, 4  ;;  %v1965_v24 = vrot.slane %v1961_v58, 4  ;;  %v1981_v10 = vrot.slane %v5511_v25, 4 }
  0xd5   : > { %8273 = vst [vmem:[#allocation124_spill] sm:$0xff] %v5538_v5  ;;  %v1973_v17 = vrot.slane %v5547_v31, 4  ;;  %4484 = vmatpush.msk.msra.mxu0 %vm1335_vm0, %v7761_v0  ;;  %v5559_v43 = vperm.slane %v5551_v60, 3  ;;  %v1843_v40 = vadd.f32 %v1839_v15, %v1481_v7  ;;  %v5562_v41 = vmul.f32 %v2003_v42, %v8267_v13 }
  0xd6   : > { %8274 = vst [vmem:[#allocation125_spill] sm:$0xff] %v5541_v30  ;;  %v1865_v44 = vadd.f32 %v1861_v23, %v1485_v53  ;;  %v1887_v50 = vadd.f32 %v1883_v39, %v1489_v45  ;;  %v1969_v18 = vadd.f32 %v1965_v24, %v5508_v49  ;;  %v5566_v58 = vadd.f32 %v1981_v10, %v5448_v19 }
  0xd7   : > { %8275 = vst [vmem:[#allocation126_spill] sm:$0xff] %v5544_v48  ;;  %v2007_v21 = vperm.slane %v5498_v37, 2  ;;  %v1845_v5 = vmul.f32 %v5559_v43, %v5541_v30  ;;  %v1867_v0 = vmul.f32 %v5559_v43, %v5544_v48  ;;  %v1889_v7 = vmul.f32 %v5559_v43, %v5547_v31 }
  0xd8   : > { %8276 = vst [vmem:[#allocation127_spill] sm:$0xff] %v5547_v31  ;;  %v2011_v42 = vperm.slane %v5498_v37, 3  ;;  %v5576_v53 = vadd.f32 %v1973_v17, %v1969_v18  ;;  %v2015_v45 = vmul.f32 0.33333334, %v8267_v13  ;;  %v2211_v39 = vperm.slane %v5566_v58, 3 }
  0xd9   : > { %8277 = vst [vmem:[#allocation128_spill] sm:$0xff] %v5551_v60  ;;  %v5579_v24 = vmul.f32 %v2007_v21, %v8267_v13  ;;  %v1849_v15 = vrot.slane %v1845_v5, 4  ;;  %v1871_v23 = vrot.slane %v1867_v0, 4  ;;  %v1893_v10 = vrot.slane %v1889_v7, 4 }
  0xda   : > { %8278 = vst [vmem:[#allocation129_spill] sm:$0xff] %v5559_v43  ;;  %v5584_v30 = vmul.f32 %v2011_v42, %v8267_v13  ;;  %v5587_v48 = vadd.f32 %v2015_v45, %v5566_v58  ;;  %v2157_v37 = vperm.slane %v5576_v53, 1  ;;  %v2167_v17 = vperm.slane %v5576_v53, 2 }
  0xdb   : > { %8279 = vst [vmem:[#allocation130_spill] sm:$0xff] %v5562_v41  ;;  %v2177_v18 = vperm.slane %v5576_v53, 3  ;;  %v1853_v21 = vadd.f32 %v1849_v15, %v1843_v40  ;;  %v1875_v43 = vadd.f32 %v1871_v23, %v1865_v44  ;;  %v1897_v49 = vadd.f32 %v1893_v10, %v1887_v50  ;;  %v8287_v40 = vld [vmem:[#allocation22_spill] sm:$0xff] }
  0xdc   : > { %8280 = vst [vmem:[#allocation131_spill] sm:$0xff] %v5566_v58  ;;  %v2213_v31 = vmul.f32 %v2211_v39, %v8267_v13  ;;  %v5594_v5 = vperm.slane %v5587_v48, 3  ;;  %v2159_v0 = vmul.f32 %v2157_v37, %v8267_v13  ;;  %v2169_v7 = vmul.f32 %v2167_v17, %v8267_v13 }
  0xdd   : > { %8281 = vst [vmem:[#allocation132_spill] sm:$0xff] %v5576_v53  ;;  %v2179_v42 = vmul.f32 %v2177_v18, %v8267_v13  ;;  %v5602_v25 = vadd.f32 %v8267_v13, %v5566_v58  ;;  %v5605_v44 = vmul.f32 0.5, %v8287_v40  ;;  %v2249_v50 = vmul.f32 0.33333334, %v8287_v40 }
  0xde   : > { %8282 = vst [vmem:[#allocation133_spill] sm:$0xff] %v5579_v24  ;;  %v2215_v45 = vadd.f32 %v2213_v31, %v5576_v53  ;;  %v2161_v39 = vadd.f32 %v2159_v0, %v1853_v21  ;;  %v2163_v15 = vmul.f32 %v5594_v5, %v5562_v41  ;;  %v2171_v37 = vadd.f32 %v2169_v7, %v1875_v43 }
  0xdf   : > { %8283 = vst [vmem:[#allocation134_spill] sm:$0xff] %v5584_v30  ;;  %v2173_v23 = vmul.f32 %v5594_v5, %v5579_v24  ;;  %v2181_v10 = vadd.f32 %v2179_v42, %v1897_v49  ;;  %v2183_v31 = vmul.f32 %v5594_v5, %v5584_v30  ;;  %v2237_v18 = vperm.slane %v5605_v44, 5 }
  0xe0   : > { %8284 = vst [vmem:[#allocation135_spill] sm:$0xff] %v5587_v48  ;;  %v5615_v17 = vadd.f32 %v2215_v45, %v5584_v30  ;;  %v2165_v58 = vadd.f32 %v2163_v15, %v2161_v39  ;;  %v2241_v21 = vperm.slane %v5605_v44, 6  ;;  %v2245_v0 = vperm.slane %v5605_v44, 7 }
  0xe1   : > { %8285 = vst [vmem:[#allocation136_spill] sm:$0xff] %v5594_v5  ;;  %v2175_v13 = vadd.f32 %v2173_v23, %v2171_v37  ;;  %v2185_v41 = vadd.f32 %v2183_v31, %v2181_v10  ;;  %v5621_v43 = vmul.f32 %v2237_v18, %v8287_v40  ;;  %v2253_v7 = vrot.slane %v2249_v50, 4 }
  0xe2   : > { %8286 = vst [vmem:[#allocation137_spill] sm:$0xff] %v5602_v25  ;;  %v2553_v49 = vperm.slane %v5615_v17, 1  ;;  %v5625_v42 = vmul.f32 %v2241_v21, %v8287_v40  ;;  %v5628_v45 = vmul.f32 %v2245_v0, %v8287_v40  ;;  %v2575_v39 = vperm.slane %v5615_v17, 2  ;;  %v8294_v0 = vld [vmem:[#allocation24_spill] sm:$0xff] }
  0xe3   : > { %8288 = vst [vmem:[#allocation138_spill] sm:$0xff] %v5605_v44  ;;  %v2597_v15 = vperm.slane %v5615_v17, 3  ;;  %v5633_v37 = vadd.f32 %v2253_v7, %v5602_v25  ;;  %v2679_v10 = vperm.slane %v5602_v25, 3  ;;  %v2701_v50 = vrot.slane %v8287_v40, 4 }
  0xe4   : > { %8289 = vst [vmem:[#allocation139_spill] sm:$0xff] %v5615_v17  ;;  %v2555_v23 = vmul.f32 %v2553_v49, %v8287_v40  ;;  %v2577_v31 = vmul.f32 %v2575_v39, %v8287_v40  ;;  %v2693_v21 = vrot.slane %v5628_v45, 4  ;;  %v5642_v24 = vmul.f32 0.5, %v8294_v0 }
  0xe5   : > { %8290 = vst [vmem:[#allocation140_spill] sm:$0xff] %v5621_v43  ;;  %v2599_v18 = vmul.f32 %v2597_v15, %v8287_v40  ;;  %v5645_v44 = vperm.slane %v5633_v37, 3  ;;  %v2681_v5 = vmul.f32 %v2679_v10, %v8287_v40  ;;  %v5649_v49 = vadd.f32 %v2701_v50, %v5602_v25 }
  0xe6   : > { %8291 = vst [vmem:[#allocation141_spill] sm:$0xff] %v5625_v42  ;;  %v2559_v7 = vrot.slane %v2555_v23, 4  ;;  %v2581_v30 = vrot.slane %v2577_v31, 4  ;;  %v2723_v39 = vperm.slane %v5642_v24, 1  ;;  %v2727_v15 = vperm.slane %v5642_v24, 2 }
  0xe7   : > { %8292 = vst [vmem:[#allocation142_spill] sm:$0xff] %v5628_v45  ;;  %v2603_v53 = vrot.slane %v2599_v18, 4  ;;  %v2565_v60 = vmul.f32 %v5645_v44, %v5621_v43  ;;  %v2609_v23 = vmul.f32 %v5645_v44, %v5628_v45  ;;  %v2685_v50 = vrot.slane %v2681_v5, 4 }
  0xe8   : > { %8293 = vst [vmem:[#allocation143_spill] sm:$0xff] %v5633_v37  ;;  %v2563_v48 = vadd.f32 %v2559_v7, %v2165_v58  ;;  %v2587_v37 = vmul.f32 %v5645_v44, %v5625_v42  ;;  %v2585_v10 = vadd.f32 %v2581_v30, %v2175_v13  ;;  %v5660_v31 = vmul.f32 %v2723_v39, %v8294_v0 }
  0xe9   : > { %8295 = vst [vmem:[#allocation144_spill] sm:$0xff] %v5642_v24  ;;  %v2607_v40 = vadd.f32 %v2603_v53, %v2185_v41  ;;  %v2569_v18 = vrot.slane %v2565_v60, 4  ;;  %v2613_v19 = vrot.slane %v2609_v23, 4  ;;  %v5663_v58 = vmul.f32 %v2727_v15, %v8294_v0  ;;  %v8304_v15 = vld [vmem:[#allocation26_spill] sm:$0xff] }
  0xea   : > { %8296 = vst [vmem:[#allocation145_spill] sm:$0xff] %v5645_v44  ;;  %v2591_v25 = vrot.slane %v2587_v37, 4  ;;  %v2689_v7 = vadd.f32 %v2685_v50, %v5615_v17  ;;  %v2731_v43 = vperm.slane %v5642_v24, 3  ;;  %v2735_v42 = vmul.f32 0.33333334, %v8294_v0 }
  0xeb   : > { %8297 = vst [vmem:[#allocation146_spill] sm:$0xff] %v5649_v49  ;;  %v2931_v44 = vperm.slane %v5649_v49, 3  ;;  %v2573_v13 = vadd.f32 %v2569_v18, %v2563_v48  ;;  %v2617_v41 = vadd.f32 %v2613_v19, %v2607_v40  ;;  %v5671_v53 = vadd.f32 %v8294_v0, %v5649_v49 }
  0xec   : > { %8298 = vst [vmem:[#allocation147_spill] sm:$0xff] %v5660_v31  ;;  %v2595_v30 = vadd.f32 %v2591_v25, %v2585_v10  ;;  %v5673_v60 = vadd.f32 %v2693_v21, %v2689_v7  ;;  %v5676_v5 = vmul.f32 %v2731_v43, %v8294_v0  ;;  %v5679_v37 = vadd.f32 %v2735_v42, %v5649_v49 }
  0xed   : > { %8299 = vst [vmem:[#allocation148_spill] sm:$0xff] %v5663_v58  ;;  %v2933_v39 = vmul.f32 %v2931_v44, %v8294_v0  ;;  %v5683_v23 = vmul.f32 0.5, %v8304_v15  ;;  %v2969_v48 = vmul.f32 0.33333334, %v8304_v15  ;;  %v3399_v19 = vperm.slane %v5671_v53, 3 }
  0xee   : > { %8300 = vst [vmem:[#allocation149_spill] sm:$0xff] %v5671_v53  ;;  %v3421_v25 = vrot.slane %v8304_v15, 4  ;;  %v5689_v40 = vperm.slane %v5679_v37, 3  ;;  %v2877_v43 = vperm.slane %v5673_v60, 1  ;;  %v2887_v21 = vperm.slane %v5673_v60, 2 }
  0xef   : > { %8301 = vst [vmem:[#allocation150_spill] sm:$0xff] %v5673_v60  ;;  %v2897_v42 = vperm.slane %v5673_v60, 3  ;;  %v2935_v44 = vadd.f32 %v2933_v39, %v5673_v60  ;;  %v2957_v10 = vperm.slane %v5683_v23, 5  ;;  %v2961_v50 = vperm.slane %v5683_v23, 6 }
  0xf0   : > { %8302 = vst [vmem:[#allocation151_spill] sm:$0xff] %v5676_v5  ;;  %v2965_v18 = vperm.slane %v5683_v23, 7  ;;  %v2879_v7 = vmul.f32 %v2877_v43, %v8294_v0  ;;  %v2883_v49 = vmul.f32 %v5689_v40, %v5660_v31  ;;  %v2893_v24 = vmul.f32 %v5689_v40, %v5663_v58 }
  0xf1   : > { %8303 = vst [vmem:[#allocation152_spill] sm:$0xff] %v5679_v37  ;;  %v2889_v37 = vmul.f32 %v2887_v21, %v8294_v0  ;;  %v2899_v45 = vmul.f32 %v2897_v42, %v8294_v0  ;;  %v2903_v39 = vmul.f32 %v5689_v40, %v5676_v5  ;;  %v5708_v60 = vadd.f32 %v2935_v44, %v5676_v5 }
  0xf2   : > { %8305 = vst [vmem:[#allocation153_spill] sm:$0xff] %v5683_v23  ;;  %v5711_v23 = vmul.f32 %v2957_v10, %v8304_v15  ;;  %v2881_v43 = vadd.f32 %v2879_v7, %v2573_v13  ;;  %v5714_v31 = vmul.f32 %v2961_v50, %v8304_v15  ;;  %v5717_v21 = vmul.f32 %v2965_v18, %v8304_v15 }
  0xf3   : > { %8306 = vst [vmem:[#allocation154_spill] sm:$0xff] %v5689_v40  ;;  %v2891_v17 = vadd.f32 %v2889_v37, %v2595_v30  ;;  %v2901_v58 = vadd.f32 %v2899_v45, %v2617_v41  ;;  %v2973_v29 = vrot.slane %v2969_v48, 4  ;;  %v3273_v42 = vperm.slane %v5708_v60, 1 }
  0xf4   : > { %8307 = vst [vmem:[#allocation155_spill] sm:$0xff] %v5711_v23  ;;  %v3295_v40 = vperm.slane %v5708_v60, 2  ;;  %v2885_v0 = vadd.f32 %v2883_v49, %v2881_v43  ;;  %v3317_v5 = vperm.slane %v5708_v60, 3  ;;  %v3401_v10 = vmul.f32 %v3399_v19, %v8304_v15  ;;  %v8312_v19 = vld [vmem:[#allocation29_spill] sm:$0xff] }
  0xf5   : > { %8308 = vst [vmem:[#allocation156_spill] sm:$0xff] %v5714_v31  ;;  %v2895_v44 = vadd.f32 %v2893_v24, %v2891_v17  ;;  %v2905_v13 = vadd.f32 %v2903_v39, %v2901_v58  ;;  %v5724_v30 = vadd.f32 %v2973_v29, %v5671_v53  ;;  %v3275_v37 = vmul.f32 %v3273_v42, %v8304_v15 }
  0xf6   : > { %8309 = vst [vmem:[#allocation157_spill] sm:$0xff] %v5717_v21  ;;  %v3297_v50 = vmul.f32 %v3295_v40, %v8304_v15  ;;  %v3319_v45 = vmul.f32 %v3317_v5, %v8304_v15  ;;  %v3405_v41 = vrot.slane %v3401_v10, 4  ;;  %v3413_v48 = vrot.slane %v5717_v21, 4 }
  0xf7   : > { %8310 = vst [vmem:[#allocation158_spill] sm:$0xff] %v5724_v30  ;;  %v5731_v49 = vadd.f32 %v3421_v25, %v5671_v53  ;;  %v5734_v24 = vperm.slane %v5724_v30, 3  ;;  %v3279_v17 = vrot.slane %v3275_v37, 4  ;;  %v5737_v29 = vmul.f32 0.5, %v8312_v19 }
  0xf8   : > { %v3301_v58 = vrot.slane %v3297_v50, 4  ;;  %v3323_v18 = vrot.slane %v3319_v45, 4  ;;  %v3409_v7 = vadd.f32 %v3405_v41, %v5708_v60  ;;  %v3455_v40 = vmul.f32 0.33333334, %v8312_v19 }
  0xf9   : > { %8311 = vst [vmem:[#allocation159_spill] sm:$0xff] %v5731_v49  ;;  %v5742_v5 = vperm.slane %v4726_v22, 1  ;;  %v3283_v39 = vadd.f32 %v3279_v17, %v2885_v0  ;;  %v3285_v25 = vmul.f32 %v5734_v24, %v5711_v23  ;;  %v3307_v42 = vmul.f32 %v5734_v24, %v5714_v31 }
  0xfa   : > { %v3305_v43 = vadd.f32 %v3301_v58, %v2895_v44  ;;  %v3327_v10 = vadd.f32 %v3323_v18, %v2905_v13  ;;  %v3329_v37 = vmul.f32 %v5734_v24, %v5717_v21  ;;  %v5750_v50 = vadd.f32 %v3413_v48, %v3409_v7 }
  0xfb   : > { %8313 = vst [vmem:[#allocation160_spill] sm:$0xff] %v5742_v5  ;;  %v3443_v45 = vperm.slane %v5737_v29, 1  ;;  %v3289_v41 = vrot.slane %v3285_v25, 4  ;;  %v3311_v15 = vrot.slane %v3307_v42, 4  ;;  %v3447_v22 = vperm.slane %v5737_v29, 2 }
  0xfc   : > { %8314 = vst [vmem:[#allocation161_spill] sm:$0xff] %v5750_v50  ;;  %v3451_v0 = vperm.slane %v5737_v29, 3  ;;  %v3333_v17 = vrot.slane %v3329_v37, 4  ;;  %v5759_v58 = vadd.f32 %v3455_v40, %v5731_v49  ;;  %v3597_v13 = vperm.slane %v5750_v50, 1 }
  0xfd   : > { %v5756_v44 = vmul.f32 %v3443_v45, %v8312_v19  ;;  %v3293_v18 = vadd.f32 %v3289_v41, %v3283_v39  ;;  %v3315_v48 = vadd.f32 %v3311_v15, %v3305_v43  ;;  %v5763_v7 = vmul.f32 %v3447_v22, %v8312_v19 }
  0xfe   : > { %8316 = vst [vmem:[#allocation163_spill] sm:$0xff] %v5759_v58  ;;  %v5766_v25 = vmul.f32 %v3451_v0, %v8312_v19  ;;  %v3337_v42 = vadd.f32 %v3333_v17, %v3327_v10  ;;  %v5769_v23 = vperm.slane %v5759_v58, 3  ;;  %v3599_v37 = vmul.f32 %v3597_v13, %v8312_v19 }
  0xff   : > { %8315 = vst [vmem:[#allocation162_spill] sm:$0xff] %v5756_v44  ;;  %v3607_v45 = vperm.slane %v5750_v50, 2  ;;  %v3617_v40 = vperm.slane %v5750_v50, 3  ;;  %v517_v39 = vmul.f32 %v5742_v5, %v4751_v36  ;;  %v523_v22 = vmul.f32 %v5010_v38, %v5017_v54 }
 0x100   : > { %8317 = vst [vmem:[#allocation164_spill] sm:$0xff] %v5763_v7  ;;  %v5780_v15 = vadd.f32 %v4736_v26, %v4883_v27  ;;  %v3601_v43 = vadd.f32 %v3599_v37, %v3293_v18  ;;  %v3603_v10 = vmul.f32 %v5769_v23, %v5756_v44  ;;  %v3613_v0 = vmul.f32 %v5769_v23, %v5763_v7  ;;  %v8321_v18 = vld [vmem:[#allocation15_spill] sm:$0xff]  ;;  %v8322_v7 = vld [vmem:[#allocation52_spill] sm:$0xff] }
 0x101   : > { %8318 = vst [vmem:[#allocation165_spill] sm:$0xff] %v5766_v25  ;;  %v3609_v41 = vmul.f32 %v3607_v45, %v8312_v19  ;;  %v3619_v17 = vmul.f32 %v3617_v40, %v8312_v19  ;;  %v3623_v13 = vmul.f32 %v5769_v23, %v5766_v25  ;;  %v519_v38 = vadd.f32 %v517_v39, %v4736_v26  ;;  %v4553_v27 = vld [vmem:[%s4713_s20] sm:$0xf]  ;;  %v8323_v25 = vld [vmem:[#allocation14_spill] sm:$0xff] }
 0x102   : > { %8319 = vst [vmem:[#allocation166_spill] sm:$0xff] %v5769_v23  ;;  %v525_v49 = vadd.f32 %v523_v22, %v4736_v26  ;;  %v3605_v36 = vadd.f32 %v3603_v10, %v3601_v43  ;;  %v5793_v37 = vperm.slane %v8321_v18, 1  ;;  %v763_v44 = vperm.slane %v5780_v15, 3 }
 0x103   : > { %8320 = vst [vmem:[#allocation167_spill] sm:$0xff] %v5780_v15  ;;  %v3611_v54 = vadd.f32 %v3609_v41, %v3315_v48  ;;  %v3621_v45 = vadd.f32 %v3619_v17, %v3337_v42  ;;  %v785_v5 = vperm.slane %v5026_v52, 0  ;;  %v799_v40 = vmul.f32 %v5032_v47, %v8322_v7 }
 0x104   : > { %v985_v19 = vperm.slane %v4553_v27, 1  ;;  %v765_v39 = vmul.f32 %v763_v44, %v4744_v32  ;;  %v775_v22 = vmul.f32 %v5793_v37, %v8323_v25  ;;  %v999_v48 = vrot.slane %v8196_v2, 4 }
 0x105   : > { %v3615_v23 = vadd.f32 %v3613_v0, %v3611_v54  ;;  %v3625_v43 = vadd.f32 %v3623_v13, %v3621_v45  ;;  %v787_v10 = vmul.f32 %v785_v5, %v4744_v32  ;;  %v803_v41 = vrot.slane %v799_v40, 4 }
 0x106   : > { %v987_v42 = vmul.f32 %v985_v19, %v4744_v32  ;;  %v769_v17 = vrot.slane %v765_v39, 4  ;;  %v779_v18 = vrot.slane %v775_v22, 4  ;;  %v5807_v47 = vperm.slane %v4798_v62, 1 }
 0x107   : > { %v3733_v52 = vrot.slane %v3615_v23, 4  ;;  %v3802_v27 = vrot.slane %v3625_v43, 4  ;;  %v791_v54 = vrot.slane %v787_v10, 4  ;;  %v1169_v0 = vperm.slane %v5080_v51, 0 }
 0x108   : > { %v991_v44 = vrot.slane %v987_v42, 4  ;;  %v773_v13 = vadd.f32 %v769_v17, %v519_v38  ;;  %v1165_v5 = vmul.f32 %v5807_v47, %v4795_v61  ;;  %v1177_v23 = vmul.f32 %v5055_v3, %v5052_v33  ;;  %v8346_v33 = vld [vmem:[#allocation69_spill] sm:$0xff] }
 0x109   : > { %v5811_v7 = vsel %vm1335_vm0, %v3605_v36, %v3733_v52  ;;  %v795_v45 = vadd.f32 %v791_v54, %v525_v49  ;;  %v1171_v39 = vmul.f32 %v1169_v0, %v4748_v35  ;;  %v5821_v43 = vperm.slane %v4849_v57, 1 }
 0x10a   : > { %v7842_v19 = vrot.slane %v5811_v7, 4  ;;  %v995_v40 = vadd.f32 %v991_v44, %v5780_v15  ;;  %v783_v22 = vadd.f32 %v779_v18, %v773_v13  ;;  %v524_v36 = vmul.f32 %v5067_v4, %v5070_v55 }
 0x10b   : > { %v5827_v38 = vadd.f32 %v4855_v63, %v8198_v1  ;;  %v807_v49 = vadd.f32 %v803_v41, %v795_v45  ;;  %v5837_v18 = vperm.slane %v4916_v14, 1  ;;  %v518_v4 = vmul.f32 %v5821_v43, %v4866_v9  ;;  %v4554_v45 = vld [vmem:[%s4713_s20 + $0x8] sm:$0xf] }
 0x10c   : > { %v5832_v3 = vsel %vm1335_vm0, %v7842_v19, %v3802_v27  ;;  %v5834_v10 = vadd.f32 %v999_v48, %v995_v40  ;;  %v526_v52 = vadd.f32 %v524_v36, %v4855_v63  ;;  %v786_v48 = vperm.slane %v5074_v56, 0  ;;  %v8345_v9 = vld [vmem:[#allocation72_spill] sm:$0xff] }
 0x10d   : > { %v7845_v42 = vrot.slane %v5832_v3, 4  ;;  %v764_v17 = vperm.slane %v5827_v38, 3  ;;  %v1173_v27 = vadd.f32 %v1171_v39, %v807_v49  ;;  %v776_v41 = vmul.f32 %v5837_v18, %v4913_v11 }
 0x10e   : > { %8324 = vst [vmem:[#allocation168_spill] sm:$0xff] %v5834_v10  ;;  %v1159_v54 = vperm.slane %v5834_v10, 3  ;;  %v520_v44 = vadd.f32 %v518_v4, %v4855_v63  ;;  %v800_v13 = vmul.f32 %v5078_v6, %v5088_v34  ;;  %v986_v40 = vperm.slane %v4554_v45, 1 }
 0x10f   : > { %4487 = vmatpush.msk.msra.mxu1 %vm1335_vm0, %v7845_v42  ;;  %v766_v0 = vmul.f32 %v764_v17, %v4871_v12  ;;  %v1179_v36 = vadd.f32 %v1177_v23, %v1173_v27  ;;  %v780_v49 = vrot.slane %v776_v41, 4  ;;  %v788_v19 = vmul.f32 %v786_v48, %v4871_v12 }
 0x110   : > { %v1161_v39 = vmul.f32 %v1159_v54, %v4748_v35  ;;  %v804_v51 = vrot.slane %v800_v13, 4  ;;  %v988_v11 = vmul.f32 %v986_v40, %v4871_v12  ;;  %v1000_v42 = vrot.slane %v8199_v59, 4  ;;  %v8326_v54 = vld [vmem:[#allocation57_spill] sm:$0xff] }
 0x111   : > { %v770_v56 = vrot.slane %v766_v0, 4  ;;  %v1325_v14 = vrot.slane %v1179_v36, 4  ;;  %v792_v17 = vrot.slane %v788_v19, 4  ;;  %v5861_v6 = vperm.slane %v4920_v16, 1  ;;  %v8327_v0 = vld [vmem:[#allocation34_spill] sm:$0xff]  ;;  %v8329_v16 = vld [vmem:[#allocation59_spill] sm:$0xff] }
 0x112   : > { %v1163_v4 = vadd.f32 %v1161_v39, %v783_v22  ;;  %v992_v34 = vrot.slane %v988_v11, 4  ;;  %v1170_v23 = vperm.slane %v5130_v8, 0  ;;  %v1178_v27 = vmul.f32 %v5106_v28, %v8326_v54  ;;  %v8328_v39 = vld [vmem:[#allocation11_spill] sm:$0xff] }
 0x113   : > { %8325 = vst [vmem:[#allocation169_spill] sm:$0xff] %v5861_v6  ;;  %v774_v45 = vadd.f32 %v770_v56, %v520_v44  ;;  %v796_v48 = vadd.f32 %v792_v17, %v526_v52  ;;  %v1166_v13 = vmul.f32 %v5861_v6, %v8327_v0  ;;  %v1394_v22 = vperm.slane %v5171_v46, 0  ;;  %v4555_v8 = vld [vmem:[%s4772_s25] sm:$0xf]  ;;  %v8333_v52 = vld [vmem:[#allocation60_spill] sm:$0xff] }
 0x114   : > { %v1167_v41 = vadd.f32 %v1165_v5, %v1163_v4  ;;  %v996_v19 = vadd.f32 %v992_v34, %v5827_v38  ;;  %v1172_v36 = vmul.f32 %v1170_v23, %v8328_v39  ;;  %v5872_v44 = vperm.slane %v8329_v16, 2  ;;  %v8332_v5 = vld [vmem:[#allocation63_spill] sm:$0xff] }
 0x115   : > { %v784_v40 = vadd.f32 %v780_v49, %v774_v45  ;;  %v808_v56 = vadd.f32 %v804_v51, %v796_v48  ;;  %v5876_v28 = vmul.f32 %v4555_v8, %v1394_v22  ;;  %v5880_v4 = vadd.f32 %v8333_v52, %v8332_v5  ;;  %v8336_v49 = vld [vmem:[#allocation64_spill] sm:$0xff]  ;;  %v8337_v17 = vld [vmem:[#allocation67_spill] sm:$0xff]  ;;  %v8340_v51 = vld [vmem:[#allocation61_spill] sm:$0xff] }
 0x116   : > { %8330 = vst [vmem:[#allocation170_spill] sm:$0xff] %v5872_v44  ;;  %v1348_v11 = vsel %vm1335_vm0, %v1167_v41, %v1325_v14  ;;  %v5882_v46 = vadd.f32 %v1000_v42, %v996_v19  ;;  %v1468_v34 = vmul.f32 %v5872_v44, %v8336_v49  ;;  %v1512_v45 = vperm.slane %v8337_v17, 4  ;;  %v8338_v23 = vld [vmem:[#allocation71_spill] sm:$0xff]  ;;  %v8341_v22 = vld [vmem:[#allocation66_spill] sm:$0xff]  ;;  %v8342_v19 = vld [vmem:[#allocation12_spill] sm:$0xff] }
 0x117   : > { %8331 = vst [vmem:[#allocation171_spill] sm:$0xff] %v5876_v28  ;;  %4069 = vmatpush.msra.mxu2 %v1348_v11  ;;  %v5888_v16 = vperm.slane %v8338_v23, 2  ;;  %v1174_v14 = vadd.f32 %v1172_v36, %v808_v56  ;;  %v1474_v41 = vmul.f32 %v8340_v51, %v5876_v28  ;;  %v1786_v48 = vperm.slane %v5880_v4, 3  ;;  %v8344_v49 = vld [vmem:[#allocation70_spill] sm:$0xff] }
 0x118   : > { %8334 = vst [vmem:[#allocation172_spill] sm:$0xff] %v5880_v4  ;;  %v1808_v0 = vperm.slane %v8341_v22, 0  ;;  %v1160_v11 = vperm.slane %v5882_v46, 3  ;;  %v1470_v42 = vadd.f32 %v1468_v34, %v8333_v52  ;;  %v5897_v54 = vmul.f32 %v1512_v45, %v8342_v19 }
 0x119   : > { %8335 = vst [vmem:[#allocation173_spill] sm:$0xff] %v5882_v46  ;;  %v1798_v17 = vmul.f32 %v5888_v16, %v8344_v49  ;;  %v1180_v23 = vadd.f32 %v1178_v27, %v1174_v14  ;;  %v1476_v36 = vadd.f32 %v1474_v41, %v8333_v52  ;;  %v1788_v56 = vmul.f32 %v1786_v48, %v8342_v19  ;;  %v8347_v41 = vld [vmem:[#allocation65_spill] sm:$0xff] }
 0x11a   : > { %8339 = vst [vmem:[#allocation67_spill] sm:$0xff] %v5888_v16  ;;  %v1810_v51 = vmul.f32 %v1808_v0, %v8342_v19  ;;  %v1162_v28 = vmul.f32 %v1160_v11, %v8328_v39  ;;  %v1822_v55 = vmul.f32 %v8345_v9, %v5897_v54  ;;  %v1938_v34 = vperm.slane %v4555_v8, 2  ;;  %v8348_v16 = vld [vmem:[#allocation78_spill] sm:$0xff] }
 0x11b   : > { %8343 = vst [vmem:[#allocation61_spill] sm:$0xff] %v5897_v54  ;;  %v1802_v22 = vrot.slane %v1798_v17, 4  ;;  %v1326_v57 = vrot.slane %v1180_v23, 4  ;;  %v1792_v45 = vrot.slane %v1788_v56, 4  ;;  %v1952_v62 = vrot.slane %v8346_v33, 4  ;;  %v8350_v17 = vld [vmem:[#allocation75_spill] sm:$0xff] }
 0x11c   : > { %v1814_v61 = vrot.slane %v1810_v51, 4  ;;  %v1164_v49 = vadd.f32 %v1162_v28, %v784_v40  ;;  %v1826_v27 = vrot.slane %v1822_v55, 4  ;;  %v1940_v14 = vmul.f32 %v1938_v34, %v8342_v19  ;;  %v8351_v23 = vld [vmem:[#allocation18_spill] sm:$0xff]  ;;  %v8353_v51 = vld [vmem:[#allocation73_spill] sm:$0xff] }
 0x11d   : > { %v1998_v48 = vperm.slane %v8347_v41, 0  ;;  %v1796_v25 = vadd.f32 %v1792_v45, %v1470_v42  ;;  %v5911_v11 = vperm.slane %v8348_v16, 2  ;;  %v2144_v52 = vperm.slane %v8350_v17, 0  ;;  %v8354_v28 = vld [vmem:[#allocation77_spill] sm:$0xff]  ;;  %v8355_v45 = vld [vmem:[#allocation79_spill] sm:$0xff] }
 0x11e   : > { %v1818_v0 = vadd.f32 %v1814_v61, %v1476_v36  ;;  %v1168_v9 = vadd.f32 %v1166_v13, %v1164_v49  ;;  %v1944_v8 = vrot.slane %v1940_v14, 4  ;;  %v2202_v54 = vperm.slane %v8353_v51, 2  ;;  %v8356_v41 = vld [vmem:[#allocation81_spill] sm:$0xff]  ;;  %v8361_v17 = vld [vmem:[#allocation83_spill] sm:$0xff] }
 0x11f   : > { %8349 = vst [vmem:[#allocation66_spill] sm:$0xff] %v5911_v11  ;;  %v5915_v56 = vmul.f32 %v1998_v48, %v8351_v23  ;;  %v1806_v40 = vadd.f32 %v1802_v22, %v1796_v25  ;;  %v2140_v34 = vmul.f32 %v5911_v11, %v8354_v28  ;;  %v2146_v42 = vmul.f32 %v2144_v52, %v8351_v23  ;;  %v8357_v25 = vld [vmem:[#allocation85_spill] sm:$0xff]  ;;  %v8360_v52 = vld [vmem:[#allocation80_spill] sm:$0xff] }
 0x120   : > { %v1830_v55 = vadd.f32 %v1826_v27, %v1818_v0  ;;  %v1349_v61 = vsel %vm1335_vm0, %v1168_v9, %v1326_v57  ;;  %v1948_v36 = vadd.f32 %v1944_v8, %v5880_v4  ;;  %v2204_v49 = vmul.f32 %v2202_v54, %v8351_v23  ;;  %v8362_v8 = vld [vmem:[#allocation86_spill] sm:$0xff]  ;;  %v8363_v28 = vld [vmem:[#allocation21_spill] sm:$0xff] }
 0x121   : > { %8352 = vst [vmem:[#allocation72_spill] sm:$0xff] %v5915_v56  ;;  %v2152_v13 = vmul.f32 %v8355_v45, %v5915_v56  ;;  %4092 = vmatpush.msra.mxu3 %v1349_v61  ;;  %v2232_v48 = vperm.slane %v8356_v41, 4  ;;  %v5928_v22 = vperm.slane %v8357_v25, 2  ;;  %v2528_v27 = vperm.slane %v5304_v20, 0 }
 0x122   : > { %v2148_v14 = vadd.f32 %v2146_v42, %v1830_v55  ;;  %v5931_v0 = vadd.f32 %v1952_v62, %v1948_v36  ;;  %v2658_v57 = vperm.slane %v8360_v52, 2  ;;  %v2672_v9 = vrot.slane %v8361_v17, 4  ;;  %v8365_v55 = vld [vmem:[#allocation84_spill] sm:$0xff]  ;;  %v8366_v36 = vld [vmem:[#allocation23_spill] sm:$0xff] }
 0x123   : > { %8358 = vst [vmem:[#allocation65_spill] sm:$0xff] %v5928_v22  ;;  %v2718_v51 = vperm.slane %v8362_v8, 0  ;;  %v5937_v54 = vmul.f32 %v2232_v48, %v8363_v28  ;;  %v2518_v42 = vmul.f32 %v5928_v22, %v8365_v55  ;;  %v2530_v61 = vmul.f32 %v2528_v27, %v8363_v28  ;;  %v8369_v48 = vld [vmem:[#allocation94_spill] sm:$0xff]  ;;  %v8371_v27 = vld [vmem:[#allocation76_spill] sm:$0xff] }
 0x124   : > { %8359 = vst [vmem:[#allocation75_spill] sm:$0xff] %v5931_v0  ;;  %v2154_v45 = vadd.f32 %v2152_v13, %v2148_v14  ;;  %v2134_v41 = vperm.slane %v5931_v0, 3  ;;  %v2206_v62 = vadd.f32 %v2204_v49, %v5931_v0  ;;  %v2660_v20 = vmul.f32 %v2658_v57, %v8363_v28  ;;  %v8368_v13 = vld [vmem:[#allocation87_spill] sm:$0xff] }
 0x125   : > { %8364 = vst [vmem:[#allocation79_spill] sm:$0xff] %v5937_v54  ;;  %v5946_v52 = vmul.f32 %v2718_v51, %v8366_v36  ;;  %v2522_v25 = vrot.slane %v2518_v42, 4  ;;  %v2534_v8 = vrot.slane %v2530_v61, 4  ;;  %v2542_v14 = vmul.f32 %v8368_v13, %v5937_v54  ;;  %v8373_v49 = vld [vmem:[#allocation91_spill] sm:$0xff]  ;;  %v8374_v51 = vld [vmem:[#allocation92_spill] sm:$0xff] }
 0x126   : > { %v5951_v56 = vperm.slane %v8369_v48, 2  ;;  %v2136_v55 = vmul.f32 %v2134_v41, %v8351_v23  ;;  %v5955_v16 = vadd.f32 %v2206_v62, %v8371_v27  ;;  %v2664_v17 = vrot.slane %v2660_v20, 4  ;;  %v8375_v61 = vld [vmem:[#allocation96_spill] sm:$0xff]  ;;  %v8377_v23 = vld [vmem:[#allocation95_spill] sm:$0xff] }
 0x127   : > { %8367 = vst [vmem:[#allocation81_spill] sm:$0xff] %v5946_v52  ;;  %v2864_v22 = vperm.slane %v8373_v49, 0  ;;  %v2538_v57 = vadd.f32 %v2534_v8, %v2154_v45  ;;  %v2546_v11 = vrot.slane %v2542_v14, 4  ;;  %v2872_v0 = vmul.f32 %v8375_v61, %v5946_v52  ;;  %v8376_v27 = vld [vmem:[#allocation88_spill] sm:$0xff]  ;;  %v8378_v45 = vld [vmem:[#allocation101_spill] sm:$0xff] }
 0x128   : > { %8370 = vst [vmem:[#allocation86_spill] sm:$0xff] %v5951_v56  ;;  %v2860_v42 = vmul.f32 %v5951_v56, %v8374_v51  ;;  %v2138_v13 = vadd.f32 %v2136_v55, %v1806_v40  ;;  %v2506_v48 = vperm.slane %v5955_v16, 3  ;;  %v2668_v54 = vadd.f32 %v2664_v17, %v5955_v16  ;;  %v8381_v40 = vld [vmem:[#allocation97_spill] sm:$0xff] }
 0x129   : > { %8372 = vst [vmem:[#allocation87_spill] sm:$0xff] %v5955_v16  ;;  %v2866_v41 = vmul.f32 %v2864_v22, %v8366_v36  ;;  %v2550_v62 = vadd.f32 %v2546_v11, %v2538_v57  ;;  %v2922_v20 = vperm.slane %v8376_v27, 2  ;;  %v2952_v49 = vperm.slane %v8377_v23, 4  ;;  %v8382_v52 = vld [vmem:[#allocation25_spill] sm:$0xff]  ;;  %v8384_v11 = vld [vmem:[#allocation100_spill] sm:$0xff] }
 0x12a   : > { %v5968_v8 = vperm.slane %v8378_v45, 2  ;;  %v2142_v14 = vadd.f32 %v2140_v34, %v2138_v13  ;;  %v2508_v51 = vmul.f32 %v2506_v48, %v8363_v28  ;;  %v5971_v56 = vadd.f32 %v2672_v9, %v2668_v54  ;;  %v8385_v13 = vld [vmem:[#allocation93_spill] sm:$0xff] }
 0x12b   : > { %v3248_v55 = vperm.slane %v8381_v40, 0  ;;  %v2868_v61 = vadd.f32 %v2866_v41, %v2550_v62  ;;  %v2924_v17 = vmul.f32 %v2922_v20, %v8366_v36  ;;  %v5976_v22 = vmul.f32 %v2952_v49, %v8382_v52  ;;  %v8386_v41 = vld [vmem:[#allocation103_spill] sm:$0xff] }
 0x12c   : > { %8379 = vst [vmem:[#allocation91_spill] sm:$0xff] %v5968_v8  ;;  %v3238_v57 = vmul.f32 %v5968_v8, %v8384_v11  ;;  %v2512_v23 = vrot.slane %v2508_v51, 4  ;;  %v2854_v45 = vperm.slane %v5971_v56, 3  ;;  %v3378_v48 = vperm.slane %v8385_v13, 2  ;;  %v8387_v51 = vld [vmem:[#allocation90_spill] sm:$0xff] }
 0x12d   : > { %8380 = vst [vmem:[#allocation96_spill] sm:$0xff] %v5971_v56  ;;  %v3250_v34 = vmul.f32 %v3248_v55, %v8382_v52  ;;  %v2874_v9 = vadd.f32 %v2872_v0, %v2868_v61  ;;  %v2926_v54 = vadd.f32 %v2924_v17, %v5971_v56  ;;  %v3262_v62 = vmul.f32 %v8386_v41, %v5976_v22  ;;  %v8389_v55 = vld [vmem:[#allocation99_spill] sm:$0xff]  ;;  %v8390_v13 = vld [vmem:[#allocation102_spill] sm:$0xff]  ;;  %v8391_v56 = vld [vmem:[#allocation112_spill] sm:$0xff] }
 0x12e   : > { %8383 = vst [vmem:[#allocation95_spill] sm:$0xff] %v5976_v22  ;;  %v3242_v40 = vrot.slane %v3238_v57, 4  ;;  %v2516_v20 = vadd.f32 %v2512_v23, %v2142_v14  ;;  %v2856_v49 = vmul.f32 %v2854_v45, %v8366_v36  ;;  %v3380_v11 = vmul.f32 %v3378_v48, %v8382_v52  ;;  %v8393_v45 = vld [vmem:[#allocation27_spill] sm:$0xff] }
 0x12f   : > { %v3254_v27 = vrot.slane %v3250_v34, 4  ;;  %v5989_v8 = vadd.f32 %v2926_v54, %v8387_v51  ;;  %v3266_v28 = vrot.slane %v3262_v62, 4  ;;  %v3392_v16 = vrot.slane %v8389_v55, 4  ;;  %v8395_v34 = vld [vmem:[#allocation107_spill] sm:$0xff]  ;;  %v8396_v54 = vld [vmem:[#allocation109_spill] sm:$0xff] }
 0x130   : > { %v3438_v0 = vperm.slane %v8390_v13, 0  ;;  %v2526_v61 = vadd.f32 %v2522_v25, %v2516_v20  ;;  %v3384_v57 = vrot.slane %v3380_v11, 4  ;;  %v5994_v33 = vperm.slane %v8391_v56, 2  ;;  %v8397_v13 = vld [vmem:[#allocation111_spill] sm:$0xff] }
 0x131   : > { %8388 = vst [vmem:[#allocation97_spill] sm:$0xff] %v5989_v8  ;;  %v3258_v17 = vadd.f32 %v3254_v27, %v2874_v9  ;;  %v3226_v14 = vperm.slane %v5989_v8, 3  ;;  %v3584_v48 = vperm.slane %v8395_v34, 0  ;;  %v1395_v41 = vperm.slane %v8396_v54, 0  ;;  %v8398_v9 = vld [vmem:[#allocation113_spill] sm:$0xff] }
 0x132   : > { %8392 = vst [vmem:[#allocation103_spill] sm:$0xff] %v5994_v33  ;;  %v5998_v23 = vmul.f32 %v3438_v0, %v8393_v45  ;;  %v2858_v62 = vadd.f32 %v2856_v49, %v2526_v61  ;;  %v3388_v55 = vadd.f32 %v3384_v57, %v5989_v8  ;;  %v3580_v25 = vmul.f32 %v5994_v33, %v8397_v13  ;;  %v8399_v0 = vld [vmem:[#allocation108_spill] sm:$0xff]  ;;  %v8402_v49 = vld [vmem:[#allocation110_spill] sm:$0xff] }
 0x133   : > { %v3270_v22 = vadd.f32 %v3266_v28, %v3258_v17  ;;  %v3228_v27 = vmul.f32 %v3226_v14, %v8382_v52  ;;  %v3586_v11 = vmul.f32 %v3584_v48, %v8393_v45  ;;  %v6010_v56 = vmul.f32 %v1395_v41, %v8399_v0  ;;  %v8404_v61 = vld [vmem:[#allocation116_spill] sm:$0xff]  ;;  %v8405_v17 = vld [vmem:[#allocation114_spill] sm:$0xff] }
 0x134   : > { %8394 = vst [vmem:[#allocation102_spill] sm:$0xff] %v5998_v23  ;;  %v3592_v20 = vmul.f32 %v8398_v9, %v5998_v23  ;;  %v2862_v34 = vadd.f32 %v2860_v42, %v2858_v62  ;;  %v6012_v51 = vadd.f32 %v3392_v16, %v3388_v55  ;;  %v6015_v28 = vperm.slane %v8402_v49, 2  ;;  %v8407_v48 = vld [vmem:[#allocation118_spill] sm:$0xff]  ;;  %v8409_v23 = vld [vmem:[#allocation117_spill] sm:$0xff]  ;;  %v8410_v42 = vld [vmem:[#allocation128_spill] sm:$0xff] }
 0x135   : > { %8400 = vst [vmem:[#allocation109_spill] sm:$0xff] %v6010_v56  ;;  %v6019_v57 = vadd.f32 %v8405_v17, %v8404_v61  ;;  %v3232_v54 = vrot.slane %v3228_v27, 4  ;;  %v3588_v14 = vadd.f32 %v3586_v11, %v3270_v22  ;;  %v1475_v13 = vmul.f32 %v8407_v48, %v6010_v56  ;;  %v8408_v33 = vld [vmem:[#allocation122_spill] sm:$0xff]  ;;  %v8412_v22 = vld [vmem:[#allocation121_spill] sm:$0xff]  ;;  %v8415_v52 = vld [vmem:[#allocation120_spill] sm:$0xff] }
 0x136   : > { %8401 = vst [vmem:[#allocation113_spill] sm:$0xff] %v6012_v51  ;;  %v1513_v9 = vperm.slane %v8408_v33, 4  ;;  %v3574_v41 = vperm.slane %v6012_v51, 3  ;;  %v1469_v16 = vmul.f32 %v6015_v28, %v8409_v23  ;;  %v6028_v55 = vperm.slane %v8410_v42, 2  ;;  %v8414_v51 = vld [vmem:[#allocation127_spill] sm:$0xff] }
 0x137   : > { %8403 = vst [vmem:[#allocation108_spill] sm:$0xff] %v6015_v28  ;;  %v1787_v62 = vperm.slane %v6019_v57, 3  ;;  %v3236_v49 = vadd.f32 %v3232_v54, %v2862_v34  ;;  %v3594_v61 = vadd.f32 %v3592_v20, %v3588_v14  ;;  %v1477_v27 = vadd.f32 %v1475_v13, %v8405_v17  ;;  %v8416_v34 = vld [vmem:[#allocation129_spill] sm:$0xff] }
 0x138   : > { %8406 = vst [vmem:[#allocation174_spill] sm:$0xff] %v6019_v57  ;;  %v6033_v11 = vmul.f32 %v1513_v9, %v8412_v22  ;;  %v3576_v48 = vmul.f32 %v3574_v41, %v8393_v45  ;;  %v1471_v33 = vadd.f32 %v1469_v16, %v8405_v17  ;;  %v1799_v23 = vmul.f32 %v6028_v55, %v8414_v51  ;;  %v8417_v9 = vld [vmem:[#allocation126_spill] sm:$0xff]  ;;  %v8418_v17 = vld [vmem:[#allocation119_spill] sm:$0xff] }
 0x139   : > { %8411 = vst [vmem:[#allocation118_spill] sm:$0xff] %v6028_v55  ;;  %v1789_v56 = vmul.f32 %v1787_v62, %v8412_v22  ;;  %v3246_v42 = vadd.f32 %v3242_v40, %v3236_v49  ;;  %v3726_v28 = vrot.slane %v3594_v61, 4  ;;  %v1809_v8 = vperm.slane %v8415_v52, 0  ;;  %v8419_v49 = vld [vmem:[#allocation135_spill] sm:$0xff]  ;;  %v8421_v61 = vld [vmem:[#allocation132_spill] sm:$0xff] }
 0x13a   : > { %8413 = vst [vmem:[#allocation122_spill] sm:$0xff] %v6033_v11  ;;  %v1823_v20 = vmul.f32 %v8416_v34, %v6033_v11  ;;  %v1803_v54 = vrot.slane %v1799_v23, 4  ;;  %v1939_v14 = vperm.slane %v8399_v0, 2  ;;  %v1953_v41 = vrot.slane %v8417_v9, 4  ;;  %v8422_v11 = vld [vmem:[#allocation19_spill] sm:$0xff] }
 0x13b   : > { %v1793_v13 = vrot.slane %v1789_v56, 4  ;;  %v3578_v45 = vadd.f32 %v3576_v48, %v3246_v42  ;;  %v1811_v16 = vmul.f32 %v1809_v8, %v8412_v22  ;;  %v1999_v36 = vperm.slane %v8418_v17, 0  ;;  %v8424_v9 = vld [vmem:[#allocation131_spill] sm:$0xff] }
 0x13c   : > { %v1827_v62 = vrot.slane %v1823_v20, 4  ;;  %v1941_v40 = vmul.f32 %v1939_v14, %v8412_v22  ;;  %v6049_v52 = vperm.slane %v8419_v49, 2  ;;  %v2145_v34 = vperm.slane %v8421_v61, 0  ;;  %v8425_v20 = vld [vmem:[#allocation134_spill] sm:$0xff]  ;;  %v8427_v61 = vld [vmem:[#allocation136_spill] sm:$0xff] }
 0x13d   : > { %v1797_v51 = vadd.f32 %v1793_v13, %v1471_v33  ;;  %v3582_v56 = vadd.f32 %v3580_v25, %v3578_v45  ;;  %v1815_v23 = vrot.slane %v1811_v16, 4  ;;  %v6053_v0 = vmul.f32 %v1999_v36, %v8422_v11 }
 0x13e   : > { %8420 = vst [vmem:[#allocation120_spill] sm:$0xff] %v6049_v52  ;;  %v2203_v42 = vperm.slane %v8424_v9, 2  ;;  %v1945_v8 = vrot.slane %v1941_v40, 4  ;;  %v2141_v17 = vmul.f32 %v6049_v52, %v8425_v20  ;;  %v2147_v33 = vmul.f32 %v2145_v34, %v8422_v11  ;;  %v8429_v40 = vld [vmem:[#allocation143_spill] sm:$0xff] }
 0x13f   : > { %8423 = vst [vmem:[#allocation129_spill] sm:$0xff] %v6053_v0  ;;  %v1807_v48 = vadd.f32 %v1803_v54, %v1797_v51  ;;  %v6060_v13 = vsel %vm1335_vm0, %v3582_v56, %v3726_v28  ;;  %v1819_v14 = vadd.f32 %v1815_v23, %v1477_v27  ;;  %v2153_v45 = vmul.f32 %v8427_v61, %v6053_v0  ;;  %v8428_v51 = vld [vmem:[#allocation138_spill] sm:$0xff]  ;;  %v8431_v34 = vld [vmem:[#allocation139_spill] sm:$0xff]  ;;  %v8432_v28 = vld [vmem:[#allocation137_spill] sm:$0xff] }
 0x140   : > { %8426 = vst [vmem:[#allocation119_spill] sm:$0xff] %v6060_v13  ;;  %v2205_v25 = vmul.f32 %v2203_v42, %v8422_v11  ;;  %v7914_v36 = vrot.slane %v6060_v13, 4  ;;  %v1949_v16 = vadd.f32 %v1945_v8, %v6019_v57  ;;  %v2233_v54 = vperm.slane %v8428_v51, 4  ;;  %v8433_v27 = vld [vmem:[#allocation141_spill] sm:$0xff]  ;;  %v8434_v52 = vld [vmem:[#allocation123_spill] sm:$0xff]  ;;  %v8438_v51 = vld [vmem:[#allocation22_spill] sm:$0xff] }
 0x141   : > { %v6069_v9 = vperm.slane %v8429_v40, 2  ;;  %v1831_v20 = vadd.f32 %v1827_v62, %v1819_v14  ;;  %v2529_v49 = vperm.slane %v8431_v34, 0  ;;  %v2659_v56 = vperm.slane %v8432_v28, 2  ;;  %v8440_v40 = vld [vmem:[#allocation142_spill] sm:$0xff] }
 0x142   : > { %v2673_v23 = vrot.slane %v8433_v27, 4  ;;  %v8435_v61 = vrot.slane %v8434_v52, 4  ;;  %v6081_v8 = vadd.f32 %v1953_v41, %v1949_v16  ;;  %v6084_v0 = vmul.f32 %v2233_v54, %v8438_v51  ;;  %v8441_v41 = vld [vmem:[#allocation145_spill] sm:$0xff]  ;;  %v8442_v54 = vld [vmem:[#allocation124_spill] sm:$0xff]  ;;  %v8448_v57 = vld [vmem:[#allocation146_spill] sm:$0xff] }
 0x143   : > { %8430 = vst [vmem:[#allocation132_spill] sm:$0xff] %v6069_v9  ;;  %v2519_v62 = vmul.f32 %v6069_v9, %v8440_v40  ;;  %v2149_v34 = vadd.f32 %v2147_v33, %v1831_v20  ;;  %v2531_v28 = vmul.f32 %v2529_v49, %v8438_v51  ;;  %v2661_v52 = vmul.f32 %v2659_v56, %v8438_v51  ;;  %v8444_v56 = vld [vmem:[#allocation133_spill] sm:$0xff] }
 0x144   : > { %v6079_v42 = vsel %vm1335_vm0, %v7914_v36, %v8435_v61  ;;  %8437 = vst [vmem:[#allocation136_spill] sm:$0xff] %v6081_v8  ;;  %v2135_v13 = vperm.slane %v6081_v8, 3  ;;  %v2207_v61 = vadd.f32 %v2205_v25, %v6081_v8  ;;  %v2543_v16 = vmul.f32 %v8441_v41, %v6084_v0  ;;  %v8446_v41 = vld [vmem:[#allocation152_spill] sm:$0xff] }
 0x145   : > { %8436 = vst [vmem:[#allocation19_spill] sm:$0xff] %v6079_v42  ;;  %v7927_v14 = vrot.slane %v6079_v42, 4  ;;  %v2523_v36 = vrot.slane %v2519_v62, 4  ;;  %v8443_v27 = vrot.slane %v8442_v54, 4  ;;  %v2155_v9 = vadd.f32 %v2153_v45, %v2149_v34  ;;  %v8445_v62 = vld [vmem:[#allocation144_spill] sm:$0xff]  ;;  %v8447_v54 = vld [vmem:[#allocation150_spill] sm:$0xff] }
 0x146   : > { %8439 = vst [vmem:[#allocation138_spill] sm:$0xff] %v6084_v0  ;;  %v2535_v20 = vrot.slane %v2531_v28, 4  ;;  %v2665_v33 = vrot.slane %v2661_v52, 4  ;;  %v2137_v49 = vmul.f32 %v2135_v13, %v8422_v11  ;;  %v6102_v22 = vadd.f32 %v2207_v61, %v8444_v56  ;;  %v8449_v13 = vld [vmem:[#allocation24_spill] sm:$0xff]  ;;  %v8451_v61 = vld [vmem:[#allocation151_spill] sm:$0xff] }
 0x147   : > { %v3972_v40 = vsel %vm1335_vm0, %v7927_v14, %v8443_v27  ;;  %v2547_v25 = vrot.slane %v2543_v16, 4  ;;  %v2719_v8 = vperm.slane %v8445_v62, 0  ;;  %v6106_v0 = vperm.slane %v8446_v41, 2 }
 0x148   : > { %4010 = vmatpush.msra.mxu0 %v3972_v40  ;;  %v2539_v55 = vadd.f32 %v2535_v20, %v2155_v9  ;;  %v2865_v42 = vperm.slane %v8447_v54, 0  ;;  %v2923_v27 = vperm.slane %v8448_v57, 2  ;;  %v2139_v45 = vadd.f32 %v2137_v49, %v1807_v48  ;;  %v8452_v48 = vld [vmem:[#allocation154_spill] sm:$0xff]  ;;  %v8453_v57 = vld [vmem:[#allocation153_spill] sm:$0xff] }
 0x149   : > { %v2507_v28 = vperm.slane %v6102_v22, 3  ;;  %v2669_v40 = vadd.f32 %v2665_v33, %v6102_v22  ;;  %v6113_v34 = vmul.f32 %v2719_v8, %v8449_v13  ;;  %v2861_v16 = vmul.f32 %v6106_v0, %v8451_v61 }
 0x14a   : > { %v2551_v52 = vadd.f32 %v2547_v25, %v2539_v55  ;;  %v2867_v9 = vmul.f32 %v2865_v42, %v8449_v13  ;;  %v2925_v20 = vmul.f32 %v2923_v27, %v8449_v13  ;;  %v2143_v62 = vadd.f32 %v2141_v17, %v2139_v45  ;;  %v8454_v45 = vld [vmem:[#allocation26_spill] sm:$0xff] }
 0x14b   : > { %8450 = vst [vmem:[#allocation139_spill] sm:$0xff] %v6113_v34  ;;  %v2509_v54 = vmul.f32 %v2507_v28, %v8438_v51  ;;  %v6120_v14 = vadd.f32 %v2673_v23, %v2669_v40  ;;  %v2873_v49 = vmul.f32 %v8452_v48, %v6113_v34  ;;  %v2953_v8 = vperm.slane %v8453_v57, 4 }
 0x14c   : > { %v2869_v33 = vadd.f32 %v2867_v9, %v2551_v52  ;;  %v6126_v55 = vperm.slane %v5724_v30, 2  ;;  %v3249_v25 = vperm.slane %v5708_v60, 0  ;;  %v3379_v27 = vperm.slane %v5671_v53, 2  ;;  %v8456_v60 = vld [vmem:[#allocation148_spill] sm:$0xff] }
 0x14d   : > { %v2513_v61 = vrot.slane %v2509_v54, 4  ;;  %v2855_v42 = vperm.slane %v6120_v14, 3  ;;  %v2927_v17 = vadd.f32 %v2925_v20, %v6120_v14  ;;  %v6133_v28 = vmul.f32 %v2953_v8, %v8454_v45 }
 0x14e   : > { %v2875_v23 = vadd.f32 %v2873_v49, %v2869_v33  ;;  %v3239_v40 = vmul.f32 %v6126_v55, %v5717_v21  ;;  %v3251_v57 = vmul.f32 %v3249_v25, %v8454_v45  ;;  %v3381_v48 = vmul.f32 %v3379_v27, %v8454_v45 }
 0x14f   : > { %8455 = vst [vmem:[#allocation123_spill] sm:$0xff] %v6133_v28  ;;  %v2517_v52 = vadd.f32 %v2513_v61, %v2143_v62  ;;  %v2857_v9 = vmul.f32 %v2855_v42, %v8449_v13  ;;  %v6140_v54 = vadd.f32 %v2927_v17, %v8456_v60  ;;  %v3263_v49 = vmul.f32 %v5734_v24, %v6133_v28 }
 0x150   : > { %v3243_v20 = vrot.slane %v3239_v40, 4  ;;  %v3255_v30 = vrot.slane %v3251_v57, 4  ;;  %v3393_v33 = vrot.slane %v5714_v31, 4  ;;  %v3385_v21 = vrot.slane %v3381_v48, 4  ;;  %v8457_v57 = vld [vmem:[#allocation29_spill] sm:$0xff] }
 0x151   : > { %v2527_v8 = vadd.f32 %v2523_v36, %v2517_v52  ;;  %v3227_v53 = vperm.slane %v6140_v54, 3  ;;  %v3439_v61 = vperm.slane %v5737_v29, 0  ;;  %v3267_v25 = vrot.slane %v3263_v49, 4  ;;  %v8459_v52 = vld [vmem:[#allocation165_spill] sm:$0xff] }
 0x152   : > { %v3259_v62 = vadd.f32 %v3255_v30, %v2875_v23  ;;  %v6149_v42 = vperm.slane %v5759_v58, 2  ;;  %v3585_v17 = vperm.slane %v5750_v50, 0  ;;  %v3389_v24 = vadd.f32 %v3385_v21, %v6140_v54  ;;  %v8460_v29 = vld [vmem:[#allocation33_spill] sm:$0xff]  ;;  %v8461_v23 = vld [vmem:[#allocation160_spill] sm:$0xff] }
 0x153   : > { %v2859_v27 = vadd.f32 %v2857_v9, %v2527_v8  ;;  %v3229_v40 = vmul.f32 %v3227_v53, %v8454_v45  ;;  %v6155_v28 = vmul.f32 %v3439_v61, %v8457_v57  ;;  %v509_v49 = vmul.f32 %v8461_v23, %v8460_v29  ;;  %v8463_v53 = vld [vmem:[#allocation166_spill] sm:$0xff]  ;;  %v8464_v61 = vld [vmem:[#allocation35_spill] sm:$0xff] }
 0x154   : > { %v3271_v36 = vadd.f32 %v3267_v25, %v3259_v62  ;;  %v3581_v48 = vmul.f32 %v6149_v42, %v8459_v52  ;;  %v3587_v30 = vmul.f32 %v3585_v17, %v8457_v57  ;;  %v6162_v50 = vadd.f32 %v3393_v33, %v3389_v24 }
 0x155   : > { %8458 = vst [vmem:[#allocation22_spill] sm:$0xff] %v6155_v28  ;;  %v2863_v58 = vadd.f32 %v2861_v16, %v2859_v27  ;;  %v3233_v34 = vrot.slane %v3229_v40, 4  ;;  %v3593_v9 = vmul.f32 %v8463_v53, %v6155_v28  ;;  %v511_v8 = vadd.f32 %v509_v49, %v4736_v26 }
 0x156   : > { %8462 = vst [vmem:[#allocation145_spill] sm:$0xff] %v6162_v50  ;;  %v3589_v21 = vadd.f32 %v3587_v30, %v3271_v36  ;;  %v513_v62 = vmul.f32 %v8461_v23, %v8464_v61  ;;  %v719_v25 = vperm.slane %v5780_v15, 1  ;;  %v3575_v17 = vperm.slane %v6162_v50, 3  ;;  %v8465_v36 = vld [vmem:[#allocation41_spill] sm:$0xff] }
 0x157   : > { %v3237_v52 = vadd.f32 %v3233_v34, %v2863_v58  ;;  %v731_v16 = vmul.f32 %v5793_v37, %v8196_v2  ;;  %v741_v33 = vperm.slane %v5780_v15, 2  ;;  %v753_v30 = vmul.f32 %v5793_v37, %v8465_v36  ;;  %v8481_v36 = vld [vmem:[#allocation74_spill] sm:$0xff] }
 0x158   : > { %v3595_v27 = vadd.f32 %v3593_v9, %v3589_v21  ;;  %v515_v40 = vadd.f32 %v513_v62, %v4736_v26  ;;  %v721_v24 = vmul.f32 %v719_v25, %v4744_v32  ;;  %v3577_v53 = vmul.f32 %v3575_v17, %v8457_v57  ;;  %v8466_v21 = vld [vmem:[#allocation43_spill] sm:$0xff] }
 0x159   : > { %v3247_v49 = vadd.f32 %v3243_v20, %v3237_v52  ;;  %v735_v61 = vrot.slane %v731_v16, 4  ;;  %v743_v58 = vmul.f32 %v741_v33, %v4744_v32  ;;  %v757_v28 = vrot.slane %v753_v30, 4  ;;  %v8467_v52 = vld [vmem:[#allocation44_spill] sm:$0xff]  ;;  %v8468_v30 = vld [vmem:[#allocation46_spill] sm:$0xff] }
 0x15a   : > { %v3727_v34 = vrot.slane %v3595_v27, 4  ;;  %v725_v29 = vrot.slane %v721_v24, 4  ;;  %v1139_v2 = vperm.slane %v5834_v10, 1  ;;  %v1145_v62 = vmul.f32 %v5807_v47, %v8466_v21 }
 0x15b   : > { %v3579_v41 = vadd.f32 %v3577_v53, %v3247_v49  ;;  %v747_v9 = vrot.slane %v743_v58, 4  ;;  %v1149_v25 = vperm.slane %v5834_v10, 2  ;;  %v1155_v17 = vmul.f32 %v5807_v47, %v8467_v52 }
 0x15c   : > { %v729_v15 = vadd.f32 %v725_v29, %v511_v8  ;;  %v1141_v20 = vmul.f32 %v1139_v2, %v4748_v35  ;;  %v510_v16 = vmul.f32 %v5821_v43, %v8198_v1  ;;  %v514_v49 = vmul.f32 %v5821_v43, %v8468_v30  ;;  %v8469_v30 = vld [vmem:[#allocation48_spill] sm:$0xff]  ;;  %v8473_v1 = vld [vmem:[#allocation50_spill] sm:$0xff] }
 0x15d   : > { %v3583_v33 = vadd.f32 %v3581_v48, %v3579_v41  ;;  %v751_v27 = vadd.f32 %v747_v9, %v515_v40  ;;  %v1151_v24 = vmul.f32 %v1149_v25, %v4748_v35  ;;  %v720_v29 = vperm.slane %v5827_v38, 1 }
 0x15e   : > { %v739_v53 = vadd.f32 %v735_v61, %v729_v15  ;;  %v512_v58 = vadd.f32 %v510_v16, %v4855_v63  ;;  %v732_v2 = vmul.f32 %v5837_v18, %v8199_v59  ;;  %v516_v41 = vadd.f32 %v514_v49, %v4855_v63  ;;  %v8472_v49 = vld [vmem:[#allocation49_spill] sm:$0xff] }
 0x15f   : > { %v6197_v8 = vsel %vm1335_vm0, %v3583_v33, %v3727_v34  ;;  %v761_v52 = vadd.f32 %v757_v28, %v751_v27  ;;  %v742_v48 = vperm.slane %v5827_v38, 2  ;;  %v722_v15 = vmul.f32 %v720_v29, %v4871_v12 }
 0x160   : > { %v7947_v40 = vrot.slane %v6197_v8, 4  ;;  %v1143_v9 = vadd.f32 %v1141_v20, %v739_v53  ;;  %v736_v61 = vrot.slane %v732_v2, 4  ;;  %v754_v59 = vmul.f32 %v5837_v18, %v8469_v30 }
 0x161   : > { %v1153_v25 = vadd.f32 %v1151_v24, %v761_v52  ;;  %v744_v16 = vmul.f32 %v742_v48, %v4871_v12  ;;  %v1140_v34 = vperm.slane %v5882_v46, 1  ;;  %v8470_v28 = vrot.slane %v5811_v7, 4  ;;  %v8516_v12 = vld [vmem:[#allocation120_spill] sm:$0xff] }
 0x162   : > { %v1147_v27 = vadd.f32 %v1145_v62, %v1143_v9  ;;  %v726_v20 = vrot.slane %v722_v15, 4  ;;  %v1146_v53 = vmul.f32 %v5861_v6, %v8472_v49  ;;  %v758_v2 = vrot.slane %v754_v59, 4 }
 0x163   : > { %v6212_v33 = vsel %vm1335_vm0, %v7947_v40, %v8470_v28  ;;  %v1157_v24 = vadd.f32 %v1155_v17, %v1153_v25  ;;  %v748_v29 = vrot.slane %v744_v16, 4  ;;  %v1142_v30 = vmul.f32 %v1140_v34, %v8328_v39  ;;  %v8475_v40 = vld [vmem:[#allocation62_spill] sm:$0xff] }
 0x164   : > { %8471 = vst [vmem:[#allocation124_spill] sm:$0xff] %v6212_v33  ;;  %v7948_v52 = vrot.slane %v6212_v33, 4  ;;  %v730_v48 = vadd.f32 %v726_v20, %v512_v58  ;;  %v1150_v7 = vperm.slane %v5882_v46, 2  ;;  %v1156_v21 = vmul.f32 %v5861_v6, %v8473_v1  ;;  %v8476_v20 = vld [vmem:[#allocation60_spill] sm:$0xff] }
 0x165   : > { %v8474_v28 = vrot.slane %v5832_v3, 4  ;;  %v1319_v9 = vrot.slane %v1157_v24, 4  ;;  %v752_v15 = vadd.f32 %v748_v29, %v516_v41  ;;  %v1460_v17 = vmul.f32 %v5872_v44, %v8475_v40  ;;  %v8478_v24 = vld [vmem:[#allocation67_spill] sm:$0xff] }
 0x166   : > { %v740_v59 = vadd.f32 %v736_v61, %v730_v48  ;;  %v1152_v58 = vmul.f32 %v1150_v7, %v8328_v39  ;;  %v1464_v25 = vmul.f32 %v5872_v44, %v8332_v5  ;;  %v1742_v16 = vperm.slane %v5880_v4, 1  ;;  %v8479_v5 = vld [vmem:[#allocation69_spill] sm:$0xff] }
 0x167   : > { %v3974_v62 = vsel %vm1335_vm0, %v7948_v52, %v8474_v28  ;;  %v1346_v3 = vsel %vm1335_vm0, %v1147_v27, %v1319_v9  ;;  %v762_v34 = vadd.f32 %v758_v2, %v752_v15  ;;  %v1462_v1 = vadd.f32 %v1460_v17, %v8476_v20  ;;  %v8477_v28 = vld [vmem:[#allocation68_spill] sm:$0xff]  ;;  %v8480_v27 = vld [vmem:[#allocation75_spill] sm:$0xff] }
 0x168   : > { %4033 = vmatpush.msra.mxu1 %v3974_v62  ;;  %v1754_v41 = vmul.f32 %v8478_v24, %v8477_v28  ;;  %4070 = vmatpush.msra.mxu2 %v1346_v3  ;;  %v1144_v29 = vadd.f32 %v1142_v30, %v740_v59  ;;  %v1466_v62 = vadd.f32 %v1464_v25, %v8476_v20  ;;  %v1764_v48 = vperm.slane %v5880_v4, 2  ;;  %v8482_v3 = vld [vmem:[#allocation66_spill] sm:$0xff] }
 0x169   : > { %v1744_v61 = vmul.f32 %v1742_v16, %v8342_v19  ;;  %v1154_v7 = vadd.f32 %v1152_v58, %v762_v34  ;;  %v1776_v49 = vmul.f32 %v8478_v24, %v8479_v5  ;;  %v2114_v2 = vperm.slane %v8480_v27, 1  ;;  %v8483_v28 = vld [vmem:[#allocation18_spill] sm:$0xff]  ;;  %v8485_v24 = vld [vmem:[#allocation87_spill] sm:$0xff] }
 0x16a   : > { %v1758_v52 = vrot.slane %v1754_v41, 4  ;;  %v1148_v9 = vadd.f32 %v1146_v53, %v1144_v29  ;;  %v1766_v17 = vmul.f32 %v1764_v48, %v8342_v19  ;;  %v2120_v30 = vmul.f32 %v8482_v3, %v8481_v36  ;;  %v8484_v41 = vld [vmem:[#allocation76_spill] sm:$0xff]  ;;  %v8487_v48 = vld [vmem:[#allocation65_spill] sm:$0xff] }
 0x16b   : > { %v1748_v15 = vrot.slane %v1744_v61, 4  ;;  %v1158_v59 = vadd.f32 %v1156_v21, %v1154_v7  ;;  %v1780_v25 = vrot.slane %v1776_v49, 4  ;;  %v2116_v16 = vmul.f32 %v2114_v2, %v8483_v28  ;;  %v8486_v61 = vld [vmem:[#allocation82_spill] sm:$0xff]  ;;  %v8488_v2 = vld [vmem:[#allocation21_spill] sm:$0xff] }
 0x16c   : > { %v2124_v4 = vperm.slane %v8480_v27, 2  ;;  %v1770_v34 = vrot.slane %v1766_v17, 4  ;;  %v2130_v5 = vmul.f32 %v8482_v3, %v8484_v41  ;;  %v2462_v20 = vperm.slane %v8485_v24, 1  ;;  %v8489_v27 = vld [vmem:[#allocation83_spill] sm:$0xff] }
 0x16d   : > { %v1752_v58 = vadd.f32 %v1748_v15, %v1462_v1  ;;  %v1320_v53 = vrot.slane %v1158_v59, 4  ;;  %v2474_v19 = vmul.f32 %v8487_v48, %v8486_v61  ;;  %v2484_v21 = vperm.slane %v8485_v24, 2  ;;  %v8490_v59 = vld [vmem:[#allocation96_spill] sm:$0xff] }
 0x16e   : > { %v2126_v29 = vmul.f32 %v2124_v4, %v8483_v28  ;;  %v1774_v7 = vadd.f32 %v1770_v34, %v1466_v62  ;;  %v2464_v36 = vmul.f32 %v2462_v20, %v8488_v2  ;;  %v2496_v1 = vmul.f32 %v8487_v48, %v8489_v27  ;;  %v8493_v20 = vld [vmem:[#allocation86_spill] sm:$0xff] }
 0x16f   : > { %v1762_v49 = vadd.f32 %v1758_v52, %v1752_v58  ;;  %v1347_v15 = vsel %vm1335_vm0, %v1148_v9, %v1320_v53  ;;  %v2478_v17 = vrot.slane %v2474_v19, 4  ;;  %v2486_v41 = vmul.f32 %v2484_v21, %v8488_v2  ;;  %v8491_v52 = vld [vmem:[#allocation23_spill] sm:$0xff]  ;;  %v8492_v58 = vld [vmem:[#allocation89_spill] sm:$0xff]  ;;  %v8494_v19 = vld [vmem:[#allocation90_spill] sm:$0xff] }
 0x170   : > { %v2834_v3 = vperm.slane %v8490_v59, 1  ;;  %4093 = vmatpush.msra.mxu3 %v1347_v15  ;;  %v1784_v4 = vadd.f32 %v1780_v25, %v1774_v7  ;;  %v2468_v61 = vrot.slane %v2464_v36, 4  ;;  %v2500_v40 = vrot.slane %v2496_v1, 4  ;;  %v8495_v21 = vld [vmem:[#allocation97_spill] sm:$0xff]  ;;  %v8497_v36 = vld [vmem:[#allocation91_spill] sm:$0xff] }
 0x171   : > { %v2118_v28 = vadd.f32 %v2116_v16, %v1762_v49  ;;  %v2490_v24 = vrot.slane %v2486_v41, 4  ;;  %v2840_v34 = vmul.f32 %v8493_v20, %v8492_v58  ;;  %v2844_v27 = vperm.slane %v8490_v59, 2  ;;  %v8496_v16 = vld [vmem:[#allocation98_spill] sm:$0xff]  ;;  %v8499_v58 = vld [vmem:[#allocation25_spill] sm:$0xff] }
 0x172   : > { %v2836_v62 = vmul.f32 %v2834_v3, %v8491_v52  ;;  %v2128_v9 = vadd.f32 %v2126_v29, %v1784_v4  ;;  %v2850_v53 = vmul.f32 %v8493_v20, %v8494_v19  ;;  %v3182_v2 = vperm.slane %v8495_v21, 1  ;;  %v8498_v3 = vld [vmem:[#allocation99_spill] sm:$0xff]  ;;  %v8501_v59 = vld [vmem:[#allocation105_spill] sm:$0xff] }
 0x173   : > { %v2122_v48 = vadd.f32 %v2120_v30, %v2118_v28  ;;  %v2846_v25 = vmul.f32 %v2844_v27, %v8491_v52  ;;  %v3194_v49 = vmul.f32 %v8497_v36, %v8496_v16  ;;  %v3204_v41 = vperm.slane %v8495_v21, 2  ;;  %v8500_v30 = vld [vmem:[#allocation113_spill] sm:$0xff]  ;;  %v8502_v27 = vld [vmem:[#allocation103_spill] sm:$0xff] }
 0x174   : > { %v3216_v7 = vmul.f32 %v8497_v36, %v8498_v3  ;;  %v2132_v1 = vadd.f32 %v2130_v5, %v2128_v9  ;;  %v3184_v28 = vmul.f32 %v3182_v2, %v8499_v58  ;;  %v3554_v29 = vperm.slane %v8500_v30, 1  ;;  %v8503_v21 = vld [vmem:[#allocation27_spill] sm:$0xff]  ;;  %v8506_v9 = vld [vmem:[#allocation108_spill] sm:$0xff] }
 0x175   : > { %v2472_v15 = vadd.f32 %v2468_v61, %v2122_v48  ;;  %v3198_v4 = vrot.slane %v3194_v49, 4  ;;  %v3206_v19 = vmul.f32 %v3204_v41, %v8499_v58  ;;  %v3560_v52 = vmul.f32 %v8502_v27, %v8501_v59  ;;  %v8504_v61 = vld [vmem:[#allocation106_spill] sm:$0xff]  ;;  %v8505_v2 = vld [vmem:[#allocation115_spill] sm:$0xff] }
 0x176   : > { %v3220_v20 = vrot.slane %v3216_v7, 4  ;;  %v2494_v16 = vadd.f32 %v2490_v24, %v2132_v1  ;;  %v3188_v39 = vrot.slane %v3184_v28, 4  ;;  %v3556_v6 = vmul.f32 %v3554_v29, %v8503_v21  ;;  %v8507_v7 = vld [vmem:[#allocation116_spill] sm:$0xff]  ;;  %v8508_v59 = vld [vmem:[#allocation174_spill] sm:$0xff] }
 0x177   : > { %v2482_v44 = vadd.f32 %v2478_v17, %v2472_v15  ;;  %v3210_v46 = vrot.slane %v3206_v19, 4  ;;  %v3564_v5 = vperm.slane %v8500_v30, 2  ;;  %v3570_v48 = vmul.f32 %v8502_v27, %v8504_v61  ;;  %v8509_v1 = vld [vmem:[#allocation114_spill] sm:$0xff]  ;;  %v8510_v19 = vld [vmem:[#allocation125_spill] sm:$0xff] }
 0x178   : > { %v1461_v49 = vmul.f32 %v8506_v9, %v8505_v2  ;;  %v2504_v3 = vadd.f32 %v2500_v40, %v2494_v16  ;;  %v1465_v58 = vmul.f32 %v8506_v9, %v8507_v7  ;;  %v1743_v17 = vperm.slane %v8508_v59, 1  ;;  %v8511_v28 = vld [vmem:[#allocation118_spill] sm:$0xff]  ;;  %v8512_v40 = vld [vmem:[#allocation121_spill] sm:$0xff] }
 0x179   : > { %v2838_v41 = vadd.f32 %v2836_v62, %v2482_v44  ;;  %v3566_v24 = vmul.f32 %v3564_v5, %v8503_v21  ;;  %v1755_v29 = vmul.f32 %v8511_v28, %v8510_v19  ;;  %v1765_v30 = vperm.slane %v8508_v59, 2  ;;  %v8513_v7 = vld [vmem:[#allocation126_spill] sm:$0xff]  ;;  %v8514_v5 = vld [vmem:[#allocation136_spill] sm:$0xff] }
 0x17a   : > { %v1463_v15 = vadd.f32 %v1461_v49, %v8509_v1  ;;  %v2848_v27 = vadd.f32 %v2846_v25, %v2504_v3  ;;  %v1467_v2 = vadd.f32 %v1465_v58, %v8509_v1  ;;  %v1745_v44 = vmul.f32 %v1743_v17, %v8512_v40  ;;  %v8515_v19 = vld [vmem:[#allocation130_spill] sm:$0xff] }
 0x17b   : > { %v2842_v61 = vadd.f32 %v2840_v34, %v2838_v41  ;;  %v1759_v62 = vrot.slane %v1755_v29, 4  ;;  %v1767_v16 = vmul.f32 %v1765_v30, %v8512_v40  ;;  %v1777_v9 = vmul.f32 %v8511_v28, %v8513_v7 }
 0x17c   : > { %v2115_v21 = vperm.slane %v8514_v5, 1  ;;  %v2852_v49 = vadd.f32 %v2850_v53, %v2848_v27  ;;  %v1749_v33 = vrot.slane %v1745_v44, 4  ;;  %v2121_v59 = vmul.f32 %v8516_v12, %v8515_v19  ;;  %v8517_v27 = vld [vmem:[#allocation140_spill] sm:$0xff] }
 0x17d   : > { %v3192_v36 = vadd.f32 %v3188_v39, %v2842_v61  ;;  %v1771_v34 = vrot.slane %v1767_v16, 4  ;;  %v1781_v25 = vrot.slane %v1777_v9, 4  ;;  %v2125_v3 = vperm.slane %v8514_v5, 2  ;;  %v8518_v61 = vld [vmem:[#allocation132_spill] sm:$0xff] }
 0x17e   : > { %v2117_v58 = vmul.f32 %v2115_v21, %v8422_v11  ;;  %v3214_v17 = vadd.f32 %v3210_v46, %v2852_v49  ;;  %v1753_v30 = vadd.f32 %v1749_v33, %v1463_v15  ;;  %v2131_v29 = vmul.f32 %v8516_v12, %v8444_v56 }
 0x17f   : > { %v3202_v41 = vadd.f32 %v3198_v4, %v3192_v36  ;;  %v1775_v7 = vadd.f32 %v1771_v34, %v1467_v2  ;;  %v2127_v53 = vmul.f32 %v2125_v3, %v8422_v11  ;;  %v2463_v39 = vperm.slane %v6102_v22, 1  ;;  %v8519_v36 = vld [vmem:[#allocation141_spill] sm:$0xff] }
 0x180   : > { %v2475_v44 = vmul.f32 %v8518_v61, %v8517_v27  ;;  %v3224_v16 = vadd.f32 %v3220_v20, %v3214_v17  ;;  %v1763_v19 = vadd.f32 %v1759_v62, %v1753_v30  ;;  %v2485_v21 = vperm.slane %v6102_v22, 2 }
 0x181   : > { %v3558_v9 = vadd.f32 %v3556_v6, %v3202_v41  ;;  %v1785_v5 = vadd.f32 %v1781_v25, %v1775_v7  ;;  %v2465_v46 = vmul.f32 %v2463_v39, %v8438_v51  ;;  %v2497_v4 = vmul.f32 %v8518_v61, %v8519_v36  ;;  %v8520_v7 = vld [vmem:[#allocation147_spill] sm:$0xff] }
 0x182   : > { %v2479_v33 = vrot.slane %v2475_v44, 4  ;;  %v3568_v15 = vadd.f32 %v3566_v24, %v3224_v16  ;;  %v2119_v49 = vadd.f32 %v2117_v58, %v1763_v19  ;;  %v2487_v34 = vmul.f32 %v2485_v21, %v8438_v51 }
 0x183   : > { %v3562_v2 = vadd.f32 %v3560_v52, %v3558_v9  ;;  %v2129_v3 = vadd.f32 %v2127_v53, %v1785_v5  ;;  %v2469_v56 = vrot.slane %v2465_v46, 4  ;;  %v2501_v27 = vrot.slane %v2497_v4, 4  ;;  %v8521_v53 = vld [vmem:[#allocation155_spill] sm:$0xff] }
 0x184   : > { %v2835_v6 = vperm.slane %v6120_v14, 1  ;;  %v3572_v20 = vadd.f32 %v3570_v48, %v3568_v15  ;;  %v2123_v62 = vadd.f32 %v2121_v59, %v2119_v49  ;;  %v2491_v41 = vrot.slane %v2487_v34, 4 }
 0x185   : > { %v2841_v25 = vmul.f32 %v6106_v0, %v8520_v7  ;;  %v2133_v17 = vadd.f32 %v2131_v29, %v2129_v3  ;;  %v2845_v52 = vperm.slane %v6120_v14, 2  ;;  %v2851_v24 = vmul.f32 %v6106_v0, %v8456_v60 }
 0x186   : > { %v2837_v30 = vmul.f32 %v2835_v6, %v8449_v13  ;;  %v3704_v19 = vrot.slane %v3572_v20, 4  ;;  %v2473_v5 = vadd.f32 %v2469_v56, %v2123_v62  ;;  %v3183_v58 = vperm.slane %v6140_v54, 1  ;;  %v8522_v20 = vld [vmem:[#allocation162_spill] sm:$0xff] }
 0x187   : > { %v3195_v48 = vmul.f32 %v6126_v55, %v8521_v53  ;;  %v2495_v59 = vadd.f32 %v2491_v41, %v2133_v17  ;;  %v2847_v39 = vmul.f32 %v2845_v52, %v8449_v13  ;;  %v3205_v44 = vperm.slane %v6140_v54, 2  ;;  %v8523_v41 = vld [vmem:[#allocation119_spill] sm:$0xff] }
 0x188   : > { %v3217_v29 = vmul.f32 %v6126_v55, %v5714_v31  ;;  %v6328_v16 = vsel %vm1335_vm0, %v3562_v2, %v3704_v19  ;;  %v2483_v9 = vadd.f32 %v2479_v33, %v2473_v5  ;;  %v3185_v21 = vmul.f32 %v3183_v58, %v8454_v45  ;;  %v8525_v58 = vld [vmem:[#allocation164_spill] sm:$0xff] }
 0x189   : > { %v3199_v56 = vrot.slane %v3195_v48, 4  ;;  %v7981_v46 = vrot.slane %v6328_v16, 4  ;;  %v2505_v4 = vadd.f32 %v2501_v27, %v2495_v59  ;;  %v3207_v15 = vmul.f32 %v3205_v44, %v8454_v45 }
 0x18a   : > { %v3221_v49 = vrot.slane %v3217_v29, 4  ;;  %v2839_v34 = vadd.f32 %v2837_v30, %v2483_v9  ;;  %v3189_v3 = vrot.slane %v3185_v21, 4  ;;  %v3555_v6 = vperm.slane %v6162_v50, 1  ;;  %v8526_v29 = vld [vmem:[#allocation7_spill] sm:$0xff] }
 0x18b   : > { %v3561_v62 = vmul.f32 %v6149_v42, %v8522_v20  ;;  %v8524_v2 = vrot.slane %v8523_v41, 4  ;;  %v2849_v17 = vadd.f32 %v2847_v39, %v2505_v4  ;;  %v3211_v52 = vrot.slane %v3207_v15, 4  ;;  %v8527_v21 = vld [vmem:[#allocation51_spill] sm:$0xff] }
 0x18c   : > { %v3565_v27 = vperm.slane %v6162_v50, 2  ;;  %v2843_v30 = vadd.f32 %v2841_v25, %v2839_v34  ;;  %v3557_v5 = vmul.f32 %v3555_v6, %v8457_v57  ;;  %v3571_v48 = vmul.f32 %v6149_v42, %v8525_v58  ;;  %v8528_v4 = vld [vmem:[#allocation19_spill] sm:$0xff] }
 0x18d   : > { %v6341_v33 = vsel %vm1335_vm0, %v7981_v46, %v8524_v2  ;;  %v2853_v59 = vadd.f32 %v2851_v24, %v2849_v17  ;;  %v6350_v9 = vperm.slane %v8526_v29, 0  ;;  %v505_v39 = vmul.f32 %v8461_v23, %v8527_v21  ;;  %v8530_v24 = vld [vmem:[#allocation15_spill] sm:$0xff]  ;;  %v8532_v17 = vld [vmem:[#allocation10_spill] sm:$0xff] }
 0x18e   : > { %v7982_v19 = vrot.slane %v6341_v33, 4  ;;  %v3567_v44 = vmul.f32 %v3565_v27, %v8457_v57  ;;  %v8529_v15 = vrot.slane %v8528_v4, 4  ;;  %v3193_v34 = vadd.f32 %v3189_v3, %v2843_v30  ;;  %v8533_v29 = vld [vmem:[#allocation167_spill] sm:$0xff]  ;;  %v8534_v3 = vld [vmem:[#allocation14_spill] sm:$0xff] }
 0x18f   : > { %v6361_v6 = vadd.f32 %v4736_v26, %v8527_v21  ;;  %v6364_v41 = vperm.slane %v8530_v24, 0  ;;  %v3215_v2 = vadd.f32 %v3211_v52, %v2853_v59  ;;  %v499_v23 = vmul.f32 %v6350_v9, %v8532_v17  ;;  %v4556_v59 = vld [vmem:[%s4713_s20] sm:$0xf] }
 0x190   : > { %v3968_v25 = vsel %vm1335_vm0, %v7982_v19, %v8529_v15  ;;  %v507_v27 = vadd.f32 %v505_v39, %v4736_v26  ;;  %v695_v4 = vperm.slane %v8533_v29, 0  ;;  %v3203_v46 = vadd.f32 %v3199_v56, %v3193_v34  ;;  %v8535_v19 = vld [vmem:[#allocation52_spill] sm:$0xff] }
 0x191   : > { %8531 = vst [vmem:[#allocation144_spill] sm:$0xff] %v6364_v41  ;;  %4011 = vmatpush.msra.mxu0 %v3968_v25  ;;  %v673_v15 = vperm.slane %v6361_v6, 3  ;;  %v685_v30 = vmul.f32 %v6364_v41, %v8534_v3  ;;  %v709_v58 = vmul.f32 %v5793_v37, %v8535_v19  ;;  %v3225_v24 = vadd.f32 %v3221_v49, %v3215_v2  ;;  %v8536_v49 = vld [vmem:[#allocation17_spill] sm:$0xff] }
 0x192   : > { %v501_v25 = vadd.f32 %v499_v23, %v4736_v26  ;;  %v697_v52 = vmul.f32 %v695_v4, %v4744_v32  ;;  %v965_v17 = vperm.slane %v4556_v59, 0  ;;  %v3559_v21 = vadd.f32 %v3557_v5, %v3203_v46  ;;  %v8538_v5 = vld [vmem:[#allocation53_spill] sm:$0xff] }
 0x193   : > { %v675_v39 = vmul.f32 %v673_v15, %v4744_v32  ;;  %v689_v29 = vrot.slane %v685_v30, 4  ;;  %v713_v56 = vrot.slane %v709_v58, 4  ;;  %v3569_v34 = vadd.f32 %v3567_v44, %v3225_v24  ;;  %v8539_v44 = vld [vmem:[#allocation16_spill] sm:$0xff] }
 0x194   : > { %v701_v20 = vrot.slane %v697_v52, 4  ;;  %v967_v31 = vmul.f32 %v965_v17, %v4744_v32  ;;  %v979_v3 = vrot.slane %v8535_v19, 4  ;;  %v3563_v60 = vadd.f32 %v3561_v62, %v3559_v21  ;;  %v8540_v52 = vld [vmem:[#allocation28_spill] sm:$0xff] }
 0x195   : > { %v679_v37 = vrot.slane %v675_v39, 4  ;;  %v6382_v2 = vperm.slane %v8536_v49, 0  ;;  %v1127_v23 = vperm.slane %v5834_v10, 0  ;;  %v3573_v4 = vadd.f32 %v3571_v48, %v3569_v34  ;;  %v8541_v49 = vld [vmem:[#allocation54_spill] sm:$0xff]  ;;  %v8542_v48 = vld [vmem:[#allocation31_spill] sm:$0xff] }
 0x196   : > { %v705_v59 = vadd.f32 %v701_v20, %v507_v27  ;;  %v971_v46 = vrot.slane %v967_v31, 4  ;;  %v1135_v15 = vmul.f32 %v5807_v47, %v8538_v5  ;;  %v6391_v62 = vperm.slane %v8540_v52, 0 }
 0x197   : > { %8537 = vst [vmem:[#allocation150_spill] sm:$0xff] %v6382_v2  ;;  %v683_v58 = vadd.f32 %v679_v37, %v501_v25  ;;  %v1123_v30 = vmul.f32 %v6382_v2, %v8539_v44  ;;  %v1129_v24 = vmul.f32 %v1127_v23, %v4748_v35  ;;  %v3705_v21 = vrot.slane %v3573_v4, 4  ;;  %v8543_v25 = vld [vmem:[#allocation39_spill] sm:$0xff] }
 0x198   : > { %v717_v17 = vadd.f32 %v713_v56, %v705_v59  ;;  %v975_v39 = vadd.f32 %v971_v46, %v6361_v6  ;;  %v506_v20 = vmul.f32 %v5821_v43, %v8541_v49  ;;  %v500_v47 = vmul.f32 %v6391_v62, %v8542_v48  ;;  %v8547_v46 = vld [vmem:[#allocation38_spill] sm:$0xff] }
 0x199   : > { %v693_v31 = vadd.f32 %v689_v29, %v683_v58  ;;  %v6400_v27 = vadd.f32 %v4855_v63, %v8541_v49  ;;  %v6403_v34 = vperm.slane %v8543_v25, 0  ;;  %v6406_v37 = vsel %vm1335_vm0, %v3563_v60, %v3705_v21  ;;  %v8548_v21 = vld [vmem:[#allocation56_spill] sm:$0xff] }
 0x19a   : > { %8545 = vst [vmem:[#allocation154_spill] sm:$0xff] %v6406_v37  ;;  %v6408_v56 = vadd.f32 %v979_v3, %v975_v39  ;;  %v1131_v23 = vadd.f32 %v1129_v24, %v717_v17  ;;  %v508_v43 = vadd.f32 %v506_v20, %v4855_v63  ;;  %v7988_v29 = vrot.slane %v6406_v37, 4  ;;  %v8551_v39 = vld [vmem:[#allocation32_spill] sm:$0xff] }
 0x19b   : > { %8544 = vst [vmem:[#allocation24_spill] sm:$0xff] %v6403_v34  ;;  %v502_v4 = vadd.f32 %v500_v47, %v4855_v63  ;;  %v674_v59 = vperm.slane %v6400_v27, 3  ;;  %v686_v58 = vmul.f32 %v6403_v34, %v8547_v46  ;;  %v696_v60 = vperm.slane %v5827_v38, 0  ;;  %v4557_v25 = vld [vmem:[%s4713_s20 + $0x8] sm:$0xf]  ;;  %v8583_v63 = vld [vmem:[#allocation77_spill] sm:$0xff] }
 0x19c   : > { %8546 = vst [vmem:[#allocation153_spill] sm:$0xff] %v6408_v56  ;;  %v1117_v52 = vperm.slane %v6408_v56, 3  ;;  %v1137_v48 = vadd.f32 %v1135_v15, %v1131_v23  ;;  %v710_v3 = vmul.f32 %v5837_v18, %v8548_v21  ;;  %v8549_v24 = vrot.slane %v6197_v8, 4  ;;  %v8554_v49 = vld [vmem:[#allocation40_spill] sm:$0xff] }
 0x19d   : > { %v676_v20 = vmul.f32 %v674_v59, %v8551_v39  ;;  %v690_v47 = vrot.slane %v686_v58, 4  ;;  %v966_v46 = vperm.slane %v4557_v25, 0  ;;  %v698_v23 = vmul.f32 %v696_v60, %v8551_v39  ;;  %v8556_v60 = vld [vmem:[#allocation173_spill] sm:$0xff] }
 0x19e   : > { %v6425_v17 = vsel %vm1335_vm0, %v7988_v29, %v8549_v24  ;;  %v1119_v15 = vmul.f32 %v1117_v52, %v4748_v35  ;;  %v1313_v38 = vrot.slane %v1137_v48, 4  ;;  %v714_v44 = vrot.slane %v710_v3, 4  ;;  %v8552_v24 = vld [vmem:[#allocation124_spill] sm:$0xff] }
 0x19f   : > { %8550 = vst [vmem:[#allocation26_spill] sm:$0xff] %v6425_v17  ;;  %v7995_v10 = vrot.slane %v6425_v17, 4  ;;  %v680_v18 = vrot.slane %v676_v20, 4  ;;  %v968_v8 = vmul.f32 %v966_v46, %v8551_v39  ;;  %v980_v5 = vrot.slane %v8548_v21, 4  ;;  %v8557_v20 = vld [vmem:[#allocation57_spill] sm:$0xff]  ;;  %v8560_v39 = vld [vmem:[#allocation59_spill] sm:$0xff] }
 0x1a0   : > { %v8553_v29 = vrot.slane %v8552_v24, 4  ;;  %v1121_v58 = vadd.f32 %v1119_v15, %v693_v31  ;;  %v702_v25 = vrot.slane %v698_v23, 4  ;;  %v6440_v19 = vperm.slane %v8554_v49, 0  ;;  %v8558_v46 = vld [vmem:[#allocation169_spill] sm:$0xff]  ;;  %v8559_v24 = vld [vmem:[#allocation34_spill] sm:$0xff]  ;;  %v8562_v15 = vld [vmem:[#allocation11_spill] sm:$0xff] }
 0x1a1   : > { %v684_v52 = vadd.f32 %v680_v18, %v502_v4  ;;  %v972_v48 = vrot.slane %v968_v8, 4  ;;  %v1128_v3 = vperm.slane %v8556_v60, 0  ;;  %v1136_v36 = vmul.f32 %v8558_v46, %v8557_v20  ;;  %v8563_v4 = vld [vmem:[#allocation171_spill] sm:$0xff]  ;;  %v8564_v18 = vld [vmem:[#allocation170_spill] sm:$0xff] }
 0x1a2   : > { %v3970_v59 = vsel %vm1335_vm0, %v7995_v10, %v8553_v29  ;;  %8555 = vst [vmem:[#allocation29_spill] sm:$0xff] %v6440_v19  ;;  %v1125_v21 = vadd.f32 %v1123_v30, %v1121_v58  ;;  %v706_v37 = vadd.f32 %v702_v25, %v508_v43  ;;  %v1124_v17 = vmul.f32 %v6440_v19, %v8559_v24  ;;  %v8565_v30 = vld [vmem:[#allocation64_spill] sm:$0xff]  ;;  %v8566_v58 = vld [vmem:[#allocation62_spill] sm:$0xff]  ;;  %v8574_v24 = vld [vmem:[#allocation67_spill] sm:$0xff] }
 0x1a3   : > { %4034 = vmatpush.msra.mxu1 %v3970_v59  ;;  %v6448_v29 = vperm.slane %v8560_v39, 1  ;;  %v694_v31 = vadd.f32 %v690_v47, %v684_v52  ;;  %v976_v49 = vadd.f32 %v972_v48, %v6400_v27  ;;  %v1130_v23 = vmul.f32 %v1128_v3, %v8562_v15  ;;  %v8567_v25 = vld [vmem:[#allocation60_spill] sm:$0xff]  ;;  %v8570_v48 = vld [vmem:[#allocation71_spill] sm:$0xff] }
 0x1a4   : > { %v1456_v8 = vmul.f32 %v8564_v18, %v8563_v4  ;;  %v1344_v59 = vsel %vm1335_vm0, %v1125_v21, %v1313_v38  ;;  %v718_v46 = vadd.f32 %v714_v44, %v706_v37  ;;  %v6459_v10 = vadd.f32 %v8567_v25, %v8566_v58  ;;  %v8572_v18 = vld [vmem:[#allocation172_spill] sm:$0xff]  ;;  %v8573_v38 = vld [vmem:[#allocation61_spill] sm:$0xff]  ;;  %v4558_v39 = vld [vmem:[%s4772_s25] sm:$0xf] }
 0x1a5   : > { %8561 = vst [vmem:[#allocation160_spill] sm:$0xff] %v6448_v29  ;;  %v1450_v43 = vmul.f32 %v6448_v29, %v8565_v30  ;;  %4071 = vmatpush.msra.mxu2 %v1344_v59  ;;  %v6461_v47 = vadd.f32 %v980_v5, %v976_v49  ;;  %v6465_v3 = vperm.slane %v8570_v48, 1  ;;  %v1718_v60 = vperm.slane %v8572_v18, 0  ;;  %v8575_v59 = vld [vmem:[#allocation70_spill] sm:$0xff]  ;;  %v8576_v49 = vld [vmem:[#allocation12_spill] sm:$0xff] }
 0x1a6   : > { %8568 = vst [vmem:[#allocation166_spill] sm:$0xff] %v6459_v10  ;;  %v1458_v52 = vadd.f32 %v1456_v8, %v8567_v25  ;;  %v1132_v21 = vadd.f32 %v1130_v23, %v718_v46  ;;  %v1696_v37 = vperm.slane %v6459_v10, 3  ;;  %v1732_v30 = vmul.f32 %v8574_v24, %v8573_v38  ;;  %v8577_v46 = vld [vmem:[#allocation68_spill] sm:$0xff] }
 0x1a7   : > { %8569 = vst [vmem:[#allocation118_spill] sm:$0xff] %v6461_v47  ;;  %v1452_v44 = vadd.f32 %v1450_v43, %v8567_v25  ;;  %v1118_v4 = vperm.slane %v6461_v47, 3  ;;  %v1708_v5 = vmul.f32 %v6465_v3, %v8575_v59  ;;  %v1720_v8 = vmul.f32 %v1718_v60, %v8576_v49  ;;  %v8578_v47 = vld [vmem:[#allocation78_spill] sm:$0xff]  ;;  %v8580_v60 = vld [vmem:[#allocation75_spill] sm:$0xff] }
 0x1a8   : > { %8571 = vst [vmem:[#allocation120_spill] sm:$0xff] %v6465_v3  ;;  %v1918_v48 = vperm.slane %v4558_v39, 1  ;;  %v1138_v20 = vadd.f32 %v1136_v36, %v1132_v21  ;;  %v1698_v18 = vmul.f32 %v1696_v37, %v8576_v49  ;;  %v1736_v23 = vrot.slane %v1732_v30, 4  ;;  %v8581_v37 = vld [vmem:[#allocation72_spill] sm:$0xff]  ;;  %v8582_v30 = vld [vmem:[#allocation66_spill] sm:$0xff] }
 0x1a9   : > { %v1932_v43 = vrot.slane %v8577_v46, 4  ;;  %v1120_v25 = vmul.f32 %v1118_v4, %v8562_v15  ;;  %v1712_v29 = vrot.slane %v1708_v5, 4  ;;  %v1724_v58 = vrot.slane %v1720_v8, 4  ;;  %v8584_v5 = vld [vmem:[#allocation18_spill] sm:$0xff]  ;;  %v8586_v15 = vld [vmem:[#allocation85_spill] sm:$0xff] }
 0x1aa   : > { %v1920_v24 = vmul.f32 %v1918_v48, %v8576_v49  ;;  %v1314_v38 = vrot.slane %v1138_v20, 4  ;;  %v1702_v19 = vrot.slane %v1698_v18, 4  ;;  %v6482_v59 = vperm.slane %v8578_v47, 1  ;;  %v8585_v48 = vld [vmem:[#allocation73_spill] sm:$0xff] }
 0x1ab   : > { %v2102_v3 = vperm.slane %v8580_v60, 0  ;;  %v1122_v39 = vadd.f32 %v1120_v25, %v694_v31  ;;  %v1728_v36 = vadd.f32 %v1724_v58, %v1458_v52  ;;  %v2110_v34 = vmul.f32 %v8582_v30, %v8581_v37  ;;  %v8588_v25 = vld [vmem:[#allocation87_spill] sm:$0xff] }
 0x1ac   : > { %8579 = vst [vmem:[#allocation132_spill] sm:$0xff] %v6482_v59  ;;  %v1924_v21 = vrot.slane %v1920_v24, 4  ;;  %v1706_v46 = vadd.f32 %v1702_v19, %v1452_v44  ;;  %v2098_v4 = vmul.f32 %v6482_v59, %v8583_v63  ;;  %v2194_v20 = vperm.slane %v8585_v48, 1  ;;  %v8589_v19 = vld [vmem:[#allocation79_spill] sm:$0xff]  ;;  %v8590_v44 = vld [vmem:[#allocation65_spill] sm:$0xff] }
 0x1ad   : > { %v2104_v8 = vmul.f32 %v2102_v3, %v8584_v5  ;;  %v1126_v18 = vadd.f32 %v1124_v17, %v1122_v39  ;;  %v1740_v49 = vadd.f32 %v1736_v23, %v1728_v36  ;;  %v6493_v60 = vperm.slane %v8586_v15, 1  ;;  %v8592_v17 = vld [vmem:[#allocation84_spill] sm:$0xff]  ;;  %v8593_v39 = vld [vmem:[#allocation21_spill] sm:$0xff] }
 0x1ae   : > { %v1928_v47 = vadd.f32 %v1924_v21, %v6459_v10  ;;  %v1716_v31 = vadd.f32 %v1712_v29, %v1706_v46  ;;  %v2196_v58 = vmul.f32 %v2194_v20, %v8584_v5  ;;  %v2438_v52 = vperm.slane %v8588_v25, 0  ;;  %v8594_v29 = vld [vmem:[#allocation80_spill] sm:$0xff]  ;;  %v8595_v20 = vld [vmem:[#allocation82_spill] sm:$0xff] }
 0x1af   : > { %8587 = vst [vmem:[#allocation119_spill] sm:$0xff] %v6493_v60  ;;  %v2452_v24 = vmul.f32 %v8590_v44, %v8589_v19  ;;  %v1345_v30 = vsel %vm1335_vm0, %v1126_v18, %v1314_v38  ;;  %v2106_v37 = vadd.f32 %v2104_v8, %v1740_v49  ;;  %v2428_v23 = vmul.f32 %v6493_v60, %v8592_v17  ;;  %v8598_v18 = vld [vmem:[#allocation96_spill] sm:$0xff]  ;;  %v8602_v19 = vld [vmem:[#allocation86_spill] sm:$0xff]  ;;  %v8605_v60 = vld [vmem:[#allocation23_spill] sm:$0xff] }
 0x1b0   : > { %v6500_v3 = vadd.f32 %v1932_v43, %v1928_v47  ;;  %4094 = vmatpush.msra.mxu3 %v1345_v30  ;;  %v2440_v36 = vmul.f32 %v2438_v52, %v8593_v39  ;;  %v2638_v46 = vperm.slane %v8594_v29, 1  ;;  %v2652_v15 = vrot.slane %v8595_v20, 4  ;;  %v8596_v43 = vld [vmem:[#allocation94_spill] sm:$0xff]  ;;  %v8601_v29 = vld [vmem:[#allocation81_spill] sm:$0xff] }
 0x1b1   : > { %v2456_v21 = vrot.slane %v2452_v24, 4  ;;  %v2112_v48 = vadd.f32 %v2110_v34, %v2106_v37  ;;  %v2432_v38 = vrot.slane %v2428_v23, 4  ;;  %v6511_v8 = vperm.slane %v8596_v43, 1  ;;  %v8599_v24 = vld [vmem:[#allocation74_spill] sm:$0xff]  ;;  %v8603_v34 = vld [vmem:[#allocation88_spill] sm:$0xff] }
 0x1b2   : > { %8591 = vst [vmem:[#allocation7_spill] sm:$0xff] %v6500_v3  ;;  %v2092_v25 = vperm.slane %v6500_v3, 3  ;;  %v2198_v44 = vadd.f32 %v2196_v58, %v6500_v3  ;;  %v2444_v47 = vrot.slane %v2440_v36, 4  ;;  %v2640_v49 = vmul.f32 %v2638_v46, %v8593_v39  ;;  %v8604_v36 = vld [vmem:[#allocation92_spill] sm:$0xff]  ;;  %v8614_v3 = vld [vmem:[#allocation25_spill] sm:$0xff]  ;;  %v8615_v10 = vld [vmem:[#allocation98_spill] sm:$0xff] }
 0x1b3   : > { %8597 = vst [vmem:[#allocation19_spill] sm:$0xff] %v6511_v8  ;;  %v2822_v30 = vperm.slane %v8598_v18, 0  ;;  %v2830_v63 = vmul.f32 %v8602_v19, %v8601_v29  ;;  %v2914_v37 = vperm.slane %v8603_v34, 1  ;;  %v2818_v46 = vmul.f32 %v6511_v8, %v8604_v36  ;;  %v8608_v29 = vld [vmem:[#allocation97_spill] sm:$0xff] }
 0x1b4   : > { %v2094_v52 = vmul.f32 %v2092_v25, %v8584_v5  ;;  %v6516_v17 = vadd.f32 %v2198_v44, %v8599_v24  ;;  %v2448_v58 = vadd.f32 %v2444_v47, %v2112_v48  ;;  %v2644_v23 = vrot.slane %v2640_v49, 4  ;;  %v8606_v5 = vld [vmem:[#allocation101_spill] sm:$0xff]  ;;  %v8609_v48 = vld [vmem:[#allocation95_spill] sm:$0xff] }
 0x1b5   : > { %v2824_v43 = vmul.f32 %v2822_v30, %v8605_v60  ;;  %v2916_v25 = vmul.f32 %v2914_v37, %v8605_v60  ;;  %v6527_v44 = vperm.slane %v8606_v5, 1  ;;  %v3158_v34 = vperm.slane %v8608_v29, 0  ;;  %v8610_v47 = vld [vmem:[#allocation91_spill] sm:$0xff]  ;;  %v8611_v30 = vld [vmem:[#allocation100_spill] sm:$0xff] }
 0x1b6   : > { %8600 = vst [vmem:[#allocation15_spill] sm:$0xff] %v6516_v17  ;;  %v2096_v20 = vadd.f32 %v2094_v52, %v1716_v31  ;;  %v2416_v18 = vperm.slane %v6516_v17, 3  ;;  %v2460_v59 = vadd.f32 %v2456_v21, %v2448_v58  ;;  %v2648_v19 = vadd.f32 %v2644_v23, %v6516_v17  ;;  %v8612_v52 = vld [vmem:[#allocation93_spill] sm:$0xff] }
 0x1b7   : > { %8607 = vst [vmem:[#allocation10_spill] sm:$0xff] %v6527_v44  ;;  %v3172_v49 = vmul.f32 %v8610_v47, %v8609_v48  ;;  %v3148_v31 = vmul.f32 %v6527_v44, %v8611_v30  ;;  %v3358_v8 = vperm.slane %v8612_v52, 1  ;;  %v3160_v21 = vmul.f32 %v3158_v34, %v8614_v3  ;;  %v8622_v44 = vld [vmem:[#allocation103_spill] sm:$0xff] }
 0x1b8   : > { %v2100_v24 = vadd.f32 %v2098_v4, %v2096_v20  ;;  %v2418_v36 = vmul.f32 %v2416_v18, %v8593_v39  ;;  %v6537_v37 = vadd.f32 %v2652_v15, %v2648_v19  ;;  %v2826_v5 = vadd.f32 %v2824_v43, %v2460_v59  ;;  %v8616_v15 = vld [vmem:[#allocation112_spill] sm:$0xff]  ;;  %v8618_v59 = vld [vmem:[#allocation113_spill] sm:$0xff] }
 0x1b9   : > { %v3176_v58 = vrot.slane %v3172_v49, 4  ;;  %v3152_v17 = vrot.slane %v3148_v31, 4  ;;  %v3360_v29 = vmul.f32 %v3358_v8, %v8614_v3  ;;  %v3372_v47 = vrot.slane %v8615_v10, 4  ;;  %v8621_v31 = vld [vmem:[#allocation102_spill] sm:$0xff] }
 0x1ba   : > { %8613 = vst [vmem:[#allocation167_spill] sm:$0xff] %v6537_v37  ;;  %v2422_v23 = vrot.slane %v2418_v36, 4  ;;  %v2812_v4 = vperm.slane %v6537_v37, 3  ;;  %v2832_v20 = vadd.f32 %v2830_v63, %v2826_v5  ;;  %v2918_v18 = vadd.f32 %v2916_v25, %v6537_v37  ;;  %v8619_v36 = vld [vmem:[#allocation89_spill] sm:$0xff]  ;;  %v8623_v5 = vld [vmem:[#allocation111_spill] sm:$0xff] }
 0x1bb   : > { %v3164_v30 = vrot.slane %v3160_v21, 4  ;;  %v3364_v52 = vrot.slane %v3360_v29, 4  ;;  %v6545_v19 = vperm.slane %v8616_v15, 1  ;;  %v3542_v43 = vperm.slane %v8618_v59, 0 }
 0x1bc   : > { %v2426_v48 = vadd.f32 %v2422_v23, %v2100_v24  ;;  %v2814_v34 = vmul.f32 %v2812_v4, %v8605_v60  ;;  %v6550_v49 = vadd.f32 %v2918_v18, %v8619_v36  ;;  %v3550_v10 = vmul.f32 %v8622_v44, %v8621_v31  ;;  %v8624_v24 = vld [vmem:[#allocation27_spill] sm:$0xff]  ;;  %v8625_v23 = vld [vmem:[#allocation110_spill] sm:$0xff]  ;;  %v8627_v18 = vld [vmem:[#allocation109_spill] sm:$0xff] }
 0x1bd   : > { %8617 = vst [vmem:[#allocation14_spill] sm:$0xff] %v6545_v19  ;;  %v3168_v8 = vadd.f32 %v3164_v30, %v2832_v20  ;;  %v3538_v25 = vmul.f32 %v6545_v19, %v8623_v5  ;;  %v3544_v21 = vmul.f32 %v3542_v43, %v8624_v24  ;;  %v6558_v29 = vperm.slane %v8625_v23, 1  ;;  %v8628_v36 = vld [vmem:[#allocation108_spill] sm:$0xff]  ;;  %v8629_v60 = vld [vmem:[#allocation117_spill] sm:$0xff]  ;;  %v8630_v44 = vld [vmem:[#allocation115_spill] sm:$0xff] }
 0x1be   : > { %8620 = vst [vmem:[#allocation17_spill] sm:$0xff] %v6550_v49  ;;  %v2436_v63 = vadd.f32 %v2432_v38, %v2426_v48  ;;  %v3136_v59 = vperm.slane %v6550_v49, 3  ;;  %v3368_v4 = vadd.f32 %v3364_v52, %v6550_v49  ;;  %v1457_v30 = vmul.f32 %v8628_v36, %v8627_v18  ;;  %v8632_v43 = vld [vmem:[#allocation128_spill] sm:$0xff]  ;;  %v8635_v18 = vld [vmem:[#allocation127_spill] sm:$0xff] }
 0x1bf   : > { %8626 = vst [vmem:[#allocation28_spill] sm:$0xff] %v6558_v29  ;;  %v3180_v15 = vadd.f32 %v3176_v58, %v3168_v8  ;;  %v1451_v38 = vmul.f32 %v6558_v29, %v8629_v60  ;;  %v6568_v48 = vadd.f32 %v8509_v1, %v8630_v44  ;;  %v6571_v5 = vperm.slane %v8632_v43, 1  ;;  %v8636_v44 = vld [vmem:[#allocation174_spill] sm:$0xff] }
 0x1c0   : > { %v2816_v20 = vadd.f32 %v2814_v34, %v2436_v63  ;;  %v3138_v23 = vmul.f32 %v3136_v59, %v8614_v3  ;;  %v6574_v58 = vadd.f32 %v3372_v47, %v3368_v4  ;;  %v1459_v8 = vadd.f32 %v1457_v30, %v8509_v1 }
 0x1c1   : > { %8631 = vst [vmem:[#allocation31_spill] sm:$0xff] %v6568_v48  ;;  %v3546_v52 = vadd.f32 %v3544_v21, %v3180_v15  ;;  %v1453_v34 = vadd.f32 %v1451_v38, %v8509_v1  ;;  %v1697_v63 = vperm.slane %v6568_v48, 3  ;;  %v1709_v60 = vmul.f32 %v6571_v5, %v8635_v18  ;;  %v8637_v15 = vld [vmem:[#allocation122_spill] sm:$0xff] }
 0x1c2   : > { %8633 = vst [vmem:[#allocation39_spill] sm:$0xff] %v6571_v5  ;;  %v2820_v36 = vadd.f32 %v2818_v46, %v2816_v20  ;;  %v3142_v31 = vrot.slane %v3138_v23, 4  ;;  %v3532_v43 = vperm.slane %v6574_v58, 3  ;;  %v1719_v19 = vperm.slane %v8636_v44, 0  ;;  %v4559_v46 = vld [vmem:[%s4772_s25 + $0x8] sm:$0xf] }
 0x1c3   : > { %8634 = vst [vmem:[#allocation38_spill] sm:$0xff] %v6574_v58  ;;  %v3552_v29 = vadd.f32 %v3550_v10, %v3546_v52  ;;  %v1699_v47 = vmul.f32 %v1697_v63, %v8512_v40  ;;  %v1713_v59 = vrot.slane %v1709_v60, 4  ;;  %v1733_v21 = vmul.f32 %v8511_v28, %v8637_v15  ;;  %v8638_v52 = vld [vmem:[#allocation125_spill] sm:$0xff]  ;;  %v8639_v60 = vld [vmem:[#allocation135_spill] sm:$0xff]  ;;  %v8640_v28 = vld [vmem:[#allocation136_spill] sm:$0xff] }
 0x1c4   : > { %v1919_v4 = vperm.slane %v4559_v46, 1  ;;  %v3146_v30 = vadd.f32 %v3142_v31, %v2820_v36  ;;  %v3534_v20 = vmul.f32 %v3532_v43, %v8624_v24  ;;  %v1721_v18 = vmul.f32 %v1719_v19, %v8512_v40  ;;  %v8641_v36 = vld [vmem:[#allocation129_spill] sm:$0xff]  ;;  %v8642_v43 = vld [vmem:[#allocation131_spill] sm:$0xff]  ;;  %v8643_v24 = vld [vmem:[#allocation134_spill] sm:$0xff] }
 0x1c5   : > { %v3698_v38 = vrot.slane %v3552_v29, 4  ;;  %v1703_v23 = vrot.slane %v1699_v47, 4  ;;  %v1737_v1 = vrot.slane %v1733_v21, 4  ;;  %v1933_v44 = vrot.slane %v8638_v52, 4 }
 0x1c6   : > { %v1921_v10 = vmul.f32 %v1919_v4, %v8512_v40  ;;  %v3156_v5 = vadd.f32 %v3152_v17, %v3146_v30  ;;  %v1725_v63 = vrot.slane %v1721_v18, 4  ;;  %v6592_v58 = vperm.slane %v8639_v60, 1 }
 0x1c7   : > { %v2103_v15 = vperm.slane %v8640_v28, 0  ;;  %v1707_v46 = vadd.f32 %v1703_v23, %v1453_v34  ;;  %v2111_v29 = vmul.f32 %v8516_v12, %v8641_v36  ;;  %v2195_v19 = vperm.slane %v8642_v43, 1  ;;  %v8644_v28 = vld [vmem:[#allocation143_spill] sm:$0xff]  ;;  %v8645_v36 = vld [vmem:[#allocation138_spill] sm:$0xff] }
 0x1c8   : > { %v1925_v31 = vrot.slane %v1921_v10, 4  ;;  %v3536_v47 = vadd.f32 %v3534_v20, %v3156_v5  ;;  %v1729_v21 = vadd.f32 %v1725_v63, %v1459_v8  ;;  %v2099_v4 = vmul.f32 %v6592_v58, %v8643_v24  ;;  %v8646_v20 = vld [vmem:[#allocation142_spill] sm:$0xff] }
 0x1c9   : > { %v2105_v17 = vmul.f32 %v2103_v15, %v8422_v11  ;;  %v1717_v18 = vadd.f32 %v1713_v59, %v1707_v46  ;;  %v2197_v60 = vmul.f32 %v2195_v19, %v8422_v11  ;;  %v6604_v34 = vperm.slane %v8644_v28, 1  ;;  %v8647_v59 = vld [vmem:[#allocation137_spill] sm:$0xff]  ;;  %v8648_v46 = vld [vmem:[#allocation140_spill] sm:$0xff] }
 0x1ca   : > { %v1929_v30 = vadd.f32 %v1925_v31, %v6568_v48  ;;  %v3540_v23 = vadd.f32 %v3538_v25, %v3536_v47  ;;  %v1741_v10 = vadd.f32 %v1737_v1, %v1729_v21  ;;  %v2439_v12 = vperm.slane %v6102_v22, 0 }
 0x1cb   : > { %v2453_v5 = vmul.f32 %v8518_v61, %v8645_v36  ;;  %v2429_v15 = vmul.f32 %v6604_v34, %v8646_v20  ;;  %v2639_v63 = vperm.slane %v8647_v59, 1  ;;  %v2653_v31 = vrot.slane %v8648_v46, 4  ;;  %v8649_v20 = vld [vmem:[#allocation152_spill] sm:$0xff] }
 0x1cc   : > { %v6609_v8 = vadd.f32 %v1933_v44, %v1929_v30  ;;  %v6616_v19 = vsel %vm1335_vm0, %v3540_v23, %v3698_v38  ;;  %v2107_v24 = vadd.f32 %v2105_v17, %v1741_v10  ;;  %v2441_v1 = vmul.f32 %v2439_v12, %v8438_v51  ;;  %v8652_v10 = vld [vmem:[#allocation130_spill] sm:$0xff] }
 0x1cd   : > { %v2457_v25 = vrot.slane %v2453_v5, 4  ;;  %v8037_v22 = vrot.slane %v6616_v19, 4  ;;  %v2433_v47 = vrot.slane %v2429_v15, 4  ;;  %v2641_v59 = vmul.f32 %v2639_v63, %v8438_v51  ;;  %v8653_v15 = vld [vmem:[#allocation151_spill] sm:$0xff] }
 0x1ce   : > { %v2093_v61 = vperm.slane %v6609_v8, 3  ;;  %v2199_v44 = vadd.f32 %v2197_v60, %v6609_v8  ;;  %v2113_v21 = vadd.f32 %v2111_v29, %v2107_v24  ;;  %v2445_v30 = vrot.slane %v2441_v1, 4 }
 0x1cf   : > { %v6624_v36 = vperm.slane %v8649_v20, 1  ;;  %v8650_v38 = vrot.slane %v6328_v16, 4  ;;  %v2823_v24 = vperm.slane %v6120_v14, 0  ;;  %v2645_v5 = vrot.slane %v2641_v59, 4 }
 0x1d0   : > { %v2095_v23 = vmul.f32 %v2093_v61, %v8422_v11  ;;  %v6635_v12 = vadd.f32 %v2199_v44, %v8652_v10  ;;  %v2449_v29 = vadd.f32 %v2445_v30, %v2113_v21  ;;  %v8655_v44 = vrot.slane %v6341_v33, 4  ;;  %v8656_v21 = vld [vmem:[#allocation146_spill] sm:$0xff] }
 0x1d1   : > { %v6631_v17 = vsel %vm1335_vm0, %v8037_v22, %v8650_v38  ;;  %v2819_v63 = vmul.f32 %v6624_v36, %v8653_v15  ;;  %v2825_v38 = vmul.f32 %v2823_v24, %v8449_v13  ;;  %v8654_v22 = vld [vmem:[#allocation139_spill] sm:$0xff]  ;;  %v2915_v30 = vperm.slane %v8656_v21, 1  ;;  %v8657_v15 = vld [vmem:[#allocation158_spill] sm:$0xff] }
 0x1d2   : > { %8651 = vst [vmem:[#allocation124_spill] sm:$0xff] %v6631_v17  ;;  %v8038_v60 = vrot.slane %v6631_v17, 4  ;;  %v2097_v16 = vadd.f32 %v2095_v23, %v1717_v18  ;;  %v2417_v1 = vperm.slane %v6635_v12, 3  ;;  %v2831_v61 = vmul.f32 %v6106_v0, %v8654_v22 }
 0x1d3   : > { %v2461_v20 = vadd.f32 %v2457_v25, %v2449_v29  ;;  %v2649_v59 = vadd.f32 %v2645_v5, %v6635_v12  ;;  %v6654_v24 = vperm.slane %v8657_v15, 1  ;;  %v3159_v0 = vperm.slane %v6140_v54, 0  ;;  %v8659_v5 = vld [vmem:[#allocation157_spill] sm:$0xff] }
 0x1d4   : > { %v3964_v14 = vsel %vm1335_vm0, %v8038_v60, %v8655_v44  ;;  %v2101_v18 = vadd.f32 %v2099_v4, %v2097_v16  ;;  %v2419_v23 = vmul.f32 %v2417_v1, %v8438_v51  ;;  %v2917_v28 = vmul.f32 %v2915_v30, %v8449_v13  ;;  %v8658_v44 = vld [vmem:[#allocation123_spill] sm:$0xff]  ;;  %v8660_v16 = vld [vmem:[#allocation149_spill] sm:$0xff] }
 0x1d5   : > { %4012 = vmatpush.msra.mxu0 %v3964_v14  ;;  %v6657_v22 = vadd.f32 %v2653_v31, %v2649_v59  ;;  %v2827_v33 = vadd.f32 %v2825_v38, %v2461_v20  ;;  %v3173_v25 = vmul.f32 %v6126_v55, %v8658_v44  ;;  %v3149_v14 = vmul.f32 %v6654_v24, %v8659_v5  ;;  %v8661_v44 = vld [vmem:[#allocation163_spill] sm:$0xff] }
 0x1d6   : > { %v2423_v29 = vrot.slane %v2419_v23, 4  ;;  %v3161_v4 = vmul.f32 %v3159_v0, %v8454_v45  ;;  %v3359_v1 = vperm.slane %v8660_v16, 1  ;;  %v3373_v0 = vrot.slane %v8521_v53, 4 }
 0x1d7   : > { %v2813_v60 = vperm.slane %v6657_v22, 3  ;;  %v2833_v15 = vadd.f32 %v2831_v61, %v2827_v33  ;;  %v2919_v54 = vadd.f32 %v2917_v28, %v6657_v22  ;;  %v3177_v31 = vrot.slane %v3173_v25, 4  ;;  %v8662_v25 = vld [vmem:[#allocation165_spill] sm:$0xff] }
 0x1d8   : > { %v2427_v20 = vadd.f32 %v2423_v29, %v2101_v18  ;;  %v3153_v38 = vrot.slane %v3149_v14, 4  ;;  %v3165_v59 = vrot.slane %v3161_v4, 4  ;;  %v3361_v30 = vmul.f32 %v3359_v1, %v8454_v45  ;;  %v8663_v14 = vld [vmem:[#allocation22_spill] sm:$0xff]  ;;  %v8664_v4 = vld [vmem:[#allocation33_spill] sm:$0xff] }
 0x1d9   : > { %v2815_v55 = vmul.f32 %v2813_v60, %v8449_v13  ;;  %v6671_v23 = vadd.f32 %v2919_v54, %v8520_v7  ;;  %v6675_v16 = vperm.slane %v8661_v44, 1  ;;  %v3543_v28 = vperm.slane %v6162_v50, 0 }
 0x1da   : > { %v2437_v5 = vadd.f32 %v2433_v47, %v2427_v20  ;;  %v3169_v61 = vadd.f32 %v3165_v59, %v2833_v15  ;;  %v3365_v33 = vrot.slane %v3361_v30, 4  ;;  %v3551_v60 = vmul.f32 %v6149_v42, %v8663_v14  ;;  %v8665_v59 = vld [vmem:[#allocation35_spill] sm:$0xff] }
 0x1db   : > { %v3137_v18 = vperm.slane %v6671_v23, 3  ;;  %v3539_v29 = vmul.f32 %v6675_v16, %v8662_v25  ;;  %v491_v1 = vmul.f32 %v6350_v9, %v8664_v4  ;;  %v3545_v47 = vmul.f32 %v3543_v28, %v8457_v57  ;;  %v8667_v4 = vld [vmem:[#allocation37_spill] sm:$0xff] }
 0x1dc   : > { %v2817_v54 = vadd.f32 %v2815_v55, %v2437_v5  ;;  %v3181_v21 = vadd.f32 %v3177_v31, %v3169_v61  ;;  %v3369_v44 = vadd.f32 %v3365_v33, %v6671_v23  ;;  %v495_v30 = vmul.f32 %v6350_v9, %v8665_v59  ;;  %v8668_v59 = vld [vmem:[#allocation41_spill] sm:$0xff] }
 0x1dd   : > { %v3139_v15 = vmul.f32 %v3137_v18, %v8454_v45  ;;  %v493_v20 = vadd.f32 %v491_v1, %v4736_v26  ;;  %v629_v50 = vperm.slane %v6361_v6, 1  ;;  %v641_v5 = vmul.f32 %v6364_v41, %v8667_v4 }
 0x1de   : > { %v2821_v25 = vadd.f32 %v2819_v63, %v2817_v54  ;;  %v6692_v42 = vadd.f32 %v3373_v0, %v3369_v44  ;;  %v3547_v14 = vadd.f32 %v3545_v47, %v3181_v21  ;;  %v497_v55 = vadd.f32 %v495_v30, %v4736_v26 }
 0x1df   : > { %v3143_v31 = vrot.slane %v3139_v15, 4  ;;  %v631_v61 = vmul.f32 %v629_v50, %v4744_v32  ;;  %v651_v33 = vperm.slane %v6361_v6, 2  ;;  %v645_v1 = vrot.slane %v641_v5, 4  ;;  %v8669_v50 = vld [vmem:[#allocation43_spill] sm:$0xff] }
 0x1e0   : > { %8666 = vst [vmem:[#allocation40_spill] sm:$0xff] %v6692_v42  ;;  %v3533_v28 = vperm.slane %v6692_v42, 3  ;;  %v3553_v18 = vadd.f32 %v3551_v60, %v3547_v14  ;;  %v663_v63 = vmul.f32 %v6364_v41, %v8668_v59  ;;  %v1097_v54 = vperm.slane %v6408_v56, 1  ;;  %v8672_v59 = vld [vmem:[#allocation46_spill] sm:$0xff] }
 0x1e1   : > { %v3147_v44 = vadd.f32 %v3143_v31, %v2821_v25  ;;  %v635_v0 = vrot.slane %v631_v61, 4  ;;  %v653_v21 = vmul.f32 %v651_v33, %v4744_v32  ;;  %v1103_v4 = vmul.f32 %v6382_v2, %v8669_v50  ;;  %v8670_v25 = vld [vmem:[#allocation44_spill] sm:$0xff]  ;;  %v8671_v61 = vld [vmem:[#allocation45_spill] sm:$0xff] }
 0x1e2   : > { %v3535_v47 = vmul.f32 %v3533_v28, %v8457_v57  ;;  %v3699_v15 = vrot.slane %v3553_v18, 4  ;;  %v667_v30 = vrot.slane %v663_v63, 4  ;;  %v1099_v60 = vmul.f32 %v1097_v54, %v4748_v35  ;;  %v8674_v54 = vld [vmem:[#allocation47_spill] sm:$0xff]  ;;  %v8675_v50 = vld [vmem:[#allocation24_spill] sm:$0xff] }
 0x1e3   : > { %v3157_v43 = vadd.f32 %v3153_v38, %v3147_v44  ;;  %v639_v26 = vadd.f32 %v635_v0, %v493_v20  ;;  %v657_v14 = vrot.slane %v653_v21, 4  ;;  %v1107_v5 = vperm.slane %v6408_v56, 2  ;;  %v8673_v44 = vld [vmem:[#allocation30_spill] sm:$0xff]  ;;  %v8676_v56 = vld [vmem:[#allocation32_spill] sm:$0xff] }
 0x1e4   : > { %v1113_v31 = vmul.f32 %v6382_v2, %v8670_v25  ;;  %v492_v33 = vmul.f32 %v6391_v62, %v8671_v61  ;;  %v496_v28 = vmul.f32 %v6391_v62, %v8672_v59  ;;  %v630_v38 = vperm.slane %v6400_v27, 1 }
 0x1e5   : > { %v3537_v18 = vadd.f32 %v3535_v47, %v3157_v43  ;;  %v649_v63 = vadd.f32 %v645_v1, %v639_v26  ;;  %v661_v32 = vadd.f32 %v657_v14, %v497_v55  ;;  %v1109_v20 = vmul.f32 %v1107_v5, %v4748_v35  ;;  %v8677_v43 = vld [vmem:[#allocation48_spill] sm:$0xff]  ;;  %v8678_v1 = vld [vmem:[#allocation118_spill] sm:$0xff] }
 0x1e6   : > { %v494_v0 = vadd.f32 %v492_v33, %v8673_v44  ;;  %v498_v21 = vadd.f32 %v496_v28, %v8673_v44  ;;  %v642_v25 = vmul.f32 %v8675_v50, %v8674_v54  ;;  %v632_v41 = vmul.f32 %v630_v38, %v8676_v56  ;;  %v8681_v38 = vld [vmem:[#allocation49_spill] sm:$0xff] }
 0x1e7   : > { %v3541_v2 = vadd.f32 %v3539_v29, %v3537_v18  ;;  %v671_v17 = vadd.f32 %v667_v30, %v661_v32  ;;  %v1101_v61 = vadd.f32 %v1099_v60, %v649_v63  ;;  %v652_v26 = vperm.slane %v6400_v27, 2  ;;  %v8680_v60 = vld [vmem:[#allocation11_spill] sm:$0xff]  ;;  %v8682_v54 = vld [vmem:[#allocation29_spill] sm:$0xff] }
 0x1e8   : > { %v646_v59 = vrot.slane %v642_v25, 4  ;;  %v664_v55 = vmul.f32 %v8675_v50, %v8677_v43  ;;  %v1098_v47 = vperm.slane %v8678_v1, 1  ;;  %v636_v28 = vrot.slane %v632_v41, 4  ;;  %v8683_v50 = vld [vmem:[#allocation154_spill] sm:$0xff] }
 0x1e9   : > { %v6727_v14 = vsel %vm1335_vm0, %v3541_v2, %v3699_v15  ;;  %v1105_v5 = vadd.f32 %v1103_v4, %v1101_v61  ;;  %v1111_v33 = vadd.f32 %v1109_v20, %v671_v17  ;;  %v654_v32 = vmul.f32 %v652_v26, %v8676_v56  ;;  %v8686_v15 = vld [vmem:[#allocation50_spill] sm:$0xff]  ;;  %v8688_v61 = vld [vmem:[#allocation160_spill] sm:$0xff] }
 0x1ea   : > { %8679 = vst [vmem:[#allocation169_spill] sm:$0xff] %v6727_v14  ;;  %v8049_v29 = vrot.slane %v6727_v14, 4  ;;  %v668_v30 = vrot.slane %v664_v55, 4  ;;  %v1100_v25 = vmul.f32 %v1098_v47, %v8680_v60  ;;  %v640_v63 = vadd.f32 %v636_v28, %v494_v0  ;;  %v8687_v20 = vld [vmem:[#allocation62_spill] sm:$0xff] }
 0x1eb   : > { %v1115_v18 = vadd.f32 %v1113_v31, %v1111_v33  ;;  %v1104_v43 = vmul.f32 %v8682_v54, %v8681_v38  ;;  %v1108_v44 = vperm.slane %v8678_v1, 2  ;;  %v8684_v2 = vrot.slane %v8683_v50, 4  ;;  %v8689_v50 = vld [vmem:[#allocation60_spill] sm:$0xff]  ;;  %v8690_v38 = vld [vmem:[#allocation63_spill] sm:$0xff]  ;;  %v8692_v14 = vld [vmem:[#allocation26_spill] sm:$0xff] }
 0x1ec   : > { %v658_v17 = vrot.slane %v654_v32, 4  ;;  %v1114_v4 = vmul.f32 %v8682_v54, %v8686_v15  ;;  %v1442_v31 = vmul.f32 %v8688_v61, %v8687_v20  ;;  %v650_v55 = vadd.f32 %v646_v59, %v640_v63  ;;  %v8694_v59 = vld [vmem:[#allocation68_spill] sm:$0xff] }
 0x1ed   : > { %v6740_v41 = vsel %vm1335_vm0, %v8049_v29, %v8684_v2  ;;  %v1307_v26 = vrot.slane %v1115_v18, 4  ;;  %v1110_v47 = vmul.f32 %v1108_v44, %v8680_v60  ;;  %v1446_v2 = vmul.f32 %v8688_v61, %v8690_v38  ;;  %v8691_v29 = vld [vmem:[#allocation166_spill] sm:$0xff]  ;;  %v8695_v63 = vld [vmem:[#allocation120_spill] sm:$0xff]  ;;  %v8706_v60 = vld [vmem:[#allocation83_spill] sm:$0xff] }
 0x1ee   : > { %8685 = vst [vmem:[#allocation170_spill] sm:$0xff] %v6740_v41  ;;  %v8055_v0 = vrot.slane %v6740_v41, 4  ;;  %v662_v33 = vadd.f32 %v658_v17, %v498_v21  ;;  %v1444_v28 = vadd.f32 %v1442_v31, %v8689_v50  ;;  %v1652_v32 = vperm.slane %v8691_v29, 1  ;;  %v8696_v31 = vld [vmem:[#allocation12_spill] sm:$0xff]  ;;  %v8697_v41 = vld [vmem:[#allocation69_spill] sm:$0xff] }
 0x1ef   : > { %v8693_v56 = vrot.slane %v8692_v14, 4  ;;  %v1342_v20 = vsel %vm1335_vm0, %v1105_v5, %v1307_v26  ;;  %v1102_v18 = vadd.f32 %v1100_v25, %v650_v55  ;;  %v1664_v44 = vmul.f32 %v8695_v63, %v8694_v59  ;;  %v8698_v25 = vld [vmem:[#allocation7_spill] sm:$0xff]  ;;  %v8699_v55 = vld [vmem:[#allocation74_spill] sm:$0xff]  ;;  %v8700_v59 = vld [vmem:[#allocation132_spill] sm:$0xff] }
 0x1f0   : > { %4072 = vmatpush.msra.mxu2 %v1342_v20  ;;  %v672_v21 = vadd.f32 %v668_v30, %v662_v33  ;;  %v1448_v17 = vadd.f32 %v1446_v2, %v8689_v50  ;;  %v1654_v38 = vmul.f32 %v1652_v32, %v8696_v31  ;;  %v1674_v14 = vperm.slane %v8691_v29, 2  ;;  %v8701_v2 = vld [vmem:[#allocation76_spill] sm:$0xff]  ;;  %v8705_v50 = vld [vmem:[#allocation119_spill] sm:$0xff] }
 0x1f1   : > { %v3966_v15 = vsel %vm1335_vm0, %v8055_v0, %v8693_v56  ;;  %v1106_v61 = vadd.f32 %v1104_v43, %v1102_v18  ;;  %v1668_v54 = vrot.slane %v1664_v44, 4  ;;  %v1686_v56 = vmul.f32 %v8695_v63, %v8697_v41  ;;  %v8702_v44 = vld [vmem:[#allocation18_spill] sm:$0xff]  ;;  %v8703_v41 = vld [vmem:[#allocation15_spill] sm:$0xff] }
 0x1f2   : > { %4035 = vmatpush.msra.mxu1 %v3966_v15  ;;  %v1112_v0 = vadd.f32 %v1110_v47, %v672_v21  ;;  %v1658_v5 = vrot.slane %v1654_v38, 4  ;;  %v2072_v26 = vperm.slane %v8698_v25, 1  ;;  %v2078_v15 = vmul.f32 %v8700_v59, %v8699_v55  ;;  %v8704_v63 = vld [vmem:[#allocation82_spill] sm:$0xff] }
 0x1f3   : > { %v1676_v30 = vmul.f32 %v1674_v14, %v8696_v31  ;;  %v1690_v20 = vrot.slane %v1686_v56, 4  ;;  %v2082_v33 = vperm.slane %v8698_v25, 2  ;;  %v2088_v43 = vmul.f32 %v8700_v59, %v8701_v2  ;;  %v8709_v59 = vld [vmem:[#allocation19_spill] sm:$0xff] }
 0x1f4   : > { %v1116_v32 = vadd.f32 %v1114_v4, %v1112_v0  ;;  %v1662_v18 = vadd.f32 %v1658_v5, %v1444_v28  ;;  %v2074_v29 = vmul.f32 %v2072_v26, %v8702_v44  ;;  %v2372_v47 = vperm.slane %v8703_v41, 1 }
 0x1f5   : > { %v1680_v38 = vrot.slane %v1676_v30, 4  ;;  %v2084_v21 = vmul.f32 %v2082_v33, %v8702_v44  ;;  %v2384_v55 = vmul.f32 %v8705_v50, %v8704_v63  ;;  %v2394_v14 = vperm.slane %v8703_v41, 2 }
 0x1f6   : > { %v1308_v56 = vrot.slane %v1116_v32, 4  ;;  %v1672_v31 = vadd.f32 %v1668_v54, %v1662_v18  ;;  %v2374_v25 = vmul.f32 %v2372_v47, %v8593_v39  ;;  %v2406_v4 = vmul.f32 %v8705_v50, %v8706_v60  ;;  %v8707_v54 = vld [vmem:[#allocation23_spill] sm:$0xff]  ;;  %v8708_v47 = vld [vmem:[#allocation89_spill] sm:$0xff] }
 0x1f7   : > { %v1684_v0 = vadd.f32 %v1680_v38, %v1448_v17  ;;  %v2388_v28 = vrot.slane %v2384_v55, 4  ;;  %v2396_v5 = vmul.f32 %v2394_v14, %v8593_v39  ;;  %v2792_v26 = vperm.slane %v6537_v37, 1  ;;  %v8710_v55 = vld [vmem:[#allocation90_spill] sm:$0xff] }
 0x1f8   : > { %v1343_v30 = vsel %vm1335_vm0, %v1106_v61, %v1308_v56  ;;  %v2076_v33 = vadd.f32 %v2074_v29, %v1672_v31  ;;  %v2378_v2 = vrot.slane %v2374_v25, 4  ;;  %v2410_v63 = vrot.slane %v2406_v4, 4  ;;  %v8711_v29 = vld [vmem:[#allocation98_spill] sm:$0xff]  ;;  %v8713_v56 = vld [vmem:[#allocation99_spill] sm:$0xff] }
 0x1f9   : > { %4095 = vmatpush.msra.mxu3 %v1343_v30  ;;  %v1694_v41 = vadd.f32 %v1690_v20, %v1684_v0  ;;  %v2400_v32 = vrot.slane %v2396_v5, 4  ;;  %v2794_v18 = vmul.f32 %v2792_v26, %v8707_v54  ;;  %v2798_v44 = vmul.f32 %v8709_v59, %v8708_v47  ;;  %v8712_v31 = vld [vmem:[#allocation10_spill] sm:$0xff] }
 0x1fa   : > { %v2080_v60 = vadd.f32 %v2078_v15, %v2076_v33  ;;  %v2802_v17 = vperm.slane %v6537_v37, 2  ;;  %v2808_v38 = vmul.f32 %v8709_v59, %v8710_v55  ;;  %v3092_v14 = vperm.slane %v6550_v49, 1  ;;  %v8714_v26 = vld [vmem:[#allocation38_spill] sm:$0xff] }
 0x1fb   : > { %v2086_v61 = vadd.f32 %v2084_v21, %v1694_v41  ;;  %v3104_v25 = vmul.f32 %v8712_v31, %v8711_v29  ;;  %v3114_v20 = vperm.slane %v6550_v49, 2  ;;  %v3126_v4 = vmul.f32 %v8712_v31, %v8713_v56  ;;  %v8715_v29 = vld [vmem:[#allocation27_spill] sm:$0xff]  ;;  %v8716_v49 = vld [vmem:[#allocation105_spill] sm:$0xff]  ;;  %v8717_v39 = vld [vmem:[#allocation14_spill] sm:$0xff] }
 0x1fc   : > { %v2382_v0 = vadd.f32 %v2378_v2, %v2080_v60  ;;  %v2804_v5 = vmul.f32 %v2802_v17, %v8707_v54  ;;  %v3094_v15 = vmul.f32 %v3092_v14, %v8614_v3  ;;  %v3512_v30 = vperm.slane %v8714_v26, 1  ;;  %v8718_v17 = vld [vmem:[#allocation106_spill] sm:$0xff] }
 0x1fd   : > { %v2090_v33 = vadd.f32 %v2088_v43, %v2086_v61  ;;  %v3108_v55 = vrot.slane %v3104_v25, 4  ;;  %v3116_v47 = vmul.f32 %v3114_v20, %v8614_v3  ;;  %v3130_v41 = vrot.slane %v3126_v4, 4  ;;  %v8719_v43 = vld [vmem:[#allocation115_spill] sm:$0xff]  ;;  %v8720_v61 = vld [vmem:[#allocation28_spill] sm:$0xff] }
 0x1fe   : > { %v2392_v21 = vadd.f32 %v2388_v28, %v2382_v0  ;;  %v3098_v59 = vrot.slane %v3094_v15, 4  ;;  %v3514_v37 = vmul.f32 %v3512_v30, %v8715_v29  ;;  %v3518_v50 = vmul.f32 %v8717_v39, %v8716_v49  ;;  %v8721_v20 = vld [vmem:[#allocation116_spill] sm:$0xff]  ;;  %v8723_v49 = vld [vmem:[#allocation114_spill] sm:$0xff] }
 0x1ff   : > { %v2404_v56 = vadd.f32 %v2400_v32, %v2090_v33  ;;  %v3120_v60 = vrot.slane %v3116_v47, 4  ;;  %v3522_v2 = vperm.slane %v8714_v26, 2  ;;  %v3528_v14 = vmul.f32 %v8717_v39, %v8718_v17  ;;  %v8722_v32 = vld [vmem:[#allocation39_spill] sm:$0xff] }
 0x200   : > { %v2796_v31 = vadd.f32 %v2794_v18, %v2392_v21  ;;  %v1443_v25 = vmul.f32 %v8720_v61, %v8719_v43  ;;  %v1447_v28 = vmul.f32 %v8720_v61, %v8721_v20  ;;  %v1653_v4 = vperm.slane %v6568_v48, 1  ;;  %v8724_v61 = vld [vmem:[#allocation126_spill] sm:$0xff] }
 0x201   : > { %v2414_v0 = vadd.f32 %v2410_v63, %v2404_v56  ;;  %v3524_v15 = vmul.f32 %v3522_v2, %v8715_v29  ;;  %v1665_v47 = vmul.f32 %v8722_v32, %v8638_v52  ;;  %v1675_v30 = vperm.slane %v6568_v48, 2 }
 0x202   : > { %v2800_v33 = vadd.f32 %v2798_v44, %v2796_v31  ;;  %v1445_v17 = vadd.f32 %v1443_v25, %v8723_v49  ;;  %v1449_v18 = vadd.f32 %v1447_v28, %v8723_v49  ;;  %v1655_v21 = vmul.f32 %v1653_v4, %v8512_v40 }
 0x203   : > { %v2806_v43 = vadd.f32 %v2804_v5, %v2414_v0  ;;  %v1669_v39 = vrot.slane %v1665_v47, 4  ;;  %v1677_v20 = vmul.f32 %v1675_v30, %v8512_v40  ;;  %v1687_v63 = vmul.f32 %v8722_v32, %v8724_v61  ;;  %v8725_v47 = vld [vmem:[#allocation133_spill] sm:$0xff] }
 0x204   : > { %v3102_v56 = vadd.f32 %v3098_v59, %v2800_v33  ;;  %v1659_v2 = vrot.slane %v1655_v21, 4  ;;  %v2073_v52 = vperm.slane %v6609_v8, 1  ;;  %v2079_v44 = vmul.f32 %v6592_v58, %v8652_v10 }
 0x205   : > { %v2810_v31 = vadd.f32 %v2808_v38, %v2806_v43  ;;  %v1681_v25 = vrot.slane %v1677_v20, 4  ;;  %v1691_v48 = vrot.slane %v1687_v63, 4  ;;  %v2083_v28 = vperm.slane %v6609_v8, 2  ;;  %v8726_v20 = vld [vmem:[#allocation141_spill] sm:$0xff] }
 0x206   : > { %v3112_v4 = vadd.f32 %v3108_v55, %v3102_v56  ;;  %v1663_v5 = vadd.f32 %v1659_v2, %v1445_v17  ;;  %v2075_v0 = vmul.f32 %v2073_v52, %v8422_v11  ;;  %v2089_v30 = vmul.f32 %v6592_v58, %v8725_v47  ;;  %v8773_v47 = vld [vmem:[#allocation78_spill] sm:$0xff] }
 0x207   : > { %v3124_v61 = vadd.f32 %v3120_v60, %v2810_v31  ;;  %v1685_v59 = vadd.f32 %v1681_v25, %v1449_v18  ;;  %v2085_v33 = vmul.f32 %v2083_v28, %v8422_v11  ;;  %v2373_v21 = vperm.slane %v6635_v12, 1 }
 0x208   : > { %v3516_v32 = vadd.f32 %v3514_v37, %v3112_v4  ;;  %v1673_v10 = vadd.f32 %v1669_v39, %v1663_v5  ;;  %v2385_v38 = vmul.f32 %v6604_v34, %v8648_v46  ;;  %v2395_v43 = vperm.slane %v6635_v12, 2 }
 0x209   : > { %v3134_v55 = vadd.f32 %v3130_v41, %v3124_v61  ;;  %v1695_v17 = vadd.f32 %v1691_v48, %v1685_v59  ;;  %v2375_v52 = vmul.f32 %v2373_v21, %v8438_v51  ;;  %v2407_v63 = vmul.f32 %v6604_v34, %v8726_v20  ;;  %v8727_v21 = vld [vmem:[#allocation148_spill] sm:$0xff] }
 0x20a   : > { %v3520_v60 = vadd.f32 %v3518_v50, %v3516_v32  ;;  %v2077_v18 = vadd.f32 %v2075_v0, %v1673_v10  ;;  %v2397_v56 = vmul.f32 %v2395_v43, %v8438_v51  ;;  %v2389_v39 = vrot.slane %v2385_v38, 4 }
 0x20b   : > { %v3526_v2 = vadd.f32 %v3524_v15, %v3134_v55  ;;  %v2087_v31 = vadd.f32 %v2085_v33, %v1695_v17  ;;  %v2379_v37 = vrot.slane %v2375_v52, 4  ;;  %v2411_v4 = vrot.slane %v2407_v63, 4  ;;  %v8728_v55 = vld [vmem:[#allocation156_spill] sm:$0xff] }
 0x20c   : > { %v2081_v25 = vadd.f32 %v2079_v44, %v2077_v18  ;;  %v2401_v28 = vrot.slane %v2397_v56, 4  ;;  %v2793_v5 = vperm.slane %v6657_v22, 1  ;;  %v2799_v61 = vmul.f32 %v6624_v36, %v8520_v7 }
 0x20d   : > { %v3530_v41 = vadd.f32 %v3528_v14, %v3526_v2  ;;  %v2091_v48 = vadd.f32 %v2089_v30, %v2087_v31  ;;  %v2803_v59 = vperm.slane %v6657_v22, 2  ;;  %v3093_v15 = vperm.slane %v6671_v23, 1 }
 0x20e   : > { %v2383_v50 = vadd.f32 %v2379_v37, %v2081_v25  ;;  %v2795_v10 = vmul.f32 %v2793_v5, %v8449_v13  ;;  %v3105_v32 = vmul.f32 %v6654_v24, %v8521_v53  ;;  %v3115_v14 = vperm.slane %v6671_v23, 2 }
 0x20f   : > { %v3692_v44 = vrot.slane %v3530_v41, 4  ;;  %v2405_v0 = vadd.f32 %v2401_v28, %v2091_v48  ;;  %v2805_v33 = vmul.f32 %v2803_v59, %v8449_v13  ;;  %v2809_v38 = vmul.f32 %v6624_v36, %v8727_v21  ;;  %v8730_v59 = vld [vmem:[#allocation162_spill] sm:$0xff] }
 0x210   : > { %v2393_v30 = vadd.f32 %v2389_v39, %v2383_v50  ;;  %v3095_v43 = vmul.f32 %v3093_v15, %v8454_v45  ;;  %v3127_v17 = vmul.f32 %v6654_v24, %v8728_v55  ;;  %v3117_v18 = vmul.f32 %v3115_v14, %v8454_v45 }
 0x211   : > { %v6853_v52 = vsel %vm1335_vm0, %v3520_v60, %v3692_v44  ;;  %v2415_v63 = vadd.f32 %v2411_v4, %v2405_v0  ;;  %v3513_v56 = vperm.slane %v6692_v42, 1  ;;  %v3109_v39 = vrot.slane %v3105_v32, 4  ;;  %v8731_v44 = vld [vmem:[#allocation51_spill] sm:$0xff] }
 0x212   : > { %v8077_v2 = vrot.slane %v6853_v52, 4  ;;  %v2797_v31 = vadd.f32 %v2795_v10, %v2393_v30  ;;  %v3099_v37 = vrot.slane %v3095_v43, 4  ;;  %v3121_v28 = vrot.slane %v3117_v18, 4  ;;  %v8732_v30 = vld [vmem:[#allocation52_spill] sm:$0xff] }
 0x213   : > { %v2807_v25 = vadd.f32 %v2805_v33, %v2415_v63  ;;  %v3131_v5 = vrot.slane %v3127_v17, 4  ;;  %v3515_v41 = vmul.f32 %v3513_v56, %v8457_v57  ;;  %v8729_v48 = vrot.slane %v6616_v19, 4  ;;  %v8733_v43 = vld [vmem:[#allocation144_spill] sm:$0xff] }
 0x214   : > { %v2801_v4 = vadd.f32 %v2799_v61, %v2797_v31  ;;  %v3519_v50 = vmul.f32 %v6675_v16, %v8730_v59  ;;  %v3523_v10 = vperm.slane %v6692_v42, 2  ;;  %v487_v0 = vmul.f32 %v6350_v9, %v8731_v44  ;;  %v8734_v61 = vld [vmem:[#allocation153_spill] sm:$0xff]  ;;  %v8735_v18 = vld [vmem:[#allocation124_spill] sm:$0xff]  ;;  %v8741_v59 = vld [vmem:[#allocation54_spill] sm:$0xff] }
 0x215   : > { %v6864_v60 = vsel %vm1335_vm0, %v8077_v2, %v8729_v48  ;;  %v2811_v32 = vadd.f32 %v2809_v38, %v2807_v25  ;;  %v605_v33 = vperm.slane %v6361_v6, 0  ;;  %v619_v17 = vmul.f32 %v8733_v43, %v8732_v30  ;;  %v8737_v25 = vld [vmem:[#allocation8_spill] sm:$0xff]  ;;  %v8738_v9 = vld [vmem:[#allocation9_spill] sm:$0xff] }
 0x216   : > { %v8078_v15 = vrot.slane %v6864_v60, 4  ;;  %v3103_v19 = vadd.f32 %v3099_v37, %v2801_v4  ;;  %v3525_v14 = vmul.f32 %v3523_v10, %v8457_v57  ;;  %v1085_v63 = vperm.slane %v8734_v61, 0  ;;  %v8739_v37 = vld [vmem:[#allocation164_spill] sm:$0xff] }
 0x217   : > { %v8736_v56 = vrot.slane %v8735_v18, 4  ;;  %v3125_v38 = vadd.f32 %v3121_v28, %v2811_v32  ;;  %v489_v48 = vadd.f32 %v487_v0, %v8737_v25  ;;  %v607_v44 = vmul.f32 %v605_v33, %v8738_v9  ;;  %v8740_v18 = vld [vmem:[#allocation13_spill] sm:$0xff]  ;;  %v8742_v0 = vld [vmem:[#allocation56_spill] sm:$0xff]  ;;  %v8745_v9 = vld [vmem:[#allocation150_spill] sm:$0xff] }
 0x218   : > { %v3113_v6 = vadd.f32 %v3109_v39, %v3103_v19  ;;  %v3529_v4 = vmul.f32 %v6675_v16, %v8739_v37  ;;  %v623_v10 = vrot.slane %v619_v17, 4  ;;  %v1087_v30 = vmul.f32 %v1085_v63, %v4748_v35  ;;  %v8743_v33 = vld [vmem:[#allocation24_spill] sm:$0xff]  ;;  %v8744_v17 = vld [vmem:[#allocation53_spill] sm:$0xff] }
 0x219   : > { %v3960_v31 = vsel %vm1335_vm0, %v8078_v15, %v8736_v56  ;;  %v3135_v43 = vadd.f32 %v3131_v5, %v3125_v38  ;;  %v611_v2 = vrot.slane %v607_v44, 4  ;;  %v1277_v61 = vperm.slane %v8740_v18, 3  ;;  %v8746_v44 = vld [vmem:[#allocation30_spill] sm:$0xff]  ;;  %v8747_v37 = vld [vmem:[#allocation32_spill] sm:$0xff] }
 0x21a   : > { %4013 = vmatpush.msra.mxu0 %v3960_v31  ;;  %v488_v56 = vmul.f32 %v6391_v62, %v8741_v59  ;;  %v3517_v28 = vadd.f32 %v3515_v41, %v3113_v6  ;;  %v606_v32 = vperm.slane %v6400_v27, 0  ;;  %v620_v31 = vmul.f32 %v8743_v33, %v8742_v0  ;;  %v8748_v6 = vld [vmem:[#allocation20_spill] sm:$0xff]  ;;  %v8749_v0 = vld [vmem:[#allocation11_spill] sm:$0xff] }
 0x21b   : > { %v1086_v39 = vperm.slane %v8678_v1, 0  ;;  %v3527_v19 = vadd.f32 %v3525_v14, %v3135_v43  ;;  %v615_v25 = vadd.f32 %v611_v2, %v489_v48  ;;  %v1093_v63 = vmul.f32 %v8745_v9, %v8744_v17  ;;  %v8750_v14 = vld [vmem:[#allocation57_spill] sm:$0xff]  ;;  %v8752_v43 = vld [vmem:[#allocation36_spill] sm:$0xff]  ;;  %v8753_v17 = vld [vmem:[#allocation59_spill] sm:$0xff] }
 0x21c   : > { %v1279_v5 = vmul.f32 %v1277_v61, %v4748_v35  ;;  %v3521_v38 = vadd.f32 %v3519_v50, %v3517_v28  ;;  %v490_v15 = vadd.f32 %v488_v56, %v8746_v44  ;;  %v608_v62 = vmul.f32 %v606_v32, %v8747_v37  ;;  %v8751_v2 = vld [vmem:[#allocation29_spill] sm:$0xff]  ;;  %v8754_v28 = vld [vmem:[#allocation171_spill] sm:$0xff]  ;;  %v8755_v37 = vld [vmem:[#allocation160_spill] sm:$0xff] }
 0x21d   : > { %v624_v41 = vrot.slane %v620_v31, 4  ;;  %v3531_v59 = vadd.f32 %v3529_v4, %v3527_v19  ;;  %v627_v27 = vadd.f32 %v623_v10, %v615_v25  ;;  %v1088_v33 = vmul.f32 %v1086_v39, %v8749_v0  ;;  %v8756_v4 = vld [vmem:[#allocation60_spill] sm:$0xff] }
 0x21e   : > { %v1281_v55 = vadd.f32 %v1279_v5, %v8748_v6  ;;  %v612_v1 = vrot.slane %v608_v62, 4  ;;  %v1094_v48 = vmul.f32 %v8751_v2, %v8750_v14  ;;  %v1278_v9 = vperm.slane %v8752_v43, 3  ;;  %v8757_v31 = vld [vmem:[#allocation16_spill] sm:$0xff] }
 0x21f   : > { %v6905_v61 = vperm.slane %v8753_v17, 0  ;;  %v3693_v50 = vrot.slane %v3531_v59, 4  ;;  %v1089_v56 = vadd.f32 %v1087_v30, %v627_v27  ;;  %v1438_v32 = vmul.f32 %v8755_v37, %v8754_v28  ;;  %v8758_v5 = vld [vmem:[#allocation64_spill] sm:$0xff]  ;;  %v8760_v30 = vld [vmem:[#allocation71_spill] sm:$0xff]  ;;  %v8761_v37 = vld [vmem:[#allocation42_spill] sm:$0xff] }
 0x220   : > { %v6911_v10 = vadd.f32 %v8756_v4, %v8754_v28  ;;  %v1283_v39 = vadd.f32 %v1281_v55, %v8757_v31  ;;  %v616_v19 = vadd.f32 %v612_v1, %v490_v15  ;;  %v1280_v25 = vmul.f32 %v1278_v9, %v8749_v0  ;;  %v8762_v9 = vld [vmem:[#allocation12_spill] sm:$0xff] }
 0x221   : > { %v1432_v44 = vmul.f32 %v6905_v61, %v8758_v5  ;;  %v6918_v17 = vsel %vm1335_vm0, %v3521_v38, %v3693_v50  ;;  %v1095_v62 = vadd.f32 %v1093_v63, %v1089_v56  ;;  %v6921_v59 = vperm.slane %v8760_v30, 0  ;;  %v8763_v5 = vld [vmem:[#allocation70_spill] sm:$0xff]  ;;  %v8765_v56 = vld [vmem:[#allocation169_spill] sm:$0xff] }
 0x222   : > { %8759 = vst [vmem:[#allocation172_spill] sm:$0xff] %v6918_v17  ;;  %v1606_v27 = vperm.slane %v6911_v10, 3  ;;  %v8082_v6 = vrot.slane %v6918_v17, 4  ;;  %v628_v2 = vadd.f32 %v624_v41, %v616_v19  ;;  %v1282_v55 = vadd.f32 %v1280_v25, %v8761_v37  ;;  %v8764_v63 = vld [vmem:[#allocation166_spill] sm:$0xff]  ;;  %v8768_v25 = vld [vmem:[#allocation61_spill] sm:$0xff] }
 0x223   : > { %v1434_v1 = vadd.f32 %v1432_v44, %v8756_v4  ;;  %v1301_v15 = vrot.slane %v1095_v62, 4  ;;  %v1618_v38 = vmul.f32 %v6921_v59, %v8763_v5  ;;  %v1628_v50 = vperm.slane %v8764_v63, 0  ;;  %v8769_v44 = vld [vmem:[#allocation120_spill] sm:$0xff] }
 0x224   : > { %v1608_v31 = vmul.f32 %v1606_v27, %v8762_v9  ;;  %v8766_v30 = vrot.slane %v8765_v56, 4  ;;  %v1090_v41 = vadd.f32 %v1088_v33, %v628_v2  ;;  %v1440_v19 = vadd.f32 %v1438_v32, %v8756_v4  ;;  %v8770_v56 = vld [vmem:[#allocation34_spill] sm:$0xff] }
 0x225   : > { %v1642_v62 = vmul.f32 %v8769_v44, %v8768_v25  ;;  %v1340_v37 = vsel %vm1335_vm0, %v1283_v39, %v1301_v15  ;;  %v1622_v28 = vrot.slane %v1618_v38, 4  ;;  %v1284_v53 = vadd.f32 %v1282_v55, %v8770_v56  ;;  %v8771_v33 = vld [vmem:[#allocation170_spill] sm:$0xff] }
 0x226   : > { %v6936_v14 = vsel %vm1335_vm0, %v8082_v6, %v8766_v30  ;;  %v1612_v5 = vrot.slane %v1608_v31, 4  ;;  %4073 = vmatpush.msra.mxu2 %v1340_v37  ;;  %v1096_v63 = vadd.f32 %v1094_v48, %v1090_v41  ;;  %v1630_v21 = vmul.f32 %v1628_v50, %v8762_v9  ;;  %v4560_v30 = vld [vmem:[%s4772_s25] sm:$0xf]  ;;  %v8776_v37 = vld [vmem:[#allocation77_spill] sm:$0xff] }
 0x227   : > { %8767 = vst [vmem:[#allocation67_spill] sm:$0xff] %v6936_v14  ;;  %v8084_v27 = vrot.slane %v6936_v14, 4  ;;  %v1898_v6 = vperm.slane %v4560_v30, 0  ;;  %v8772_v2 = vrot.slane %v8771_v33, 4  ;;  %v1646_v7 = vrot.slane %v1642_v62, 4  ;;  %v8775_v31 = vld [vmem:[#allocation7_spill] sm:$0xff] }
 0x228   : > { %v1616_v44 = vadd.f32 %v1612_v5, %v1434_v1  ;;  %v6952_v39 = vperm.slane %v8773_v47, 0  ;;  %v1302_v15 = vrot.slane %v1096_v63, 4  ;;  %v1634_v48 = vrot.slane %v1630_v21, 4  ;;  %v8777_v30 = vld [vmem:[#allocation73_spill] sm:$0xff]  ;;  %v8778_v5 = vld [vmem:[#allocation18_spill] sm:$0xff]  ;;  %v8779_v21 = vld [vmem:[#allocation72_spill] sm:$0xff] }
 0x229   : > { %v3962_v32 = vsel %vm1335_vm0, %v8084_v27, %v8772_v2  ;;  %v1900_v55 = vmul.f32 %v1898_v6, %v8762_v9  ;;  %v2060_v38 = vperm.slane %v8775_v31, 0  ;;  %v1912_v41 = vrot.slane %v8768_v25, 4  ;;  %v8780_v63 = vld [vmem:[#allocation132_spill] sm:$0xff]  ;;  %v8784_v27 = vld [vmem:[#allocation79_spill] sm:$0xff] }
 0x22a   : > { %8774 = vst [vmem:[#allocation75_spill] sm:$0xff] %v6952_v39  ;;  %4036 = vmatpush.msra.mxu1 %v3962_v32  ;;  %v1626_v50 = vadd.f32 %v1622_v28, %v1616_v44  ;;  %v2056_v56 = vmul.f32 %v6952_v39, %v8776_v37  ;;  %v2186_v33 = vperm.slane %v8777_v30, 0  ;;  %v1341_v1 = vsel %vm1335_vm0, %v1284_v53, %v1302_v15  ;;  %v8781_v32 = vld [vmem:[#allocation85_spill] sm:$0xff]  ;;  %v8783_v28 = vld [vmem:[#allocation15_spill] sm:$0xff] }
 0x22b   : > { %v1638_v62 = vadd.f32 %v1634_v48, %v1440_v19  ;;  %v1904_v47 = vrot.slane %v1900_v55, 4  ;;  %v2062_v2 = vmul.f32 %v2060_v38, %v8778_v5  ;;  %4096 = vmatpush.msra.mxu3 %v1341_v1  ;;  %v2068_v6 = vmul.f32 %v8780_v63, %v8779_v21  ;;  %v8785_v25 = vld [vmem:[#allocation119_spill] sm:$0xff]  ;;  %v8786_v19 = vld [vmem:[#allocation80_spill] sm:$0xff]  ;;  %v8788_v38 = vld [vmem:[#allocation21_spill] sm:$0xff] }
 0x22c   : > { %v6965_v31 = vperm.slane %v8781_v32, 0  ;;  %v2348_v44 = vperm.slane %v8783_v28, 0  ;;  %v2362_v37 = vmul.f32 %v8785_v25, %v8784_v27  ;;  %v2188_v53 = vmul.f32 %v2186_v33, %v8778_v5  ;;  %v8787_v48 = vld [vmem:[#allocation84_spill] sm:$0xff]  ;;  %v8791_v33 = vld [vmem:[#allocation94_spill] sm:$0xff]  ;;  %v8794_v39 = vld [vmem:[#allocation19_spill] sm:$0xff] }
 0x22d   : > { %v1650_v20 = vadd.f32 %v1646_v7, %v1638_v62  ;;  %v1908_v30 = vadd.f32 %v1904_v47, %v6911_v10  ;;  %v2618_v15 = vperm.slane %v8786_v19, 0  ;;  %v2632_v32 = vrot.slane %v8784_v27, 4  ;;  %v8790_v7 = vld [vmem:[#allocation167_spill] sm:$0xff]  ;;  %v8793_v19 = vld [vmem:[#allocation81_spill] sm:$0xff] }
 0x22e   : > { %8782 = vst [vmem:[#allocation66_spill] sm:$0xff] %v6965_v31  ;;  %v2338_v55 = vmul.f32 %v6965_v31, %v8787_v48  ;;  %v2350_v1 = vmul.f32 %v2348_v44, %v8788_v38  ;;  %v2366_v63 = vrot.slane %v2362_v37, 4  ;;  %v2780_v62 = vperm.slane %v8790_v7, 0  ;;  %v8799_v9 = vld [vmem:[#allocation95_spill] sm:$0xff] }
 0x22f   : > { %v6977_v46 = vadd.f32 %v1912_v41, %v1908_v30  ;;  %v2064_v28 = vadd.f32 %v2062_v2, %v1650_v20  ;;  %v2620_v25 = vmul.f32 %v2618_v15, %v8788_v38  ;;  %v6982_v17 = vperm.slane %v8791_v33, 0  ;;  %v8795_v2 = vld [vmem:[#allocation88_spill] sm:$0xff]  ;;  %v8796_v15 = vld [vmem:[#allocation101_spill] sm:$0xff] }
 0x230   : > { %v2342_v47 = vrot.slane %v2338_v55, 4  ;;  %v2354_v14 = vrot.slane %v2350_v1, 4  ;;  %v2788_v48 = vmul.f32 %v8794_v39, %v8793_v19  ;;  %v2782_v20 = vmul.f32 %v2780_v62, %v8707_v54  ;;  %v8798_v55 = vld [vmem:[#allocation17_spill] sm:$0xff] }
 0x231   : > { %8789 = vst [vmem:[#allocation87_spill] sm:$0xff] %v6977_v46  ;;  %v2050_v44 = vperm.slane %v6977_v46, 3  ;;  %v2070_v37 = vadd.f32 %v2068_v6, %v2064_v28  ;;  %v2190_v27 = vadd.f32 %v2188_v53, %v6977_v46  ;;  %v2624_v41 = vrot.slane %v2620_v25, 4  ;;  %v8800_v6 = vld [vmem:[#allocation10_spill] sm:$0xff]  ;;  %v8801_v25 = vld [vmem:[#allocation100_spill] sm:$0xff] }
 0x232   : > { %8792 = vst [vmem:[#allocation65_spill] sm:$0xff] %v6982_v17  ;;  %v2906_v30 = vperm.slane %v8795_v2, 0  ;;  %v6991_v7 = vperm.slane %v8796_v15, 0  ;;  %v3068_v1 = vperm.slane %v8798_v55, 0  ;;  %v3082_v28 = vmul.f32 %v8800_v6, %v8799_v9  ;;  %v8802_v15 = vld [vmem:[#allocation93_spill] sm:$0xff] }
 0x233   : > { %v2052_v33 = vmul.f32 %v2050_v44, %v8778_v5  ;;  %v6996_v31 = vadd.f32 %v2190_v27, %v8779_v21  ;;  %v2358_v39 = vadd.f32 %v2354_v14, %v2070_v37  ;;  %v3338_v46 = vperm.slane %v8802_v15, 0  ;;  %v8803_v14 = vld [vmem:[#allocation92_spill] sm:$0xff] }
 0x234   : > { %8797 = vst [vmem:[#allocation96_spill] sm:$0xff] %v6991_v7  ;;  %v2908_v53 = vmul.f32 %v2906_v30, %v8707_v54  ;;  %v7003_v62 = vmul.f32 %v6991_v7, %v8801_v25  ;;  %v3070_v2 = vmul.f32 %v3068_v1, %v8614_v3  ;;  %v2776_v37 = vmul.f32 %v6982_v17, %v8803_v14 }
 0x235   : > { %v2054_v55 = vadd.f32 %v2052_v33, %v1626_v50  ;;  %v2326_v44 = vperm.slane %v6996_v31, 3  ;;  %v2370_v5 = vadd.f32 %v2366_v63, %v2358_v39  ;;  %v2628_v27 = vadd.f32 %v2624_v41, %v6996_v31 }
 0x236   : > { %v3062_v6 = vrot.slane %v7003_v62, 4  ;;  %v3074_v30 = vrot.slane %v3070_v2, 4  ;;  %v3340_v21 = vmul.f32 %v3338_v46, %v8614_v3  ;;  %v3086_v50 = vrot.slane %v3082_v28, 4  ;;  %v8805_v2 = vld [vmem:[#allocation112_spill] sm:$0xff] }
 0x237   : > { %v2058_v25 = vadd.f32 %v2056_v56, %v2054_v55  ;;  %v2328_v7 = vmul.f32 %v2326_v44, %v8788_v38  ;;  %v7014_v1 = vadd.f32 %v2632_v32, %v2628_v27  ;;  %v2784_v15 = vadd.f32 %v2782_v20, %v2370_v5  ;;  %v8807_v32 = vld [vmem:[#allocation102_spill] sm:$0xff]  ;;  %v8812_v27 = vld [vmem:[#allocation117_spill] sm:$0xff] }
 0x238   : > { %v3344_v33 = vrot.slane %v3340_v21, 4  ;;  %v3352_v63 = vrot.slane %v8799_v9, 4  ;;  %v3500_v41 = vperm.slane %v8714_v26, 0  ;;  %v7021_v46 = vperm.slane %v8805_v2, 0  ;;  %v8808_v55 = vld [vmem:[#allocation14_spill] sm:$0xff]  ;;  %v8814_v2 = vld [vmem:[#allocation28_spill] sm:$0xff] }
 0x239   : > { %8804 = vst [vmem:[#allocation86_spill] sm:$0xff] %v7014_v1  ;;  %v2332_v39 = vrot.slane %v2328_v7, 4  ;;  %v2770_v14 = vperm.slane %v7014_v1, 3  ;;  %v2790_v17 = vadd.f32 %v2788_v48, %v2784_v15  ;;  %v2910_v62 = vadd.f32 %v2908_v53, %v7014_v1  ;;  %v8809_v20 = vld [vmem:[#allocation110_spill] sm:$0xff]  ;;  %v8813_v15 = vld [vmem:[#allocation109_spill] sm:$0xff] }
 0x23a   : > { %8806 = vst [vmem:[#allocation97_spill] sm:$0xff] %v7021_v46  ;;  %v3502_v56 = vmul.f32 %v3500_v41, %v8715_v29  ;;  %v3508_v5 = vmul.f32 %v8808_v55, %v8807_v32  ;;  %v7027_v21 = vperm.slane %v8809_v20, 0  ;;  %v1439_v26 = vmul.f32 %v8814_v2, %v8813_v15  ;;  %v8816_v55 = vld [vmem:[#allocation128_spill] sm:$0xff]  ;;  %v8819_v32 = vld [vmem:[#allocation127_spill] sm:$0xff] }
 0x23b   : > { %v2336_v28 = vadd.f32 %v2332_v39, %v2058_v25  ;;  %v2772_v44 = vmul.f32 %v2770_v14, %v8707_v54  ;;  %v7031_v7 = vadd.f32 %v2910_v62, %v8793_v19  ;;  %v3078_v48 = vadd.f32 %v3074_v30, %v2790_v17  ;;  %v8818_v17 = vld [vmem:[#allocation111_spill] sm:$0xff] }
 0x23c   : > { %8810 = vst [vmem:[#allocation91_spill] sm:$0xff] %v7027_v21  ;;  %v1433_v53 = vmul.f32 %v7027_v21, %v8812_v27  ;;  %v7039_v41 = vadd.f32 %v8723_v49, %v8813_v15  ;;  %v7042_v20 = vperm.slane %v8816_v55, 0  ;;  %v3496_v30 = vmul.f32 %v7021_v46, %v8818_v17  ;;  %v8822_v15 = vld [vmem:[#allocation122_spill] sm:$0xff] }
 0x23d   : > { %8811 = vst [vmem:[#allocation103_spill] sm:$0xff] %v7031_v7  ;;  %v2346_v25 = vadd.f32 %v2342_v47, %v2336_v28  ;;  %v3046_v39 = vperm.slane %v7031_v7, 3  ;;  %v3090_v14 = vadd.f32 %v3086_v50, %v3078_v48  ;;  %v3348_v62 = vadd.f32 %v3344_v33, %v7031_v7  ;;  %v8821_v48 = vld [vmem:[#allocation31_spill] sm:$0xff] }
 0x23e   : > { %8815 = vst [vmem:[#allocation108_spill] sm:$0xff] %v7039_v41  ;;  %v1435_v27 = vadd.f32 %v1433_v53, %v8723_v49  ;;  %v1607_v2 = vperm.slane %v7039_v41, 3  ;;  %v1619_v9 = vmul.f32 %v7042_v20, %v8819_v32  ;;  %v1441_v50 = vadd.f32 %v1439_v26, %v8723_v49  ;;  %v8823_v53 = vld [vmem:[#allocation39_spill] sm:$0xff] }
 0x23f   : > { %8817 = vst [vmem:[#allocation174_spill] sm:$0xff] %v7042_v20  ;;  %v2774_v19 = vadd.f32 %v2772_v44, %v2346_v25  ;;  %v3048_v55 = vmul.f32 %v3046_v39, %v8614_v3  ;;  %v7053_v47 = vadd.f32 %v3352_v63, %v3348_v62  ;;  %v3504_v28 = vadd.f32 %v3502_v56, %v3090_v14  ;;  %v4561_v39 = vld [vmem:[%s4772_s25 + $0x8] sm:$0xf]  ;;  %s4590_s25 = smov 112  }
 0x240   : > { %v1609_v33 = vmul.f32 %v1607_v2, %v8512_v40  ;;  %v1629_v17 = vperm.slane %v8821_v48, 0  ;;  %v1643_v21 = vmul.f32 %v8823_v53, %v8822_v15  ;;  %v1623_v25 = vrot.slane %v1619_v9, 4 }
 0x241   : > { %8820 = vst [vmem:[#allocation136_spill] sm:$0xff] %v7053_v47  ;;  %v2778_v46 = vadd.f32 %v2776_v37, %v2774_v19  ;;  %v3052_v7 = vrot.slane %v3048_v55, 4  ;;  %v3490_v32 = vperm.slane %v7053_v47, 3  ;;  %v3510_v20 = vadd.f32 %v3508_v5, %v3504_v28  ;;  %v8824_v55 = vld [vmem:[#allocation135_spill] sm:$0xff] }
 0x242   : > { %v1613_v44 = vrot.slane %v1609_v33, 4  ;;  %v1631_v63 = vmul.f32 %v1629_v17, %v8512_v40  ;;  %v1899_v56 = vperm.slane %v4561_v39, 0  ;;  %v1647_v2 = vrot.slane %v1643_v21, 4  ;;  %v8825_v17 = vld [vmem:[#allocation131_spill] sm:$0xff] }
 0x243   : > { %v3056_v14 = vadd.f32 %v3052_v7, %v2778_v46  ;;  %v3492_v26 = vmul.f32 %v3490_v32, %v8715_v29  ;;  %v3686_v62 = vrot.slane %v3510_v20, 4  ;;  %v1913_v19 = vrot.slane %v8822_v15, 4  ;;  %v8826_v32 = vld [vmem:[#allocation129_spill] sm:$0xff] }
 0x244   : > { %v1617_v48 = vadd.f32 %v1613_v44, %v1435_v27  ;;  %v1635_v49 = vrot.slane %v1631_v63, 4  ;;  %v1901_v53 = vmul.f32 %v1899_v56, %v8512_v40  ;;  %v7067_v5 = vperm.slane %v8824_v55, 0  ;;  %v8827_v63 = vld [vmem:[#allocation143_spill] sm:$0xff] }
 0x245   : > { %v3066_v37 = vadd.f32 %v3062_v6, %v3056_v14  ;;  %v2061_v9 = vperm.slane %v6609_v8, 0  ;;  %v2187_v28 = vperm.slane %v8825_v17, 0  ;;  %v2069_v21 = vmul.f32 %v6592_v58, %v8826_v32  ;;  %v8828_v14 = vld [vmem:[#allocation138_spill] sm:$0xff] }
 0x246   : > { %v1627_v33 = vadd.f32 %v1623_v25, %v1617_v48  ;;  %v1639_v46 = vadd.f32 %v1635_v49, %v1441_v50  ;;  %v1905_v7 = vrot.slane %v1901_v53, 4  ;;  %v7076_v6 = vperm.slane %v8827_v63, 0  ;;  %v8829_v25 = vld [vmem:[#allocation134_spill] sm:$0xff]  ;;  %v8831_v53 = vld [vmem:[#allocation137_spill] sm:$0xff] }
 0x247   : > { %v3494_v20 = vadd.f32 %v3492_v26, %v3066_v37  ;;  %v2063_v27 = vmul.f32 %v2061_v9, %v8422_v11  ;;  %v2189_v44 = vmul.f32 %v2187_v28, %v8422_v11  ;;  %v2349_v8 = vperm.slane %v6635_v12, 0  ;;  %v8830_v26 = vld [vmem:[#allocation142_spill] sm:$0xff] }
 0x248   : > { %v1651_v39 = vadd.f32 %v1647_v2, %v1639_v46  ;;  %v1909_v56 = vadd.f32 %v1905_v7, %v7039_v41  ;;  %v2363_v49 = vmul.f32 %v6604_v34, %v8828_v14  ;;  %v2057_v58 = vmul.f32 %v7067_v5, %v8829_v25 }
 0x249   : > { %v3498_v50 = vadd.f32 %v3496_v30, %v3494_v20  ;;  %v2339_v48 = vmul.f32 %v7076_v6, %v8830_v26  ;;  %v2619_v37 = vperm.slane %v8831_v53, 0  ;;  %v2351_v2 = vmul.f32 %v2349_v8, %v8438_v51  ;;  %v8835_v53 = vld [vmem:[#allocation146_spill] sm:$0xff] }
 0x24a   : > { %v7087_v55 = vadd.f32 %v1913_v19, %v1909_v56  ;;  %v2065_v9 = vadd.f32 %v2063_v27, %v1651_v39  ;;  %v2633_v17 = vrot.slane %v8828_v14, 4  ;;  %v2367_v30 = vrot.slane %v2363_v49, 4  ;;  %v8832_v39 = vld [vmem:[#allocation152_spill] sm:$0xff] }
 0x24b   : > { %v7092_v12 = vsel %vm1335_vm0, %v3498_v50, %v3686_v62  ;;  %v2343_v34 = vrot.slane %v2339_v48, 4  ;;  %v2621_v28 = vmul.f32 %v2619_v37, %v8438_v51  ;;  %v2355_v63 = vrot.slane %v2351_v2, 4 }
 0x24c   : > { %v8117_v46 = vrot.slane %v7092_v12, 4  ;;  %v2051_v7 = vperm.slane %v7087_v55, 3  ;;  %v2071_v20 = vadd.f32 %v2069_v21, %v2065_v9  ;;  %v2191_v19 = vadd.f32 %v2189_v44, %v7087_v55  ;;  %v8834_v44 = vld [vmem:[#allocation139_spill] sm:$0xff] }
 0x24d   : > { %v2625_v27 = vrot.slane %v2621_v28, 4  ;;  %v7099_v56 = vperm.slane %v8832_v39, 0  ;;  %v2781_v8 = vperm.slane %v6657_v22, 0  ;;  %v8833_v62 = vrot.slane %v6853_v52, 4  ;;  %v8836_v28 = vld [vmem:[#allocation158_spill] sm:$0xff] }
 0x24e   : > { %v2053_v50 = vmul.f32 %v2051_v7, %v8422_v11  ;;  %v7111_v21 = vadd.f32 %v2191_v19, %v8826_v32  ;;  %v2789_v25 = vmul.f32 %v6624_v36, %v8834_v44  ;;  %v2359_v48 = vadd.f32 %v2355_v63, %v2071_v20  ;;  %v8853_v32 = vld [vmem:[#allocation49_spill] sm:$0xff] }
 0x24f   : > { %v7107_v49 = vsel %vm1335_vm0, %v8117_v46, %v8833_v62  ;;  %v2783_v22 = vmul.f32 %v2781_v8, %v8449_v13  ;;  %v2907_v52 = vperm.slane %v8835_v53, 0  ;;  %v7121_v7 = vperm.slane %v8836_v28, 0  ;;  %v8839_v28 = vld [vmem:[#allocation123_spill] sm:$0xff] }
 0x250   : > { %v8116_v26 = vrot.slane %v7107_v49, 4  ;;  %v2055_v37 = vadd.f32 %v2053_v50, %v1627_v33  ;;  %v2327_v9 = vperm.slane %v7111_v21, 3  ;;  %v2629_v2 = vadd.f32 %v2625_v27, %v7111_v21  ;;  %v8838_v27 = vld [vmem:[#allocation157_spill] sm:$0xff] }
 0x251   : > { %v8837_v19 = vrot.slane %v6864_v60, 4  ;;  %v2371_v39 = vadd.f32 %v2367_v30, %v2359_v48  ;;  %v2909_v20 = vmul.f32 %v2907_v52, %v8449_v13  ;;  %v3069_v63 = vperm.slane %v6671_v23, 0  ;;  %v8840_v30 = vld [vmem:[#allocation149_spill] sm:$0xff] }
 0x252   : > { %v2059_v33 = vadd.f32 %v2057_v58, %v2055_v37  ;;  %v2329_v8 = vmul.f32 %v2327_v9, %v8438_v51  ;;  %v7131_v62 = vadd.f32 %v2633_v17, %v2629_v2  ;;  %v3059_v50 = vmul.f32 %v7121_v7, %v8838_v27 }
 0x253   : > { %v3956_v36 = vsel %vm1335_vm0, %v8116_v26, %v8837_v19  ;;  %v2785_v53 = vadd.f32 %v2783_v22, %v2371_v39  ;;  %v3071_v60 = vmul.f32 %v3069_v63, %v8454_v45  ;;  %v3083_v19 = vmul.f32 %v6654_v24, %v8839_v28 }
 0x254   : > { %4014 = vmatpush.msra.mxu0 %v3956_v36  ;;  %v3339_v48 = vperm.slane %v8840_v30, 0  ;;  %v2333_v52 = vrot.slane %v2329_v8, 4  ;;  %v2771_v23 = vperm.slane %v7131_v62, 3  ;;  %v8841_v36 = vld [vmem:[#allocation151_spill] sm:$0xff]  ;;  %v2911_v17 = vadd.f32 %v2909_v20, %v7131_v62 }
 0x255   : > { %v2777_v58 = vmul.f32 %v7099_v56, %v8841_v36  ;;  %v2791_v37 = vadd.f32 %v2789_v25, %v2785_v53  ;;  %v3075_v9 = vrot.slane %v3071_v60, 4  ;;  %v3087_v2 = vrot.slane %v3083_v19, 4  ;;  %v8842_v20 = vld [vmem:[#allocation163_spill] sm:$0xff] }
 0x256   : > { %v3341_v22 = vmul.f32 %v3339_v48, %v8454_v45  ;;  %v2337_v39 = vadd.f32 %v2333_v52, %v2059_v33  ;;  %v2773_v63 = vmul.f32 %v2771_v23, %v8449_v13  ;;  %v7146_v24 = vadd.f32 %v2911_v17, %v8834_v44 }
 0x257   : > { %v3063_v27 = vrot.slane %v3059_v50, 4  ;;  %v3079_v8 = vadd.f32 %v3075_v9, %v2791_v37  ;;  %v3353_v26 = vrot.slane %v8839_v28, 4  ;;  %v3501_v36 = vperm.slane %v6692_v42, 0  ;;  %v8843_v50 = vld [vmem:[#allocation22_spill] sm:$0xff] }
 0x258   : > { %v3345_v30 = vrot.slane %v3341_v22, 4  ;;  %v2347_v46 = vadd.f32 %v2343_v34, %v2337_v39  ;;  %v3047_v25 = vperm.slane %v7146_v24, 3  ;;  %v7152_v53 = vperm.slane %v8842_v20, 0  ;;  %v8847_v42 = vld [vmem:[#allocation62_spill] sm:$0xff] }
 0x259   : > { %v1261_v33 = vperm.slane %v8740_v18, 1  ;;  %v3091_v60 = vadd.f32 %v3087_v2, %v3079_v8  ;;  %v3503_v48 = vmul.f32 %v3501_v36, %v8457_v57  ;;  %v3509_v52 = vmul.f32 %v6675_v16, %v8843_v50  ;;  %v8844_v36 = vld [vmem:[#allocation168_spill] sm:$0xff] }
 0x25a   : > { %v3349_v19 = vadd.f32 %v3345_v30, %v7146_v24  ;;  %v2775_v23 = vadd.f32 %v2773_v63, %v2347_v46  ;;  %v3049_v17 = vmul.f32 %v3047_v25, %v8454_v45  ;;  %v1269_v37 = vperm.slane %v8740_v18, 2 }
 0x25b   : > { %v1263_v34 = vmul.f32 %v1261_v33, %v4748_v35  ;;  %v3505_v22 = vadd.f32 %v3503_v48, %v3091_v60  ;;  %v1262_v39 = vperm.slane %v8752_v43, 1  ;;  %v1270_v2 = vperm.slane %v8752_v43, 2  ;;  %v8846_v48 = vld [vmem:[#allocation55_spill] sm:$0xff] }
 0x25c   : > { %v7162_v9 = vadd.f32 %v3353_v26, %v3349_v19  ;;  %v2779_v8 = vadd.f32 %v2777_v58, %v2775_v23  ;;  %v3053_v30 = vrot.slane %v3049_v17, 4  ;;  %v1271_v16 = vmul.f32 %v1269_v37, %v4748_v35  ;;  %v8845_v19 = vld [vmem:[#allocation165_spill] sm:$0xff]  ;;  %v8848_v17 = vld [vmem:[#allocation43_spill] sm:$0xff] }
 0x25d   : > { %v1265_v20 = vadd.f32 %v1263_v34, %v8844_v36  ;;  %v3511_v63 = vadd.f32 %v3509_v52, %v3505_v22  ;;  %v1264_v25 = vmul.f32 %v1262_v39, %v8749_v0  ;;  %v1272_v33 = vmul.f32 %v1270_v2, %v8749_v0  ;;  %v8849_v37 = vld [vmem:[#allocation173_spill] sm:$0xff]  ;;  %v8850_v52 = vld [vmem:[#allocation58_spill] sm:$0xff]  ;;  %v8851_v2 = vld [vmem:[#allocation44_spill] sm:$0xff] }
 0x25e   : > { %v3491_v46 = vperm.slane %v7162_v9, 3  ;;  %v3057_v26 = vadd.f32 %v3053_v30, %v2779_v8  ;;  %v3497_v60 = vmul.f32 %v7152_v53, %v8845_v19  ;;  %v1273_v50 = vadd.f32 %v1271_v16, %v8846_v48  ;;  %v8852_v30 = vld [vmem:[#allocation63_spill] sm:$0xff]  ;;  %v8854_v48 = vld [vmem:[#allocation50_spill] sm:$0xff] }
 0x25f   : > { %v1424_v58 = vmul.f32 %v6905_v61, %v8847_v42  ;;  %v1267_v34 = vadd.f32 %v1265_v20, %v8848_v17  ;;  %v1266_v36 = vadd.f32 %v1264_v25, %v8849_v37  ;;  %v1274_v22 = vadd.f32 %v1272_v33, %v8850_v52  ;;  %v8857_v52 = vld [vmem:[#allocation69_spill] sm:$0xff] }
 0x260   : > { %v3493_v23 = vmul.f32 %v3491_v46, %v8457_v57  ;;  %v3067_v39 = vadd.f32 %v3063_v27, %v3057_v26  ;;  %v3687_v44 = vrot.slane %v3511_v63, 4  ;;  %v1275_v8 = vadd.f32 %v1273_v50, %v8851_v2  ;;  %v8855_v46 = vld [vmem:[#allocation68_spill] sm:$0xff] }
 0x261   : > { %v1428_v19 = vmul.f32 %v6905_v61, %v8852_v30  ;;  %v1268_v16 = vadd.f32 %v1266_v36, %v8853_v32  ;;  %v1276_v28 = vadd.f32 %v1274_v22, %v8854_v48  ;;  %v1562_v42 = vperm.slane %v6911_v10, 1  ;;  %v8856_v26 = vld [vmem:[#allocation12_spill] sm:$0xff]  ;;  %v8858_v30 = vld [vmem:[#allocation87_spill] sm:$0xff] }
 0x262   : > { %v1574_v20 = vmul.f32 %v6921_v59, %v8855_v46  ;;  %v3495_v17 = vadd.f32 %v3493_v23, %v3067_v39  ;;  %v1295_v25 = vrot.slane %v1275_v8, 4  ;;  %v1426_v33 = vadd.f32 %v1424_v58, %v8756_v4  ;;  %v8861_v46 = vld [vmem:[#allocation75_spill] sm:$0xff] }
 0x263   : > { %v1584_v27 = vperm.slane %v6911_v10, 2  ;;  %v1296_v63 = vrot.slane %v1276_v28, 4  ;;  %v1430_v50 = vadd.f32 %v1428_v19, %v8756_v4  ;;  %v1564_v37 = vmul.f32 %v1562_v42, %v8856_v26  ;;  %v8860_v42 = vld [vmem:[#allocation74_spill] sm:$0xff] }
 0x264   : > { %v1596_v32 = vmul.f32 %v6921_v59, %v8857_v52  ;;  %v3499_v36 = vadd.f32 %v3497_v60, %v3495_v17  ;;  %v1338_v22 = vsel %vm1335_vm0, %v1267_v34, %v1295_v25  ;;  %v2030_v23 = vperm.slane %v8858_v30, 1 }
 0x265   : > { %v1586_v2 = vmul.f32 %v1584_v27, %v8856_v26  ;;  %4074 = vmatpush.msra.mxu2 %v1338_v22  ;;  %v1339_v58 = vsel %vm1335_vm0, %v1268_v16, %v1296_v63  ;;  %v1568_v39 = vrot.slane %v1564_v37, 4  ;;  %v1578_v8 = vrot.slane %v1574_v20, 4  ;;  %v8862_v27 = vld [vmem:[#allocation18_spill] sm:$0xff]  ;;  %v8865_v22 = vld [vmem:[#allocation172_spill] sm:$0xff] }
 0x266   : > { %v1600_v28 = vrot.slane %v1596_v32, 4  ;;  %v7199_v19 = vsel %vm1335_vm0, %v3499_v36, %v3687_v44  ;;  %4097 = vmatpush.msra.mxu3 %v1339_v58  ;;  %v2036_v60 = vmul.f32 %v8861_v46, %v8860_v42  ;;  %v2040_v34 = vperm.slane %v8858_v30, 2  ;;  %v8863_v37 = vld [vmem:[#allocation82_spill] sm:$0xff] }
 0x267   : > { %8859 = vst [vmem:[#allocation33_spill] sm:$0xff] %v7199_v19  ;;  %v1590_v48 = vrot.slane %v1586_v2, 4  ;;  %v8125_v17 = vrot.slane %v7199_v19, 4  ;;  %v1572_v25 = vadd.f32 %v1568_v39, %v1426_v33  ;;  %v2032_v52 = vmul.f32 %v2030_v23, %v8862_v27  ;;  %v8864_v44 = vld [vmem:[#allocation66_spill] sm:$0xff]  ;;  %v8868_v39 = vld [vmem:[#allocation83_spill] sm:$0xff] }
 0x268   : > { %v2282_v16 = vperm.slane %v6996_v31, 1  ;;  %v2042_v20 = vmul.f32 %v2040_v34, %v8862_v27  ;;  %v2294_v32 = vmul.f32 %v8864_v44, %v8863_v37  ;;  %v2304_v36 = vperm.slane %v6996_v31, 2  ;;  %v8869_v34 = vld [vmem:[#allocation76_spill] sm:$0xff] }
 0x269   : > { %v1594_v63 = vadd.f32 %v1590_v48, %v1430_v50  ;;  %v8866_v2 = vrot.slane %v8865_v22, 4  ;;  %v1582_v33 = vadd.f32 %v1578_v8, %v1572_v25  ;;  %v2316_v50 = vmul.f32 %v8864_v44, %v8868_v39 }
 0x26a   : > { %v2284_v23 = vmul.f32 %v2282_v16, %v8788_v38  ;;  %v2046_v37 = vmul.f32 %v8861_v46, %v8869_v34  ;;  %v2306_v14 = vmul.f32 %v2304_v36, %v8788_v38  ;;  %v2298_v19 = vrot.slane %v2294_v32, 4  ;;  %v8872_v34 = vld [vmem:[#allocation89_spill] sm:$0xff]  ;;  %v8876_v38 = vld [vmem:[#allocation96_spill] sm:$0xff] }
 0x26b   : > { %v7216_v58 = vsel %vm1335_vm0, %v8125_v17, %v8866_v2  ;;  %v1604_v42 = vadd.f32 %v1600_v28, %v1594_v63  ;;  %v2034_v22 = vadd.f32 %v2032_v52, %v1582_v33  ;;  %v2750_v2 = vperm.slane %v7014_v1, 1  ;;  %v8870_v17 = vld [vmem:[#allocation67_spill] sm:$0xff]  ;;  %v8873_v36 = vld [vmem:[#allocation65_spill] sm:$0xff] }
 0x26c   : > { %8867 = vst [vmem:[#allocation35_spill] sm:$0xff] %v7216_v58  ;;  %v8130_v48 = vrot.slane %v7216_v58, 4  ;;  %v2288_v15 = vrot.slane %v2284_v23, 4  ;;  %v8871_v8 = vrot.slane %v8870_v17, 4  ;;  %v2310_v39 = vrot.slane %v2306_v14, 4  ;;  %v8874_v23 = vld [vmem:[#allocation103_spill] sm:$0xff] }
 0x26d   : > { %v2044_v16 = vadd.f32 %v2042_v20, %v1604_v42  ;;  %v2320_v44 = vrot.slane %v2316_v50, 4  ;;  %v2038_v28 = vadd.f32 %v2036_v60, %v2034_v22  ;;  %v2752_v63 = vmul.f32 %v2750_v2, %v8707_v54  ;;  %v8875_v17 = vld [vmem:[#allocation98_spill] sm:$0xff]  ;;  %v8878_v60 = vld [vmem:[#allocation99_spill] sm:$0xff] }
 0x26e   : > { %v3958_v25 = vsel %vm1335_vm0, %v8130_v48, %v8871_v8  ;;  %v2756_v52 = vmul.f32 %v8873_v36, %v8872_v34  ;;  %v2760_v32 = vperm.slane %v7014_v1, 2  ;;  %v3002_v46 = vperm.slane %v8874_v23, 1  ;;  %v8877_v14 = vld [vmem:[#allocation90_spill] sm:$0xff] }
 0x26f   : > { %4037 = vmatpush.msra.mxu1 %v3958_v25  ;;  %v2048_v33 = vadd.f32 %v2046_v37, %v2044_v16  ;;  %v3014_v58 = vmul.f32 %v8876_v38, %v8875_v17  ;;  %v3024_v8 = vperm.slane %v8874_v23, 2  ;;  %v2292_v20 = vadd.f32 %v2288_v15, %v2038_v28 }
 0x270   : > { %v2766_v50 = vmul.f32 %v8873_v36, %v8877_v14  ;;  %v3036_v42 = vmul.f32 %v8876_v38, %v8878_v60  ;;  %v3470_v22 = vperm.slane %v7053_v47, 1  ;;  %v2762_v25 = vmul.f32 %v2760_v32, %v8707_v54  ;;  %v8879_v14 = vld [vmem:[#allocation105_spill] sm:$0xff]  ;;  %v8882_v32 = vld [vmem:[#allocation91_spill] sm:$0xff] }
 0x271   : > { %v2314_v2 = vadd.f32 %v2310_v39, %v2048_v33  ;;  %v3004_v37 = vmul.f32 %v3002_v46, %v8614_v3  ;;  %v3026_v16 = vmul.f32 %v3024_v8, %v8614_v3  ;;  %v2302_v34 = vadd.f32 %v2298_v19, %v2292_v20  ;;  %v8880_v36 = vld [vmem:[#allocation97_spill] sm:$0xff]  ;;  %v8881_v33 = vld [vmem:[#allocation115_spill] sm:$0xff]  ;;  %v8883_v46 = vld [vmem:[#allocation116_spill] sm:$0xff] }
 0x272   : > { %v3018_v17 = vrot.slane %v3014_v58, 4  ;;  %v3040_v48 = vrot.slane %v3036_v42, 4  ;;  %v3472_v15 = vmul.f32 %v3470_v22, %v8715_v29  ;;  %v3476_v1 = vmul.f32 %v8880_v36, %v8879_v14  ;;  %v8884_v58 = vld [vmem:[#allocation106_spill] sm:$0xff]  ;;  %v8885_v42 = vld [vmem:[#allocation125_spill] sm:$0xff] }
 0x273   : > { %v2324_v28 = vadd.f32 %v2320_v44, %v2314_v2  ;;  %v3008_v23 = vrot.slane %v3004_v37, 4  ;;  %v3480_v60 = vperm.slane %v7053_v47, 2  ;;  %v2754_v38 = vadd.f32 %v2752_v63, %v2302_v34  ;;  %v8886_v22 = vld [vmem:[#allocation174_spill] sm:$0xff] }
 0x274   : > { %v3030_v39 = vrot.slane %v3026_v16, 4  ;;  %v1425_v54 = vmul.f32 %v8882_v32, %v8881_v33  ;;  %v1429_v8 = vmul.f32 %v8882_v32, %v8883_v46  ;;  %v3486_v20 = vmul.f32 %v8880_v36, %v8884_v58  ;;  %v8887_v63 = vld [vmem:[#allocation114_spill] sm:$0xff] }
 0x275   : > { %v2764_v19 = vadd.f32 %v2762_v25, %v2324_v28  ;;  %v1563_v44 = vperm.slane %v7039_v41, 1  ;;  %v1575_v2 = vmul.f32 %v8886_v22, %v8885_v42  ;;  %v2758_v37 = vadd.f32 %v2756_v52, %v2754_v38  ;;  %v8888_v28 = vld [vmem:[#allocation126_spill] sm:$0xff] }
 0x276   : > { %v3482_v14 = vmul.f32 %v3480_v60, %v8715_v29  ;;  %v1427_v16 = vadd.f32 %v1425_v54, %v8887_v63  ;;  %v1585_v34 = vperm.slane %v7039_v41, 2  ;;  %v1431_v47 = vadd.f32 %v1429_v8, %v8887_v63  ;;  %v8889_v42 = vld [vmem:[#allocation130_spill] sm:$0xff] }
 0x277   : > { %v2768_v33 = vadd.f32 %v2766_v50, %v2764_v19  ;;  %v1565_v25 = vmul.f32 %v1563_v44, %v8512_v40  ;;  %v1597_v46 = vmul.f32 %v8886_v22, %v8888_v28  ;;  %v3012_v58 = vadd.f32 %v3008_v23, %v2758_v37 }
 0x278   : > { %v1579_v36 = vrot.slane %v1575_v2, 4  ;;  %v1587_v3 = vmul.f32 %v1585_v34, %v8512_v40  ;;  %v2031_v38 = vperm.slane %v7087_v55, 1  ;;  %v2037_v54 = vmul.f32 %v7067_v5, %v8889_v42 }
 0x279   : > { %v3034_v52 = vadd.f32 %v3030_v39, %v2768_v33  ;;  %v1569_v60 = vrot.slane %v1565_v25, 4  ;;  %v2041_v50 = vperm.slane %v7087_v55, 2  ;;  %v3022_v19 = vadd.f32 %v3018_v17, %v3012_v58  ;;  %v8890_v39 = vld [vmem:[#allocation140_spill] sm:$0xff]  ;;  %v8891_v17 = vld [vmem:[#allocation141_spill] sm:$0xff] }
 0x27a   : > { %v1591_v8 = vrot.slane %v1587_v3, 4  ;;  %v1601_v63 = vrot.slane %v1597_v46, 4  ;;  %v2033_v44 = vmul.f32 %v2031_v38, %v8422_v11  ;;  %v2283_v2 = vperm.slane %v7111_v21, 1  ;;  %v8892_v46 = vld [vmem:[#allocation133_spill] sm:$0xff] }
 0x27b   : > { %v3044_v41 = vadd.f32 %v3040_v48, %v3034_v52  ;;  %v1573_v28 = vadd.f32 %v1569_v60, %v1427_v16  ;;  %v2043_v23 = vmul.f32 %v2041_v50, %v8422_v11  ;;  %v3474_v37 = vadd.f32 %v3472_v15, %v3022_v19 }
 0x27c   : > { %v1595_v34 = vadd.f32 %v1591_v8, %v1431_v47  ;;  %v2295_v33 = vmul.f32 %v7076_v6, %v8890_v39  ;;  %v2305_v25 = vperm.slane %v7111_v21, 2  ;;  %v2285_v3 = vmul.f32 %v2283_v2, %v8438_v51  ;;  %v8893_v2 = vld [vmem:[#allocation147_spill] sm:$0xff] }
 0x27d   : > { %v3484_v42 = vadd.f32 %v3482_v14, %v3044_v41  ;;  %v1583_v40 = vadd.f32 %v1579_v36, %v1573_v28  ;;  %v2317_v58 = vmul.f32 %v7076_v6, %v8891_v17  ;;  %v3478_v48 = vadd.f32 %v3476_v1, %v3474_v37 }
 0x27e   : > { %v1605_v16 = vadd.f32 %v1601_v63, %v1595_v34  ;;  %v2047_v38 = vmul.f32 %v7067_v5, %v8892_v46  ;;  %v2307_v15 = vmul.f32 %v2305_v25, %v8438_v51  ;;  %v2289_v60 = vrot.slane %v2285_v3, 4  ;;  %v8894_v34 = vld [vmem:[#allocation148_spill] sm:$0xff] }
 0x27f   : > { %v3488_v47 = vadd.f32 %v3486_v20, %v3484_v42  ;;  %v2035_v52 = vadd.f32 %v2033_v44, %v1583_v40  ;;  %v2299_v50 = vrot.slane %v2295_v33, 4  ;;  %v2321_v41 = vrot.slane %v2317_v58, 4  ;;  %v8895_v20 = vld [vmem:[#allocation155_spill] sm:$0xff] }
 0x280   : > { %v2045_v19 = vadd.f32 %v2043_v23, %v1605_v16  ;;  %v2311_v8 = vrot.slane %v2307_v15, 4  ;;  %v2751_v36 = vperm.slane %v7131_v62, 1  ;;  %v2757_v1 = vmul.f32 %v7099_v56, %v8893_v2 }
 0x281   : > { %v3680_v14 = vrot.slane %v3488_v47, 4  ;;  %v2039_v28 = vadd.f32 %v2037_v54, %v2035_v52  ;;  %v2761_v63 = vperm.slane %v7131_v62, 2  ;;  %v2767_v39 = vmul.f32 %v7099_v56, %v8894_v34 }
 0x282   : > { %v2049_v37 = vadd.f32 %v2047_v38, %v2045_v19  ;;  %v3003_v40 = vperm.slane %v7146_v24, 1  ;;  %v3015_v44 = vmul.f32 %v7121_v7, %v8895_v20  ;;  %v2753_v54 = vmul.f32 %v2751_v36, %v8449_v13  ;;  %v8896_v38 = vld [vmem:[#allocation156_spill] sm:$0xff] }
 0x283   : > { %v7294_v23 = vsel %vm1335_vm0, %v3478_v48, %v3680_v14  ;;  %v2293_v33 = vadd.f32 %v2289_v60, %v2039_v28  ;;  %v3025_v25 = vperm.slane %v7146_v24, 2  ;;  %v2763_v17 = vmul.f32 %v2761_v63, %v8449_v13  ;;  %v8898_v28 = vld [vmem:[#allocation162_spill] sm:$0xff] }
 0x284   : > { %v3772_v42 = vrot.slane %v7294_v23, 4  ;;  %v2315_v3 = vadd.f32 %v2311_v8, %v2049_v37  ;;  %v3005_v58 = vmul.f32 %v3003_v40, %v8454_v45  ;;  %v3037_v15 = vmul.f32 %v7121_v7, %v8896_v38 }
 0x285   : > { %v2303_v16 = vadd.f32 %v2299_v50, %v2293_v33  ;;  %v3027_v46 = vmul.f32 %v3025_v25, %v8454_v45  ;;  %v3471_v48 = vperm.slane %v7162_v9, 1  ;;  %v8897_v47 = vrot.slane %v7092_v12, 4 }
 0x286   : > { %v2325_v60 = vadd.f32 %v2321_v41, %v2315_v3  ;;  %v3009_v19 = vrot.slane %v3005_v58, 4  ;;  %v3019_v8 = vrot.slane %v3015_v44, 4  ;;  %v3477_v2 = vmul.f32 %v7152_v53, %v8898_v28  ;;  %v8900_v44 = vld [vmem:[#allocation164_spill] sm:$0xff] }
 0x287   : > { %v7310_v52 = vsel %vm1335_vm0, %v3772_v42, %v8897_v47  ;;  %v2755_v50 = vadd.f32 %v2753_v54, %v2303_v16  ;;  %v3031_v14 = vrot.slane %v3027_v46, 4  ;;  %v3041_v37 = vrot.slane %v3037_v15, 4  ;;  %v8901_v46 = vld [vmem:[#allocation171_spill] sm:$0xff]  ;;  %v8902_v47 = vld [vmem:[#allocation61_spill] sm:$0xff] }
 0x288   : > { %v3947_v36 = vrot.slane %v7310_v52, 4  ;;  %v2765_v63 = vadd.f32 %v2763_v17, %v2325_v60  ;;  %v3473_v34 = vmul.f32 %v3471_v48, %v8457_v57  ;;  %v3481_v12 = vperm.slane %v7162_v9, 2 }
 0x289   : > { %v8899_v40 = vrot.slane %v7107_v49, 4  ;;  %v2759_v20 = vadd.f32 %v2757_v1, %v2755_v50  ;;  %v3487_v33 = vmul.f32 %v7152_v53, %v8900_v44  ;;  %v1253_v54 = vperm.slane %v8740_v18, 0  ;;  %v8903_v50 = vld [vmem:[#allocation153_spill] sm:$0xff] }
 0x28a   : > { %v2769_v25 = vadd.f32 %v2767_v39, %v2765_v63  ;;  %v3483_v3 = vmul.f32 %v3481_v12, %v8457_v57  ;;  %v1285_v17 = vadd.f32 %v4748_v35, %v8740_v18  ;;  %v1254_v58 = vperm.slane %v8752_v43, 0  ;;  %v8904_v12 = vld [vmem:[#allocation118_spill] sm:$0xff] }
 0x28b   : > { %v3952_v41 = vsel %vm1335_vm0, %v3947_v36, %v8899_v40  ;;  %v3013_v49 = vadd.f32 %v3009_v19, %v2759_v20  ;;  %v1255_v16 = vmul.f32 %v1253_v54, %v4748_v35  ;;  %v1286_v1 = vadd.f32 %v8749_v0, %v8752_v43 }
 0x28c   : > { %4015 = vmatpush.msra.mxu0 %v3952_v41  ;;  %v1420_v38 = vmul.f32 %v6905_v61, %v8901_v46  ;;  %v3035_v15 = vadd.f32 %v3031_v14, %v2769_v25  ;;  %v1256_v48 = vmul.f32 %v1254_v58, %v8749_v0  ;;  %v1538_v39 = vperm.slane %v6911_v10, 0  ;;  %v8905_v0 = vld [vmem:[#allocation53_spill] sm:$0xff] }
 0x28d   : > { %v1552_v60 = vmul.f32 %v6921_v59, %v8902_v47  ;;  %v3023_v18 = vadd.f32 %v3019_v8, %v3013_v49  ;;  %v1257_v63 = vadd.f32 %v1255_v16, %v8903_v50  ;;  %v2018_v35 = vperm.slane %v8858_v30, 0  ;;  %v8906_v8 = vld [vmem:[#allocation57_spill] sm:$0xff]  ;;  %v8907_v49 = vld [vmem:[#allocation79_spill] sm:$0xff]  ;;  %v8908_v16 = vld [vmem:[#allocation66_spill] sm:$0xff] }
 0x28e   : > { %v3045_v19 = vadd.f32 %v3041_v37, %v3035_v15  ;;  %v1258_v43 = vadd.f32 %v1256_v48, %v8904_v12  ;;  %v1422_v40 = vadd.f32 %v1420_v38, %v8756_v4  ;;  %v1540_v61 = vmul.f32 %v1538_v39, %v8856_v26  ;;  %v8909_v4 = vld [vmem:[#allocation86_spill] sm:$0xff]  ;;  %v8910_v48 = vld [vmem:[#allocation21_spill] sm:$0xff] }
 0x28f   : > { %v3475_v14 = vadd.f32 %v3473_v34, %v3023_v18  ;;  %v1259_v41 = vadd.f32 %v1257_v63, %v8905_v0  ;;  %v1556_v10 = vrot.slane %v1552_v60, 4  ;;  %v2020_v20 = vmul.f32 %v2018_v35, %v8862_v27  ;;  %v4562_v50 = vld [vmem:[%s7594_s2] sm:$0xff]  ;;  %v8913_v35 = vld [vmem:[#allocation23_spill] sm:$0xff] }
 0x290   : > { %v3485_v59 = vadd.f32 %v3483_v3, %v3045_v19  ;;  %v1260_v54 = vadd.f32 %v1258_v43, %v8906_v8  ;;  %v1544_v25 = vrot.slane %v1540_v61, 4  ;;  %v2258_v58 = vperm.slane %v6996_v31, 0  ;;  %v8911_v31 = vld [vmem:[#allocation72_spill] sm:$0xff] }
 0x291   : > { %v3479_v30 = vadd.f32 %v3477_v2, %v3475_v14  ;;  %v1289_v37 = vrot.slane %v1259_v41, 4  ;;  %v2272_v46 = vmul.f32 %v8908_v16, %v8907_v49  ;;  %v2738_v38 = vperm.slane %v8909_v4, 0  ;;  %v8912_v2 = vld [vmem:[#allocation75_spill] sm:$0xff]  ;;  %v8916_v14 = vld [vmem:[#allocation109_spill] sm:$0xff]  ;;  %v8922_v16 = vld [vmem:[#allocation136_spill] sm:$0xff] }
 0x292   : > { %v3489_v26 = vadd.f32 %v3487_v33, %v3485_v59  ;;  %v1290_v34 = vrot.slane %v1260_v54, 4  ;;  %v1548_v15 = vadd.f32 %v1544_v25, %v1422_v40  ;;  %v2260_v39 = vmul.f32 %v2258_v58, %v8910_v48  ;;  %v8915_v40 = vld [vmem:[#allocation104_spill] sm:$0xff]  ;;  %v8918_v59 = vld [vmem:[#allocation65_spill] sm:$0xff]  ;;  %v8920_v58 = vld [vmem:[#allocation95_spill] sm:$0xff] }
 0x293   : > { %v1336_v27 = vsel %vm1335_vm0, %v1285_v17, %v1289_v37  ;;  %v2026_v18 = vmul.f32 %v8912_v2, %v8911_v31  ;;  %v2276_v63 = vrot.slane %v2272_v46, 4  ;;  %v2740_v19 = vmul.f32 %v2738_v38, %v8913_v35  ;;  %v8914_v17 = vld [vmem:[#allocation103_spill] sm:$0xff]  ;;  %v8919_v54 = vld [vmem:[#allocation25_spill] sm:$0xff]  ;;  %v8921_v37 = vld [vmem:[#allocation96_spill] sm:$0xff] }
 0x294   : > { %v3681_v3 = vrot.slane %v3489_v26, 4  ;;  %4075 = vmatpush.msra.mxu2 %v1336_v27  ;;  %v1337_v47 = vsel %vm1335_vm0, %v1286_v1, %v1290_v34  ;;  %v1560_v60 = vadd.f32 %v1556_v10, %v1548_v15  ;;  %v2264_v33 = vrot.slane %v2260_v39, 4  ;;  %v8917_v10 = vld [vmem:[#allocation81_spill] sm:$0xff]  ;;  %v8923_v4 = vld [vmem:[#allocation108_spill] sm:$0xff]  ;;  %v8926_v15 = vld [vmem:[#allocation102_spill] sm:$0xff] }
 0x295   : > { %4098 = vmatpush.msra.mxu3 %v1337_v47  ;;  %4491 = vmatmul.msk.f32.vlgmr.msra.gmra.mxu2 %vm3995_vm1, %v4562_v50  ;;  %v2978_v12 = vperm.slane %v8914_v17, 0  ;;  %v3650_v61 = vperm.slane %v8915_v40, 3  ;;  %v1421_v0 = vmul.f32 %v8882_v32, %v8916_v14  ;;  %v2746_v8 = vmul.f32 %v8918_v59, %v8917_v10  ;;  %v8924_v26 = vld [vmem:[#allocation33_spill] sm:$0xff]  ;;  %v8928_v27 = vld [vmem:[#allocation122_spill] sm:$0xff]  ;;  %v8932_v10 = vld [vmem:[#allocation35_spill] sm:$0xff] }
 0x296   : > { %v7362_v43 = vsel %vm1335_vm0, %v3479_v30, %v3681_v3  ;;  %4494 = vmatmul.msk.f32.vlgmr.msra.gmra.mxu3 %vm3995_vm1, %v4562_v50  ;;  %v2022_v1 = vadd.f32 %v2020_v20, %v1560_v60  ;;  %v2992_v49 = vmul.f32 %v8921_v37, %v8920_v58  ;;  %v3458_v46 = vperm.slane %v8922_v16, 0  ;;  %v8927_v48 = vld [vmem:[#allocation97_spill] sm:$0xff]  ;;  %v8929_v2 = vld [vmem:[#allocation114_spill] sm:$0xff] }
 0x297   : > { %v3774_v41 = vrot.slane %v7362_v43, 4  ;;  %v2980_v25 = vmul.f32 %v2978_v12, %v8919_v54  ;;  %v3652_v20 = vmul.f32 %v3650_v61, %v8715_v29  ;;  %v1539_v38 = vperm.slane %v8923_v4, 0  ;;  %v8930_v50 = vld [vmem:[#allocation121_spill] sm:$0xff]  ;;  %v8935_v4 = vld [vmem:[#allocation123_spill] sm:$0xff] }
 0x298   : > { %v2028_v30 = vadd.f32 %v2026_v18, %v2022_v1  ;;  %v8925_v34 = vrot.slane %v8924_v26, 4  ;;  %v7386_v39 = vmul.f32 %v8927_v48, %v8926_v15  ;;  %v1553_v3 = vmul.f32 %v8886_v22, %v8928_v27  ;;  %v8931_v1 = vld [vmem:[#allocation107_spill] sm:$0xff] }
 0x299   : > { %v2019_v47 = vperm.slane %v7087_v55, 0  ;;  %v1423_v18 = vadd.f32 %v1421_v0, %v8929_v2  ;;  %v1541_v35 = vmul.f32 %v1539_v38, %v8930_v50  ;;  %v2984_v17 = vrot.slane %v2980_v25, 4  ;;  %v8934_v25 = vld [vmem:[#allocation138_spill] sm:$0xff]  ;;  %v8937_v38 = vld [vmem:[#allocation129_spill] sm:$0xff] }
 0x29a   : > { %v7382_v32 = vsel %vm1335_vm0, %v3774_v41, %v8925_v34  ;;  %v2268_v31 = vadd.f32 %v2264_v33, %v2028_v30  ;;  %v2996_v12 = vrot.slane %v2992_v49, 4  ;;  %v3654_v61 = vadd.f32 %v3652_v20, %v8931_v1  ;;  %v8938_v34 = vld [vmem:[#allocation139_spill] sm:$0xff] }
 0x29b   : > { %v3949_v60 = vrot.slane %v7382_v32, 4  ;;  %v2259_v14 = vperm.slane %v7111_v21, 0  ;;  %v8933_v59 = vrot.slane %v8932_v10, 4  ;;  %v1545_v54 = vrot.slane %v1541_v35, 4  ;;  %v4563_v21 = vld [vmem:[%s7594_s2 + $0x10] sm:$0xff] }
 0x29c   : > { %v2280_v55 = vadd.f32 %v2276_v63, %v2268_v31  ;;  %v1557_v58 = vrot.slane %v1553_v3, 4  ;;  %v2021_v33 = vmul.f32 %v2019_v47, %v8422_v11  ;;  %v2273_v37 = vmul.f32 %v7076_v6, %v8934_v25  ;;  %v8936_v6 = vld [vmem:[#allocation111_spill] sm:$0xff] }
 0x29d   : > { %v3954_v22 = vsel %vm1335_vm0, %v3949_v60, %v8933_v59  ;;  %v2261_v0 = vmul.f32 %v2259_v14, %v8438_v51  ;;  %v2739_v49 = vperm.slane %v7131_v62, 0  ;;  %4492 = vmatmul.msk.f32.gmra.mxu2 %vm3995_vm1, %v4563_v21  ;;  %v1549_v63 = vadd.f32 %v1545_v54, %v1423_v18  ;;  %v8939_v35 = vld [vmem:[#allocation159_spill] sm:$0xff]  ;;  %v8940_v59 = vld [vmem:[#allocation38_spill] sm:$0xff] }
 0x29e   : > { %4038 = vmatpush.msra.mxu1 %v3954_v22  ;;  %v2742_v30 = vadd.f32 %v2740_v19, %v2280_v55  ;;  %v2979_v20 = vperm.slane %v7146_v24, 0  ;;  %v7413_v11 = vmul.f32 %v7121_v7, %v8935_v4  ;;  %4495 = vmatmul.msk.f32.gmra.mxu3 %vm3995_vm1, %v4563_v21  ;;  %v3460_v51 = vmul.f32 %v3458_v46, %v8715_v29 }
 0x29f   : > { %v3656_v62 = vadd.f32 %v3654_v61, %v8936_v6  ;;  %v2027_v26 = vmul.f32 %v7067_v5, %v8937_v38  ;;  %v2747_v48 = vmul.f32 %v7099_v56, %v8938_v34  ;;  %v1561_v27 = vadd.f32 %v1557_v58, %v1549_v63 }
 0x2a0   : > { %v2748_v19 = vadd.f32 %v2746_v8, %v2742_v30  ;;  %v2265_v3 = vrot.slane %v2261_v0, 4  ;;  %v2277_v24 = vrot.slane %v2273_v37, 4  ;;  %v2741_v47 = vmul.f32 %v2739_v49, %v8449_v13  ;;  %v8941_v0 = vld [vmem:[#allocation113_spill] sm:$0xff]  ;;  %v8943_v30 = vld [vmem:[#allocation40_spill] sm:$0xff] }
 0x2a1   : > { %v2981_v7 = vmul.f32 %v2979_v20, %v8454_v45  ;;  %v3459_v31 = vperm.slane %v7162_v9, 0  ;;  %v3634_v46 = vperm.slane %v8915_v40, 1  ;;  %v2023_v18 = vadd.f32 %v2021_v33, %v1561_v27  ;;  %v8942_v49 = vld [vmem:[#allocation105_spill] sm:$0xff] }
 0x2a2   : > { %v2988_v2 = vadd.f32 %v2984_v17, %v2748_v19  ;;  %v2997_v50 = vrot.slane %v7413_v11, 4  ;;  %v3642_v5 = vperm.slane %v8915_v40, 2  ;;  %v3651_v56 = vperm.slane %v8939_v35, 3  ;;  %v8944_v20 = vld [vmem:[#allocation145_spill] sm:$0xff] }
 0x2a3   : > { %v3636_v8 = vmul.f32 %v3634_v46, %v8715_v29  ;;  %v3635_v1 = vperm.slane %v8939_v35, 1  ;;  %v3643_v13 = vperm.slane %v8939_v35, 2  ;;  %v2029_v45 = vadd.f32 %v2027_v26, %v2023_v18  ;;  %v8945_v26 = vld [vmem:[#allocation106_spill] sm:$0xff]  ;;  %v7454_v46 = vld [vmem:[%s413_s29 + $0x10] sm:$0x1] }
 0x2a4   : > { %v3000_v61 = vadd.f32 %v2996_v12, %v2988_v2  ;;  %v3644_v14 = vmul.f32 %v3642_v5, %v8715_v29  ;;  %v3626_v10 = vperm.slane %v8915_v40, 0  ;;  %v7435_v17 = vmul.f32 %v3459_v31, %v8457_v57  ;;  %v7456_v2 = vld [vmem:[%s413_s29 + $0x18] sm:$0x1]  ;;  %4519 = vmatpush.msk.msrb.mxu2 %vm4151_vm2, %v7454_v46 }
 0x2a5   : > { %v3638_v22 = vadd.f32 %v3636_v8, %v8940_v59  ;;  %v3637_v55 = vmul.f32 %v3635_v1, %v8457_v57  ;;  %v3645_v54 = vmul.f32 %v3643_v13, %v8457_v57  ;;  %v2269_v33 = vadd.f32 %v2265_v3, %v2029_v45  ;;  %4521 = vmatpush.msk.msrb.mxu3 %vm4151_vm2, %v7456_v2 }
 0x2a6   : > { %v3462_v58 = vadd.f32 %v3460_v51, %v3000_v61  ;;  %v3646_v25 = vadd.f32 %v3644_v14, %v8941_v0  ;;  %v3628_v12 = vmul.f32 %v3626_v10, %v8715_v29  ;;  %v3653_v37 = vmul.f32 %v3651_v56, %v8457_v57  ;;  %v8946_v56 = vld [vmem:[#allocation161_spill] sm:$0xff] }
 0x2a7   : > { %v3640_v21 = vadd.f32 %v3638_v22, %v8942_v49  ;;  %v3639_v63 = vadd.f32 %v3637_v55, %v8943_v30  ;;  %v3647_v4 = vadd.f32 %v3645_v54, %v8944_v20  ;;  %v2281_v38 = vadd.f32 %v2277_v24, %v2269_v33  ;;  %v8947_v54 = vld [vmem:[#allocation22_spill] sm:$0xff] }
 0x2a8   : > { %v3468_v6 = vadd.f32 %v7386_v39, %v3462_v58  ;;  %v3648_v34 = vadd.f32 %v3646_v25, %v8945_v26  ;;  %v3630_v51 = vadd.f32 %v3628_v12, %v8922_v16  ;;  %v2985_v19 = vrot.slane %v2981_v7, 4  ;;  %v4127_v58 = vld [vmem:[%s7592_s0 + $0x8] sm:$0xff]  ;;  %v7512_v26 = vld [vmem:[%s7596_s4] sm:$0xff] }
 0x2a9   : > { %v3649_v27 = vadd.f32 %v3647_v4, %v8900_v44  ;;  %v3658_v3 = vadd.f32 %v8715_v29, %v8915_v40  ;;  %v3627_v31 = vperm.slane %v8939_v35, 0  ;;  %v2743_v39 = vadd.f32 %v2741_v47, %v2281_v38  ;;  %v7462_v29 = vld [vmem:[%s413_s29] sm:$0xff]  ;;  %v7464_v40 = vld [vmem:[%s413_s29 + $0x8] sm:$0xff]  ;;  %v4133_v38 = vld [vmem:[%s7593_s1 + $0x8] sm:$0xff]  ;;  %4212 = vrot.lane.b32.xlu1 %v7512_v26, %s4590_s25 }
 0x2aa   : > { %v3674_v18 = vrot.slane %v3468_v6, 4  ;;  %v3668_v24 = vrot.slane %v3648_v34, 4  ;;  %v3632_v5 = vadd.f32 %v3630_v51, %v8926_v15  ;;  %v3655_v16 = vadd.f32 %v3653_v37, %v8946_v56  ;;  %4520 = vmatpush.msrb.mxu2 %v7462_v29  ;;  %4522 = vmatpush.msrb.mxu3 %v7464_v40  ;;  %v3905_v51 = vpop.permute.xlu1 %3904 }
 0x2ab   : > { %v3641_v7 = vadd.f32 %v3639_v63, %v8898_v28  ;;  %v3629_v44 = vmul.f32 %v3627_v31, %v8457_v57  ;;  %v2749_v1 = vadd.f32 %v2747_v48, %v2743_v39  ;;  %v3669_v61 = vrot.slane %v3649_v27, 4  ;;  %v3901_v48 = vpop.permute.xlu0 %3900  ;;  %4498 = vmatmul.msk.f32.vlgmr.msrb.gmra.mxu2 %vm4144_vm3, %v4127_v58  ;;  %4501 = vmatmul.msk.f32.vlgmr.msrb.gmra.mxu3 %vm4144_vm3, %v4127_v58  ;;  %v4106_v31 = vld [vmem:[%s7595_s3] sm:$0xff] }
 0x2ac   : > { %v3712_v8 = vsel %vm1335_vm0, %v3656_v62, %v3674_v18  ;;  %v3710_v13 = vsel %vm1335_vm0, %v3640_v21, %v3668_v24  ;;  %v3662_v47 = vrot.slane %v3632_v5, 4  ;;  %v3659_v62 = vadd.f32 %v8457_v57, %v8939_v35 }
 0x2ad   : > { %v3768_v28 = vrot.slane %v3712_v8, 4  ;;  %v3764_v15 = vrot.slane %v3710_v13, 4  ;;  %v3631_v45 = vadd.f32 %v3629_v44, %v7162_v9  ;;  %v2989_v14 = vadd.f32 %v2985_v19, %v2749_v1  ;;  %v4318_v1 = vld [vmem:[%s7597_s5 + $0x8] sm:$0xff] }
 0x2ae   : > { %v3708_v10 = vsel %vm1335_vm0, %v3658_v3, %v3662_v47  ;;  %v3467_v35 = vmul.f32 %v7152_v53, %v8947_v54  ;;  %v3711_v23 = vsel %vm1335_vm0, %v3641_v7, %v3669_v61  ;;  %v4107_v53 = vld [vmem:[%s7595_s3 + $0x8] sm:$0xff]  ;;  %v4589_v20 = vmov 0   ;;  %v4126_v61 = vld [vmem:[%s7592_s0] sm:$0xff] }
 0x2af   : > { %v3773_v59 = vsel %vm1335_vm0, %v3768_v28, %v3772_v42  ;;  %v3769_v22 = vsel %vm1335_vm0, %v3764_v15, %v3768_v28  ;;  %v3762_v55 = vrot.slane %v3708_v10, 4  ;;  %v3633_v9 = vadd.f32 %v3631_v45, %v8947_v54  ;;  %4550 = vset.pattern.permute.xlu2 %v4589_v20  ;;  %4551 = vset.pattern.permute.xlu0 %v4589_v20  ;;  %v7535_v47 = vld [vmem:[%s7596_s4 + $0x8] sm:$0xff] }
 0x2b0   : > { %v3943_v33 = vrot.slane %v3773_v59, 4  ;;  %v3001_v57 = vadd.f32 %v2997_v50, %v2989_v14  ;;  %v3939_v0 = vrot.slane %v3769_v22, 4  ;;  %v8948_v50 = vld [vmem:[#allocation165_spill] sm:$0xff]  ;;  %4115 = vperm.xlu2 %4550, %v4107_v53   ;;  %4141 = vperm.xlu0 %4551, %v4133_v38  }
 0x2b1   : > { %v3765_v42 = vsel %vm1335_vm0, %v3762_v55, %v3764_v15  ;;  %v3663_v25 = vrot.slane %v3633_v9, 4  ;;  %v3657_v21 = vadd.f32 %v3655_v16, %v8948_v50  ;;  %3826 = vst [vmem:[#allocation2 + $0xa8] sm:$0xf0] %v3762_v55  ;;  %4214 = vrot.lane.b32.xlu1 %v7535_v47, %s4590_s25 }
 0x2b2   : > { %v3948_v12 = vsel %vm1335_vm0, %v3943_v33, %v3947_v36  ;;  %v3463_v37 = vadd.f32 %v7435_v17, %v3001_v57  ;;  %v3944_v49 = vsel %vm1335_vm0, %v3939_v0, %v3943_v33  ;;  %v3934_v11 = vrot.slane %v3765_v42, 4  ;;  %v3907_v15 = vpop.permute.xlu1 %3906 }
 0x2b3   : > { %4016 = vmatpush.msra.mxu0 %v3948_v12  ;;  %v3709_v30 = vsel %vm1335_vm0, %v3659_v62, %v3663_v25  ;;  %v3766_v36 = vrot.slane %v3711_v23, 4  ;;  %v3903_v27 = vpop.permute.xlu0 %3902 }
 0x2b4   : > { %v3469_v52 = vadd.f32 %v3467_v35, %v3463_v37  ;;  %v3940_v17 = vsel %vm1335_vm0, %v3934_v11, %v3939_v0  ;;  %v3763_v63 = vrot.slane %v3709_v30, 4  ;;  %v3909_v7 = vsel %vm3908_vm4, %v3901_v48, %v3903_v27 }
 0x2b5   : > { %4017 = vmatpush.msra.mxu0 %v3944_v49 }
 0x2b6   : > { %v3675_v4 = vrot.slane %v3469_v52, 4  ;;  %v3767_v6 = vsel %vm1335_vm0, %v3763_v63, %v3766_v36  ;;  %3827 = vst [vmem:[#allocation2 + $0x90] sm:$0xf0] %v3763_v63 }
 0x2b7   : > { %4018 = vmatpush.msra.mxu0 %v3940_v17  ;;  %v3937_v16 = vrot.slane %v3767_v6, 4 }
 0x2b8   : > { %v3713_v34 = vsel %vm1335_vm0, %v3657_v21, %v3675_v4  ;;  %v3874_v3 = vld [vmem:[#allocation2 + $0xa8] sm:$0xf0]  ;;  %4110 = vperm.xlu2 %4550, %v4106_v31   ;;  %4326 = vperm.xlu0 %4551, %v4318_v1  }
 0x2b9   : > { %v3770_v19 = vrot.slane %v3713_v34, 4  ;;  %v3933_v24 = vrot.slane %v3874_v3, 4 }
 0x2bb   : > { %v3775_v18 = vsel %vm1335_vm0, %v3770_v19, %v3774_v41  ;;  %v3771_v39 = vsel %vm1335_vm0, %v3766_v36, %v3770_v19  ;;  %v3935_v44 = vsel %vm1335_vm0, %v3933_v24, %v3934_v11 }
 0x2bc   : > { %v3945_v5 = vrot.slane %v3775_v18, 4  ;;  %v3941_v56 = vrot.slane %v3771_v39, 4  ;;  %4019 = vmatpush.msra.mxu0 %v3935_v44 }
 0x2bd   : > { %v3875_v8 = vld [vmem:[#allocation2 + $0x90] sm:$0xf0]  ;;  %4485 = vmatmul.msk.f32.vlgmr.msra.gmra.mxu0 %vm3995_vm1, %v3909_v7 }
 0x2be   : > { %v3950_v43 = vsel %vm1335_vm0, %v3945_v5, %v3949_v60  ;;  %v3946_v41 = vsel %vm1335_vm0, %v3941_v56, %v3945_v5  ;;  %v3936_v13 = vrot.slane %v3875_v8, 4  ;;  %v3942_v28 = vsel %vm1335_vm0, %v3937_v16, %v3941_v56  ;;  %4496 = vmatpush.msk.msrb.mxu0 %vm4151_vm2, %v7454_v46  ;;  %v4132_v60 = vld [vmem:[%s7593_s1] sm:$0xff] }
 0x2bf   : > { %4039 = vmatpush.msra.mxu1 %v3950_v43  ;;  %v3910_v46 = vsel %vm3908_vm4, %v3905_v51, %v3907_v15 }
 0x2c0   : > { %v3938_v32 = vsel %vm1335_vm0, %v3936_v13, %v3937_v16  ;;  %4173 = vmatpush.msrb.mxu0 %v7462_v29  ;;  %4136 = vperm.xlu2 %4550, %v4132_v60   ;;  %v4317_v29 = vld [vmem:[%s7597_s5] sm:$0xff] }
 0x2c1   : > { %4040 = vmatpush.msra.mxu1 %v3946_v41 }
 0x2c3   : > { %4041 = vmatpush.msra.mxu1 %v3942_v28 }
 0x2c5   : > { %4042 = vmatpush.msra.mxu1 %v3938_v32  ;;  %4486 = vmatmul.msk.f32.gmra.mxu0 %vm3995_vm1, %v3910_v46 }
 0x2c6   : > { %4488 = vmatmul.msk.f32.vlgmr.msra.gmra.mxu1 %vm3995_vm1, %v3909_v7 }
 0x2c7   : > { %4499 = vmatpush.msk.msrb.mxu1 %vm4151_vm2, %v7456_v2 }
 0x2c8   : > { %4321 = vperm.xlu2 %4550, %v4317_v29  }
 0x2c9   : > { %4196 = vmatpush.msrb.mxu1 %v7464_v40 }
 0x2cd   : > { %4497 = vmatmul.msk.f32.vlgmr.msrb.gmra.mxu0 %vm4144_vm3, %v4126_v61 }
 0x2ce   : > { %4489 = vmatmul.msk.f32.gmra.mxu1 %vm3995_vm1, %v3910_v46 }
 0x2d6   : > { %4500 = vmatmul.msk.f32.vlgmr.msrb.gmra.mxu1 %vm4144_vm3, %v4126_v61 }
 0x30a   : > { %v4116_v55 = vpop.permute.xlu2 %4115 }
 0x312   : > { %v4111_v33 = vpop.permute.xlu2 %4110 }
 0x318   : > { %v4077_v2 = vpop.f32.mrf.mxu2 }
 0x319   : > { %v4100_v45 = vpop.f32.mrf.mxu3 }
 0x31a   : > { %v4137_v50 = vpop.permute.xlu2 %4136 }
 0x31b   : > { %v4213_v37 = vpop.permute.xlu1 %4212 }
 0x320   : > { %v4080_v14 = vpop.f32.mrf.mxu2 }
 0x321   : > { %v4103_v10 = vpop.f32.mrf.mxu3 }
 0x322   : > { %v4142_v40 = vpop.permute.xlu0 %4141  ;;  %v4322_v31 = vpop.permute.xlu2 %4321 }
 0x323   : > { %v4215_v38 = vpop.permute.xlu1 %4214 }
 0x32a   : > { %v4327_v44 = vpop.permute.xlu0 %4326 }
 0x32e   : > { %v4178_v62 = vpop.f32.mrf.mxu2  ;;  %v4201_v59 = vpop.f32.mrf.mxu3 }
 0x32f   : > { %v4179_v48 = vadd.f32 %v4178_v62, %v4142_v40  ;;  %v4202_v22 = vadd.f32 %v4201_v59, %v4142_v40 }
 0x331   : > { %v4206_v54 = vmax.f32 %v4179_v48, 0.0  ;;  %v4207_v9 = vmax.f32 %v4202_v22, 0.0 }
 0x333   : > { %4285 = vmatpush.msra.mxu0 %v4206_v54  ;;  %4308 = vmatpush.msra.mxu1 %v4207_v9 }
 0x33a   : > { %v4021_v58 = vpop.f32.mrf.mxu0 }
 0x33b   : > { %v4078_v57 = vadd.f32 %v4077_v2, %v4021_v58 }
 0x33d   : > { %v4118_v42 = vadd.f32 %v4111_v33, %v4078_v57 }
 0x33f   : > { %v4122_v11 = vmax.f32 %v4118_v42, 0.0 }
 0x342   : > { %v4024_v0 = vpop.f32.mrf.mxu0 }
 0x343   : > { %v4044_v35 = vpop.f32.mrf.mxu1  ;;  %v4081_v23 = vadd.f32 %v4080_v14, %v4024_v0 }
 0x344   : > { %v4101_v49 = vadd.f32 %v4100_v45, %v4044_v35 }
 0x345   : > { %v4120_v25 = vadd.f32 %v4116_v55, %v4081_v23 }
 0x346   : > { %v4119_v36 = vadd.f32 %v4111_v33, %v4101_v49 }
 0x347   : > { %v4124_v12 = vmax.f32 %v4120_v25, 0.0 }
 0x348   : > { %v4123_v4 = vmax.f32 %v4119_v36, 0.0 }
 0x349   : > { %4235 = vmatpush.msra.mxu2 %v4124_v12 }
 0x34a   : > { %v4175_v30 = vpop.f32.mrf.mxu0 }
 0x34b   : > { %v4047_v53 = vpop.f32.mrf.mxu1  ;;  %v4176_v52 = vadd.f32 %v4175_v30, %v4137_v50  ;;  %4236 = vmatpush.msra.mxu2 %v4122_v11 }
 0x34c   : > { %v4104_v21 = vadd.f32 %v4103_v10, %v4047_v53  ;;  %4502 = vmatmul.msk.f32.vlgmr.msra.gmra.mxu2 %vm4216_vm5, %v4213_v37 }
 0x34d   : > { %v4204_v63 = vmax.f32 %v4176_v52, 0.0 }
 0x34e   : > { %v4121_v17 = vadd.f32 %v4116_v55, %v4104_v21 }
 0x34f   : > { %4286 = vmatpush.msra.mxu0 %v4204_v63 }
 0x350   : > { %v4125_v20 = vmax.f32 %v4121_v17, 0.0  ;;  %4506 = vmatmul.msk.f32.vlgmr.msra.gmra.mxu0 %vm4216_vm5, %v7512_v26 }
 0x352   : > { %4258 = vmatpush.msra.mxu3 %v4125_v20 }
 0x353   : > { %v4198_v6 = vpop.f32.mrf.mxu1 }
 0x354   : > { %v4199_v34 = vadd.f32 %v4198_v6, %v4137_v50  ;;  %4259 = vmatpush.msra.mxu3 %v4123_v4  ;;  %4503 = vmatmul.msk.f32.gmra.mxu2 %vm4216_vm5, %v4215_v38 }
 0x355   : > { %4504 = vmatmul.msk.f32.vlgmr.msra.gmra.mxu3 %vm4216_vm5, %v4213_v37 }
 0x356   : > { %v4205_v51 = vmax.f32 %v4199_v34, 0.0 }
 0x358   : > { %4309 = vmatpush.msra.mxu1 %v4205_v51  ;;  %4507 = vmatmul.msk.f32.gmra.mxu0 %vm4216_vm5, %v7535_v47 }
 0x359   : > { %4508 = vmatmul.msk.f32.vlgmr.msra.gmra.mxu1 %vm4216_vm5, %v7512_v26 }
 0x35d   : > { %4505 = vmatmul.msk.f32.gmra.mxu3 %vm4216_vm5, %v4215_v38 }
 0x361   : > { %4509 = vmatmul.msk.f32.gmra.mxu1 %vm4216_vm5, %v7535_v47 }
 0x3cd   : > { %v4288_v19 = vpop.f32.mrf.mxu0 }
 0x3cf   : > { %v4238_v27 = vpop.f32.mrf.mxu2 }
 0x3d0   : > { %v4289_v3 = vadd.f32 %v4288_v19, %v4238_v27 }
 0x3d2   : > { %v4329_v18 = vadd.f32 %v4322_v31, %v4289_v3 }
 0x3d4   : > { %v4333_v39 = vmax.f32 %v4329_v18, 0.0 }
 0x3d5   : > { %v4291_v5 = vpop.f32.mrf.mxu0 }
 0x3d6   : > { %v4311_v24 = vpop.f32.mrf.mxu1  ;;  %4337 = vst [vmem:[%s452_s24] sm:$0xff] %v4333_v39 }
 0x3d7   : > { %v4241_v16 = vpop.f32.mrf.mxu2 }
 0x3d8   : > { %v4261_v56 = vpop.f32.mrf.mxu3  ;;  %v4292_v7 = vadd.f32 %v4291_v5, %v4241_v16 }
 0x3d9   : > { %v4312_v26 = vadd.f32 %v4311_v24, %v4261_v56 }
 0x3da   : > { %v4331_v1 = vadd.f32 %v4327_v44, %v4292_v7 }
 0x3db   : > { %v4330_v8 = vadd.f32 %v4322_v31, %v4312_v26 }
 0x3dc   : > { %v4335_v41 = vmax.f32 %v4331_v1, 0.0 }
 0x3dd   : > { %v4334_v43 = vmax.f32 %v4330_v8, 0.0  ;;  %v4363_v15 = vld [vmem:[%s452_s24] sm:$0xff] (%p4675_p5) }
 0x3de   : > { %v4314_v13 = vpop.f32.mrf.mxu1  ;;  %4339 = vst [vmem:[%s452_s24 + $0x10] sm:$0xff] %v4335_v41 }
 0x3df   : > { %4338 = vst [vmem:[%s452_s24 + $0x8] sm:$0xff] %v4334_v43 }
 0x3e0   : > { %v4264_v47 = vpop.f32.mrf.mxu3  ;;  %4364 = vst [vmem:[%s4350_s17] sm:$0xff] (%p4675_p5), %v4363_v15 }
 0x3e1   : > { %v4315_v28 = vadd.f32 %v4314_v13, %v4264_v47 }
 0x3e3   : > { %v4332_v32 = vadd.f32 %v4327_v44, %v4315_v28  ;;  %4347 = sbr.rel (!%p4675_p5) target bundleno = 1008 (0x3f0), region = 129 }
 0x3e5   : > { %v4336_v60 = vmax.f32 %v4332_v32, 0.0  ;;  %v4367_v29 = vld [vmem:[%s452_s24 + $0x10] sm:$0xff] (%p4675_p5) }
 0x3e6   : > { %v4365_v46 = vld [vmem:[%s452_s24 + $0x8] sm:$0xff] (%p4675_p5)  ;;  %4368 = vst [vmem:[%s4350_s17 + $0x20] sm:$0xff] (%p4675_p5), %v4367_v29 }
 0x3e7   : > { %4340 = vst [vmem:[%s452_s24 + $0x18] sm:$0xff] %v4336_v60 }
 0x3e8   : > { %4366 = vst [vmem:[%s4350_s17 + $0x8] sm:$0xff] %v4365_v46 }
 0x3ee   : > { %v4369_v61 = vld [vmem:[%s452_s24 + $0x18] sm:$0xff] }
 0x3ef   : > { %4370 = vst [vmem:[%s4350_s17 + $0x28] sm:$0xff] %v4369_v61 }
 0x3f0 PF: > { %p16_p10 = scmp.ge.s32.totalorder %s4658_s13, 4   ;;  %s8949_s30 = smov %s4582_s10 }
 0x3f1   : > { %s8950_s10 = smov %s4669_s16  ;;  %s8951_s11 = smov %s4658_s13 }
 0x3f2   :  { %18 = sbr.rel (!%p16_p10) target bundleno = 2 (0x2), region = 199 }

</bundles_post_ra>
